<compile_context>
chip_gen: v7x
topology: tpu7x:2x2x1
jax: 0.10.0
libtpu: 0.0.40
codegen_flags: <defaults>
</compile_context>

<pallas_src>
import functools
import numpy as np
import jax
import jax.numpy as jnp
from jax.experimental import pallas as pl
from jax.experimental.pallas import tpu as pltpu


def _round_up(x, m):
    return (x + m - 1) // m * m


# ---------------------------------------------------------------------------
# Pallas kernels
# ---------------------------------------------------------------------------
def _mm_kernel(a_ref, b_ref, o_ref, acc_ref):
    @pl.when(pl.program_id(2) == 0)
    def _():
        acc_ref[...] = jnp.zeros_like(acc_ref)

    acc_ref[...] += jnp.dot(a_ref[...], b_ref[...],
                            preferred_element_type=jnp.float32)

    @pl.when(pl.program_id(2) == pl.num_programs(2) - 1)
    def _():
        o_ref[...] = acc_ref[...].astype(o_ref.dtype)


def _mm_bn_kernel(a_ref, b_ref, s_ref, t_ref, o_ref, acc_ref, *, relu):
    """out = act((A @ B) * scale + shift)  -- BN fused into matmul epilogue."""
    @pl.when(pl.program_id(2) == 0)
    def _():
        acc_ref[...] = jnp.zeros_like(acc_ref)

    acc_ref[...] += jnp.dot(a_ref[...], b_ref[...],
                            preferred_element_type=jnp.float32)

    @pl.when(pl.program_id(2) == pl.num_programs(2) - 1)
    def _():
        y = acc_ref[...] * s_ref[...] + t_ref[...]
        if relu:
            y = jnp.maximum(y, 0.0)
        o_ref[...] = y.astype(o_ref.dtype)


def _mm_bn_res_kernel(a_ref, b_ref, s_ref, t_ref, r_ref, o_ref, acc_ref, *,
                      relu):
    """out = act((A @ B) * scale + shift + residual)."""
    @pl.when(pl.program_id(2) == 0)
    def _():
        acc_ref[...] = jnp.zeros_like(acc_ref)

    acc_ref[...] += jnp.dot(a_ref[...], b_ref[...],
                            preferred_element_type=jnp.float32)

    @pl.when(pl.program_id(2) == pl.num_programs(2) - 1)
    def _():
        y = acc_ref[...] * s_ref[...] + t_ref[...] + r_ref[...]
        if relu:
            y = jnp.maximum(y, 0.0)
        o_ref[...] = y.astype(o_ref.dtype)


def _max_kernel(x_ref, o_ref):
    acc = x_ref[0]
    for i in range(1, x_ref.shape[0]):
        acc = jnp.maximum(acc, x_ref[i])
    o_ref[...] = acc


def _avgpool_kernel(x_ref, o_ref, *, inv_k):
    # x_ref: (N, H*W, Cp) -> o_ref: (N, Cp) ; 1/K folded into the kernel.
    o_ref[...] = jnp.sum(x_ref[...], axis=1) * inv_k


# ---------------------------------------------------------------------------
# Fused matmul wrapper (bf16 operands, f32 accumulation, BN/res/ReLU epilogue)
# ---------------------------------------------------------------------------
def fused_matmul(a, b, scale=None, shift=None, residual=None, relu=False):
    """a: (M, K), b: (K, N) -> (M, N) f32.
    Optional per-column scale/shift (+ residual (M, N)) (+ ReLU) epilogue."""
    M, K = a.shape
    K2, N = b.shape
    assert K == K2

    # Adaptive tiles: don't pad tiny M up to 128; cap tn/tk for MXU-sized tiles.
    tm = min(_round_up(M, 16), 128)
    tn = min(_round_up(N, 128), 256)
    Kp0 = _round_up(K, 128)
    nk = -(-Kp0 // 512)                      # number of K steps targeting <=512
    tk = _round_up(-(-Kp0 // nk), 128)
    Mp = _round_up(M, tm)
    Np = _round_up(N, tn)
    Kp = nk * tk

    a_p = jnp.pad(a.astype(jnp.bfloat16), ((0, Mp - M), (0, Kp - K)))
    b_p = jnp.pad(b.astype(jnp.bfloat16), ((0, Kp - K), (0, Np - N)))

    in_specs = [
        pl.BlockSpec((tm, tk), lambda i, j, k: (i, k)),
        pl.BlockSpec((tk, tn), lambda i, j, k: (k, j)),
    ]
    args = [a_p, b_p]

    if scale is not None:
        s_p = jnp.pad(scale.astype(jnp.float32).reshape(1, N),
                      ((0, 0), (0, Np - N)))
        t_p = jnp.pad(shift.astype(jnp.float32).reshape(1, N),
                      ((0, 0), (0, Np - N)))
        in_specs.append(pl.BlockSpec((1, tn), lambda i, j, k: (0, j)))
        in_specs.append(pl.BlockSpec((1, tn), lambda i, j, k: (0, j)))
        args += [s_p, t_p]
        if residual is not None:
            r_p = jnp.pad(residual.astype(jnp.float32),
                          ((0, Mp - M), (0, Np - N)))
            in_specs.append(pl.BlockSpec((tm, tn), lambda i, j, k: (i, j)))
            args.append(r_p)
            kernel = functools.partial(_mm_bn_res_kernel, relu=relu)
        else:
            kernel = functools.partial(_mm_bn_kernel, relu=relu)
    else:
        kernel = _mm_kernel

    out = pl.pallas_call(
        kernel,
        out_shape=jax.ShapeDtypeStruct((Mp, Np), jnp.float32),
        grid_spec=pltpu.PrefetchScalarGridSpec(
            num_scalar_prefetch=0,
            grid=(Mp // tm, Np // tn, Kp // tk),
            in_specs=in_specs,
            out_specs=pl.BlockSpec((tm, tn), lambda i, j, k: (i, j)),
            scratch_shapes=[pltpu.VMEM((tm, tn), jnp.float32)],
        ),
        compiler_params=pltpu.CompilerParams(
            dimension_semantics=("parallel", "parallel", "arbitrary")),
    )(*args)
    return out[:M, :N]


# ---------------------------------------------------------------------------
# Op wrappers (NHWC channels-last everywhere inside the network)
# ---------------------------------------------------------------------------
def _im2col(x, kh, kw, stride, padding):
    """x: (N, H, W, C) -> A: (N*Ho*Wo, kh*kw*C), Ho, Wo."""
    N, H, W, C = x.shape
    xp = jnp.pad(x, ((0, 0), (padding, padding), (padding, padding), (0, 0)))
    Ho = (H + 2 * padding - kh) // stride + 1
    Wo = (W + 2 * padding - kw) // stride + 1
    pats = [xp[:, i:i + stride * (Ho - 1) + 1:stride,
               j:j + stride * (Wo - 1) + 1:stride, :]
            for i in range(kh) for j in range(kw)]
    A = jnp.stack(pats, axis=3).reshape(N * Ho * Wo, kh * kw * C)
    return A, Ho, Wo


def conv_bn(x, w, stride, padding, bn=None, relu=False, residual=None):
    """x: (N,H,W,C) NHWC; w: (Cout,Cin,kh,kw) [PyTorch layout]; no bias.
    Optional eval-mode BN (scale, shift), residual add and ReLU, all fused
    into the matmul epilogue."""
    N, H, W, C = x.shape
    Cout, Cin, kh, kw = w.shape
    A, Ho, Wo = _im2col(x, kh, kw, stride, padding)
    B = w.transpose(2, 3, 1, 0).reshape(kh * kw * Cin, Cout)
    res2d = (residual.reshape(N * Ho * Wo, Cout)
             if residual is not None else None)
    scale, shift = bn if bn is not None else (None, None)
    out = fused_matmul(A, B, scale=scale, shift=shift, residual=res2d,
                       relu=relu)
    return out.reshape(N, Ho, Wo, Cout)


def conv_transpose2d(x, w, stride, padding):
    """x: (N,H,W,Cin) NHWC; w: (Cin,Cout,kh,kw); output_padding=0, no bias."""
    N, H, W, C = x.shape
    Cin, Cout, kh, kw = w.shape
    Hd, Wd = (H - 1) * stride + 1, (W - 1) * stride + 1
    xd = jnp.zeros((N, Hd, Wd, C), x.dtype).at[:, ::stride, ::stride, :].set(x)
    wt = jnp.flip(w, axis=(2, 3)).transpose(1, 0, 2, 3)   # (Cout, Cin, kh, kw)
    return conv_bn(xd, wt, stride=1, padding=kh - 1 - padding)


def max_pool2d(x, k=3, stride=2, padding=1):
    """x: (N,H,W,C) NHWC."""
    N, H, W, C = x.shape
    xp = jnp.pad(x, ((0, 0), (padding, padding), (padding, padding), (0, 0)),
                 constant_values=-jnp.inf)
    Ho = (H + 2 * padding - k) // stride + 1
    Wo = (W + 2 * padding - k) // stride + 1
    pats = [xp[:, i:i + stride * (Ho - 1) + 1:stride,
               j:j + stride * (Wo - 1) + 1:stride, :]
            for i in range(k) for j in range(k)]
    st = jnp.stack(pats, axis=0)                      # (k*k, N, Ho, Wo, C)
    L = N * Ho * Wo * C
    Lp = _round_up(L, 8 * 128)
    flat = jnp.pad(st.reshape(k * k, L), ((0, 0), (0, Lp - L)),
                   constant_values=-jnp.inf)
    flat = flat.reshape(k * k, Lp // 128, 128)
    out = pl.pallas_call(
        _max_kernel,
        out_shape=jax.ShapeDtypeStruct((Lp // 128, 128), jnp.float32))(flat)
    return out.reshape(Lp)[:L].reshape(N, Ho, Wo, C)


def adaptive_avg_pool_1x1(x):
    """F.adaptive_avg_pool2d(x, (1,1)) + flatten, x: (N,H,W,C) NHWC -> (N,C)."""
    N, H, W, C = x.shape
    Cp = _round_up(C, 128)
    xr = jnp.pad(x.reshape(N, H * W, C), ((0, 0), (0, 0), (0, Cp - C)))
    out = pl.pallas_call(
        functools.partial(_avgpool_kernel, inv_k=1.0 / float(H * W)),
        out_shape=jax.ShapeDtypeStruct((N, Cp), jnp.float32))(xr)
    return out[:, :C]


def _interp_matrix(in_size, out_size):
    # PyTorch bilinear, align_corners=False
    scale = in_size / out_size
    i = np.arange(out_size)
    src = np.maximum((i + 0.5) * scale - 0.5, 0.0)
    i0 = np.minimum(np.floor(src).astype(np.int64), in_size - 1)
    i1 = np.minimum(i0 + 1, in_size - 1)
    l1 = src - i0
    l0 = 1.0 - l1
    R = np.zeros((out_size, in_size), np.float32)
    np.add.at(R, (np.arange(out_size), i0), l0)
    np.add.at(R, (np.arange(out_size), i1), l1)
    return jnp.asarray(R)


def bilinear_resize_nchw(x, out_h, out_w):
    """x: (N,C,H,W) NCHW -> (N,C,out_h,out_w), separable bilinear via matmuls."""
    N, C, H, W = x.shape
    Rh = _interp_matrix(H, out_h)
    Rw = _interp_matrix(W, out_w)
    t = fused_matmul(x.reshape(N * C * H, W), Rw.T)          # (N*C*H, out_w)
    t = t.reshape(N, C, H, out_w).transpose(0, 1, 3, 2).reshape(
        N * C * out_w, H)
    t = fused_matmul(t, Rh.T)                                # (N*C*out_w, out_h)
    return t.reshape(N, C, out_w, out_h).transpose(0, 1, 3, 2)


# ---------------------------------------------------------------------------
# ResNet18 backbone + ResNetUp head (synthetic deterministic parameters)
# ---------------------------------------------------------------------------
def _conv_w(key, cout, cin, kh, kw):
    fan_in = cin * kh * kw
    return jax.random.normal(key, (cout, cin, kh, kw), jnp.float32) * np.sqrt(
        2.0 / fan_in)


def _bn_p(key, c, eps=1e-5):
    k1, k2 = jax.random.split(key)
    gamma = 1.0 + 0.1 * jax.random.normal(k1, (c,), jnp.float32)
    beta = 0.1 * jax.random.normal(k2, (c,), jnp.float32)
    rmean = jnp.zeros((c,), jnp.float32)
    rvar = jnp.ones((c,), jnp.float32)
    scale = gamma / jnp.sqrt(rvar + eps)
    shift = beta - rmean * scale
    return (scale, shift)


def _basic_block_params(key, cin, cout, stride):
    ks = jax.random.split(key, 6)
    p = {
        "conv1": _conv_w(ks[0], cout, cin, 3, 3),
        "bn1": _bn_p(ks[1], cout),
        "conv2": _conv_w(ks[2], cout, cout, 3, 3),
        "bn2": _bn_p(ks[3], cout),
    }
    if stride != 1 or cin != cout:
        p["down_conv"] = _conv_w(ks[4], cout, cin, 1, 1)
        p["down_bn"] = _bn_p(ks[5], cout)
    return p


def init_params(key, num_classes):
    ks = jax.random.split(key, 16)
    params = {"conv1": _conv_w(ks[0], 64, 3, 7, 7), "bn1": _bn_p(ks[1], 64)}
    cfg = [(64, 64, 1), (64, 128, 2), (128, 256, 2), (256, 512, 2)]
    layers, ki = [], 2
    for cin, cout, stride in cfg:
        blocks = [_basic_block_params(ks[ki], cin, cout, stride),
                  _basic_block_params(ks[ki + 1], cout, cout, 1)]
        ki += 2
        layers.append(blocks)
    params["layers"] = layers
    in_channel = 512
    # ConvTranspose2d(512, 256, 4, stride=2, padding=1, bias=False) weight
    params["up_conv1"] = jax.random.normal(
        ks[ki], (in_channel, in_channel // 2, 4, 4), jnp.float32) * np.sqrt(
            1.0 / (in_channel * 16))
    ki += 1
    # Conv2d(256, num_classes, 1, bias=False) weight
    params["class_fc"] = jax.random.normal(
        ks[ki], (num_classes, in_channel // 2, 1, 1), jnp.float32) * np.sqrt(
            2.0 / (in_channel // 2))
    return params


def _basic_block_forward(x, p, stride):
    if "down_conv" in p:
        identity = conv_bn(x, p["down_conv"], stride, 0,
                           bn=p["down_bn"], relu=False)
    else:
        identity = x
    out = conv_bn(x, p["conv1"], stride, 1, bn=p["bn1"], relu=True)
    out = conv_bn(out, p["conv2"], 1, 1, bn=p["bn2"], relu=True,
                  residual=identity)
    return out


def resnet_up_forward(params, x):
    """x: (N, 3, H, W) NCHW (public API). Returns NCHW feature/cam + score."""
    input_x = x
    h = jnp.transpose(x, (0, 2, 3, 1))                 # NHWC internally
    # backbone: conv1, bn1, relu, maxpool, layer1..layer4 (stop before avgpool)
    h = conv_bn(h, params["conv1"], 2, 3, bn=params["bn1"], relu=True)
    h = max_pool2d(h, 3, 2, 1)
    for layer, stride in zip(params["layers"], (1, 2, 2, 2)):
        h = _basic_block_forward(h, layer[0], stride)
        h = _basic_block_forward(h, layer[1], 1)
    # up_conv1 (no BN)
    h = conv_transpose2d(h, params["up_conv1"], stride=2, padding=1)
    N, fh, fw, _ = h.shape
    x_s = bilinear_resize_nchw(input_x, fh, fw)        # (N, 3, fh, fw)
    feature = jnp.concatenate(
        [x_s, jnp.transpose(h, (0, 3, 1, 2))], axis=1)
    # class-aware 1x1 conv on the up-conv output
    cam_nhwc = conv_bn(h, params["class_fc"], 1, 0)    # (N, fh, fw, nc)
    cam = jnp.transpose(cam_nhwc, (0, 3, 1, 2))
    score = adaptive_avg_pool_1x1(cam_nhwc)
    return feature, cam, score


if __name__ == "__main__":
    num_classes = 5
    key = jax.random.PRNGKey(0)
    kp, kx = jax.random.split(key)
    params = init_params(kp, num_classes)
    x = jax.random.normal(kx, (2, 3, 32, 32), jnp.float32)  # NCHW, 3-ch input

    fwd = jax.jit(resnet_up_forward)
    feature, cam, score = fwd(params, x)
    jax.block_until_ready((feature, cam, score))

    assert feature.shape == (2, 3 + 256, 2, 2)
    assert cam.shape == (2, num_classes, 2, 2)
    assert score.shape == (2, num_classes)
    assert np.all(np.isfinite(np.asarray(feature)))
    assert np.all(np.isfinite(np.asarray(score)))
    print("KERNEL_OK")
</pallas_src>

<mosaic_0001>
module attributes {stable_mosaic.version = 11 : i64} {
  func.func @_mm_bn_kernel(%arg0: i32, %arg1: i32, %arg2: i32, %arg3: memref<128x256xbf16, #tpu.memory_space<vmem>>, %arg4: memref<256x128xbf16, #tpu.memory_space<vmem>>, %arg5: memref<1x128xf32, #tpu.memory_space<vmem>>, %arg6: memref<1x128xf32, #tpu.memory_space<vmem>>, %arg7: memref<128x128xf32, #tpu.memory_space<vmem>>, %arg8: memref<128x128xf32, #tpu.memory_space<vmem>>) attributes {dimension_semantics = [#tpu.dimension_semantics<parallel>, #tpu.dimension_semantics<parallel>, #tpu.dimension_semantics<arbitrary>], iteration_bounds = array<i64: 4, 1, 1>, scalar_prefetch = 0 : i64, scratch_operands = 1 : i64, tpu.core_type = #tpu.core_type<tc>, window_params = [{transform_indices = @transform_0, window_bounds = array<i64: 128, 256>}, {transform_indices = @transform_1, window_bounds = array<i64: 256, 128>}, {transform_indices = @transform_2, window_bounds = array<i64: 1, 128>}, {transform_indices = @transform_3, window_bounds = array<i64: 1, 128>}, {transform_indices = @transform_4, window_bounds = array<i64: 128, 128>}]} {
    %c0_i32 = arith.constant 0 : i32
    %0 = arith.cmpi eq, %arg2, %c0_i32 : i32
    %1 = arith.extui %0 : i1 to i32
    %c0_i32_0 = arith.constant 0 : i32
    %2 = arith.cmpi ne, %1, %c0_i32_0 : i32
    scf.if %2 {
      %cst_10 = arith.constant 0.000000e+00 : f32
      %12 = vector.broadcast %cst_10 : f32 to vector<128x128xf32>
      %c0_11 = arith.constant 0 : index
      %c0_12 = arith.constant 0 : index
      %13 = vector.load %arg8[%c0_11, %c0_12] : memref<128x128xf32, #tpu.memory_space<vmem>>, vector<128x128xf32>
      tpu.vector_store %arg8[%c0_11, %c0_12], %12 {strides = array<i32>} : memref<128x128xf32, #tpu.memory_space<vmem>>, vector<128x128xf32>,
    } else {
    }
    %c0 = arith.constant 0 : index
    %c0_1 = arith.constant 0 : index
    %3 = vector.load %arg8[%c0, %c0_1] : memref<128x128xf32, #tpu.memory_space<vmem>>, vector<128x128xf32>
    %c0_2 = arith.constant 0 : index
    %c0_3 = arith.constant 0 : index
    %4 = vector.load %arg3[%c0_2, %c0_3] : memref<128x256xbf16, #tpu.memory_space<vmem>>, vector<128x256xbf16>
    %c0_4 = arith.constant 0 : index
    %c0_5 = arith.constant 0 : index
    %5 = vector.load %arg4[%c0_4, %c0_5] : memref<256x128xbf16, #tpu.memory_space<vmem>>, vector<256x128xbf16>
    %cst = arith.constant dense<0.000000e+00> : vector<128x128xf32>
    %6 = tpu.matmul %4, %5, %cst {dimension_numbers = #tpu.dot_dimension_numbers<[1], [0], [0], [1], [0, 0, 1, 1], [], []>} : vector<128x256xbf16>, vector<256x128xbf16>, vector<128x128xf32> -> vector<128x128xf32>
    %7 = arith.addf %3, %6 : vector<128x128xf32>
    %c0_6 = arith.constant 0 : index
    %c0_7 = arith.constant 0 : index
    %8 = vector.load %arg8[%c0_6, %c0_7] : memref<128x128xf32, #tpu.memory_space<vmem>>, vector<128x128xf32>
    tpu.vector_store %arg8[%c0_6, %c0_7], %7 {strides = array<i32>} : memref<128x128xf32, #tpu.memory_space<vmem>>, vector<128x128xf32>,
    %c0_i32_8 = arith.constant 0 : i32
    %9 = arith.cmpi eq, %arg2, %c0_i32_8 : i32
    %10 = arith.extui %9 : i1 to i32
    %c0_i32_9 = arith.constant 0 : i32
    %11 = arith.cmpi ne, %10, %c0_i32_9 : i32
    scf.if %11 {
      %c0_10 = arith.constant 0 : index
      %c0_11 = arith.constant 0 : index
      %12 = vector.load %arg8[%c0_10, %c0_11] : memref<128x128xf32, #tpu.memory_space<vmem>>, vector<128x128xf32>
      %c0_12 = arith.constant 0 : index
      %c0_13 = arith.constant 0 : index
      %13 = vector.load %arg5[%c0_12, %c0_13] : memref<1x128xf32, #tpu.memory_space<vmem>>, vector<1x128xf32>
      %14 = vector.broadcast %13 : vector<1x128xf32> to vector<128x128xf32>
      %15 = arith.mulf %12, %14 : vector<128x128xf32>
      %c0_14 = arith.constant 0 : index
      %c0_15 = arith.constant 0 : index
      %16 = vector.load %arg6[%c0_14, %c0_15] : memref<1x128xf32, #tpu.memory_space<vmem>>, vector<1x128xf32>
      %17 = vector.broadcast %16 : vector<1x128xf32> to vector<128x128xf32>
      %18 = arith.addf %15, %17 : vector<128x128xf32>
      %cst_16 = arith.constant 0.000000e+00 : f32
      %19 = vector.broadcast %cst_16 : f32 to vector<128x128xf32>
      %20 = arith.maximumf %18, %19 : vector<128x128xf32>
      %c0_17 = arith.constant 0 : index
      %c0_18 = arith.constant 0 : index
      %21 = vector.load %arg7[%c0_17, %c0_18] : memref<128x128xf32, #tpu.memory_space<vmem>>, vector<128x128xf32>
      tpu.vector_store %arg7[%c0_17, %c0_18], %20 {strides = array<i32>} : memref<128x128xf32, #tpu.memory_space<vmem>>, vector<128x128xf32>,
    } else {
    }
    return
  }
  func.func @transform_0(%arg0: i32, %arg1: i32, %arg2: i32) -> (i32, i32) {
    %c0_i32 = arith.constant 0 : i32
    return %arg0, %arg2 : i32, i32
  }
  func.func @transform_1(%arg0: i32, %arg1: i32, %arg2: i32) -> (i32, i32) {
    %c0_i32 = arith.constant 0 : i32
    return %arg2, %arg1 : i32, i32
  }
  func.func @transform_2(%arg0: i32, %arg1: i32, %arg2: i32) -> (i32, i32) {
    %c0_i32 = arith.constant 0 : i32
    %c0_i32_0 = arith.constant 0 : i32
    return %c0_i32, %arg1 : i32, i32
  }
  func.func @transform_3(%arg0: i32, %arg1: i32, %arg2: i32) -> (i32, i32) {
    %c0_i32 = arith.constant 0 : i32
    %c0_i32_0 = arith.constant 0 : i32
    return %c0_i32, %arg1 : i32, i32
  }
  func.func @transform_4(%arg0: i32, %arg1: i32, %arg2: i32) -> (i32, i32) {
    %c0_i32 = arith.constant 0 : i32
    return %arg0, %arg1 : i32, i32
  }
}

module attributes {stable_mosaic.version = 11 : i64} {
  func.func @_max_kernel(%arg0: memref<9x64x128xf32, #tpu.memory_space<vmem>>, %arg1: memref<64x128xf32, #tpu.memory_space<vmem>>) attributes {dimension_semantics = [], scalar_prefetch = 0 : i64, scratch_operands = 0 : i64, tpu.core_type = #tpu.core_type<tc>} {
    %c0 = arith.constant 0 : index
    %c0_0 = arith.constant 0 : index
    %c0_1 = arith.constant 0 : index
    %0 = vector.load %arg0[%c0, %c0_0, %c0_1] : memref<9x64x128xf32, #tpu.memory_space<vmem>>, vector<1x64x128xf32>
    %1 = vector.shape_cast %0 : vector<1x64x128xf32> to vector<64x128xf32>
    %c1 = arith.constant 1 : index
    %c0_2 = arith.constant 0 : index
    %c0_3 = arith.constant 0 : index
    %2 = vector.load %arg0[%c1, %c0_2, %c0_3] : memref<9x64x128xf32, #tpu.memory_space<vmem>>, vector<1x64x128xf32>
    %3 = vector.shape_cast %2 : vector<1x64x128xf32> to vector<64x128xf32>
    %4 = arith.maximumf %1, %3 : vector<64x128xf32>
    %c2 = arith.constant 2 : index
    %c0_4 = arith.constant 0 : index
    %c0_5 = arith.constant 0 : index
    %5 = vector.load %arg0[%c2, %c0_4, %c0_5] : memref<9x64x128xf32, #tpu.memory_space<vmem>>, vector<1x64x128xf32>
    %6 = vector.shape_cast %5 : vector<1x64x128xf32> to vector<64x128xf32>
    %7 = arith.maximumf %4, %6 : vector<64x128xf32>
    %c3 = arith.constant 3 : index
    %c0_6 = arith.constant 0 : index
    %c0_7 = arith.constant 0 : index
    %8 = vector.load %arg0[%c3, %c0_6, %c0_7] : memref<9x64x128xf32, #tpu.memory_space<vmem>>, vector<1x64x128xf32>
    %9 = vector.shape_cast %8 : vector<1x64x128xf32> to vector<64x128xf32>
    %10 = arith.maximumf %7, %9 : vector<64x128xf32>
    %c4 = arith.constant 4 : index
    %c0_8 = arith.constant 0 : index
    %c0_9 = arith.constant 0 : index
    %11 = vector.load %arg0[%c4, %c0_8, %c0_9] : memref<9x64x128xf32, #tpu.memory_space<vmem>>, vector<1x64x128xf32>
    %12 = vector.shape_cast %11 : vector<1x64x128xf32> to vector<64x128xf32>
    %13 = arith.maximumf %10, %12 : vector<64x128xf32>
    %c5 = arith.constant 5 : index
    %c0_10 = arith.constant 0 : index
    %c0_11 = arith.constant 0 : index
    %14 = vector.load %arg0[%c5, %c0_10, %c0_11] : memref<9x64x128xf32, #tpu.memory_space<vmem>>, vector<1x64x128xf32>
    %15 = vector.shape_cast %14 : vector<1x64x128xf32> to vector<64x128xf32>
    %16 = arith.maximumf %13, %15 : vector<64x128xf32>
    %c6 = arith.constant 6 : index
    %c0_12 = arith.constant 0 : index
    %c0_13 = arith.constant 0 : index
    %17 = vector.load %arg0[%c6, %c0_12, %c0_13] : memref<9x64x128xf32, #tpu.memory_space<vmem>>, vector<1x64x128xf32>
    %18 = vector.shape_cast %17 : vector<1x64x128xf32> to vector<64x128xf32>
    %19 = arith.maximumf %16, %18 : vector<64x128xf32>
    %c7 = arith.constant 7 : index
    %c0_14 = arith.constant 0 : index
    %c0_15 = arith.constant 0 : index
    %20 = vector.load %arg0[%c7, %c0_14, %c0_15] : memref<9x64x128xf32, #tpu.memory_space<vmem>>, vector<1x64x128xf32>
    %21 = vector.shape_cast %20 : vector<1x64x128xf32> to vector<64x128xf32>
    %22 = arith.maximumf %19, %21 : vector<64x128xf32>
    %c8 = arith.constant 8 : index
    %c0_16 = arith.constant 0 : index
    %c0_17 = arith.constant 0 : index
    %23 = vector.load %arg0[%c8, %c0_16, %c0_17] : memref<9x64x128xf32, #tpu.memory_space<vmem>>, vector<1x64x128xf32>
    %24 = vector.shape_cast %23 : vector<1x64x128xf32> to vector<64x128xf32>
    %25 = arith.maximumf %22, %24 : vector<64x128xf32>
    %c0_18 = arith.constant 0 : index
    %c0_19 = arith.constant 0 : index
    %26 = vector.load %arg1[%c0_18, %c0_19] : memref<64x128xf32, #tpu.memory_space<vmem>>, vector<64x128xf32>
    tpu.vector_store %arg1[%c0_18, %c0_19], %25 {strides = array<i32>} : memref<64x128xf32, #tpu.memory_space<vmem>>, vector<64x128xf32>,
    return
  }
}

module attributes {stable_mosaic.version = 11 : i64} {
  func.func @_mm_bn_kernel(%arg0: i32, %arg1: i32, %arg2: i32, %arg3: memref<128x384xbf16, #tpu.memory_space<vmem>>, %arg4: memref<384x128xbf16, #tpu.memory_space<vmem>>, %arg5: memref<1x128xf32, #tpu.memory_space<vmem>>, %arg6: memref<1x128xf32, #tpu.memory_space<vmem>>, %arg7: memref<128x128xf32, #tpu.memory_space<vmem>>, %arg8: memref<128x128xf32, #tpu.memory_space<vmem>>) attributes {dimension_semantics = [#tpu.dimension_semantics<parallel>, #tpu.dimension_semantics<parallel>, #tpu.dimension_semantics<arbitrary>], iteration_bounds = array<i64: 1, 1, 2>, scalar_prefetch = 0 : i64, scratch_operands = 1 : i64, tpu.core_type = #tpu.core_type<tc>, window_params = [{transform_indices = @transform_0, window_bounds = array<i64: 128, 384>}, {transform_indices = @transform_1, window_bounds = array<i64: 384, 128>}, {transform_indices = @transform_2, window_bounds = array<i64: 1, 128>}, {transform_indices = @transform_3, window_bounds = array<i64: 1, 128>}, {transform_indices = @transform_4, window_bounds = array<i64: 128, 128>}]} {
    %c0_i32 = arith.constant 0 : i32
    %0 = arith.cmpi eq, %arg2, %c0_i32 : i32
    %1 = arith.extui %0 : i1 to i32
    %c0_i32_0 = arith.constant 0 : i32
    %2 = arith.cmpi ne, %1, %c0_i32_0 : i32
    scf.if %2 {
      %cst_9 = arith.constant 0.000000e+00 : f32
      %12 = vector.broadcast %cst_9 : f32 to vector<128x128xf32>
      %c0_10 = arith.constant 0 : index
      %c0_11 = arith.constant 0 : index
      %13 = vector.load %arg8[%c0_10, %c0_11] : memref<128x128xf32, #tpu.memory_space<vmem>>, vector<128x128xf32>
      tpu.vector_store %arg8[%c0_10, %c0_11], %12 {strides = array<i32>} : memref<128x128xf32, #tpu.memory_space<vmem>>, vector<128x128xf32>,
    } else {
    }
    %c0 = arith.constant 0 : index
    %c0_1 = arith.constant 0 : index
    %3 = vector.load %arg8[%c0, %c0_1] : memref<128x128xf32, #tpu.memory_space<vmem>>, vector<128x128xf32>
    %c0_2 = arith.constant 0 : index
    %c0_3 = arith.constant 0 : index
    %4 = vector.load %arg3[%c0_2, %c0_3] : memref<128x384xbf16, #tpu.memory_space<vmem>>, vector<128x384xbf16>
    %c0_4 = arith.constant 0 : index
    %c0_5 = arith.constant 0 : index
    %5 = vector.load %arg4[%c0_4, %c0_5] : memref<384x128xbf16, #tpu.memory_space<vmem>>, vector<384x128xbf16>
    %cst = arith.constant dense<0.000000e+00> : vector<128x128xf32>
    %6 = tpu.matmul %4, %5, %cst {dimension_numbers = #tpu.dot_dimension_numbers<[1], [0], [0], [1], [0, 0, 1, 1], [], []>} : vector<128x384xbf16>, vector<384x128xbf16>, vector<128x128xf32> -> vector<128x128xf32>
    %7 = arith.addf %3, %6 : vector<128x128xf32>
    %c0_6 = arith.constant 0 : index
    %c0_7 = arith.constant 0 : index
    %8 = vector.load %arg8[%c0_6, %c0_7] : memref<128x128xf32, #tpu.memory_space<vmem>>, vector<128x128xf32>
    tpu.vector_store %arg8[%c0_6, %c0_7], %7 {strides = array<i32>} : memref<128x128xf32, #tpu.memory_space<vmem>>, vector<128x128xf32>,
    %c1_i32 = arith.constant 1 : i32
    %9 = arith.cmpi eq, %arg2, %c1_i32 : i32
    %10 = arith.extui %9 : i1 to i32
    %c0_i32_8 = arith.constant 0 : i32
    %11 = arith.cmpi ne, %10, %c0_i32_8 : i32
    scf.if %11 {
      %c0_9 = arith.constant 0 : index
      %c0_10 = arith.constant 0 : index
      %12 = vector.load %arg8[%c0_9, %c0_10] : memref<128x128xf32, #tpu.memory_space<vmem>>, vector<128x128xf32>
      %c0_11 = arith.constant 0 : index
      %c0_12 = arith.constant 0 : index
      %13 = vector.load %arg5[%c0_11, %c0_12] : memref<1x128xf32, #tpu.memory_space<vmem>>, vector<1x128xf32>
      %14 = vector.broadcast %13 : vector<1x128xf32> to vector<128x128xf32>
      %15 = arith.mulf %12, %14 : vector<128x128xf32>
      %c0_13 = arith.constant 0 : index
      %c0_14 = arith.constant 0 : index
      %16 = vector.load %arg6[%c0_13, %c0_14] : memref<1x128xf32, #tpu.memory_space<vmem>>, vector<1x128xf32>
      %17 = vector.broadcast %16 : vector<1x128xf32> to vector<128x128xf32>
      %18 = arith.addf %15, %17 : vector<128x128xf32>
      %cst_15 = arith.constant 0.000000e+00 : f32
      %19 = vector.broadcast %cst_15 : f32 to vector<128x128xf32>
      %20 = arith.maximumf %18, %19 : vector<128x128xf32>
      %c0_16 = arith.constant 0 : index
      %c0_17 = arith.constant 0 : index
      %21 = vector.load %arg7[%c0_16, %c0_17] : memref<128x128xf32, #tpu.memory_space<vmem>>, vector<128x128xf32>
      tpu.vector_store %arg7[%c0_16, %c0_17], %20 {strides = array<i32>} : memref<128x128xf32, #tpu.memory_space<vmem>>, vector<128x128xf32>,
    } else {
    }
    return
  }
  func.func @transform_0(%arg0: i32, %arg1: i32, %arg2: i32) -> (i32, i32) {
    %c0_i32 = arith.constant 0 : i32
    return %arg0, %arg2 : i32, i32
  }
  func.func @transform_1(%arg0: i32, %arg1: i32, %arg2: i32) -> (i32, i32) {
    %c0_i32 = arith.constant 0 : i32
    return %arg2, %arg1 : i32, i32
  }
  func.func @transform_2(%arg0: i32, %arg1: i32, %arg2: i32) -> (i32, i32) {
    %c0_i32 = arith.constant 0 : i32
    %c0_i32_0 = arith.constant 0 : i32
    return %c0_i32, %arg1 : i32, i32
  }
  func.func @transform_3(%arg0: i32, %arg1: i32, %arg2: i32) -> (i32, i32) {
    %c0_i32 = arith.constant 0 : i32
    %c0_i32_0 = arith.constant 0 : i32
    return %c0_i32, %arg1 : i32, i32
  }
  func.func @transform_4(%arg0: i32, %arg1: i32, %arg2: i32) -> (i32, i32) {
    %c0_i32 = arith.constant 0 : i32
    return %arg0, %arg1 : i32, i32
  }
}

module attributes {stable_mosaic.version = 11 : i64} {
  func.func @_mm_bn_res_kernel(%arg0: i32, %arg1: i32, %arg2: i32, %arg3: memref<128x384xbf16, #tpu.memory_space<vmem>>, %arg4: memref<384x128xbf16, #tpu.memory_space<vmem>>, %arg5: memref<1x128xf32, #tpu.memory_space<vmem>>, %arg6: memref<1x128xf32, #tpu.memory_space<vmem>>, %arg7: memref<128x128xf32, #tpu.memory_space<vmem>>, %arg8: memref<128x128xf32, #tpu.memory_space<vmem>>, %arg9: memref<128x128xf32, #tpu.memory_space<vmem>>) attributes {dimension_semantics = [#tpu.dimension_semantics<parallel>, #tpu.dimension_semantics<parallel>, #tpu.dimension_semantics<arbitrary>], iteration_bounds = array<i64: 1, 1, 2>, scalar_prefetch = 0 : i64, scratch_operands = 1 : i64, tpu.core_type = #tpu.core_type<tc>, window_params = [{transform_indices = @transform_0, window_bounds = array<i64: 128, 384>}, {transform_indices = @transform_1, window_bounds = array<i64: 384, 128>}, {transform_indices = @transform_2, window_bounds = array<i64: 1, 128>}, {transform_indices = @transform_3, window_bounds = array<i64: 1, 128>}, {transform_indices = @transform_4, window_bounds = array<i64: 128, 128>}, {transform_indices = @transform_5, window_bounds = array<i64: 128, 128>}]} {
    %c0_i32 = arith.constant 0 : i32
    %0 = arith.cmpi eq, %arg2, %c0_i32 : i32
    %1 = arith.extui %0 : i1 to i32
    %c0_i32_0 = arith.constant 0 : i32
    %2 = arith.cmpi ne, %1, %c0_i32_0 : i32
    scf.if %2 {
      %cst_9 = arith.constant 0.000000e+00 : f32
      %12 = vector.broadcast %cst_9 : f32 to vector<128x128xf32>
      %c0_10 = arith.constant 0 : index
      %c0_11 = arith.constant 0 : index
      %13 = vector.load %arg9[%c0_10, %c0_11] : memref<128x128xf32, #tpu.memory_space<vmem>>, vector<128x128xf32>
      tpu.vector_store %arg9[%c0_10, %c0_11], %12 {strides = array<i32>} : memref<128x128xf32, #tpu.memory_space<vmem>>, vector<128x128xf32>,
    } else {
    }
    %c0 = arith.constant 0 : index
    %c0_1 = arith.constant 0 : index
    %3 = vector.load %arg9[%c0, %c0_1] : memref<128x128xf32, #tpu.memory_space<vmem>>, vector<128x128xf32>
    %c0_2 = arith.constant 0 : index
    %c0_3 = arith.constant 0 : index
    %4 = vector.load %arg3[%c0_2, %c0_3] : memref<128x384xbf16, #tpu.memory_space<vmem>>, vector<128x384xbf16>
    %c0_4 = arith.constant 0 : index
    %c0_5 = arith.constant 0 : index
    %5 = vector.load %arg4[%c0_4, %c0_5] : memref<384x128xbf16, #tpu.memory_space<vmem>>, vector<384x128xbf16>
    %cst = arith.constant dense<0.000000e+00> : vector<128x128xf32>
    %6 = tpu.matmul %4, %5, %cst {dimension_numbers = #tpu.dot_dimension_numbers<[1], [0], [0], [1], [0, 0, 1, 1], [], []>} : vector<128x384xbf16>, vector<384x128xbf16>, vector<128x128xf32> -> vector<128x128xf32>
    %7 = arith.addf %3, %6 : vector<128x128xf32>
    %c0_6 = arith.constant 0 : index
    %c0_7 = arith.constant 0 : index
    %8 = vector.load %arg9[%c0_6, %c0_7] : memref<128x128xf32, #tpu.memory_space<vmem>>, vector<128x128xf32>
    tpu.vector_store %arg9[%c0_6, %c0_7], %7 {strides = array<i32>} : memref<128x128xf32, #tpu.memory_space<vmem>>, vector<128x128xf32>,
    %c1_i32 = arith.constant 1 : i32
    %9 = arith.cmpi eq, %arg2, %c1_i32 : i32
    %10 = arith.extui %9 : i1 to i32
    %c0_i32_8 = arith.constant 0 : i32
    %11 = arith.cmpi ne, %10, %c0_i32_8 : i32
    scf.if %11 {
      %c0_9 = arith.constant 0 : index
      %c0_10 = arith.constant 0 : index
      %12 = vector.load %arg9[%c0_9, %c0_10] : memref<128x128xf32, #tpu.memory_space<vmem>>, vector<128x128xf32>
      %c0_11 = arith.constant 0 : index
      %c0_12 = arith.constant 0 : index
      %13 = vector.load %arg5[%c0_11, %c0_12] : memref<1x128xf32, #tpu.memory_space<vmem>>, vector<1x128xf32>
      %14 = vector.broadcast %13 : vector<1x128xf32> to vector<128x128xf32>
      %15 = arith.mulf %12, %14 : vector<128x128xf32>
      %c0_13 = arith.constant 0 : index
      %c0_14 = arith.constant 0 : index
      %16 = vector.load %arg6[%c0_13, %c0_14] : memref<1x128xf32, #tpu.memory_space<vmem>>, vector<1x128xf32>
      %17 = vector.broadcast %16 : vector<1x128xf32> to vector<128x128xf32>
      %18 = arith.addf %15, %17 : vector<128x128xf32>
      %c0_15 = arith.constant 0 : index
      %c0_16 = arith.constant 0 : index
      %19 = vector.load %arg7[%c0_15, %c0_16] : memref<128x128xf32, #tpu.memory_space<vmem>>, vector<128x128xf32>
      %20 = arith.addf %18, %19 : vector<128x128xf32>
      %cst_17 = arith.constant 0.000000e+00 : f32
      %21 = vector.broadcast %cst_17 : f32 to vector<128x128xf32>
      %22 = arith.maximumf %20, %21 : vector<128x128xf32>
      %c0_18 = arith.constant 0 : index
      %c0_19 = arith.constant 0 : index
      %23 = vector.load %arg8[%c0_18, %c0_19] : memref<128x128xf32, #tpu.memory_space<vmem>>, vector<128x128xf32>
      tpu.vector_store %arg8[%c0_18, %c0_19], %22 {strides = array<i32>} : memref<128x128xf32, #tpu.memory_space<vmem>>, vector<128x128xf32>,
    } else {
    }
    return
  }
  func.func @transform_0(%arg0: i32, %arg1: i32, %arg2: i32) -> (i32, i32) {
    %c0_i32 = arith.constant 0 : i32
    return %arg0, %arg2 : i32, i32
  }
  func.func @transform_1(%arg0: i32, %arg1: i32, %arg2: i32) -> (i32, i32) {
    %c0_i32 = arith.constant 0 : i32
    return %arg2, %arg1 : i32, i32
  }
  func.func @transform_2(%arg0: i32, %arg1: i32, %arg2: i32) -> (i32, i32) {
    %c0_i32 = arith.constant 0 : i32
    %c0_i32_0 = arith.constant 0 : i32
    return %c0_i32, %arg1 : i32, i32
  }
  func.func @transform_3(%arg0: i32, %arg1: i32, %arg2: i32) -> (i32, i32) {
    %c0_i32 = arith.constant 0 : i32
    %c0_i32_0 = arith.constant 0 : i32
    return %c0_i32, %arg1 : i32, i32
  }
  func.func @transform_4(%arg0: i32, %arg1: i32, %arg2: i32) -> (i32, i32) {
    %c0_i32 = arith.constant 0 : i32
    return %arg0, %arg1 : i32, i32
  }
  func.func @transform_5(%arg0: i32, %arg1: i32, %arg2: i32) -> (i32, i32) {
    %c0_i32 = arith.constant 0 : i32
    return %arg0, %arg1 : i32, i32
  }
}

module attributes {stable_mosaic.version = 11 : i64} {
  func.func @_mm_bn_kernel(%arg0: i32, %arg1: i32, %arg2: i32, %arg3: memref<32x384xbf16, #tpu.memory_space<vmem>>, %arg4: memref<384x128xbf16, #tpu.memory_space<vmem>>, %arg5: memref<1x128xf32, #tpu.memory_space<vmem>>, %arg6: memref<1x128xf32, #tpu.memory_space<vmem>>, %arg7: memref<32x128xf32, #tpu.memory_space<vmem>>, %arg8: memref<32x128xf32, #tpu.memory_space<vmem>>) attributes {dimension_semantics = [#tpu.dimension_semantics<parallel>, #tpu.dimension_semantics<parallel>, #tpu.dimension_semantics<arbitrary>], iteration_bounds = array<i64: 1, 1, 2>, scalar_prefetch = 0 : i64, scratch_operands = 1 : i64, tpu.core_type = #tpu.core_type<tc>, window_params = [{transform_indices = @transform_0, window_bounds = array<i64: 32, 384>}, {transform_indices = @transform_1, window_bounds = array<i64: 384, 128>}, {transform_indices = @transform_2, window_bounds = array<i64: 1, 128>}, {transform_indices = @transform_3, window_bounds = array<i64: 1, 128>}, {transform_indices = @transform_4, window_bounds = array<i64: 32, 128>}]} {
    %c0_i32 = arith.constant 0 : i32
    %0 = arith.cmpi eq, %arg2, %c0_i32 : i32
    %1 = arith.extui %0 : i1 to i32
    %c0_i32_0 = arith.constant 0 : i32
    %2 = arith.cmpi ne, %1, %c0_i32_0 : i32
    scf.if %2 {
      %cst_9 = arith.constant 0.000000e+00 : f32
      %12 = vector.broadcast %cst_9 : f32 to vector<32x128xf32>
      %c0_10 = arith.constant 0 : index
      %c0_11 = arith.constant 0 : index
      %13 = vector.load %arg8[%c0_10, %c0_11] : memref<32x128xf32, #tpu.memory_space<vmem>>, vector<32x128xf32>
      tpu.vector_store %arg8[%c0_10, %c0_11], %12 {strides = array<i32>} : memref<32x128xf32, #tpu.memory_space<vmem>>, vector<32x128xf32>,
    } else {
    }
    %c0 = arith.constant 0 : index
    %c0_1 = arith.constant 0 : index
    %3 = vector.load %arg8[%c0, %c0_1] : memref<32x128xf32, #tpu.memory_space<vmem>>, vector<32x128xf32>
    %c0_2 = arith.constant 0 : index
    %c0_3 = arith.constant 0 : index
    %4 = vector.load %arg3[%c0_2, %c0_3] : memref<32x384xbf16, #tpu.memory_space<vmem>>, vector<32x384xbf16>
    %c0_4 = arith.constant 0 : index
    %c0_5 = arith.constant 0 : index
    %5 = vector.load %arg4[%c0_4, %c0_5] : memref<384x128xbf16, #tpu.memory_space<vmem>>, vector<384x128xbf16>
    %cst = arith.constant dense<0.000000e+00> : vector<32x128xf32>
    %6 = tpu.matmul %4, %5, %cst {dimension_numbers = #tpu.dot_dimension_numbers<[1], [0], [0], [1], [0, 0, 1, 1], [], []>} : vector<32x384xbf16>, vector<384x128xbf16>, vector<32x128xf32> -> vector<32x128xf32>
    %7 = arith.addf %3, %6 : vector<32x128xf32>
    %c0_6 = arith.constant 0 : index
    %c0_7 = arith.constant 0 : index
    %8 = vector.load %arg8[%c0_6, %c0_7] : memref<32x128xf32, #tpu.memory_space<vmem>>, vector<32x128xf32>
    tpu.vector_store %arg8[%c0_6, %c0_7], %7 {strides = array<i32>} : memref<32x128xf32, #tpu.memory_space<vmem>>, vector<32x128xf32>,
    %c1_i32 = arith.constant 1 : i32
    %9 = arith.cmpi eq, %arg2, %c1_i32 : i32
    %10 = arith.extui %9 : i1 to i32
    %c0_i32_8 = arith.constant 0 : i32
    %11 = arith.cmpi ne, %10, %c0_i32_8 : i32
    scf.if %11 {
      %c0_9 = arith.constant 0 : index
      %c0_10 = arith.constant 0 : index
      %12 = vector.load %arg8[%c0_9, %c0_10] : memref<32x128xf32, #tpu.memory_space<vmem>>, vector<32x128xf32>
      %c0_11 = arith.constant 0 : index
      %c0_12 = arith.constant 0 : index
      %13 = vector.load %arg5[%c0_11, %c0_12] : memref<1x128xf32, #tpu.memory_space<vmem>>, vector<1x128xf32>
      %14 = vector.broadcast %13 : vector<1x128xf32> to vector<32x128xf32>
      %15 = arith.mulf %12, %14 : vector<32x128xf32>
      %c0_13 = arith.constant 0 : index
      %c0_14 = arith.constant 0 : index
      %16 = vector.load %arg6[%c0_13, %c0_14] : memref<1x128xf32, #tpu.memory_space<vmem>>, vector<1x128xf32>
      %17 = vector.broadcast %16 : vector<1x128xf32> to vector<32x128xf32>
      %18 = arith.addf %15, %17 : vector<32x128xf32>
      %cst_15 = arith.constant 0.000000e+00 : f32
      %19 = vector.broadcast %cst_15 : f32 to vector<32x128xf32>
      %20 = arith.maximumf %18, %19 : vector<32x128xf32>
      %c0_16 = arith.constant 0 : index
      %c0_17 = arith.constant 0 : index
      %21 = vector.load %arg7[%c0_16, %c0_17] : memref<32x128xf32, #tpu.memory_space<vmem>>, vector<32x128xf32>
      tpu.vector_store %arg7[%c0_16, %c0_17], %20 {strides = array<i32>} : memref<32x128xf32, #tpu.memory_space<vmem>>, vector<32x128xf32>,
    } else {
    }
    return
  }
  func.func @transform_0(%arg0: i32, %arg1: i32, %arg2: i32) -> (i32, i32) {
    %c0_i32 = arith.constant 0 : i32
    return %arg0, %arg2 : i32, i32
  }
  func.func @transform_1(%arg0: i32, %arg1: i32, %arg2: i32) -> (i32, i32) {
    %c0_i32 = arith.constant 0 : i32
    return %arg2, %arg1 : i32, i32
  }
  func.func @transform_2(%arg0: i32, %arg1: i32, %arg2: i32) -> (i32, i32) {
    %c0_i32 = arith.constant 0 : i32
    %c0_i32_0 = arith.constant 0 : i32
    return %c0_i32, %arg1 : i32, i32
  }
  func.func @transform_3(%arg0: i32, %arg1: i32, %arg2: i32) -> (i32, i32) {
    %c0_i32 = arith.constant 0 : i32
    %c0_i32_0 = arith.constant 0 : i32
    return %c0_i32, %arg1 : i32, i32
  }
  func.func @transform_4(%arg0: i32, %arg1: i32, %arg2: i32) -> (i32, i32) {
    %c0_i32 = arith.constant 0 : i32
    return %arg0, %arg1 : i32, i32
  }
}

module attributes {stable_mosaic.version = 11 : i64} {
  func.func @_mm_bn_kernel(%arg0: i32, %arg1: i32, %arg2: i32, %arg3: memref<32x128xbf16, #tpu.memory_space<vmem>>, %arg4: memref<128x128xbf16, #tpu.memory_space<vmem>>, %arg5: memref<1x128xf32, #tpu.memory_space<vmem>>, %arg6: memref<1x128xf32, #tpu.memory_space<vmem>>, %arg7: memref<32x128xf32, #tpu.memory_space<vmem>>, %arg8: memref<32x128xf32, #tpu.memory_space<vmem>>) attributes {dimension_semantics = [#tpu.dimension_semantics<parallel>, #tpu.dimension_semantics<parallel>, #tpu.dimension_semantics<arbitrary>], iteration_bounds = array<i64: 1, 1, 1>, scalar_prefetch = 0 : i64, scratch_operands = 1 : i64, tpu.core_type = #tpu.core_type<tc>, window_params = [{transform_indices = @transform_0, window_bounds = array<i64: 32, 128>}, {transform_indices = @transform_1, window_bounds = array<i64: 128, 128>}, {transform_indices = @transform_2, window_bounds = array<i64: 1, 128>}, {transform_indices = @transform_3, window_bounds = array<i64: 1, 128>}, {transform_indices = @transform_4, window_bounds = array<i64: 32, 128>}]} {
    %c0_i32 = arith.constant 0 : i32
    %0 = arith.cmpi eq, %arg2, %c0_i32 : i32
    %1 = arith.extui %0 : i1 to i32
    %c0_i32_0 = arith.constant 0 : i32
    %2 = arith.cmpi ne, %1, %c0_i32_0 : i32
    scf.if %2 {
      %cst_10 = arith.constant 0.000000e+00 : f32
      %12 = vector.broadcast %cst_10 : f32 to vector<32x128xf32>
      %c0_11 = arith.constant 0 : index
      %c0_12 = arith.constant 0 : index
      %13 = vector.load %arg8[%c0_11, %c0_12] : memref<32x128xf32, #tpu.memory_space<vmem>>, vector<32x128xf32>
      tpu.vector_store %arg8[%c0_11, %c0_12], %12 {strides = array<i32>} : memref<32x128xf32, #tpu.memory_space<vmem>>, vector<32x128xf32>,
    } else {
    }
    %c0 = arith.constant 0 : index
    %c0_1 = arith.constant 0 : index
    %3 = vector.load %arg8[%c0, %c0_1] : memref<32x128xf32, #tpu.memory_space<vmem>>, vector<32x128xf32>
    %c0_2 = arith.constant 0 : index
    %c0_3 = arith.constant 0 : index
    %4 = vector.load %arg3[%c0_2, %c0_3] : memref<32x128xbf16, #tpu.memory_space<vmem>>, vector<32x128xbf16>
    %c0_4 = arith.constant 0 : index
    %c0_5 = arith.constant 0 : index
    %5 = vector.load %arg4[%c0_4, %c0_5] : memref<128x128xbf16, #tpu.memory_space<vmem>>, vector<128x128xbf16>
    %cst = arith.constant dense<0.000000e+00> : vector<32x128xf32>
    %6 = tpu.matmul %4, %5, %cst {dimension_numbers = #tpu.dot_dimension_numbers<[1], [0], [0], [1], [0, 0, 1, 1], [], []>} : vector<32x128xbf16>, vector<128x128xbf16>, vector<32x128xf32> -> vector<32x128xf32>
    %7 = arith.addf %3, %6 : vector<32x128xf32>
    %c0_6 = arith.constant 0 : index
    %c0_7 = arith.constant 0 : index
    %8 = vector.load %arg8[%c0_6, %c0_7] : memref<32x128xf32, #tpu.memory_space<vmem>>, vector<32x128xf32>
    tpu.vector_store %arg8[%c0_6, %c0_7], %7 {strides = array<i32>} : memref<32x128xf32, #tpu.memory_space<vmem>>, vector<32x128xf32>,
    %c0_i32_8 = arith.constant 0 : i32
    %9 = arith.cmpi eq, %arg2, %c0_i32_8 : i32
    %10 = arith.extui %9 : i1 to i32
    %c0_i32_9 = arith.constant 0 : i32
    %11 = arith.cmpi ne, %10, %c0_i32_9 : i32
    scf.if %11 {
      %c0_10 = arith.constant 0 : index
      %c0_11 = arith.constant 0 : index
      %12 = vector.load %arg8[%c0_10, %c0_11] : memref<32x128xf32, #tpu.memory_space<vmem>>, vector<32x128xf32>
      %c0_12 = arith.constant 0 : index
      %c0_13 = arith.constant 0 : index
      %13 = vector.load %arg5[%c0_12, %c0_13] : memref<1x128xf32, #tpu.memory_space<vmem>>, vector<1x128xf32>
      %14 = vector.broadcast %13 : vector<1x128xf32> to vector<32x128xf32>
      %15 = arith.mulf %12, %14 : vector<32x128xf32>
      %c0_14 = arith.constant 0 : index
      %c0_15 = arith.constant 0 : index
      %16 = vector.load %arg6[%c0_14, %c0_15] : memref<1x128xf32, #tpu.memory_space<vmem>>, vector<1x128xf32>
      %17 = vector.broadcast %16 : vector<1x128xf32> to vector<32x128xf32>
      %18 = arith.addf %15, %17 : vector<32x128xf32>
      %c0_16 = arith.constant 0 : index
      %c0_17 = arith.constant 0 : index
      %19 = vector.load %arg7[%c0_16, %c0_17] : memref<32x128xf32, #tpu.memory_space<vmem>>, vector<32x128xf32>
      tpu.vector_store %arg7[%c0_16, %c0_17], %18 {strides = array<i32>} : memref<32x128xf32, #tpu.memory_space<vmem>>, vector<32x128xf32>,
    } else {
    }
    return
  }
  func.func @transform_0(%arg0: i32, %arg1: i32, %arg2: i32) -> (i32, i32) {
    %c0_i32 = arith.constant 0 : i32
    return %arg0, %arg2 : i32, i32
  }
  func.func @transform_1(%arg0: i32, %arg1: i32, %arg2: i32) -> (i32, i32) {
    %c0_i32 = arith.constant 0 : i32
    return %arg2, %arg1 : i32, i32
  }
  func.func @transform_2(%arg0: i32, %arg1: i32, %arg2: i32) -> (i32, i32) {
    %c0_i32 = arith.constant 0 : i32
    %c0_i32_0 = arith.constant 0 : i32
    return %c0_i32, %arg1 : i32, i32
  }
  func.func @transform_3(%arg0: i32, %arg1: i32, %arg2: i32) -> (i32, i32) {
    %c0_i32 = arith.constant 0 : i32
    %c0_i32_0 = arith.constant 0 : i32
    return %c0_i32, %arg1 : i32, i32
  }
  func.func @transform_4(%arg0: i32, %arg1: i32, %arg2: i32) -> (i32, i32) {
    %c0_i32 = arith.constant 0 : i32
    return %arg0, %arg1 : i32, i32
  }
}

module attributes {stable_mosaic.version = 11 : i64} {
  func.func @_mm_bn_res_kernel(%arg0: i32, %arg1: i32, %arg2: i32, %arg3: memref<32x384xbf16, #tpu.memory_space<vmem>>, %arg4: memref<384x128xbf16, #tpu.memory_space<vmem>>, %arg5: memref<1x128xf32, #tpu.memory_space<vmem>>, %arg6: memref<1x128xf32, #tpu.memory_space<vmem>>, %arg7: memref<32x128xf32, #tpu.memory_space<vmem>>, %arg8: memref<32x128xf32, #tpu.memory_space<vmem>>, %arg9: memref<32x128xf32, #tpu.memory_space<vmem>>) attributes {dimension_semantics = [#tpu.dimension_semantics<parallel>, #tpu.dimension_semantics<parallel>, #tpu.dimension_semantics<arbitrary>], iteration_bounds = array<i64: 1, 1, 3>, scalar_prefetch = 0 : i64, scratch_operands = 1 : i64, tpu.core_type = #tpu.core_type<tc>, window_params = [{transform_indices = @transform_0, window_bounds = array<i64: 32, 384>}, {transform_indices = @transform_1, window_bounds = array<i64: 384, 128>}, {transform_indices = @transform_2, window_bounds = array<i64: 1, 128>}, {transform_indices = @transform_3, window_bounds = array<i64: 1, 128>}, {transform_indices = @transform_4, window_bounds = array<i64: 32, 128>}, {transform_indices = @transform_5, window_bounds = array<i64: 32, 128>}]} {
    %c0_i32 = arith.constant 0 : i32
    %0 = arith.cmpi eq, %arg2, %c0_i32 : i32
    %1 = arith.extui %0 : i1 to i32
    %c0_i32_0 = arith.constant 0 : i32
    %2 = arith.cmpi ne, %1, %c0_i32_0 : i32
    scf.if %2 {
      %cst_9 = arith.constant 0.000000e+00 : f32
      %12 = vector.broadcast %cst_9 : f32 to vector<32x128xf32>
      %c0_10 = arith.constant 0 : index
      %c0_11 = arith.constant 0 : index
      %13 = vector.load %arg9[%c0_10, %c0_11] : memref<32x128xf32, #tpu.memory_space<vmem>>, vector<32x128xf32>
      tpu.vector_store %arg9[%c0_10, %c0_11], %12 {strides = array<i32>} : memref<32x128xf32, #tpu.memory_space<vmem>>, vector<32x128xf32>,
    } else {
    }
    %c0 = arith.constant 0 : index
    %c0_1 = arith.constant 0 : index
    %3 = vector.load %arg9[%c0, %c0_1] : memref<32x128xf32, #tpu.memory_space<vmem>>, vector<32x128xf32>
    %c0_2 = arith.constant 0 : index
    %c0_3 = arith.constant 0 : index
    %4 = vector.load %arg3[%c0_2, %c0_3] : memref<32x384xbf16, #tpu.memory_space<vmem>>, vector<32x384xbf16>
    %c0_4 = arith.constant 0 : index
    %c0_5 = arith.constant 0 : index
    %5 = vector.load %arg4[%c0_4, %c0_5] : memref<384x128xbf16, #tpu.memory_space<vmem>>, vector<384x128xbf16>
    %cst = arith.constant dense<0.000000e+00> : vector<32x128xf32>
    %6 = tpu.matmul %4, %5, %cst {dimension_numbers = #tpu.dot_dimension_numbers<[1], [0], [0], [1], [0, 0, 1, 1], [], []>} : vector<32x384xbf16>, vector<384x128xbf16>, vector<32x128xf32> -> vector<32x128xf32>
    %7 = arith.addf %3, %6 : vector<32x128xf32>
    %c0_6 = arith.constant 0 : index
    %c0_7 = arith.constant 0 : index
    %8 = vector.load %arg9[%c0_6, %c0_7] : memref<32x128xf32, #tpu.memory_space<vmem>>, vector<32x128xf32>
    tpu.vector_store %arg9[%c0_6, %c0_7], %7 {strides = array<i32>} : memref<32x128xf32, #tpu.memory_space<vmem>>, vector<32x128xf32>,
    %c2_i32 = arith.constant 2 : i32
    %9 = arith.cmpi eq, %arg2, %c2_i32 : i32
    %10 = arith.extui %9 : i1 to i32
    %c0_i32_8 = arith.constant 0 : i32
    %11 = arith.cmpi ne, %10, %c0_i32_8 : i32
    scf.if %11 {
      %c0_9 = arith.constant 0 : index
      %c0_10 = arith.constant 0 : index
      %12 = vector.load %arg9[%c0_9, %c0_10] : memref<32x128xf32, #tpu.memory_space<vmem>>, vector<32x128xf32>
      %c0_11 = arith.constant 0 : index
      %c0_12 = arith.constant 0 : index
      %13 = vector.load %arg5[%c0_11, %c0_12] : memref<1x128xf32, #tpu.memory_space<vmem>>, vector<1x128xf32>
      %14 = vector.broadcast %13 : vector<1x128xf32> to vector<32x128xf32>
      %15 = arith.mulf %12, %14 : vector<32x128xf32>
      %c0_13 = arith.constant 0 : index
      %c0_14 = arith.constant 0 : index
      %16 = vector.load %arg6[%c0_13, %c0_14] : memref<1x128xf32, #tpu.memory_space<vmem>>, vector<1x128xf32>
      %17 = vector.broadcast %16 : vector<1x128xf32> to vector<32x128xf32>
      %18 = arith.addf %15, %17 : vector<32x128xf32>
      %c0_15 = arith.constant 0 : index
      %c0_16 = arith.constant 0 : index
      %19 = vector.load %arg7[%c0_15, %c0_16] : memref<32x128xf32, #tpu.memory_space<vmem>>, vector<32x128xf32>
      %20 = arith.addf %18, %19 : vector<32x128xf32>
      %cst_17 = arith.constant 0.000000e+00 : f32
      %21 = vector.broadcast %cst_17 : f32 to vector<32x128xf32>
      %22 = arith.maximumf %20, %21 : vector<32x128xf32>
      %c0_18 = arith.constant 0 : index
      %c0_19 = arith.constant 0 : index
      %23 = vector.load %arg8[%c0_18, %c0_19] : memref<32x128xf32, #tpu.memory_space<vmem>>, vector<32x128xf32>
      tpu.vector_store %arg8[%c0_18, %c0_19], %22 {strides = array<i32>} : memref<32x128xf32, #tpu.memory_space<vmem>>, vector<32x128xf32>,
    } else {
    }
    return
  }
  func.func @transform_0(%arg0: i32, %arg1: i32, %arg2: i32) -> (i32, i32) {
    %c0_i32 = arith.constant 0 : i32
    return %arg0, %arg2 : i32, i32
  }
  func.func @transform_1(%arg0: i32, %arg1: i32, %arg2: i32) -> (i32, i32) {
    %c0_i32 = arith.constant 0 : i32
    return %arg2, %arg1 : i32, i32
  }
  func.func @transform_2(%arg0: i32, %arg1: i32, %arg2: i32) -> (i32, i32) {
    %c0_i32 = arith.constant 0 : i32
    %c0_i32_0 = arith.constant 0 : i32
    return %c0_i32, %arg1 : i32, i32
  }
  func.func @transform_3(%arg0: i32, %arg1: i32, %arg2: i32) -> (i32, i32) {
    %c0_i32 = arith.constant 0 : i32
    %c0_i32_0 = arith.constant 0 : i32
    return %c0_i32, %arg1 : i32, i32
  }
  func.func @transform_4(%arg0: i32, %arg1: i32, %arg2: i32) -> (i32, i32) {
    %c0_i32 = arith.constant 0 : i32
    return %arg0, %arg1 : i32, i32
  }
  func.func @transform_5(%arg0: i32, %arg1: i32, %arg2: i32) -> (i32, i32) {
    %c0_i32 = arith.constant 0 : i32
    return %arg0, %arg1 : i32, i32
  }
}

module attributes {stable_mosaic.version = 11 : i64} {
  func.func @_mm_bn_kernel(%arg0: i32, %arg1: i32, %arg2: i32, %arg3: memref<32x384xbf16, #tpu.memory_space<vmem>>, %arg4: memref<384x128xbf16, #tpu.memory_space<vmem>>, %arg5: memref<1x128xf32, #tpu.memory_space<vmem>>, %arg6: memref<1x128xf32, #tpu.memory_space<vmem>>, %arg7: memref<32x128xf32, #tpu.memory_space<vmem>>, %arg8: memref<32x128xf32, #tpu.memory_space<vmem>>) attributes {dimension_semantics = [#tpu.dimension_semantics<parallel>, #tpu.dimension_semantics<parallel>, #tpu.dimension_semantics<arbitrary>], iteration_bounds = array<i64: 1, 1, 3>, scalar_prefetch = 0 : i64, scratch_operands = 1 : i64, tpu.core_type = #tpu.core_type<tc>, window_params = [{transform_indices = @transform_0, window_bounds = array<i64: 32, 384>}, {transform_indices = @transform_1, window_bounds = array<i64: 384, 128>}, {transform_indices = @transform_2, window_bounds = array<i64: 1, 128>}, {transform_indices = @transform_3, window_bounds = array<i64: 1, 128>}, {transform_indices = @transform_4, window_bounds = array<i64: 32, 128>}]} {
    %c0_i32 = arith.constant 0 : i32
    %0 = arith.cmpi eq, %arg2, %c0_i32 : i32
    %1 = arith.extui %0 : i1 to i32
    %c0_i32_0 = arith.constant 0 : i32
    %2 = arith.cmpi ne, %1, %c0_i32_0 : i32
    scf.if %2 {
      %cst_9 = arith.constant 0.000000e+00 : f32
      %12 = vector.broadcast %cst_9 : f32 to vector<32x128xf32>
      %c0_10 = arith.constant 0 : index
      %c0_11 = arith.constant 0 : index
      %13 = vector.load %arg8[%c0_10, %c0_11] : memref<32x128xf32, #tpu.memory_space<vmem>>, vector<32x128xf32>
      tpu.vector_store %arg8[%c0_10, %c0_11], %12 {strides = array<i32>} : memref<32x128xf32, #tpu.memory_space<vmem>>, vector<32x128xf32>,
    } else {
    }
    %c0 = arith.constant 0 : index
    %c0_1 = arith.constant 0 : index
    %3 = vector.load %arg8[%c0, %c0_1] : memref<32x128xf32, #tpu.memory_space<vmem>>, vector<32x128xf32>
    %c0_2 = arith.constant 0 : index
    %c0_3 = arith.constant 0 : index
    %4 = vector.load %arg3[%c0_2, %c0_3] : memref<32x384xbf16, #tpu.memory_space<vmem>>, vector<32x384xbf16>
    %c0_4 = arith.constant 0 : index
    %c0_5 = arith.constant 0 : index
    %5 = vector.load %arg4[%c0_4, %c0_5] : memref<384x128xbf16, #tpu.memory_space<vmem>>, vector<384x128xbf16>
    %cst = arith.constant dense<0.000000e+00> : vector<32x128xf32>
    %6 = tpu.matmul %4, %5, %cst {dimension_numbers = #tpu.dot_dimension_numbers<[1], [0], [0], [1], [0, 0, 1, 1], [], []>} : vector<32x384xbf16>, vector<384x128xbf16>, vector<32x128xf32> -> vector<32x128xf32>
    %7 = arith.addf %3, %6 : vector<32x128xf32>
    %c0_6 = arith.constant 0 : index
    %c0_7 = arith.constant 0 : index
    %8 = vector.load %arg8[%c0_6, %c0_7] : memref<32x128xf32, #tpu.memory_space<vmem>>, vector<32x128xf32>
    tpu.vector_store %arg8[%c0_6, %c0_7], %7 {strides = array<i32>} : memref<32x128xf32, #tpu.memory_space<vmem>>, vector<32x128xf32>,
    %c2_i32 = arith.constant 2 : i32
    %9 = arith.cmpi eq, %arg2, %c2_i32 : i32
    %10 = arith.extui %9 : i1 to i32
    %c0_i32_8 = arith.constant 0 : i32
    %11 = arith.cmpi ne, %10, %c0_i32_8 : i32
    scf.if %11 {
      %c0_9 = arith.constant 0 : index
      %c0_10 = arith.constant 0 : index
      %12 = vector.load %arg8[%c0_9, %c0_10] : memref<32x128xf32, #tpu.memory_space<vmem>>, vector<32x128xf32>
      %c0_11 = arith.constant 0 : index
      %c0_12 = arith.constant 0 : index
      %13 = vector.load %arg5[%c0_11, %c0_12] : memref<1x128xf32, #tpu.memory_space<vmem>>, vector<1x128xf32>
      %14 = vector.broadcast %13 : vector<1x128xf32> to vector<32x128xf32>
      %15 = arith.mulf %12, %14 : vector<32x128xf32>
      %c0_13 = arith.constant 0 : index
      %c0_14 = arith.constant 0 : index
      %16 = vector.load %arg6[%c0_13, %c0_14] : memref<1x128xf32, #tpu.memory_space<vmem>>, vector<1x128xf32>
      %17 = vector.broadcast %16 : vector<1x128xf32> to vector<32x128xf32>
      %18 = arith.addf %15, %17 : vector<32x128xf32>
      %cst_15 = arith.constant 0.000000e+00 : f32
      %19 = vector.broadcast %cst_15 : f32 to vector<32x128xf32>
      %20 = arith.maximumf %18, %19 : vector<32x128xf32>
      %c0_16 = arith.constant 0 : index
      %c0_17 = arith.constant 0 : index
      %21 = vector.load %arg7[%c0_16, %c0_17] : memref<32x128xf32, #tpu.memory_space<vmem>>, vector<32x128xf32>
      tpu.vector_store %arg7[%c0_16, %c0_17], %20 {strides = array<i32>} : memref<32x128xf32, #tpu.memory_space<vmem>>, vector<32x128xf32>,
    } else {
    }
    return
  }
  func.func @transform_0(%arg0: i32, %arg1: i32, %arg2: i32) -> (i32, i32) {
    %c0_i32 = arith.constant 0 : i32
    return %arg0, %arg2 : i32, i32
  }
  func.func @transform_1(%arg0: i32, %arg1: i32, %arg2: i32) -> (i32, i32) {
    %c0_i32 = arith.constant 0 : i32
    return %arg2, %arg1 : i32, i32
  }
  func.func @transform_2(%arg0: i32, %arg1: i32, %arg2: i32) -> (i32, i32) {
    %c0_i32 = arith.constant 0 : i32
    %c0_i32_0 = arith.constant 0 : i32
    return %c0_i32, %arg1 : i32, i32
  }
  func.func @transform_3(%arg0: i32, %arg1: i32, %arg2: i32) -> (i32, i32) {
    %c0_i32 = arith.constant 0 : i32
    %c0_i32_0 = arith.constant 0 : i32
    return %c0_i32, %arg1 : i32, i32
  }
  func.func @transform_4(%arg0: i32, %arg1: i32, %arg2: i32) -> (i32, i32) {
    %c0_i32 = arith.constant 0 : i32
    return %arg0, %arg1 : i32, i32
  }
}

module attributes {stable_mosaic.version = 11 : i64} {
  func.func @_mm_bn_kernel(%arg0: i32, %arg1: i32, %arg2: i32, %arg3: memref<16x384xbf16, #tpu.memory_space<vmem>>, %arg4: memref<384x256xbf16, #tpu.memory_space<vmem>>, %arg5: memref<1x256xf32, #tpu.memory_space<vmem>>, %arg6: memref<1x256xf32, #tpu.memory_space<vmem>>, %arg7: memref<16x256xf32, #tpu.memory_space<vmem>>, %arg8: memref<16x256xf32, #tpu.memory_space<vmem>>) attributes {dimension_semantics = [#tpu.dimension_semantics<parallel>, #tpu.dimension_semantics<parallel>, #tpu.dimension_semantics<arbitrary>], iteration_bounds = array<i64: 1, 1, 3>, scalar_prefetch = 0 : i64, scratch_operands = 1 : i64, tpu.core_type = #tpu.core_type<tc>, window_params = [{transform_indices = @transform_0, window_bounds = array<i64: 16, 384>}, {transform_indices = @transform_1, window_bounds = array<i64: 384, 256>}, {transform_indices = @transform_2, window_bounds = array<i64: 1, 256>}, {transform_indices = @transform_3, window_bounds = array<i64: 1, 256>}, {transform_indices = @transform_4, window_bounds = array<i64: 16, 256>}]} {
    %c0_i32 = arith.constant 0 : i32
    %0 = arith.cmpi eq, %arg2, %c0_i32 : i32
    %1 = arith.extui %0 : i1 to i32
    %c0_i32_0 = arith.constant 0 : i32
    %2 = arith.cmpi ne, %1, %c0_i32_0 : i32
    scf.if %2 {
      %cst_9 = arith.constant 0.000000e+00 : f32
      %12 = vector.broadcast %cst_9 : f32 to vector<16x256xf32>
      %c0_10 = arith.constant 0 : index
      %c0_11 = arith.constant 0 : index
      %13 = vector.load %arg8[%c0_10, %c0_11] : memref<16x256xf32, #tpu.memory_space<vmem>>, vector<16x256xf32>
      tpu.vector_store %arg8[%c0_10, %c0_11], %12 {strides = array<i32>} : memref<16x256xf32, #tpu.memory_space<vmem>>, vector<16x256xf32>,
    } else {
    }
    %c0 = arith.constant 0 : index
    %c0_1 = arith.constant 0 : index
    %3 = vector.load %arg8[%c0, %c0_1] : memref<16x256xf32, #tpu.memory_space<vmem>>, vector<16x256xf32>
    %c0_2 = arith.constant 0 : index
    %c0_3 = arith.constant 0 : index
    %4 = vector.load %arg3[%c0_2, %c0_3] : memref<16x384xbf16, #tpu.memory_space<vmem>>, vector<16x384xbf16>
    %c0_4 = arith.constant 0 : index
    %c0_5 = arith.constant 0 : index
    %5 = vector.load %arg4[%c0_4, %c0_5] : memref<384x256xbf16, #tpu.memory_space<vmem>>, vector<384x256xbf16>
    %cst = arith.constant dense<0.000000e+00> : vector<16x256xf32>
    %6 = tpu.matmul %4, %5, %cst {dimension_numbers = #tpu.dot_dimension_numbers<[1], [0], [0], [1], [0, 0, 1, 1], [], []>} : vector<16x384xbf16>, vector<384x256xbf16>, vector<16x256xf32> -> vector<16x256xf32>
    %7 = arith.addf %3, %6 : vector<16x256xf32>
    %c0_6 = arith.constant 0 : index
    %c0_7 = arith.constant 0 : index
    %8 = vector.load %arg8[%c0_6, %c0_7] : memref<16x256xf32, #tpu.memory_space<vmem>>, vector<16x256xf32>
    tpu.vector_store %arg8[%c0_6, %c0_7], %7 {strides = array<i32>} : memref<16x256xf32, #tpu.memory_space<vmem>>, vector<16x256xf32>,
    %c2_i32 = arith.constant 2 : i32
    %9 = arith.cmpi eq, %arg2, %c2_i32 : i32
    %10 = arith.extui %9 : i1 to i32
    %c0_i32_8 = arith.constant 0 : i32
    %11 = arith.cmpi ne, %10, %c0_i32_8 : i32
    scf.if %11 {
      %c0_9 = arith.constant 0 : index
      %c0_10 = arith.constant 0 : index
      %12 = vector.load %arg8[%c0_9, %c0_10] : memref<16x256xf32, #tpu.memory_space<vmem>>, vector<16x256xf32>
      %c0_11 = arith.constant 0 : index
      %c0_12 = arith.constant 0 : index
      %13 = vector.load %arg5[%c0_11, %c0_12] : memref<1x256xf32, #tpu.memory_space<vmem>>, vector<1x256xf32>
      %14 = vector.broadcast %13 : vector<1x256xf32> to vector<16x256xf32>
      %15 = arith.mulf %12, %14 : vector<16x256xf32>
      %c0_13 = arith.constant 0 : index
      %c0_14 = arith.constant 0 : index
      %16 = vector.load %arg6[%c0_13, %c0_14] : memref<1x256xf32, #tpu.memory_space<vmem>>, vector<1x256xf32>
      %17 = vector.broadcast %16 : vector<1x256xf32> to vector<16x256xf32>
      %18 = arith.addf %15, %17 : vector<16x256xf32>
      %cst_15 = arith.constant 0.000000e+00 : f32
      %19 = vector.broadcast %cst_15 : f32 to vector<16x256xf32>
      %20 = arith.maximumf %18, %19 : vector<16x256xf32>
      %c0_16 = arith.constant 0 : index
      %c0_17 = arith.constant 0 : index
      %21 = vector.load %arg7[%c0_16, %c0_17] : memref<16x256xf32, #tpu.memory_space<vmem>>, vector<16x256xf32>
      tpu.vector_store %arg7[%c0_16, %c0_17], %20 {strides = array<i32>} : memref<16x256xf32, #tpu.memory_space<vmem>>, vector<16x256xf32>,
    } else {
    }
    return
  }
  func.func @transform_0(%arg0: i32, %arg1: i32, %arg2: i32) -> (i32, i32) {
    %c0_i32 = arith.constant 0 : i32
    return %arg0, %arg2 : i32, i32
  }
  func.func @transform_1(%arg0: i32, %arg1: i32, %arg2: i32) -> (i32, i32) {
    %c0_i32 = arith.constant 0 : i32
    return %arg2, %arg1 : i32, i32
  }
  func.func @transform_2(%arg0: i32, %arg1: i32, %arg2: i32) -> (i32, i32) {
    %c0_i32 = arith.constant 0 : i32
    %c0_i32_0 = arith.constant 0 : i32
    return %c0_i32, %arg1 : i32, i32
  }
  func.func @transform_3(%arg0: i32, %arg1: i32, %arg2: i32) -> (i32, i32) {
    %c0_i32 = arith.constant 0 : i32
    %c0_i32_0 = arith.constant 0 : i32
    return %c0_i32, %arg1 : i32, i32
  }
  func.func @transform_4(%arg0: i32, %arg1: i32, %arg2: i32) -> (i32, i32) {
    %c0_i32 = arith.constant 0 : i32
    return %arg0, %arg1 : i32, i32
  }
}

module attributes {stable_mosaic.version = 11 : i64} {
  func.func @_mm_bn_kernel(%arg0: i32, %arg1: i32, %arg2: i32, %arg3: memref<16x128xbf16, #tpu.memory_space<vmem>>, %arg4: memref<128x256xbf16, #tpu.memory_space<vmem>>, %arg5: memref<1x256xf32, #tpu.memory_space<vmem>>, %arg6: memref<1x256xf32, #tpu.memory_space<vmem>>, %arg7: memref<16x256xf32, #tpu.memory_space<vmem>>, %arg8: memref<16x256xf32, #tpu.memory_space<vmem>>) attributes {dimension_semantics = [#tpu.dimension_semantics<parallel>, #tpu.dimension_semantics<parallel>, #tpu.dimension_semantics<arbitrary>], iteration_bounds = array<i64: 1, 1, 1>, scalar_prefetch = 0 : i64, scratch_operands = 1 : i64, tpu.core_type = #tpu.core_type<tc>, window_params = [{transform_indices = @transform_0, window_bounds = array<i64: 16, 128>}, {transform_indices = @transform_1, window_bounds = array<i64: 128, 256>}, {transform_indices = @transform_2, window_bounds = array<i64: 1, 256>}, {transform_indices = @transform_3, window_bounds = array<i64: 1, 256>}, {transform_indices = @transform_4, window_bounds = array<i64: 16, 256>}]} {
    %c0_i32 = arith.constant 0 : i32
    %0 = arith.cmpi eq, %arg2, %c0_i32 : i32
    %1 = arith.extui %0 : i1 to i32
    %c0_i32_0 = arith.constant 0 : i32
    %2 = arith.cmpi ne, %1, %c0_i32_0 : i32
    scf.if %2 {
      %cst_10 = arith.constant 0.000000e+00 : f32
      %12 = vector.broadcast %cst_10 : f32 to vector<16x256xf32>
      %c0_11 = arith.constant 0 : index
      %c0_12 = arith.constant 0 : index
      %13 = vector.load %arg8[%c0_11, %c0_12] : memref<16x256xf32, #tpu.memory_space<vmem>>, vector<16x256xf32>
      tpu.vector_store %arg8[%c0_11, %c0_12], %12 {strides = array<i32>} : memref<16x256xf32, #tpu.memory_space<vmem>>, vector<16x256xf32>,
    } else {
    }
    %c0 = arith.constant 0 : index
    %c0_1 = arith.constant 0 : index
    %3 = vector.load %arg8[%c0, %c0_1] : memref<16x256xf32, #tpu.memory_space<vmem>>, vector<16x256xf32>
    %c0_2 = arith.constant 0 : index
    %c0_3 = arith.constant 0 : index
    %4 = vector.load %arg3[%c0_2, %c0_3] : memref<16x128xbf16, #tpu.memory_space<vmem>>, vector<16x128xbf16>
    %c0_4 = arith.constant 0 : index
    %c0_5 = arith.constant 0 : index
    %5 = vector.load %arg4[%c0_4, %c0_5] : memref<128x256xbf16, #tpu.memory_space<vmem>>, vector<128x256xbf16>
    %cst = arith.constant dense<0.000000e+00> : vector<16x256xf32>
    %6 = tpu.matmul %4, %5, %cst {dimension_numbers = #tpu.dot_dimension_numbers<[1], [0], [0], [1], [0, 0, 1, 1], [], []>} : vector<16x128xbf16>, vector<128x256xbf16>, vector<16x256xf32> -> vector<16x256xf32>
    %7 = arith.addf %3, %6 : vector<16x256xf32>
    %c0_6 = arith.constant 0 : index
    %c0_7 = arith.constant 0 : index
    %8 = vector.load %arg8[%c0_6, %c0_7] : memref<16x256xf32, #tpu.memory_space<vmem>>, vector<16x256xf32>
    tpu.vector_store %arg8[%c0_6, %c0_7], %7 {strides = array<i32>} : memref<16x256xf32, #tpu.memory_space<vmem>>, vector<16x256xf32>,
    %c0_i32_8 = arith.constant 0 : i32
    %9 = arith.cmpi eq, %arg2, %c0_i32_8 : i32
    %10 = arith.extui %9 : i1 to i32
    %c0_i32_9 = arith.constant 0 : i32
    %11 = arith.cmpi ne, %10, %c0_i32_9 : i32
    scf.if %11 {
      %c0_10 = arith.constant 0 : index
      %c0_11 = arith.constant 0 : index
      %12 = vector.load %arg8[%c0_10, %c0_11] : memref<16x256xf32, #tpu.memory_space<vmem>>, vector<16x256xf32>
      %c0_12 = arith.constant 0 : index
      %c0_13 = arith.constant 0 : index
      %13 = vector.load %arg5[%c0_12, %c0_13] : memref<1x256xf32, #tpu.memory_space<vmem>>, vector<1x256xf32>
      %14 = vector.broadcast %13 : vector<1x256xf32> to vector<16x256xf32>
      %15 = arith.mulf %12, %14 : vector<16x256xf32>
      %c0_14 = arith.constant 0 : index
      %c0_15 = arith.constant 0 : index
      %16 = vector.load %arg6[%c0_14, %c0_15] : memref<1x256xf32, #tpu.memory_space<vmem>>, vector<1x256xf32>
      %17 = vector.broadcast %16 : vector<1x256xf32> to vector<16x256xf32>
      %18 = arith.addf %15, %17 : vector<16x256xf32>
      %c0_16 = arith.constant 0 : index
      %c0_17 = arith.constant 0 : index
      %19 = vector.load %arg7[%c0_16, %c0_17] : memref<16x256xf32, #tpu.memory_space<vmem>>, vector<16x256xf32>
      tpu.vector_store %arg7[%c0_16, %c0_17], %18 {strides = array<i32>} : memref<16x256xf32, #tpu.memory_space<vmem>>, vector<16x256xf32>,
    } else {
    }
    return
  }
  func.func @transform_0(%arg0: i32, %arg1: i32, %arg2: i32) -> (i32, i32) {
    %c0_i32 = arith.constant 0 : i32
    return %arg0, %arg2 : i32, i32
  }
  func.func @transform_1(%arg0: i32, %arg1: i32, %arg2: i32) -> (i32, i32) {
    %c0_i32 = arith.constant 0 : i32
    return %arg2, %arg1 : i32, i32
  }
  func.func @transform_2(%arg0: i32, %arg1: i32, %arg2: i32) -> (i32, i32) {
    %c0_i32 = arith.constant 0 : i32
    %c0_i32_0 = arith.constant 0 : i32
    return %c0_i32, %arg1 : i32, i32
  }
  func.func @transform_3(%arg0: i32, %arg1: i32, %arg2: i32) -> (i32, i32) {
    %c0_i32 = arith.constant 0 : i32
    %c0_i32_0 = arith.constant 0 : i32
    return %c0_i32, %arg1 : i32, i32
  }
  func.func @transform_4(%arg0: i32, %arg1: i32, %arg2: i32) -> (i32, i32) {
    %c0_i32 = arith.constant 0 : i32
    return %arg0, %arg1 : i32, i32
  }
}

module attributes {stable_mosaic.version = 11 : i64} {
  func.func @_mm_bn_kernel(%arg0: i32, %arg1: i32, %arg2: i32, %arg3: memref<16x512xbf16, #tpu.memory_space<vmem>>, %arg4: memref<512x256xbf16, #tpu.memory_space<vmem>>, %arg5: memref<1x256xf32, #tpu.memory_space<vmem>>, %arg6: memref<1x256xf32, #tpu.memory_space<vmem>>, %arg7: memref<16x256xf32, #tpu.memory_space<vmem>>, %arg8: memref<16x256xf32, #tpu.memory_space<vmem>>) attributes {dimension_semantics = [#tpu.dimension_semantics<parallel>, #tpu.dimension_semantics<parallel>, #tpu.dimension_semantics<arbitrary>], iteration_bounds = array<i64: 1, 1, 5>, scalar_prefetch = 0 : i64, scratch_operands = 1 : i64, tpu.core_type = #tpu.core_type<tc>, window_params = [{transform_indices = @transform_0, window_bounds = array<i64: 16, 512>}, {transform_indices = @transform_1, window_bounds = array<i64: 512, 256>}, {transform_indices = @transform_2, window_bounds = array<i64: 1, 256>}, {transform_indices = @transform_3, window_bounds = array<i64: 1, 256>}, {transform_indices = @transform_4, window_bounds = array<i64: 16, 256>}]} {
    %c0_i32 = arith.constant 0 : i32
    %0 = arith.cmpi eq, %arg2, %c0_i32 : i32
    %1 = arith.extui %0 : i1 to i32
    %c0_i32_0 = arith.constant 0 : i32
    %2 = arith.cmpi ne, %1, %c0_i32_0 : i32
    scf.if %2 {
      %cst_9 = arith.constant 0.000000e+00 : f32
      %12 = vector.broadcast %cst_9 : f32 to vector<16x256xf32>
      %c0_10 = arith.constant 0 : index
      %c0_11 = arith.constant 0 : index
      %13 = vector.load %arg8[%c0_10, %c0_11] : memref<16x256xf32, #tpu.memory_space<vmem>>, vector<16x256xf32>
      tpu.vector_store %arg8[%c0_10, %c0_11], %12 {strides = array<i32>} : memref<16x256xf32, #tpu.memory_space<vmem>>, vector<16x256xf32>,
    } else {
    }
    %c0 = arith.constant 0 : index
    %c0_1 = arith.constant 0 : index
    %3 = vector.load %arg8[%c0, %c0_1] : memref<16x256xf32, #tpu.memory_space<vmem>>, vector<16x256xf32>
    %c0_2 = arith.constant 0 : index
    %c0_3 = arith.constant 0 : index
    %4 = vector.load %arg3[%c0_2, %c0_3] : memref<16x512xbf16, #tpu.memory_space<vmem>>, vector<16x512xbf16>
    %c0_4 = arith.constant 0 : index
    %c0_5 = arith.constant 0 : index
    %5 = vector.load %arg4[%c0_4, %c0_5] : memref<512x256xbf16, #tpu.memory_space<vmem>>, vector<512x256xbf16>
    %cst = arith.constant dense<0.000000e+00> : vector<16x256xf32>
    %6 = tpu.matmul %4, %5, %cst {dimension_numbers = #tpu.dot_dimension_numbers<[1], [0], [0], [1], [0, 0, 1, 1], [], []>} : vector<16x512xbf16>, vector<512x256xbf16>, vector<16x256xf32> -> vector<16x256xf32>
    %7 = arith.addf %3, %6 : vector<16x256xf32>
    %c0_6 = arith.constant 0 : index
    %c0_7 = arith.constant 0 : index
    %8 = vector.load %arg8[%c0_6, %c0_7] : memref<16x256xf32, #tpu.memory_space<vmem>>, vector<16x256xf32>
    tpu.vector_store %arg8[%c0_6, %c0_7], %7 {strides = array<i32>} : memref<16x256xf32, #tpu.memory_space<vmem>>, vector<16x256xf32>,
    %c4_i32 = arith.constant 4 : i32
    %9 = arith.cmpi eq, %arg2, %c4_i32 : i32
    %10 = arith.extui %9 : i1 to i32
    %c0_i32_8 = arith.constant 0 : i32
    %11 = arith.cmpi ne, %10, %c0_i32_8 : i32
    scf.if %11 {
      %c0_9 = arith.constant 0 : index
      %c0_10 = arith.constant 0 : index
      %12 = vector.load %arg8[%c0_9, %c0_10] : memref<16x256xf32, #tpu.memory_space<vmem>>, vector<16x256xf32>
      %c0_11 = arith.constant 0 : index
      %c0_12 = arith.constant 0 : index
      %13 = vector.load %arg5[%c0_11, %c0_12] : memref<1x256xf32, #tpu.memory_space<vmem>>, vector<1x256xf32>
      %14 = vector.broadcast %13 : vector<1x256xf32> to vector<16x256xf32>
      %15 = arith.mulf %12, %14 : vector<16x256xf32>
      %c0_13 = arith.constant 0 : index
      %c0_14 = arith.constant 0 : index
      %16 = vector.load %arg6[%c0_13, %c0_14] : memref<1x256xf32, #tpu.memory_space<vmem>>, vector<1x256xf32>
      %17 = vector.broadcast %16 : vector<1x256xf32> to vector<16x256xf32>
      %18 = arith.addf %15, %17 : vector<16x256xf32>
      %cst_15 = arith.constant 0.000000e+00 : f32
      %19 = vector.broadcast %cst_15 : f32 to vector<16x256xf32>
      %20 = arith.maximumf %18, %19 : vector<16x256xf32>
      %c0_16 = arith.constant 0 : index
      %c0_17 = arith.constant 0 : index
      %21 = vector.load %arg7[%c0_16, %c0_17] : memref<16x256xf32, #tpu.memory_space<vmem>>, vector<16x256xf32>
      tpu.vector_store %arg7[%c0_16, %c0_17], %20 {strides = array<i32>} : memref<16x256xf32, #tpu.memory_space<vmem>>, vector<16x256xf32>,
    } else {
    }
    return
  }
  func.func @transform_0(%arg0: i32, %arg1: i32, %arg2: i32) -> (i32, i32) {
    %c0_i32 = arith.constant 0 : i32
    return %arg0, %arg2 : i32, i32
  }
  func.func @transform_1(%arg0: i32, %arg1: i32, %arg2: i32) -> (i32, i32) {
    %c0_i32 = arith.constant 0 : i32
    return %arg2, %arg1 : i32, i32
  }
  func.func @transform_2(%arg0: i32, %arg1: i32, %arg2: i32) -> (i32, i32) {
    %c0_i32 = arith.constant 0 : i32
    %c0_i32_0 = arith.constant 0 : i32
    return %c0_i32, %arg1 : i32, i32
  }
  func.func @transform_3(%arg0: i32, %arg1: i32, %arg2: i32) -> (i32, i32) {
    %c0_i32 = arith.constant 0 : i32
    %c0_i32_0 = arith.constant 0 : i32
    return %c0_i32, %arg1 : i32, i32
  }
  func.func @transform_4(%arg0: i32, %arg1: i32, %arg2: i32) -> (i32, i32) {
    %c0_i32 = arith.constant 0 : i32
    return %arg0, %arg1 : i32, i32
  }
}

module attributes {stable_mosaic.version = 11 : i64} {
  func.func @_mm_bn_res_kernel(%arg0: i32, %arg1: i32, %arg2: i32, %arg3: memref<16x512xbf16, #tpu.memory_space<vmem>>, %arg4: memref<512x256xbf16, #tpu.memory_space<vmem>>, %arg5: memref<1x256xf32, #tpu.memory_space<vmem>>, %arg6: memref<1x256xf32, #tpu.memory_space<vmem>>, %arg7: memref<16x256xf32, #tpu.memory_space<vmem>>, %arg8: memref<16x256xf32, #tpu.memory_space<vmem>>, %arg9: memref<16x256xf32, #tpu.memory_space<vmem>>) attributes {dimension_semantics = [#tpu.dimension_semantics<parallel>, #tpu.dimension_semantics<parallel>, #tpu.dimension_semantics<arbitrary>], iteration_bounds = array<i64: 1, 1, 5>, scalar_prefetch = 0 : i64, scratch_operands = 1 : i64, tpu.core_type = #tpu.core_type<tc>, window_params = [{transform_indices = @transform_0, window_bounds = array<i64: 16, 512>}, {transform_indices = @transform_1, window_bounds = array<i64: 512, 256>}, {transform_indices = @transform_2, window_bounds = array<i64: 1, 256>}, {transform_indices = @transform_3, window_bounds = array<i64: 1, 256>}, {transform_indices = @transform_4, window_bounds = array<i64: 16, 256>}, {transform_indices = @transform_5, window_bounds = array<i64: 16, 256>}]} {
    %c0_i32 = arith.constant 0 : i32
    %0 = arith.cmpi eq, %arg2, %c0_i32 : i32
    %1 = arith.extui %0 : i1 to i32
    %c0_i32_0 = arith.constant 0 : i32
    %2 = arith.cmpi ne, %1, %c0_i32_0 : i32
    scf.if %2 {
      %cst_9 = arith.constant 0.000000e+00 : f32
      %12 = vector.broadcast %cst_9 : f32 to vector<16x256xf32>
      %c0_10 = arith.constant 0 : index
      %c0_11 = arith.constant 0 : index
      %13 = vector.load %arg9[%c0_10, %c0_11] : memref<16x256xf32, #tpu.memory_space<vmem>>, vector<16x256xf32>
      tpu.vector_store %arg9[%c0_10, %c0_11], %12 {strides = array<i32>} : memref<16x256xf32, #tpu.memory_space<vmem>>, vector<16x256xf32>,
    } else {
    }
    %c0 = arith.constant 0 : index
    %c0_1 = arith.constant 0 : index
    %3 = vector.load %arg9[%c0, %c0_1] : memref<16x256xf32, #tpu.memory_space<vmem>>, vector<16x256xf32>
    %c0_2 = arith.constant 0 : index
    %c0_3 = arith.constant 0 : index
    %4 = vector.load %arg3[%c0_2, %c0_3] : memref<16x512xbf16, #tpu.memory_space<vmem>>, vector<16x512xbf16>
    %c0_4 = arith.constant 0 : index
    %c0_5 = arith.constant 0 : index
    %5 = vector.load %arg4[%c0_4, %c0_5] : memref<512x256xbf16, #tpu.memory_space<vmem>>, vector<512x256xbf16>
    %cst = arith.constant dense<0.000000e+00> : vector<16x256xf32>
    %6 = tpu.matmul %4, %5, %cst {dimension_numbers = #tpu.dot_dimension_numbers<[1], [0], [0], [1], [0, 0, 1, 1], [], []>} : vector<16x512xbf16>, vector<512x256xbf16>, vector<16x256xf32> -> vector<16x256xf32>
    %7 = arith.addf %3, %6 : vector<16x256xf32>
    %c0_6 = arith.constant 0 : index
    %c0_7 = arith.constant 0 : index
    %8 = vector.load %arg9[%c0_6, %c0_7] : memref<16x256xf32, #tpu.memory_space<vmem>>, vector<16x256xf32>
    tpu.vector_store %arg9[%c0_6, %c0_7], %7 {strides = array<i32>} : memref<16x256xf32, #tpu.memory_space<vmem>>, vector<16x256xf32>,
    %c4_i32 = arith.constant 4 : i32
    %9 = arith.cmpi eq, %arg2, %c4_i32 : i32
    %10 = arith.extui %9 : i1 to i32
    %c0_i32_8 = arith.constant 0 : i32
    %11 = arith.cmpi ne, %10, %c0_i32_8 : i32
    scf.if %11 {
      %c0_9 = arith.constant 0 : index
      %c0_10 = arith.constant 0 : index
      %12 = vector.load %arg9[%c0_9, %c0_10] : memref<16x256xf32, #tpu.memory_space<vmem>>, vector<16x256xf32>
      %c0_11 = arith.constant 0 : index
      %c0_12 = arith.constant 0 : index
      %13 = vector.load %arg5[%c0_11, %c0_12] : memref<1x256xf32, #tpu.memory_space<vmem>>, vector<1x256xf32>
      %14 = vector.broadcast %13 : vector<1x256xf32> to vector<16x256xf32>
      %15 = arith.mulf %12, %14 : vector<16x256xf32>
      %c0_13 = arith.constant 0 : index
      %c0_14 = arith.constant 0 : index
      %16 = vector.load %arg6[%c0_13, %c0_14] : memref<1x256xf32, #tpu.memory_space<vmem>>, vector<1x256xf32>
      %17 = vector.broadcast %16 : vector<1x256xf32> to vector<16x256xf32>
      %18 = arith.addf %15, %17 : vector<16x256xf32>
      %c0_15 = arith.constant 0 : index
      %c0_16 = arith.constant 0 : index
      %19 = vector.load %arg7[%c0_15, %c0_16] : memref<16x256xf32, #tpu.memory_space<vmem>>, vector<16x256xf32>
      %20 = arith.addf %18, %19 : vector<16x256xf32>
      %cst_17 = arith.constant 0.000000e+00 : f32
      %21 = vector.broadcast %cst_17 : f32 to vector<16x256xf32>
      %22 = arith.maximumf %20, %21 : vector<16x256xf32>
      %c0_18 = arith.constant 0 : index
      %c0_19 = arith.constant 0 : index
      %23 = vector.load %arg8[%c0_18, %c0_19] : memref<16x256xf32, #tpu.memory_space<vmem>>, vector<16x256xf32>
      tpu.vector_store %arg8[%c0_18, %c0_19], %22 {strides = array<i32>} : memref<16x256xf32, #tpu.memory_space<vmem>>, vector<16x256xf32>,
    } else {
    }
    return
  }
  func.func @transform_0(%arg0: i32, %arg1: i32, %arg2: i32) -> (i32, i32) {
    %c0_i32 = arith.constant 0 : i32
    return %arg0, %arg2 : i32, i32
  }
  func.func @transform_1(%arg0: i32, %arg1: i32, %arg2: i32) -> (i32, i32) {
    %c0_i32 = arith.constant 0 : i32
    return %arg2, %arg1 : i32, i32
  }
  func.func @transform_2(%arg0: i32, %arg1: i32, %arg2: i32) -> (i32, i32) {
    %c0_i32 = arith.constant 0 : i32
    %c0_i32_0 = arith.constant 0 : i32
    return %c0_i32, %arg1 : i32, i32
  }
  func.func @transform_3(%arg0: i32, %arg1: i32, %arg2: i32) -> (i32, i32) {
    %c0_i32 = arith.constant 0 : i32
    %c0_i32_0 = arith.constant 0 : i32
    return %c0_i32, %arg1 : i32, i32
  }
  func.func @transform_4(%arg0: i32, %arg1: i32, %arg2: i32) -> (i32, i32) {
    %c0_i32 = arith.constant 0 : i32
    return %arg0, %arg1 : i32, i32
  }
  func.func @transform_5(%arg0: i32, %arg1: i32, %arg2: i32) -> (i32, i32) {
    %c0_i32 = arith.constant 0 : i32
    return %arg0, %arg1 : i32, i32
  }
}

module attributes {stable_mosaic.version = 11 : i64} {
  func.func @_mm_bn_kernel(%arg0: i32, %arg1: i32, %arg2: i32, %arg3: memref<16x512xbf16, #tpu.memory_space<vmem>>, %arg4: memref<512x256xbf16, #tpu.memory_space<vmem>>, %arg5: memref<1x256xf32, #tpu.memory_space<vmem>>, %arg6: memref<1x256xf32, #tpu.memory_space<vmem>>, %arg7: memref<16x256xf32, #tpu.memory_space<vmem>>, %arg8: memref<16x256xf32, #tpu.memory_space<vmem>>) attributes {dimension_semantics = [#tpu.dimension_semantics<parallel>, #tpu.dimension_semantics<parallel>, #tpu.dimension_semantics<arbitrary>], iteration_bounds = array<i64: 1, 2, 5>, scalar_prefetch = 0 : i64, scratch_operands = 1 : i64, tpu.core_type = #tpu.core_type<tc>, window_params = [{transform_indices = @transform_0, window_bounds = array<i64: 16, 512>}, {transform_indices = @transform_1, window_bounds = array<i64: 512, 256>}, {transform_indices = @transform_2, window_bounds = array<i64: 1, 256>}, {transform_indices = @transform_3, window_bounds = array<i64: 1, 256>}, {transform_indices = @transform_4, window_bounds = array<i64: 16, 256>}]} {
    %c0_i32 = arith.constant 0 : i32
    %0 = arith.cmpi eq, %arg2, %c0_i32 : i32
    %1 = arith.extui %0 : i1 to i32
    %c0_i32_0 = arith.constant 0 : i32
    %2 = arith.cmpi ne, %1, %c0_i32_0 : i32
    scf.if %2 {
      %cst_9 = arith.constant 0.000000e+00 : f32
      %12 = vector.broadcast %cst_9 : f32 to vector<16x256xf32>
      %c0_10 = arith.constant 0 : index
      %c0_11 = arith.constant 0 : index
      %13 = vector.load %arg8[%c0_10, %c0_11] : memref<16x256xf32, #tpu.memory_space<vmem>>, vector<16x256xf32>
      tpu.vector_store %arg8[%c0_10, %c0_11], %12 {strides = array<i32>} : memref<16x256xf32, #tpu.memory_space<vmem>>, vector<16x256xf32>,
    } else {
    }
    %c0 = arith.constant 0 : index
    %c0_1 = arith.constant 0 : index
    %3 = vector.load %arg8[%c0, %c0_1] : memref<16x256xf32, #tpu.memory_space<vmem>>, vector<16x256xf32>
    %c0_2 = arith.constant 0 : index
    %c0_3 = arith.constant 0 : index
    %4 = vector.load %arg3[%c0_2, %c0_3] : memref<16x512xbf16, #tpu.memory_space<vmem>>, vector<16x512xbf16>
    %c0_4 = arith.constant 0 : index
    %c0_5 = arith.constant 0 : index
    %5 = vector.load %arg4[%c0_4, %c0_5] : memref<512x256xbf16, #tpu.memory_space<vmem>>, vector<512x256xbf16>
    %cst = arith.constant dense<0.000000e+00> : vector<16x256xf32>
    %6 = tpu.matmul %4, %5, %cst {dimension_numbers = #tpu.dot_dimension_numbers<[1], [0], [0], [1], [0, 0, 1, 1], [], []>} : vector<16x512xbf16>, vector<512x256xbf16>, vector<16x256xf32> -> vector<16x256xf32>
    %7 = arith.addf %3, %6 : vector<16x256xf32>
    %c0_6 = arith.constant 0 : index
    %c0_7 = arith.constant 0 : index
    %8 = vector.load %arg8[%c0_6, %c0_7] : memref<16x256xf32, #tpu.memory_space<vmem>>, vector<16x256xf32>
    tpu.vector_store %arg8[%c0_6, %c0_7], %7 {strides = array<i32>} : memref<16x256xf32, #tpu.memory_space<vmem>>, vector<16x256xf32>,
    %c4_i32 = arith.constant 4 : i32
    %9 = arith.cmpi eq, %arg2, %c4_i32 : i32
    %10 = arith.extui %9 : i1 to i32
    %c0_i32_8 = arith.constant 0 : i32
    %11 = arith.cmpi ne, %10, %c0_i32_8 : i32
    scf.if %11 {
      %c0_9 = arith.constant 0 : index
      %c0_10 = arith.constant 0 : index
      %12 = vector.load %arg8[%c0_9, %c0_10] : memref<16x256xf32, #tpu.memory_space<vmem>>, vector<16x256xf32>
      %c0_11 = arith.constant 0 : index
      %c0_12 = arith.constant 0 : index
      %13 = vector.load %arg5[%c0_11, %c0_12] : memref<1x256xf32, #tpu.memory_space<vmem>>, vector<1x256xf32>
      %14 = vector.broadcast %13 : vector<1x256xf32> to vector<16x256xf32>
      %15 = arith.mulf %12, %14 : vector<16x256xf32>
      %c0_13 = arith.constant 0 : index
      %c0_14 = arith.constant 0 : index
      %16 = vector.load %arg6[%c0_13, %c0_14] : memref<1x256xf32, #tpu.memory_space<vmem>>, vector<1x256xf32>
      %17 = vector.broadcast %16 : vector<1x256xf32> to vector<16x256xf32>
      %18 = arith.addf %15, %17 : vector<16x256xf32>
      %cst_15 = arith.constant 0.000000e+00 : f32
      %19 = vector.broadcast %cst_15 : f32 to vector<16x256xf32>
      %20 = arith.maximumf %18, %19 : vector<16x256xf32>
      %c0_16 = arith.constant 0 : index
      %c0_17 = arith.constant 0 : index
      %21 = vector.load %arg7[%c0_16, %c0_17] : memref<16x256xf32, #tpu.memory_space<vmem>>, vector<16x256xf32>
      tpu.vector_store %arg7[%c0_16, %c0_17], %20 {strides = array<i32>} : memref<16x256xf32, #tpu.memory_space<vmem>>, vector<16x256xf32>,
    } else {
    }
    return
  }
  func.func @transform_0(%arg0: i32, %arg1: i32, %arg2: i32) -> (i32, i32) {
    %c0_i32 = arith.constant 0 : i32
    return %arg0, %arg2 : i32, i32
  }
  func.func @transform_1(%arg0: i32, %arg1: i32, %arg2: i32) -> (i32, i32) {
    %c0_i32 = arith.constant 0 : i32
    return %arg2, %arg1 : i32, i32
  }
  func.func @transform_2(%arg0: i32, %arg1: i32, %arg2: i32) -> (i32, i32) {
    %c0_i32 = arith.constant 0 : i32
    %c0_i32_0 = arith.constant 0 : i32
    return %c0_i32, %arg1 : i32, i32
  }
  func.func @transform_3(%arg0: i32, %arg1: i32, %arg2: i32) -> (i32, i32) {
    %c0_i32 = arith.constant 0 : i32
    %c0_i32_0 = arith.constant 0 : i32
    return %c0_i32, %arg1 : i32, i32
  }
  func.func @transform_4(%arg0: i32, %arg1: i32, %arg2: i32) -> (i32, i32) {
    %c0_i32 = arith.constant 0 : i32
    return %arg0, %arg1 : i32, i32
  }
}

module attributes {stable_mosaic.version = 11 : i64} {
  func.func @_mm_bn_kernel(%arg0: i32, %arg1: i32, %arg2: i32, %arg3: memref<16x256xbf16, #tpu.memory_space<vmem>>, %arg4: memref<256x256xbf16, #tpu.memory_space<vmem>>, %arg5: memref<1x256xf32, #tpu.memory_space<vmem>>, %arg6: memref<1x256xf32, #tpu.memory_space<vmem>>, %arg7: memref<16x256xf32, #tpu.memory_space<vmem>>, %arg8: memref<16x256xf32, #tpu.memory_space<vmem>>) attributes {dimension_semantics = [#tpu.dimension_semantics<parallel>, #tpu.dimension_semantics<parallel>, #tpu.dimension_semantics<arbitrary>], iteration_bounds = array<i64: 1, 2, 1>, scalar_prefetch = 0 : i64, scratch_operands = 1 : i64, tpu.core_type = #tpu.core_type<tc>, window_params = [{transform_indices = @transform_0, window_bounds = array<i64: 16, 256>}, {transform_indices = @transform_1, window_bounds = array<i64: 256, 256>}, {transform_indices = @transform_2, window_bounds = array<i64: 1, 256>}, {transform_indices = @transform_3, window_bounds = array<i64: 1, 256>}, {transform_indices = @transform_4, window_bounds = array<i64: 16, 256>}]} {
    %c0_i32 = arith.constant 0 : i32
    %0 = arith.cmpi eq, %arg2, %c0_i32 : i32
    %1 = arith.extui %0 : i1 to i32
    %c0_i32_0 = arith.constant 0 : i32
    %2 = arith.cmpi ne, %1, %c0_i32_0 : i32
    scf.if %2 {
      %cst_10 = arith.constant 0.000000e+00 : f32
      %12 = vector.broadcast %cst_10 : f32 to vector<16x256xf32>
      %c0_11 = arith.constant 0 : index
      %c0_12 = arith.constant 0 : index
      %13 = vector.load %arg8[%c0_11, %c0_12] : memref<16x256xf32, #tpu.memory_space<vmem>>, vector<16x256xf32>
      tpu.vector_store %arg8[%c0_11, %c0_12], %12 {strides = array<i32>} : memref<16x256xf32, #tpu.memory_space<vmem>>, vector<16x256xf32>,
    } else {
    }
    %c0 = arith.constant 0 : index
    %c0_1 = arith.constant 0 : index
    %3 = vector.load %arg8[%c0, %c0_1] : memref<16x256xf32, #tpu.memory_space<vmem>>, vector<16x256xf32>
    %c0_2 = arith.constant 0 : index
    %c0_3 = arith.constant 0 : index
    %4 = vector.load %arg3[%c0_2, %c0_3] : memref<16x256xbf16, #tpu.memory_space<vmem>>, vector<16x256xbf16>
    %c0_4 = arith.constant 0 : index
    %c0_5 = arith.constant 0 : index
    %5 = vector.load %arg4[%c0_4, %c0_5] : memref<256x256xbf16, #tpu.memory_space<vmem>>, vector<256x256xbf16>
    %cst = arith.constant dense<0.000000e+00> : vector<16x256xf32>
    %6 = tpu.matmul %4, %5, %cst {dimension_numbers = #tpu.dot_dimension_numbers<[1], [0], [0], [1], [0, 0, 1, 1], [], []>} : vector<16x256xbf16>, vector<256x256xbf16>, vector<16x256xf32> -> vector<16x256xf32>
    %7 = arith.addf %3, %6 : vector<16x256xf32>
    %c0_6 = arith.constant 0 : index
    %c0_7 = arith.constant 0 : index
    %8 = vector.load %arg8[%c0_6, %c0_7] : memref<16x256xf32, #tpu.memory_space<vmem>>, vector<16x256xf32>
    tpu.vector_store %arg8[%c0_6, %c0_7], %7 {strides = array<i32>} : memref<16x256xf32, #tpu.memory_space<vmem>>, vector<16x256xf32>,
    %c0_i32_8 = arith.constant 0 : i32
    %9 = arith.cmpi eq, %arg2, %c0_i32_8 : i32
    %10 = arith.extui %9 : i1 to i32
    %c0_i32_9 = arith.constant 0 : i32
    %11 = arith.cmpi ne, %10, %c0_i32_9 : i32
    scf.if %11 {
      %c0_10 = arith.constant 0 : index
      %c0_11 = arith.constant 0 : index
      %12 = vector.load %arg8[%c0_10, %c0_11] : memref<16x256xf32, #tpu.memory_space<vmem>>, vector<16x256xf32>
      %c0_12 = arith.constant 0 : index
      %c0_13 = arith.constant 0 : index
      %13 = vector.load %arg5[%c0_12, %c0_13] : memref<1x256xf32, #tpu.memory_space<vmem>>, vector<1x256xf32>
      %14 = vector.broadcast %13 : vector<1x256xf32> to vector<16x256xf32>
      %15 = arith.mulf %12, %14 : vector<16x256xf32>
      %c0_14 = arith.constant 0 : index
      %c0_15 = arith.constant 0 : index
      %16 = vector.load %arg6[%c0_14, %c0_15] : memref<1x256xf32, #tpu.memory_space<vmem>>, vector<1x256xf32>
      %17 = vector.broadcast %16 : vector<1x256xf32> to vector<16x256xf32>
      %18 = arith.addf %15, %17 : vector<16x256xf32>
      %c0_16 = arith.constant 0 : index
      %c0_17 = arith.constant 0 : index
      %19 = vector.load %arg7[%c0_16, %c0_17] : memref<16x256xf32, #tpu.memory_space<vmem>>, vector<16x256xf32>
      tpu.vector_store %arg7[%c0_16, %c0_17], %18 {strides = array<i32>} : memref<16x256xf32, #tpu.memory_space<vmem>>, vector<16x256xf32>,
    } else {
    }
    return
  }
  func.func @transform_0(%arg0: i32, %arg1: i32, %arg2: i32) -> (i32, i32) {
    %c0_i32 = arith.constant 0 : i32
    return %arg0, %arg2 : i32, i32
  }
  func.func @transform_1(%arg0: i32, %arg1: i32, %arg2: i32) -> (i32, i32) {
    %c0_i32 = arith.constant 0 : i32
    return %arg2, %arg1 : i32, i32
  }
  func.func @transform_2(%arg0: i32, %arg1: i32, %arg2: i32) -> (i32, i32) {
    %c0_i32 = arith.constant 0 : i32
    %c0_i32_0 = arith.constant 0 : i32
    return %c0_i32, %arg1 : i32, i32
  }
  func.func @transform_3(%arg0: i32, %arg1: i32, %arg2: i32) -> (i32, i32) {
    %c0_i32 = arith.constant 0 : i32
    %c0_i32_0 = arith.constant 0 : i32
    return %c0_i32, %arg1 : i32, i32
  }
  func.func @transform_4(%arg0: i32, %arg1: i32, %arg2: i32) -> (i32, i32) {
    %c0_i32 = arith.constant 0 : i32
    return %arg0, %arg1 : i32, i32
  }
}

module attributes {stable_mosaic.version = 11 : i64} {
  func.func @_mm_bn_res_kernel(%arg0: i32, %arg1: i32, %arg2: i32, %arg3: memref<16x512xbf16, #tpu.memory_space<vmem>>, %arg4: memref<512x256xbf16, #tpu.memory_space<vmem>>, %arg5: memref<1x256xf32, #tpu.memory_space<vmem>>, %arg6: memref<1x256xf32, #tpu.memory_space<vmem>>, %arg7: memref<16x256xf32, #tpu.memory_space<vmem>>, %arg8: memref<16x256xf32, #tpu.memory_space<vmem>>, %arg9: memref<16x256xf32, #tpu.memory_space<vmem>>) attributes {dimension_semantics = [#tpu.dimension_semantics<parallel>, #tpu.dimension_semantics<parallel>, #tpu.dimension_semantics<arbitrary>], iteration_bounds = array<i64: 1, 2, 9>, scalar_prefetch = 0 : i64, scratch_operands = 1 : i64, tpu.core_type = #tpu.core_type<tc>, window_params = [{transform_indices = @transform_0, window_bounds = array<i64: 16, 512>}, {transform_indices = @transform_1, window_bounds = array<i64: 512, 256>}, {transform_indices = @transform_2, window_bounds = array<i64: 1, 256>}, {transform_indices = @transform_3, window_bounds = array<i64: 1, 256>}, {transform_indices = @transform_4, window_bounds = array<i64: 16, 256>}, {transform_indices = @transform_5, window_bounds = array<i64: 16, 256>}]} {
    %c0_i32 = arith.constant 0 : i32
    %0 = arith.cmpi eq, %arg2, %c0_i32 : i32
    %1 = arith.extui %0 : i1 to i32
    %c0_i32_0 = arith.constant 0 : i32
    %2 = arith.cmpi ne, %1, %c0_i32_0 : i32
    scf.if %2 {
      %cst_9 = arith.constant 0.000000e+00 : f32
      %12 = vector.broadcast %cst_9 : f32 to vector<16x256xf32>
      %c0_10 = arith.constant 0 : index
      %c0_11 = arith.constant 0 : index
      %13 = vector.load %arg9[%c0_10, %c0_11] : memref<16x256xf32, #tpu.memory_space<vmem>>, vector<16x256xf32>
      tpu.vector_store %arg9[%c0_10, %c0_11], %12 {strides = array<i32>} : memref<16x256xf32, #tpu.memory_space<vmem>>, vector<16x256xf32>,
    } else {
    }
    %c0 = arith.constant 0 : index
    %c0_1 = arith.constant 0 : index
    %3 = vector.load %arg9[%c0, %c0_1] : memref<16x256xf32, #tpu.memory_space<vmem>>, vector<16x256xf32>
    %c0_2 = arith.constant 0 : index
    %c0_3 = arith.constant 0 : index
    %4 = vector.load %arg3[%c0_2, %c0_3] : memref<16x512xbf16, #tpu.memory_space<vmem>>, vector<16x512xbf16>
    %c0_4 = arith.constant 0 : index
    %c0_5 = arith.constant 0 : index
    %5 = vector.load %arg4[%c0_4, %c0_5] : memref<512x256xbf16, #tpu.memory_space<vmem>>, vector<512x256xbf16>
    %cst = arith.constant dense<0.000000e+00> : vector<16x256xf32>
    %6 = tpu.matmul %4, %5, %cst {dimension_numbers = #tpu.dot_dimension_numbers<[1], [0], [0], [1], [0, 0, 1, 1], [], []>} : vector<16x512xbf16>, vector<512x256xbf16>, vector<16x256xf32> -> vector<16x256xf32>
    %7 = arith.addf %3, %6 : vector<16x256xf32>
    %c0_6 = arith.constant 0 : index
    %c0_7 = arith.constant 0 : index
    %8 = vector.load %arg9[%c0_6, %c0_7] : memref<16x256xf32, #tpu.memory_space<vmem>>, vector<16x256xf32>
    tpu.vector_store %arg9[%c0_6, %c0_7], %7 {strides = array<i32>} : memref<16x256xf32, #tpu.memory_space<vmem>>, vector<16x256xf32>,
    %c8_i32 = arith.constant 8 : i32
    %9 = arith.cmpi eq, %arg2, %c8_i32 : i32
    %10 = arith.extui %9 : i1 to i32
    %c0_i32_8 = arith.constant 0 : i32
    %11 = arith.cmpi ne, %10, %c0_i32_8 : i32
    scf.if %11 {
      %c0_9 = arith.constant 0 : index
      %c0_10 = arith.constant 0 : index
      %12 = vector.load %arg9[%c0_9, %c0_10] : memref<16x256xf32, #tpu.memory_space<vmem>>, vector<16x256xf32>
      %c0_11 = arith.constant 0 : index
      %c0_12 = arith.constant 0 : index
      %13 = vector.load %arg5[%c0_11, %c0_12] : memref<1x256xf32, #tpu.memory_space<vmem>>, vector<1x256xf32>
      %14 = vector.broadcast %13 : vector<1x256xf32> to vector<16x256xf32>
      %15 = arith.mulf %12, %14 : vector<16x256xf32>
      %c0_13 = arith.constant 0 : index
      %c0_14 = arith.constant 0 : index
      %16 = vector.load %arg6[%c0_13, %c0_14] : memref<1x256xf32, #tpu.memory_space<vmem>>, vector<1x256xf32>
      %17 = vector.broadcast %16 : vector<1x256xf32> to vector<16x256xf32>
      %18 = arith.addf %15, %17 : vector<16x256xf32>
      %c0_15 = arith.constant 0 : index
      %c0_16 = arith.constant 0 : index
      %19 = vector.load %arg7[%c0_15, %c0_16] : memref<16x256xf32, #tpu.memory_space<vmem>>, vector<16x256xf32>
      %20 = arith.addf %18, %19 : vector<16x256xf32>
      %cst_17 = arith.constant 0.000000e+00 : f32
      %21 = vector.broadcast %cst_17 : f32 to vector<16x256xf32>
      %22 = arith.maximumf %20, %21 : vector<16x256xf32>
      %c0_18 = arith.constant 0 : index
      %c0_19 = arith.constant 0 : index
      %23 = vector.load %arg8[%c0_18, %c0_19] : memref<16x256xf32, #tpu.memory_space<vmem>>, vector<16x256xf32>
      tpu.vector_store %arg8[%c0_18, %c0_19], %22 {strides = array<i32>} : memref<16x256xf32, #tpu.memory_space<vmem>>, vector<16x256xf32>,
    } else {
    }
    return
  }
  func.func @transform_0(%arg0: i32, %arg1: i32, %arg2: i32) -> (i32, i32) {
    %c0_i32 = arith.constant 0 : i32
    return %arg0, %arg2 : i32, i32
  }
  func.func @transform_1(%arg0: i32, %arg1: i32, %arg2: i32) -> (i32, i32) {
    %c0_i32 = arith.constant 0 : i32
    return %arg2, %arg1 : i32, i32
  }
  func.func @transform_2(%arg0: i32, %arg1: i32, %arg2: i32) -> (i32, i32) {
    %c0_i32 = arith.constant 0 : i32
    %c0_i32_0 = arith.constant 0 : i32
    return %c0_i32, %arg1 : i32, i32
  }
  func.func @transform_3(%arg0: i32, %arg1: i32, %arg2: i32) -> (i32, i32) {
    %c0_i32 = arith.constant 0 : i32
    %c0_i32_0 = arith.constant 0 : i32
    return %c0_i32, %arg1 : i32, i32
  }
  func.func @transform_4(%arg0: i32, %arg1: i32, %arg2: i32) -> (i32, i32) {
    %c0_i32 = arith.constant 0 : i32
    return %arg0, %arg1 : i32, i32
  }
  func.func @transform_5(%arg0: i32, %arg1: i32, %arg2: i32) -> (i32, i32) {
    %c0_i32 = arith.constant 0 : i32
    return %arg0, %arg1 : i32, i32
  }
}

module attributes {stable_mosaic.version = 11 : i64} {
  func.func @_mm_bn_kernel(%arg0: i32, %arg1: i32, %arg2: i32, %arg3: memref<16x512xbf16, #tpu.memory_space<vmem>>, %arg4: memref<512x256xbf16, #tpu.memory_space<vmem>>, %arg5: memref<1x256xf32, #tpu.memory_space<vmem>>, %arg6: memref<1x256xf32, #tpu.memory_space<vmem>>, %arg7: memref<16x256xf32, #tpu.memory_space<vmem>>, %arg8: memref<16x256xf32, #tpu.memory_space<vmem>>) attributes {dimension_semantics = [#tpu.dimension_semantics<parallel>, #tpu.dimension_semantics<parallel>, #tpu.dimension_semantics<arbitrary>], iteration_bounds = array<i64: 1, 2, 9>, scalar_prefetch = 0 : i64, scratch_operands = 1 : i64, tpu.core_type = #tpu.core_type<tc>, window_params = [{transform_indices = @transform_0, window_bounds = array<i64: 16, 512>}, {transform_indices = @transform_1, window_bounds = array<i64: 512, 256>}, {transform_indices = @transform_2, window_bounds = array<i64: 1, 256>}, {transform_indices = @transform_3, window_bounds = array<i64: 1, 256>}, {transform_indices = @transform_4, window_bounds = array<i64: 16, 256>}]} {
    %c0_i32 = arith.constant 0 : i32
    %0 = arith.cmpi eq, %arg2, %c0_i32 : i32
    %1 = arith.extui %0 : i1 to i32
    %c0_i32_0 = arith.constant 0 : i32
    %2 = arith.cmpi ne, %1, %c0_i32_0 : i32
    scf.if %2 {
      %cst_9 = arith.constant 0.000000e+00 : f32
      %12 = vector.broadcast %cst_9 : f32 to vector<16x256xf32>
      %c0_10 = arith.constant 0 : index
      %c0_11 = arith.constant 0 : index
      %13 = vector.load %arg8[%c0_10, %c0_11] : memref<16x256xf32, #tpu.memory_space<vmem>>, vector<16x256xf32>
      tpu.vector_store %arg8[%c0_10, %c0_11], %12 {strides = array<i32>} : memref<16x256xf32, #tpu.memory_space<vmem>>, vector<16x256xf32>,
    } else {
    }
    %c0 = arith.constant 0 : index
    %c0_1 = arith.constant 0 : index
    %3 = vector.load %arg8[%c0, %c0_1] : memref<16x256xf32, #tpu.memory_space<vmem>>, vector<16x256xf32>
    %c0_2 = arith.constant 0 : index
    %c0_3 = arith.constant 0 : index
    %4 = vector.load %arg3[%c0_2, %c0_3] : memref<16x512xbf16, #tpu.memory_space<vmem>>, vector<16x512xbf16>
    %c0_4 = arith.constant 0 : index
    %c0_5 = arith.constant 0 : index
    %5 = vector.load %arg4[%c0_4, %c0_5] : memref<512x256xbf16, #tpu.memory_space<vmem>>, vector<512x256xbf16>
    %cst = arith.constant dense<0.000000e+00> : vector<16x256xf32>
    %6 = tpu.matmul %4, %5, %cst {dimension_numbers = #tpu.dot_dimension_numbers<[1], [0], [0], [1], [0, 0, 1, 1], [], []>} : vector<16x512xbf16>, vector<512x256xbf16>, vector<16x256xf32> -> vector<16x256xf32>
    %7 = arith.addf %3, %6 : vector<16x256xf32>
    %c0_6 = arith.constant 0 : index
    %c0_7 = arith.constant 0 : index
    %8 = vector.load %arg8[%c0_6, %c0_7] : memref<16x256xf32, #tpu.memory_space<vmem>>, vector<16x256xf32>
    tpu.vector_store %arg8[%c0_6, %c0_7], %7 {strides = array<i32>} : memref<16x256xf32, #tpu.memory_space<vmem>>, vector<16x256xf32>,
    %c8_i32 = arith.constant 8 : i32
    %9 = arith.cmpi eq, %arg2, %c8_i32 : i32
    %10 = arith.extui %9 : i1 to i32
    %c0_i32_8 = arith.constant 0 : i32
    %11 = arith.cmpi ne, %10, %c0_i32_8 : i32
    scf.if %11 {
      %c0_9 = arith.constant 0 : index
      %c0_10 = arith.constant 0 : index
      %12 = vector.load %arg8[%c0_9, %c0_10] : memref<16x256xf32, #tpu.memory_space<vmem>>, vector<16x256xf32>
      %c0_11 = arith.constant 0 : index
      %c0_12 = arith.constant 0 : index
      %13 = vector.load %arg5[%c0_11, %c0_12] : memref<1x256xf32, #tpu.memory_space<vmem>>, vector<1x256xf32>
      %14 = vector.broadcast %13 : vector<1x256xf32> to vector<16x256xf32>
      %15 = arith.mulf %12, %14 : vector<16x256xf32>
      %c0_13 = arith.constant 0 : index
      %c0_14 = arith.constant 0 : index
      %16 = vector.load %arg6[%c0_13, %c0_14] : memref<1x256xf32, #tpu.memory_space<vmem>>, vector<1x256xf32>
      %17 = vector.broadcast %16 : vector<1x256xf32> to vector<16x256xf32>
      %18 = arith.addf %15, %17 : vector<16x256xf32>
      %cst_15 = arith.constant 0.000000e+00 : f32
      %19 = vector.broadcast %cst_15 : f32 to vector<16x256xf32>
      %20 = arith.maximumf %18, %19 : vector<16x256xf32>
      %c0_16 = arith.constant 0 : index
      %c0_17 = arith.constant 0 : index
      %21 = vector.load %arg7[%c0_16, %c0_17] : memref<16x256xf32, #tpu.memory_space<vmem>>, vector<16x256xf32>
      tpu.vector_store %arg7[%c0_16, %c0_17], %20 {strides = array<i32>} : memref<16x256xf32, #tpu.memory_space<vmem>>, vector<16x256xf32>,
    } else {
    }
    return
  }
  func.func @transform_0(%arg0: i32, %arg1: i32, %arg2: i32) -> (i32, i32) {
    %c0_i32 = arith.constant 0 : i32
    return %arg0, %arg2 : i32, i32
  }
  func.func @transform_1(%arg0: i32, %arg1: i32, %arg2: i32) -> (i32, i32) {
    %c0_i32 = arith.constant 0 : i32
    return %arg2, %arg1 : i32, i32
  }
  func.func @transform_2(%arg0: i32, %arg1: i32, %arg2: i32) -> (i32, i32) {
    %c0_i32 = arith.constant 0 : i32
    %c0_i32_0 = arith.constant 0 : i32
    return %c0_i32, %arg1 : i32, i32
  }
  func.func @transform_3(%arg0: i32, %arg1: i32, %arg2: i32) -> (i32, i32) {
    %c0_i32 = arith.constant 0 : i32
    %c0_i32_0 = arith.constant 0 : i32
    return %c0_i32, %arg1 : i32, i32
  }
  func.func @transform_4(%arg0: i32, %arg1: i32, %arg2: i32) -> (i32, i32) {
    %c0_i32 = arith.constant 0 : i32
    return %arg0, %arg1 : i32, i32
  }
}

module attributes {stable_mosaic.version = 11 : i64} {
  func.func @_mm_kernel(%arg0: i32, %arg1: i32, %arg2: i32, %arg3: memref<16x512xbf16, #tpu.memory_space<vmem>>, %arg4: memref<512x256xbf16, #tpu.memory_space<vmem>>, %arg5: memref<16x256xf32, #tpu.memory_space<vmem>>, %arg6: memref<16x256xf32, #tpu.memory_space<vmem>>) attributes {dimension_semantics = [#tpu.dimension_semantics<parallel>, #tpu.dimension_semantics<parallel>, #tpu.dimension_semantics<arbitrary>], iteration_bounds = array<i64: 1, 1, 16>, scalar_prefetch = 0 : i64, scratch_operands = 1 : i64, tpu.core_type = #tpu.core_type<tc>, window_params = [{transform_indices = @transform_0, window_bounds = array<i64: 16, 512>}, {transform_indices = @transform_1, window_bounds = array<i64: 512, 256>}, {transform_indices = @transform_2, window_bounds = array<i64: 16, 256>}]} {
    %c0_i32 = arith.constant 0 : i32
    %0 = arith.cmpi eq, %arg2, %c0_i32 : i32
    %1 = arith.extui %0 : i1 to i32
    %c0_i32_0 = arith.constant 0 : i32
    %2 = arith.cmpi ne, %1, %c0_i32_0 : i32
    scf.if %2 {
      %cst_9 = arith.constant 0.000000e+00 : f32
      %12 = vector.broadcast %cst_9 : f32 to vector<16x256xf32>
      %c0_10 = arith.constant 0 : index
      %c0_11 = arith.constant 0 : index
      %13 = vector.load %arg6[%c0_10, %c0_11] : memref<16x256xf32, #tpu.memory_space<vmem>>, vector<16x256xf32>
      tpu.vector_store %arg6[%c0_10, %c0_11], %12 {strides = array<i32>} : memref<16x256xf32, #tpu.memory_space<vmem>>, vector<16x256xf32>,
    } else {
    }
    %c0 = arith.constant 0 : index
    %c0_1 = arith.constant 0 : index
    %3 = vector.load %arg6[%c0, %c0_1] : memref<16x256xf32, #tpu.memory_space<vmem>>, vector<16x256xf32>
    %c0_2 = arith.constant 0 : index
    %c0_3 = arith.constant 0 : index
    %4 = vector.load %arg3[%c0_2, %c0_3] : memref<16x512xbf16, #tpu.memory_space<vmem>>, vector<16x512xbf16>
    %c0_4 = arith.constant 0 : index
    %c0_5 = arith.constant 0 : index
    %5 = vector.load %arg4[%c0_4, %c0_5] : memref<512x256xbf16, #tpu.memory_space<vmem>>, vector<512x256xbf16>
    %cst = arith.constant dense<0.000000e+00> : vector<16x256xf32>
    %6 = tpu.matmul %4, %5, %cst {dimension_numbers = #tpu.dot_dimension_numbers<[1], [0], [0], [1], [0, 0, 1, 1], [], []>} : vector<16x512xbf16>, vector<512x256xbf16>, vector<16x256xf32> -> vector<16x256xf32>
    %7 = arith.addf %3, %6 : vector<16x256xf32>
    %c0_6 = arith.constant 0 : index
    %c0_7 = arith.constant 0 : index
    %8 = vector.load %arg6[%c0_6, %c0_7] : memref<16x256xf32, #tpu.memory_space<vmem>>, vector<16x256xf32>
    tpu.vector_store %arg6[%c0_6, %c0_7], %7 {strides = array<i32>} : memref<16x256xf32, #tpu.memory_space<vmem>>, vector<16x256xf32>,
    %c15_i32 = arith.constant 15 : i32
    %9 = arith.cmpi eq, %arg2, %c15_i32 : i32
    %10 = arith.extui %9 : i1 to i32
    %c0_i32_8 = arith.constant 0 : i32
    %11 = arith.cmpi ne, %10, %c0_i32_8 : i32
    scf.if %11 {
      %c0_9 = arith.constant 0 : index
      %c0_10 = arith.constant 0 : index
      %12 = vector.load %arg6[%c0_9, %c0_10] : memref<16x256xf32, #tpu.memory_space<vmem>>, vector<16x256xf32>
      %c0_11 = arith.constant 0 : index
      %c0_12 = arith.constant 0 : index
      %13 = vector.load %arg5[%c0_11, %c0_12] : memref<16x256xf32, #tpu.memory_space<vmem>>, vector<16x256xf32>
      tpu.vector_store %arg5[%c0_11, %c0_12], %12 {strides = array<i32>} : memref<16x256xf32, #tpu.memory_space<vmem>>, vector<16x256xf32>,
    } else {
    }
    return
  }
  func.func @transform_0(%arg0: i32, %arg1: i32, %arg2: i32) -> (i32, i32) {
    %c0_i32 = arith.constant 0 : i32
    return %arg0, %arg2 : i32, i32
  }
  func.func @transform_1(%arg0: i32, %arg1: i32, %arg2: i32) -> (i32, i32) {
    %c0_i32 = arith.constant 0 : i32
    return %arg2, %arg1 : i32, i32
  }
  func.func @transform_2(%arg0: i32, %arg1: i32, %arg2: i32) -> (i32, i32) {
    %c0_i32 = arith.constant 0 : i32
    return %arg0, %arg1 : i32, i32
  }
}

module attributes {stable_mosaic.version = 11 : i64} {
  func.func @_mm_kernel(%arg0: i32, %arg1: i32, %arg2: i32, %arg3: memref<128x128xbf16, #tpu.memory_space<vmem>>, %arg4: memref<128x128xbf16, #tpu.memory_space<vmem>>, %arg5: memref<128x128xf32, #tpu.memory_space<vmem>>, %arg6: memref<128x128xf32, #tpu.memory_space<vmem>>) attributes {dimension_semantics = [#tpu.dimension_semantics<parallel>, #tpu.dimension_semantics<parallel>, #tpu.dimension_semantics<arbitrary>], iteration_bounds = array<i64: 2, 1, 1>, scalar_prefetch = 0 : i64, scratch_operands = 1 : i64, tpu.core_type = #tpu.core_type<tc>, window_params = [{transform_indices = @transform_0, window_bounds = array<i64: 128, 128>}, {transform_indices = @transform_1, window_bounds = array<i64: 128, 128>}, {transform_indices = @transform_2, window_bounds = array<i64: 128, 128>}]} {
    %c0_i32 = arith.constant 0 : i32
    %0 = arith.cmpi eq, %arg2, %c0_i32 : i32
    %1 = arith.extui %0 : i1 to i32
    %c0_i32_0 = arith.constant 0 : i32
    %2 = arith.cmpi ne, %1, %c0_i32_0 : i32
    scf.if %2 {
      %cst_10 = arith.constant 0.000000e+00 : f32
      %12 = vector.broadcast %cst_10 : f32 to vector<128x128xf32>
      %c0_11 = arith.constant 0 : index
      %c0_12 = arith.constant 0 : index
      %13 = vector.load %arg6[%c0_11, %c0_12] : memref<128x128xf32, #tpu.memory_space<vmem>>, vector<128x128xf32>
      tpu.vector_store %arg6[%c0_11, %c0_12], %12 {strides = array<i32>} : memref<128x128xf32, #tpu.memory_space<vmem>>, vector<128x128xf32>,
    } else {
    }
    %c0 = arith.constant 0 : index
    %c0_1 = arith.constant 0 : index
    %3 = vector.load %arg6[%c0, %c0_1] : memref<128x128xf32, #tpu.memory_space<vmem>>, vector<128x128xf32>
    %c0_2 = arith.constant 0 : index
    %c0_3 = arith.constant 0 : index
    %4 = vector.load %arg3[%c0_2, %c0_3] : memref<128x128xbf16, #tpu.memory_space<vmem>>, vector<128x128xbf16>
    %c0_4 = arith.constant 0 : index
    %c0_5 = arith.constant 0 : index
    %5 = vector.load %arg4[%c0_4, %c0_5] : memref<128x128xbf16, #tpu.memory_space<vmem>>, vector<128x128xbf16>
    %cst = arith.constant dense<0.000000e+00> : vector<128x128xf32>
    %6 = tpu.matmul %4, %5, %cst {dimension_numbers = #tpu.dot_dimension_numbers<[1], [0], [0], [1], [0, 0, 1, 1], [], []>} : vector<128x128xbf16>, vector<128x128xbf16>, vector<128x128xf32> -> vector<128x128xf32>
    %7 = arith.addf %3, %6 : vector<128x128xf32>
    %c0_6 = arith.constant 0 : index
    %c0_7 = arith.constant 0 : index
    %8 = vector.load %arg6[%c0_6, %c0_7] : memref<128x128xf32, #tpu.memory_space<vmem>>, vector<128x128xf32>
    tpu.vector_store %arg6[%c0_6, %c0_7], %7 {strides = array<i32>} : memref<128x128xf32, #tpu.memory_space<vmem>>, vector<128x128xf32>,
    %c0_i32_8 = arith.constant 0 : i32
    %9 = arith.cmpi eq, %arg2, %c0_i32_8 : i32
    %10 = arith.extui %9 : i1 to i32
    %c0_i32_9 = arith.constant 0 : i32
    %11 = arith.cmpi ne, %10, %c0_i32_9 : i32
    scf.if %11 {
      %c0_10 = arith.constant 0 : index
      %c0_11 = arith.constant 0 : index
      %12 = vector.load %arg6[%c0_10, %c0_11] : memref<128x128xf32, #tpu.memory_space<vmem>>, vector<128x128xf32>
      %c0_12 = arith.constant 0 : index
      %c0_13 = arith.constant 0 : index
      %13 = vector.load %arg5[%c0_12, %c0_13] : memref<128x128xf32, #tpu.memory_space<vmem>>, vector<128x128xf32>
      tpu.vector_store %arg5[%c0_12, %c0_13], %12 {strides = array<i32>} : memref<128x128xf32, #tpu.memory_space<vmem>>, vector<128x128xf32>,
    } else {
    }
    return
  }
  func.func @transform_0(%arg0: i32, %arg1: i32, %arg2: i32) -> (i32, i32) {
    %c0_i32 = arith.constant 0 : i32
    return %arg0, %arg2 : i32, i32
  }
  func.func @transform_1(%arg0: i32, %arg1: i32, %arg2: i32) -> (i32, i32) {
    %c0_i32 = arith.constant 0 : i32
    return %arg2, %arg1 : i32, i32
  }
  func.func @transform_2(%arg0: i32, %arg1: i32, %arg2: i32) -> (i32, i32) {
    %c0_i32 = arith.constant 0 : i32
    return %arg0, %arg1 : i32, i32
  }
}

module attributes {stable_mosaic.version = 11 : i64} {
  func.func @_mm_kernel(%arg0: i32, %arg1: i32, %arg2: i32, %arg3: memref<16x128xbf16, #tpu.memory_space<vmem>>, %arg4: memref<128x128xbf16, #tpu.memory_space<vmem>>, %arg5: memref<16x128xf32, #tpu.memory_space<vmem>>, %arg6: memref<16x128xf32, #tpu.memory_space<vmem>>) attributes {dimension_semantics = [#tpu.dimension_semantics<parallel>, #tpu.dimension_semantics<parallel>, #tpu.dimension_semantics<arbitrary>], iteration_bounds = array<i64: 1, 1, 1>, scalar_prefetch = 0 : i64, scratch_operands = 1 : i64, tpu.core_type = #tpu.core_type<tc>, window_params = [{transform_indices = @transform_0, window_bounds = array<i64: 16, 128>}, {transform_indices = @transform_1, window_bounds = array<i64: 128, 128>}, {transform_indices = @transform_2, window_bounds = array<i64: 16, 128>}]} {
    %c0_i32 = arith.constant 0 : i32
    %0 = arith.cmpi eq, %arg2, %c0_i32 : i32
    %1 = arith.extui %0 : i1 to i32
    %c0_i32_0 = arith.constant 0 : i32
    %2 = arith.cmpi ne, %1, %c0_i32_0 : i32
    scf.if %2 {
      %cst_10 = arith.constant 0.000000e+00 : f32
      %12 = vector.broadcast %cst_10 : f32 to vector<16x128xf32>
      %c0_11 = arith.constant 0 : index
      %c0_12 = arith.constant 0 : index
      %13 = vector.load %arg6[%c0_11, %c0_12] : memref<16x128xf32, #tpu.memory_space<vmem>>, vector<16x128xf32>
      tpu.vector_store %arg6[%c0_11, %c0_12], %12 {strides = array<i32>} : memref<16x128xf32, #tpu.memory_space<vmem>>, vector<16x128xf32>,
    } else {
    }
    %c0 = arith.constant 0 : index
    %c0_1 = arith.constant 0 : index
    %3 = vector.load %arg6[%c0, %c0_1] : memref<16x128xf32, #tpu.memory_space<vmem>>, vector<16x128xf32>
    %c0_2 = arith.constant 0 : index
    %c0_3 = arith.constant 0 : index
    %4 = vector.load %arg3[%c0_2, %c0_3] : memref<16x128xbf16, #tpu.memory_space<vmem>>, vector<16x128xbf16>
    %c0_4 = arith.constant 0 : index
    %c0_5 = arith.constant 0 : index
    %5 = vector.load %arg4[%c0_4, %c0_5] : memref<128x128xbf16, #tpu.memory_space<vmem>>, vector<128x128xbf16>
    %cst = arith.constant dense<0.000000e+00> : vector<16x128xf32>
    %6 = tpu.matmul %4, %5, %cst {dimension_numbers = #tpu.dot_dimension_numbers<[1], [0], [0], [1], [0, 0, 1, 1], [], []>} : vector<16x128xbf16>, vector<128x128xbf16>, vector<16x128xf32> -> vector<16x128xf32>
    %7 = arith.addf %3, %6 : vector<16x128xf32>
    %c0_6 = arith.constant 0 : index
    %c0_7 = arith.constant 0 : index
    %8 = vector.load %arg6[%c0_6, %c0_7] : memref<16x128xf32, #tpu.memory_space<vmem>>, vector<16x128xf32>
    tpu.vector_store %arg6[%c0_6, %c0_7], %7 {strides = array<i32>} : memref<16x128xf32, #tpu.memory_space<vmem>>, vector<16x128xf32>,
    %c0_i32_8 = arith.constant 0 : i32
    %9 = arith.cmpi eq, %arg2, %c0_i32_8 : i32
    %10 = arith.extui %9 : i1 to i32
    %c0_i32_9 = arith.constant 0 : i32
    %11 = arith.cmpi ne, %10, %c0_i32_9 : i32
    scf.if %11 {
      %c0_10 = arith.constant 0 : index
      %c0_11 = arith.constant 0 : index
      %12 = vector.load %arg6[%c0_10, %c0_11] : memref<16x128xf32, #tpu.memory_space<vmem>>, vector<16x128xf32>
      %c0_12 = arith.constant 0 : index
      %c0_13 = arith.constant 0 : index
      %13 = vector.load %arg5[%c0_12, %c0_13] : memref<16x128xf32, #tpu.memory_space<vmem>>, vector<16x128xf32>
      tpu.vector_store %arg5[%c0_12, %c0_13], %12 {strides = array<i32>} : memref<16x128xf32, #tpu.memory_space<vmem>>, vector<16x128xf32>,
    } else {
    }
    return
  }
  func.func @transform_0(%arg0: i32, %arg1: i32, %arg2: i32) -> (i32, i32) {
    %c0_i32 = arith.constant 0 : i32
    return %arg0, %arg2 : i32, i32
  }
  func.func @transform_1(%arg0: i32, %arg1: i32, %arg2: i32) -> (i32, i32) {
    %c0_i32 = arith.constant 0 : i32
    return %arg2, %arg1 : i32, i32
  }
  func.func @transform_2(%arg0: i32, %arg1: i32, %arg2: i32) -> (i32, i32) {
    %c0_i32 = arith.constant 0 : i32
    return %arg0, %arg1 : i32, i32
  }
}

module attributes {stable_mosaic.version = 11 : i64} {
  func.func @_mm_kernel(%arg0: i32, %arg1: i32, %arg2: i32, %arg3: memref<16x256xbf16, #tpu.memory_space<vmem>>, %arg4: memref<256x128xbf16, #tpu.memory_space<vmem>>, %arg5: memref<16x128xf32, #tpu.memory_space<vmem>>, %arg6: memref<16x128xf32, #tpu.memory_space<vmem>>) attributes {dimension_semantics = [#tpu.dimension_semantics<parallel>, #tpu.dimension_semantics<parallel>, #tpu.dimension_semantics<arbitrary>], iteration_bounds = array<i64: 1, 1, 1>, scalar_prefetch = 0 : i64, scratch_operands = 1 : i64, tpu.core_type = #tpu.core_type<tc>, window_params = [{transform_indices = @transform_0, window_bounds = array<i64: 16, 256>}, {transform_indices = @transform_1, window_bounds = array<i64: 256, 128>}, {transform_indices = @transform_2, window_bounds = array<i64: 16, 128>}]} {
    %c0_i32 = arith.constant 0 : i32
    %0 = arith.cmpi eq, %arg2, %c0_i32 : i32
    %1 = arith.extui %0 : i1 to i32
    %c0_i32_0 = arith.constant 0 : i32
    %2 = arith.cmpi ne, %1, %c0_i32_0 : i32
    scf.if %2 {
      %cst_10 = arith.constant 0.000000e+00 : f32
      %12 = vector.broadcast %cst_10 : f32 to vector<16x128xf32>
      %c0_11 = arith.constant 0 : index
      %c0_12 = arith.constant 0 : index
      %13 = vector.load %arg6[%c0_11, %c0_12] : memref<16x128xf32, #tpu.memory_space<vmem>>, vector<16x128xf32>
      tpu.vector_store %arg6[%c0_11, %c0_12], %12 {strides = array<i32>} : memref<16x128xf32, #tpu.memory_space<vmem>>, vector<16x128xf32>,
    } else {
    }
    %c0 = arith.constant 0 : index
    %c0_1 = arith.constant 0 : index
    %3 = vector.load %arg6[%c0, %c0_1] : memref<16x128xf32, #tpu.memory_space<vmem>>, vector<16x128xf32>
    %c0_2 = arith.constant 0 : index
    %c0_3 = arith.constant 0 : index
    %4 = vector.load %arg3[%c0_2, %c0_3] : memref<16x256xbf16, #tpu.memory_space<vmem>>, vector<16x256xbf16>
    %c0_4 = arith.constant 0 : index
    %c0_5 = arith.constant 0 : index
    %5 = vector.load %arg4[%c0_4, %c0_5] : memref<256x128xbf16, #tpu.memory_space<vmem>>, vector<256x128xbf16>
    %cst = arith.constant dense<0.000000e+00> : vector<16x128xf32>
    %6 = tpu.matmul %4, %5, %cst {dimension_numbers = #tpu.dot_dimension_numbers<[1], [0], [0], [1], [0, 0, 1, 1], [], []>} : vector<16x256xbf16>, vector<256x128xbf16>, vector<16x128xf32> -> vector<16x128xf32>
    %7 = arith.addf %3, %6 : vector<16x128xf32>
    %c0_6 = arith.constant 0 : index
    %c0_7 = arith.constant 0 : index
    %8 = vector.load %arg6[%c0_6, %c0_7] : memref<16x128xf32, #tpu.memory_space<vmem>>, vector<16x128xf32>
    tpu.vector_store %arg6[%c0_6, %c0_7], %7 {strides = array<i32>} : memref<16x128xf32, #tpu.memory_space<vmem>>, vector<16x128xf32>,
    %c0_i32_8 = arith.constant 0 : i32
    %9 = arith.cmpi eq, %arg2, %c0_i32_8 : i32
    %10 = arith.extui %9 : i1 to i32
    %c0_i32_9 = arith.constant 0 : i32
    %11 = arith.cmpi ne, %10, %c0_i32_9 : i32
    scf.if %11 {
      %c0_10 = arith.constant 0 : index
      %c0_11 = arith.constant 0 : index
      %12 = vector.load %arg6[%c0_10, %c0_11] : memref<16x128xf32, #tpu.memory_space<vmem>>, vector<16x128xf32>
      %c0_12 = arith.constant 0 : index
      %c0_13 = arith.constant 0 : index
      %13 = vector.load %arg5[%c0_12, %c0_13] : memref<16x128xf32, #tpu.memory_space<vmem>>, vector<16x128xf32>
      tpu.vector_store %arg5[%c0_12, %c0_13], %12 {strides = array<i32>} : memref<16x128xf32, #tpu.memory_space<vmem>>, vector<16x128xf32>,
    } else {
    }
    return
  }
  func.func @transform_0(%arg0: i32, %arg1: i32, %arg2: i32) -> (i32, i32) {
    %c0_i32 = arith.constant 0 : i32
    return %arg0, %arg2 : i32, i32
  }
  func.func @transform_1(%arg0: i32, %arg1: i32, %arg2: i32) -> (i32, i32) {
    %c0_i32 = arith.constant 0 : i32
    return %arg2, %arg1 : i32, i32
  }
  func.func @transform_2(%arg0: i32, %arg1: i32, %arg2: i32) -> (i32, i32) {
    %c0_i32 = arith.constant 0 : i32
    return %arg0, %arg1 : i32, i32
  }
}

module attributes {stable_mosaic.version = 11 : i64} {
  func.func @_avgpool_kernel(%arg0: memref<2x4x128xf32, #tpu.memory_space<vmem>>, %arg1: memref<2x128xf32, #tpu.memory_space<vmem>>) attributes {dimension_semantics = [], scalar_prefetch = 0 : i64, scratch_operands = 0 : i64, tpu.core_type = #tpu.core_type<tc>} {
    %c0 = arith.constant 0 : index
    %c0_0 = arith.constant 0 : index
    %c0_1 = arith.constant 0 : index
    %0 = vector.load %arg0[%c0, %c0_0, %c0_1] : memref<2x4x128xf32, #tpu.memory_space<vmem>>, vector<2x4x128xf32>
    %cst = arith.constant dense<0.000000e+00> : vector<2x128xf32>
    %1 = vector.multi_reduction <add>, %0, %cst [1] : vector<2x4x128xf32> to vector<2x128xf32>
    %cst_2 = arith.constant 2.500000e-01 : f32
    %2 = vector.broadcast %cst_2 : f32 to vector<2x128xf32>
    %3 = arith.mulf %1, %2 : vector<2x128xf32>
    %c0_3 = arith.constant 0 : index
    %c0_4 = arith.constant 0 : index
    %4 = vector.load %arg1[%c0_3, %c0_4] : memref<2x128xf32, #tpu.memory_space<vmem>>, vector<2x128xf32>
    tpu.vector_store %arg1[%c0_3, %c0_4], %3 {strides = array<i32>} : memref<2x128xf32, #tpu.memory_space<vmem>>, vector<2x128xf32>,
    return
  }
}

</mosaic_0001>

<bundles_post_ra>
// kernel: resnet_up_forward.26
= control target key start
LH: loop header
LB: loop body
LE: loop exit
PB: predicated region body
PF: predicated region fallthrough
CT: control target
= control target key end

     0   :  { %s1164_s15 = smov 0   ;;  %s1166_s16 = smov 0   ;;  %s1330_s0 = inlined_call_operand.vmem [shape: bf16[512,256], index: 0, kind: input, shape index: {}]   ;;  %s1331_s1 = inlined_call_operand.vmem [shape: bf16[256,128], index: 1, kind: input, shape index: {}]   ;;  %s1332_s2 = inlined_call_operand.vmem [shape: f32[1,128], index: 2, kind: input, shape index: {}]   ;;  %s1333_s3 = inlined_call_operand.vmem [shape: f32[1,128], index: 3, kind: input, shape index: {}]   ;;  %s1334_s4 = inlined_call_operand.vmem [shape: f32[512,128], index: 4, kind: output, shape index: {}]  }
   0x1   :  { %s1168_s17 = smov 0  }
   0x2 LB: > { %s33_s18 = sadd.s32 1, %s1133_s16  ;;  %p928_p0 = scmp.ge.s32.totalorder %s1137_s17, 1  ;;  %s1137_s17 = sphi %s1168_s17, %s14_s17   ;;  %s1133_s16 = sphi %s1166_s16, %s1336_s16   ;;  %s1129_s15 = sphi %s1164_s15, %s1335_s15  }
   0x3   : > { %p35_p1 = scmp.ge.s32.totalorder %s33_s18, 4  ;;  %p224_p2 = scmp.lt.s32.totalorder %s1137_s17, 5 }
   0x5   : > { %s1338_s18 = smov (%p35_p1, %s33_s18), 0  ;;  %p225_p3 = pnand %p928_p0, %p224_p2 }
   0x6   : > { %v1075_v0 = vld [vmem:[%s1331_s1 + $0x40] sm:$0xff] (!%p225_p3)   ;;  %s929_s21 = sshll.u32 (!%p225_p3), %s1129_s15, 4  ;;  %v1077_v2 = vld [vmem:[%s1331_s1 + $0x48] sm:$0xff] (!%p225_p3)   ;;  %v1079_v4 = vld [vmem:[%s1331_s1 + $0x50] sm:$0xff] (!%p225_p3)  }
   0x7   : > { %228 = sbr.rel (%p225_p3) target bundleno = 288 (0x120), region = 36  ;;  %v1076_v1 = vld [vmem:[%s1331_s1] sm:$0xff] (!%p225_p3)   ;;  %971 = vmatprep.subr.bf16.mxu0 (!%p225_p3), %v1075_v0  ;;  %1035 = vmatprep.subr.bf16.mxu1 (!%p225_p3), %v1075_v0  ;;  %v1078_v3 = vld [vmem:[%s1331_s1 + $0x8] sm:$0xff] (!%p225_p3)   ;;  %p274_p4 = scmp.lt.s32.totalorder (!%p225_p3), %s929_s21, 63  ;;  %v1080_v5 = vld [vmem:[%s1331_s1 + $0x10] sm:$0xff] (!%p225_p3)  }
   0x8   : > { %972 = vmatpush3.bf16.msra.mxu0 (!%p225_p3), %v1076_v1  ;;  %1043 = vmatpush3.bf16.msra.mxu1 (!%p225_p3), %v1076_v1  ;;  %v1081_v6 = vld [vmem:[%s1331_s1 + $0x58] sm:$0xff] (!%p225_p3)   ;;  %v1083_v8 = vld [vmem:[%s1331_s1 + $0x60] sm:$0xff] (!%p225_p3)   ;;  %v1085_v10 = vld [vmem:[%s1331_s1 + $0x68] sm:$0xff] (!%p225_p3)  }
   0x9   : > { %973 = vmatprep.subr.bf16.mxu0 (!%p225_p3), %v1077_v2  ;;  %1036 = vmatprep.subr.bf16.mxu1 (!%p225_p3), %v1077_v2  ;;  %v1082_v7 = vld [vmem:[%s1331_s1 + $0x18] sm:$0xff] (!%p225_p3)   ;;  %v1084_v9 = vld [vmem:[%s1331_s1 + $0x20] sm:$0xff] (!%p225_p3)   ;;  %v1086_v13 = vld [vmem:[%s1331_s1 + $0x28] sm:$0xff] (!%p225_p3)  }
   0xa   : > { %v1087_v14 = vld [vmem:[%s1331_s1 + $0x70] sm:$0xff] (!%p225_p3)   ;;  %v1089_v16 = vld [vmem:[%s1331_s1 + $0x78] sm:$0xff] (!%p225_p3)   ;;  %v1259_v35 = vld [vmem:[%s1332_s2] ss:$0 sm:$0xff] (!%p225_p3) }
   0xb   : > { %v1088_v15 = vld [vmem:[%s1331_s1 + $0x30] sm:$0xff] (!%p225_p3)   ;;  %v1090_v17 = vld [vmem:[%s1331_s1 + $0x38] sm:$0xff] (!%p225_p3)   ;;  %v1264_v41 = vld [vmem:[%s1333_s3] ss:$0 sm:$0xff] (!%p225_p3) }
   0xc   : > { %974 = vmatpush3.bf16.msra.mxu0 (!%p225_p3), %v1078_v3  ;;  %1044 = vmatpush3.bf16.msra.mxu1 (!%p225_p3), %v1078_v3 }
   0xd   : > { %975 = vmatprep.subr.bf16.mxu0 (!%p225_p3), %v1079_v4  ;;  %1037 = vmatprep.subr.bf16.mxu1 (!%p225_p3), %v1079_v4 }
   0xe   : > { %s1340_s21 = smov (!%p274_p4, %s929_s21), 63 }
   0xf   : > { %s970_s10 = sshll.u32 %s1340_s21, 3 }
  0x10   : > { %976 = vmatpush3.bf16.msra.mxu0 %v1080_v5  ;;  %1045 = vmatpush3.bf16.msra.mxu1 %v1080_v5  ;;  %s1217_s15 = scalar_lea.vmem %s1330_s0, %s970_s10 }
  0x11   : > { %977 = vmatprep.subr.bf16.mxu0 %v1081_v6  ;;  %1038 = vmatprep.subr.bf16.mxu1 %v1081_v6  ;;  %v1093_v11 = vld [vmem:[%s1217_s15 + $0x4] ss:$8 sps:$4 sm:$0xff]   ;;  %v1091_v18 = vld [vmem:[%s1217_s15] ss:$8 sps:$4 sm:$0xff]   ;;  %v1097_v20 = vld [vmem:[%s1217_s15 + $0x14] ss:$8 sps:$4 sm:$0xff]  }
  0x12   : > { %v1096_v12 = vld [vmem:[%s1217_s15 + $0x44] ss:$8 sps:$4 sm:$0xff]   ;;  %601 = vmatprep.mubr.bf16.mxu0 %v1093_v11  ;;  %v1094_v19 = vld [vmem:[%s1217_s15 + $0x40] ss:$8 sps:$4 sm:$0xff]   ;;  %v1099_v21 = vld [vmem:[%s1217_s15 + $0x54] ss:$8 sps:$4 sm:$0xff]  }
  0x13   : > { %633 = vmatprep.mubr.bf16.mxu1 %v1096_v12  ;;  %v1101_v22 = vld [vmem:[%s1217_s15 + $0x10] ss:$8 sps:$4 sm:$0xff]   ;;  %v1103_v24 = vld [vmem:[%s1217_s15 + $0x24] ss:$8 sps:$4 sm:$0xff]   ;;  %v1107_v26 = vld [vmem:[%s1217_s15 + $0x20] ss:$8 sps:$4 sm:$0xff]  }
  0x14   : > { %978 = vmatpush3.bf16.msra.mxu0 %v1082_v7  ;;  %1046 = vmatpush3.bf16.msra.mxu1 %v1082_v7  ;;  %v1102_v23 = vld [vmem:[%s1217_s15 + $0x50] ss:$8 sps:$4 sm:$0xff]   ;;  %v1105_v25 = vld [vmem:[%s1217_s15 + $0x64] ss:$8 sps:$4 sm:$0xff]   ;;  %v1108_v27 = vld [vmem:[%s1217_s15 + $0x60] ss:$8 sps:$4 sm:$0xff]  }
  0x15   : > { %979 = vmatprep.subr.bf16.mxu0 %v1083_v8  ;;  %1039 = vmatprep.subr.bf16.mxu1 %v1083_v8  ;;  %v1109_v28 = vld [vmem:[%s1217_s15 + $0x34] ss:$8 sps:$4 sm:$0xff]   ;;  %v1113_v30 = vld [vmem:[%s1217_s15 + $0x30] ss:$8 sps:$4 sm:$0xff]  }
  0x16   : > { %v1111_v29 = vld [vmem:[%s1217_s15 + $0x74] ss:$8 sps:$4 sm:$0xff]   ;;  %v1114_v31 = vld [vmem:[%s1217_s15 + $0x70] ss:$8 sps:$4 sm:$0xff]   ;;  %s1277_s15 = scalar_lea.vmem %s1334_s4, %s970_s10 }
  0x18   : > { %980 = vmatpush3.bf16.msra.mxu0 %v1084_v9  ;;  %1047 = vmatpush3.bf16.msra.mxu1 %v1084_v9 }
  0x19   : > { %981 = vmatprep.subr.bf16.mxu0 %v1085_v10  ;;  %1040 = vmatprep.subr.bf16.mxu1 %v1085_v10 }
  0x1c   : > { %982 = vmatpush3.bf16.msra.mxu0 %v1086_v13  ;;  %1048 = vmatpush3.bf16.msra.mxu1 %v1086_v13 }
  0x1d   : > { %983 = vmatprep.subr.bf16.mxu0 %v1087_v14  ;;  %1041 = vmatprep.subr.bf16.mxu1 %v1087_v14 }
  0x20   : > { %984 = vmatpush3.bf16.msra.mxu0 %v1088_v15  ;;  %1049 = vmatpush3.bf16.msra.mxu1 %v1088_v15 }
  0x21   : > { %985 = vmatprep.subr.bf16.mxu0 %v1089_v16  ;;  %1042 = vmatprep.subr.bf16.mxu1 %v1089_v16 }
  0x24   : > { %986 = vmatpush3.bf16.msra.mxu0 %v1090_v17  ;;  %1050 = vmatpush3.bf16.msra.mxu1 %v1090_v17 }
  0x27   : > { %602 = vmatmul.mubr.bf16.vlgmr.msra.gmra.mrb[0].mxu0 %v1091_v18  ;;  %634 = vmatmul.mubr.bf16.vlgmr.msra.gmra.mrb[0].mxu1 %v1094_v19 }
  0x28   : > { %609 = vmatprep.mubr.bf16.mxu0 %v1097_v20  ;;  %641 = vmatprep.mubr.bf16.mxu1 %v1099_v21 }
  0x2f   : > { %610 = vmatmul.mubr.bf16.gmra.mrb[4].mxu0 %v1101_v22  ;;  %642 = vmatmul.mubr.bf16.gmra.mrb[4].mxu1 %v1102_v23 }
  0x30   : > { %617 = vmatprep.mubr.bf16.mxu0 %v1103_v24  ;;  %649 = vmatprep.mubr.bf16.mxu1 %v1105_v25 }
  0x37   : > { %618 = vmatmul.mubr.bf16.gmra.mrb[8].mxu0 %v1107_v26  ;;  %650 = vmatmul.mubr.bf16.gmra.mrb[8].mxu1 %v1108_v27 }
  0x38   : > { %625 = vmatprep.mubr.bf16.mxu0 %v1109_v28  ;;  %657 = vmatprep.mubr.bf16.mxu1 %v1111_v29 }
  0x3f   : > { %626 = vmatmul.mubr.bf16.gmra.mrb[12].mxu0 %v1113_v30  ;;  %658 = vmatmul.mubr.bf16.gmra.mrb[12].mxu1 %v1114_v31 }
  0xfa   : > { %v987_v32 = vpop.f32.mrb[0].mxu0  ;;  %v1011_v33 = vpop.f32.mrb[0].mxu1 }
  0xfb   : > { %v988_v34 = vpop.f32.mrb[1].mxu0  ;;  %v1012_v36 = vpop.f32.mrb[1].mxu1 }
  0xfc   : > { %v989_v37 = vadd.f32 %v988_v34, %v987_v32  ;;  %v1013_v38 = vadd.f32 %v1012_v36, %v1011_v33  ;;  %v990_v39 = vpop.f32.mrb[2].mxu0  ;;  %v1014_v40 = vpop.f32.mrb[2].mxu1 }
  0xfd   : > { %v991_v42 = vpop.f32.mrb[3].mxu0  ;;  %v1015_v43 = vpop.f32.mrb[3].mxu1 }
  0xfe   : > { %v724_v44 = vmul.f32 %v989_v37, %v1259_v35  ;;  %v732_v45 = vmul.f32 %v1013_v38, %v1259_v35  ;;  %v992_v46 = vadd.f32 %v991_v42, %v990_v39  ;;  %v1016_v47 = vadd.f32 %v1015_v43, %v1014_v40 }
 0x100   : > { %v747_v48 = vadd.f32 %v1264_v41, %v724_v44  ;;  %v755_v49 = vadd.f32 %v1264_v41, %v732_v45  ;;  %v725_v50 = vmul.f32 %v992_v46, %v1259_v35  ;;  %v733_v51 = vmul.f32 %v1016_v47, %v1259_v35 }
 0x102   : > { %v763_v52 = vmax.f32 %v747_v48, 0.0  ;;  %v771_v53 = vmax.f32 %v755_v49, 0.0  ;;  %v748_v54 = vadd.f32 %v1264_v41, %v725_v50  ;;  %v756_v55 = vadd.f32 %v1264_v41, %v733_v51  ;;  %v993_v56 = vpop.f32.mrb[4].mxu0  ;;  %v1017_v57 = vpop.f32.mrb[4].mxu1 }
 0x103   : > { %v994_v58 = vpop.f32.mrb[5].mxu0  ;;  %v1018_v59 = vpop.f32.mrb[5].mxu1 }
 0x104   : > { %779 = vst [vmem:[%s1277_s15] sm:$0xff] %v763_v52  ;;  %787 = vst [vmem:[%s1277_s15 + $0x40] sm:$0xff] %v771_v53  ;;  %v764_v60 = vmax.f32 %v748_v54, 0.0  ;;  %v772_v61 = vmax.f32 %v756_v55, 0.0  ;;  %v995_v62 = vadd.f32 %v994_v58, %v993_v56  ;;  %v1019_v63 = vadd.f32 %v1018_v59, %v1017_v57  ;;  %v996_v0 = vpop.f32.mrb[6].mxu0  ;;  %v1020_v1 = vpop.f32.mrb[6].mxu1 }
 0x105   : > { %v997_v2 = vpop.f32.mrb[7].mxu0  ;;  %v1021_v3 = vpop.f32.mrb[7].mxu1 }
 0x106   : > { %780 = vst [vmem:[%s1277_s15 + $0x8] sm:$0xff] %v764_v60  ;;  %788 = vst [vmem:[%s1277_s15 + $0x48] sm:$0xff] %v772_v61  ;;  %v726_v4 = vmul.f32 %v995_v62, %v1259_v35  ;;  %v734_v5 = vmul.f32 %v1019_v63, %v1259_v35  ;;  %v998_v6 = vadd.f32 %v997_v2, %v996_v0 }
 0x107   : > { %v1022_v7 = vadd.f32 %v1021_v3, %v1020_v1 }
 0x108   : > { %v749_v8 = vadd.f32 %v1264_v41, %v726_v4  ;;  %v757_v9 = vadd.f32 %v1264_v41, %v734_v5  ;;  %v727_v10 = vmul.f32 %v998_v6, %v1259_v35 }
 0x109   : > { %v735_v11 = vmul.f32 %v1022_v7, %v1259_v35 }
 0x10a   : > { %v765_v12 = vmax.f32 %v749_v8, 0.0  ;;  %v773_v13 = vmax.f32 %v757_v9, 0.0  ;;  %v750_v14 = vadd.f32 %v1264_v41, %v727_v10  ;;  %v999_v16 = vpop.f32.mrb[8].mxu0  ;;  %v1023_v17 = vpop.f32.mrb[8].mxu1 }
 0x10b   : > { %v758_v15 = vadd.f32 %v1264_v41, %v735_v11  ;;  %v1000_v18 = vpop.f32.mrb[9].mxu0  ;;  %v1024_v19 = vpop.f32.mrb[9].mxu1 }
 0x10c   : > { %781 = vst [vmem:[%s1277_s15 + $0x10] sm:$0xff] %v765_v12  ;;  %789 = vst [vmem:[%s1277_s15 + $0x50] sm:$0xff] %v773_v13  ;;  %v766_v20 = vmax.f32 %v750_v14, 0.0  ;;  %v1001_v22 = vadd.f32 %v1000_v18, %v999_v16  ;;  %v1025_v23 = vadd.f32 %v1024_v19, %v1023_v17  ;;  %v1002_v24 = vpop.f32.mrb[10].mxu0  ;;  %v1026_v25 = vpop.f32.mrb[10].mxu1 }
 0x10d   : > { %v774_v21 = vmax.f32 %v758_v15, 0.0  ;;  %v1003_v26 = vpop.f32.mrb[11].mxu0  ;;  %v1027_v27 = vpop.f32.mrb[11].mxu1 }
 0x10e   : > { %782 = vst [vmem:[%s1277_s15 + $0x18] sm:$0xff] %v766_v20  ;;  %v728_v28 = vmul.f32 %v1001_v22, %v1259_v35  ;;  %v736_v29 = vmul.f32 %v1025_v23, %v1259_v35  ;;  %v1004_v30 = vadd.f32 %v1003_v26, %v1002_v24  ;;  %v1028_v31 = vadd.f32 %v1027_v27, %v1026_v25 }
 0x10f   : > { %790 = vst [vmem:[%s1277_s15 + $0x58] sm:$0xff] %v774_v21 }
 0x110   : > { %v751_v32 = vadd.f32 %v1264_v41, %v728_v28  ;;  %v759_v33 = vadd.f32 %v1264_v41, %v736_v29  ;;  %v729_v34 = vmul.f32 %v1004_v30, %v1259_v35  ;;  %v737_v36 = vmul.f32 %v1028_v31, %v1259_v35 }
 0x112   : > { %v767_v37 = vmax.f32 %v751_v32, 0.0  ;;  %v775_v38 = vmax.f32 %v759_v33, 0.0  ;;  %v752_v39 = vadd.f32 %v1264_v41, %v729_v34  ;;  %v760_v40 = vadd.f32 %v1264_v41, %v737_v36  ;;  %v1005_v42 = vpop.f32.mrb[12].mxu0  ;;  %v1029_v43 = vpop.f32.mrb[12].mxu1 }
 0x113   : > { %v1006_v44 = vpop.f32.mrb[13].mxu0  ;;  %v1030_v45 = vpop.f32.mrb[13].mxu1 }
 0x114   : > { %783 = vst [vmem:[%s1277_s15 + $0x20] sm:$0xff] %v767_v37  ;;  %791 = vst [vmem:[%s1277_s15 + $0x60] sm:$0xff] %v775_v38  ;;  %v768_v46 = vmax.f32 %v752_v39, 0.0  ;;  %v776_v47 = vmax.f32 %v760_v40, 0.0  ;;  %v1007_v48 = vadd.f32 %v1006_v44, %v1005_v42  ;;  %v1031_v49 = vadd.f32 %v1030_v45, %v1029_v43  ;;  %v1008_v50 = vpop.f32.mrb[14].mxu0  ;;  %v1032_v51 = vpop.f32.mrb[14].mxu1 }
 0x115   : > { %v1009_v52 = vpop.f32.mrb[15].mxu0  ;;  %v1033_v53 = vpop.f32.mrb[15].mxu1 }
 0x116   : > { %784 = vst [vmem:[%s1277_s15 + $0x28] sm:$0xff] %v768_v46  ;;  %792 = vst [vmem:[%s1277_s15 + $0x68] sm:$0xff] %v776_v47  ;;  %v730_v54 = vmul.f32 %v1007_v48, %v1259_v35  ;;  %v738_v55 = vmul.f32 %v1031_v49, %v1259_v35  ;;  %v1010_v56 = vadd.f32 %v1009_v52, %v1008_v50 }
 0x117   : > { %v1034_v57 = vadd.f32 %v1033_v53, %v1032_v51 }
 0x118   : > { %v753_v58 = vadd.f32 %v1264_v41, %v730_v54  ;;  %v761_v59 = vadd.f32 %v1264_v41, %v738_v55  ;;  %v731_v60 = vmul.f32 %v1010_v56, %v1259_v35 }
 0x119   : > { %v739_v61 = vmul.f32 %v1034_v57, %v1259_v35 }
 0x11a   : > { %v769_v62 = vmax.f32 %v753_v58, 0.0  ;;  %v777_v63 = vmax.f32 %v761_v59, 0.0  ;;  %v754_v0 = vadd.f32 %v1264_v41, %v731_v60 }
 0x11b   : > { %v762_v1 = vadd.f32 %v1264_v41, %v739_v61 }
 0x11c   : > { %785 = vst [vmem:[%s1277_s15 + $0x30] sm:$0xff] %v769_v62  ;;  %793 = vst [vmem:[%s1277_s15 + $0x70] sm:$0xff] %v777_v63  ;;  %v770_v2 = vmax.f32 %v754_v0, 0.0 }
 0x11d   : > { %v778_v3 = vmax.f32 %v762_v1, 0.0 }
 0x11e   : > { %786 = vst [vmem:[%s1277_s15 + $0x38] sm:$0xff] %v770_v2 }
 0x11f   : > { %794 = vst [vmem:[%s1277_s15 + $0x78] sm:$0xff] %v778_v3 }
 0x120 PF: > { %s14_s17 = sadd.s32 1, %s1137_s17   ;;  %s1335_s15 = smov %s1133_s16 }
 0x121   : > { %p11_p5 = scmp.ge.s32.totalorder %s14_s17, 6   ;;  %s1336_s16 = smov %s1338_s18 }
 0x123   :  { %13 = sbr.rel (!%p11_p5) target bundleno = 2 (0x2), region = 83 }

// kernel: resnet_up_forward.27
= control target key start
LH: loop header
LB: loop body
LE: loop exit
PB: predicated region body
PF: predicated region fallthrough
CT: control target
= control target key end

     0   :  { %s478_s0 = inlined_call_operand.vmem [shape: f32[9,64,128], index: 0, kind: input, shape index: {}]   ;;  %s479_s1 = inlined_call_operand.vmem [shape: f32[64,128], index: 1, kind: output, shape index: {}]  }
   0x1   :  { %v8_v0 = vld [vmem:[%s478_s0] sm:$0xff]  ;;  %v9_v6 = vld [vmem:[%s478_s0 + $0x8] sm:$0xff]  ;;  %v10_v15 = vld [vmem:[%s478_s0 + $0x10] sm:$0xff] }
   0x2   :  { %v164_v1 = vld [vmem:[%s478_s0 + $0x40] sm:$0xff]  ;;  %v165_v7 = vld [vmem:[%s478_s0 + $0x48] sm:$0xff]  ;;  %v166_v16 = vld [vmem:[%s478_s0 + $0x50] sm:$0xff] }
   0x3   :  { %v172_v2 = vld [vmem:[%s478_s0 + $0x80] sm:$0xff]  ;;  %v25_v3 = vmax.f32 %v8_v0, %v164_v1  ;;  %v173_v8 = vld [vmem:[%s478_s0 + $0x88] sm:$0xff]  ;;  %v26_v10 = vmax.f32 %v9_v6, %v165_v7  ;;  %v174_v17 = vld [vmem:[%s478_s0 + $0x90] sm:$0xff]  ;;  %v27_v20 = vmax.f32 %v10_v15, %v166_v16 }
   0x4   :  { %v180_v4 = vld [vmem:[%s478_s0 + $0xc0] sm:$0xff]  ;;  %v181_v13 = vld [vmem:[%s478_s0 + $0xc8] sm:$0xff]  ;;  %v182_v24 = vld [vmem:[%s478_s0 + $0xd0] sm:$0xff] }
   0x5   :  { %v42_v5 = vmax.f32 %v25_v3, %v172_v2  ;;  %v188_v9 = vld [vmem:[%s478_s0 + $0x100] sm:$0xff]  ;;  %v43_v14 = vmax.f32 %v26_v10, %v173_v8  ;;  %v189_v19 = vld [vmem:[%s478_s0 + $0x108] sm:$0xff]  ;;  %v44_v26 = vmax.f32 %v27_v20, %v174_v17  ;;  %v11_v27 = vld [vmem:[%s478_s0 + $0x18] sm:$0xff] }
   0x6   :  { %v196_v12 = vld [vmem:[%s478_s0 + $0x140] sm:$0xff]  ;;  %v197_v23 = vld [vmem:[%s478_s0 + $0x148] sm:$0xff]  ;;  %v167_v28 = vld [vmem:[%s478_s0 + $0x58] sm:$0xff] }
   0x7   :  { %v59_v11 = vmax.f32 %v42_v5, %v180_v4  ;;  %v204_v21 = vld [vmem:[%s478_s0 + $0x180] sm:$0xff]  ;;  %v60_v22 = vmax.f32 %v43_v14, %v181_v13  ;;  %v175_v29 = vld [vmem:[%s478_s0 + $0x98] sm:$0xff]  ;;  %v190_v33 = vld [vmem:[%s478_s0 + $0x110] sm:$0xff]  ;;  %v28_v34 = vmax.f32 %v11_v27, %v167_v28  ;;  %v61_v37 = vmax.f32 %v44_v26, %v182_v24 }
   0x8   :  { %v212_v30 = vld [vmem:[%s478_s0 + $0x1c0] sm:$0xff]  ;;  %v205_v36 = vld [vmem:[%s478_s0 + $0x188] sm:$0xff]  ;;  %v198_v38 = vld [vmem:[%s478_s0 + $0x150] sm:$0xff] }
   0x9   :  { %v76_v18 = vmax.f32 %v59_v11, %v188_v9  ;;  %v220_v31 = vld [vmem:[%s478_s0 + $0x200] sm:$0xff]  ;;  %v77_v32 = vmax.f32 %v60_v22, %v189_v19  ;;  %v183_v39 = vld [vmem:[%s478_s0 + $0xd8] sm:$0xff]  ;;  %v45_v41 = vmax.f32 %v28_v34, %v175_v29  ;;  %v213_v46 = vld [vmem:[%s478_s0 + $0x1c8] sm:$0xff]  ;;  %v78_v48 = vmax.f32 %v61_v37, %v190_v33 }
   0xa   :  { %v12_v42 = vld [vmem:[%s478_s0 + $0x20] sm:$0xff]  ;;  %v221_v47 = vld [vmem:[%s478_s0 + $0x208] sm:$0xff]  ;;  %v191_v49 = vld [vmem:[%s478_s0 + $0x118] sm:$0xff] }
   0xb   :  { %v93_v25 = vmax.f32 %v76_v18, %v196_v12  ;;  %v94_v40 = vmax.f32 %v77_v32, %v197_v23  ;;  %v168_v43 = vld [vmem:[%s478_s0 + $0x60] sm:$0xff]  ;;  %v206_v52 = vld [vmem:[%s478_s0 + $0x190] sm:$0xff]  ;;  %v62_v53 = vmax.f32 %v45_v41, %v183_v39  ;;  %v199_v54 = vld [vmem:[%s478_s0 + $0x158] sm:$0xff]  ;;  %v95_v57 = vmax.f32 %v78_v48, %v198_v38 }
   0xc   :  { %v176_v44 = vld [vmem:[%s478_s0 + $0xa0] sm:$0xff]  ;;  %v29_v50 = vmax.f32 %v12_v42, %v168_v43  ;;  %v13_v59 = vld [vmem:[%s478_s0 + $0x28] sm:$0xff]  ;;  %v214_v63 = vld [vmem:[%s478_s0 + $0x1d0] sm:$0xff] }
   0xd   :  { %v110_v35 = vmax.f32 %v93_v25, %v204_v21  ;;  %v111_v51 = vmax.f32 %v94_v40, %v205_v36  ;;  %v184_v55 = vld [vmem:[%s478_s0 + $0xe0] sm:$0xff]  ;;  %v169_v60 = vld [vmem:[%s478_s0 + $0x68] sm:$0xff]  ;;  %v222_v0 = vld [vmem:[%s478_s0 + $0x210] sm:$0xff]  ;;  %v79_v1 = vmax.f32 %v62_v53, %v191_v49  ;;  %v112_v4 = vmax.f32 %v95_v57, %v206_v52 }
   0xe   :  { %v46_v58 = vmax.f32 %v29_v50, %v176_v44  ;;  %v177_v61 = vld [vmem:[%s478_s0 + $0xa8] sm:$0xff]  ;;  %v192_v2 = vld [vmem:[%s478_s0 + $0x120] sm:$0xff]  ;;  %v30_v3 = vmax.f32 %v13_v59, %v169_v60  ;;  %v207_v5 = vld [vmem:[%s478_s0 + $0x198] sm:$0xff] }
   0xf   :  { %v127_v45 = vmax.f32 %v110_v35, %v212_v30  ;;  %v128_v62 = vmax.f32 %v111_v51, %v213_v46  ;;  %v200_v7 = vld [vmem:[%s478_s0 + $0x160] sm:$0xff]  ;;  %v185_v8 = vld [vmem:[%s478_s0 + $0xe8] sm:$0xff]  ;;  %v96_v10 = vmax.f32 %v79_v1, %v199_v54  ;;  %v14_v12 = vld [vmem:[%s478_s0 + $0x30] sm:$0xff]  ;;  %v129_v15 = vmax.f32 %v112_v4, %v214_v63 }
  0x10   :  { %v63_v6 = vmax.f32 %v46_v58, %v184_v55  ;;  %v47_v11 = vmax.f32 %v30_v3, %v177_v61  ;;  %v170_v13 = vld [vmem:[%s478_s0 + $0x70] sm:$0xff]  ;;  %v215_v16 = vld [vmem:[%s478_s0 + $0x1d8] sm:$0xff]  ;;  %v193_v19 = vld [vmem:[%s478_s0 + $0x128] sm:$0xff] }
  0x11   :  { %v144_v56 = vmax.f32 %v127_v45, %v220_v31  ;;  %v145_v9 = vmax.f32 %v128_v62, %v221_v47  ;;  %v178_v14 = vld [vmem:[%s478_s0 + $0xb0] sm:$0xff]  ;;  %v223_v17 = vld [vmem:[%s478_s0 + $0x218] sm:$0xff]  ;;  %v31_v20 = vmax.f32 %v14_v12, %v170_v13  ;;  %v113_v21 = vmax.f32 %v96_v10, %v207_v5  ;;  %v208_v22 = vld [vmem:[%s478_s0 + $0x1a0] sm:$0xff] }
  0x12   :  { %v80_v18 = vmax.f32 %v63_v6, %v192_v2  ;;  %v64_v23 = vmax.f32 %v47_v11, %v185_v8  ;;  %v201_v24 = vld [vmem:[%s478_s0 + $0x168] sm:$0xff]  ;;  %v186_v25 = vld [vmem:[%s478_s0 + $0xf0] sm:$0xff]  ;;  %v146_v26 = vmax.f32 %v129_v15, %v222_v0  ;;  %v15_v29 = vld [vmem:[%s478_s0 + $0x38] sm:$0xff] }
  0x13   :  { %152 = vst [vmem:[%s479_s1] sm:$0xff] %v144_v56  ;;  %153 = vst [vmem:[%s479_s1 + $0x8] sm:$0xff] %v145_v9  ;;  %v48_v28 = vmax.f32 %v31_v20, %v178_v14  ;;  %v171_v30 = vld [vmem:[%s478_s0 + $0x78] sm:$0xff]  ;;  %v130_v32 = vmax.f32 %v113_v21, %v215_v16  ;;  %v216_v33 = vld [vmem:[%s478_s0 + $0x1e0] sm:$0xff] }
  0x14   :  { %v97_v27 = vmax.f32 %v80_v18, %v200_v7  ;;  %v179_v31 = vld [vmem:[%s478_s0 + $0xb8] sm:$0xff]  ;;  %v81_v34 = vmax.f32 %v64_v23, %v193_v19  ;;  %v194_v35 = vld [vmem:[%s478_s0 + $0x130] sm:$0xff]  ;;  %v32_v36 = vmax.f32 %v15_v29, %v171_v30  ;;  %154 = vst [vmem:[%s479_s1 + $0x10] sm:$0xff] %v146_v26  ;;  %v209_v38 = vld [vmem:[%s478_s0 + $0x1a8] sm:$0xff] }
  0x15   :  { %v65_v39 = vmax.f32 %v48_v28, %v186_v25  ;;  %v187_v40 = vld [vmem:[%s478_s0 + $0xf8] sm:$0xff]  ;;  %v147_v41 = vmax.f32 %v130_v32, %v223_v17  ;;  %v224_v42 = vld [vmem:[%s478_s0 + $0x220] sm:$0xff]  ;;  %v202_v44 = vld [vmem:[%s478_s0 + $0x170] sm:$0xff] }
  0x16   :  { %v114_v37 = vmax.f32 %v97_v27, %v208_v22  ;;  %v98_v43 = vmax.f32 %v81_v34, %v201_v24  ;;  %v49_v45 = vmax.f32 %v32_v36, %v179_v31  ;;  %v217_v47 = vld [vmem:[%s478_s0 + $0x1e8] sm:$0xff]  ;;  %v195_v49 = vld [vmem:[%s478_s0 + $0x138] sm:$0xff]  ;;  %v210_v51 = vld [vmem:[%s478_s0 + $0x1b0] sm:$0xff] }
  0x17   :  { %v82_v48 = vmax.f32 %v65_v39, %v194_v35  ;;  %155 = vst [vmem:[%s479_s1 + $0x18] sm:$0xff] %v147_v41  ;;  %v225_v54 = vld [vmem:[%s478_s0 + $0x228] sm:$0xff]  ;;  %v203_v56 = vld [vmem:[%s478_s0 + $0x178] sm:$0xff]  ;;  %v218_v58 = vld [vmem:[%s478_s0 + $0x1f0] sm:$0xff] }
  0x18   :  { %v131_v46 = vmax.f32 %v114_v37, %v216_v33  ;;  %v115_v50 = vmax.f32 %v98_v43, %v209_v38  ;;  %v66_v52 = vmax.f32 %v49_v45, %v187_v40  ;;  %v211_v61 = vld [vmem:[%s478_s0 + $0x1b8] sm:$0xff]  ;;  %v226_v63 = vld [vmem:[%s478_s0 + $0x230] sm:$0xff] }
  0x19   :  { %v99_v55 = vmax.f32 %v82_v48, %v202_v44  ;;  %v219_v2 = vld [vmem:[%s478_s0 + $0x1f8] sm:$0xff] }
  0x1a   :  { %v148_v53 = vmax.f32 %v131_v46, %v224_v42  ;;  %v132_v57 = vmax.f32 %v115_v50, %v217_v47  ;;  %v83_v59 = vmax.f32 %v66_v52, %v195_v49  ;;  %v227_v5 = vld [vmem:[%s478_s0 + $0x238] sm:$0xff] }
  0x1b   :  { %v116_v60 = vmax.f32 %v99_v55, %v210_v51 }
  0x1c   :  { %156 = vst [vmem:[%s479_s1 + $0x20] sm:$0xff] %v148_v53  ;;  %v149_v62 = vmax.f32 %v132_v57, %v225_v54  ;;  %v100_v0 = vmax.f32 %v83_v59, %v203_v56 }
  0x1d   :  { %v133_v1 = vmax.f32 %v116_v60, %v218_v58 }
  0x1e   :  { %157 = vst [vmem:[%s479_s1 + $0x28] sm:$0xff] %v149_v62  ;;  %v117_v3 = vmax.f32 %v100_v0, %v211_v61 }
  0x1f   :  { %v150_v4 = vmax.f32 %v133_v1, %v226_v63 }
  0x20   :  { %v134_v6 = vmax.f32 %v117_v3, %v219_v2 }
  0x21   :  { %158 = vst [vmem:[%s479_s1 + $0x30] sm:$0xff] %v150_v4 }
  0x22   :  { %v151_v7 = vmax.f32 %v134_v6, %v227_v5 }
  0x24   :  { %159 = vst [vmem:[%s479_s1 + $0x38] sm:$0xff] %v151_v7 }

// kernel: resnet_up_forward.28
= control target key start
LH: loop header
LB: loop body
LE: loop exit
PB: predicated region body
PF: predicated region fallthrough
CT: control target
= control target key end

     0   :  { %s1599_s15 = smov 0   ;;  %s1601_s16 = smov 0   ;;  %s1858_s0 = inlined_call_operand.vmem [shape: bf16[128,768], index: 0, kind: input, shape index: {}]   ;;  %s1859_s1 = inlined_call_operand.vmem [shape: bf16[768,128], index: 1, kind: input, shape index: {}]   ;;  %s1860_s2 = inlined_call_operand.vmem [shape: f32[1,128], index: 2, kind: input, shape index: {}]   ;;  %s1861_s3 = inlined_call_operand.vmem [shape: f32[1,128], index: 3, kind: input, shape index: {}]   ;;  %s1862_s4 = inlined_call_operand.vmem [shape: f32[128,128], index: 4, kind: output, shape index: {}]  }
   0x1   :  { %s1603_s17 = smov 0   ;;  %s1605_s18 = smov 0  }
   0x2   :  { %s1607_s19 = smov 0  }
   0x3 LB: > { %s26_s20 = sadd.s32 1, %s1567_s18  ;;  %p49_p1 = scmp.ne.s32.totalorder %s1559_s16, %s1555_s15  ;;  %s1571_s19 = sphi %s1607_s19, %s14_s19   ;;  %s1567_s18 = sphi %s1605_s18, %s1866_s18   ;;  %s1563_s17 = sphi %s1603_s17, %s1865_s17   ;;  %s1559_s16 = sphi %s1601_s16, %s1864_s16   ;;  %s1555_s15 = sphi %s1599_s15, %s1863_s15  }
   0x4   : > { %p27_p0 = scmp.ge.s32.totalorder %s26_s20, 2  ;;  %p50_p2 = scmp.eq.s32.totalorder %s1571_s19, 0 }
   0x5   : > { %s42_s22 = sadd.s32 1, %s1559_s16  ;;  %p1229_p5 = scmp.ge.s32.totalorder %s1571_s19, 2 }
   0x6   : > { %s1868_s20 = smov (%p27_p0, %s26_s20), 0  ;;  %p51_p3 = por %p50_p2, %p49_p1 }
   0x7   : > { %s38_s21 = ssub.s32 %s1567_s18, %s1868_s20  ;;  %195 = sbr.rel (%p1229_p5) target bundleno = 37 (0x25), region = 24 }
   0x8   : > { %p40_p4 = scmp.eq.s32.totalorder %s38_s21, 0 }
   0xa   : > { %s1634_s23 = scalar_select %p40_p4, %s1559_s16, %s42_s22  }
   0xe   : > { %198 = sbr.rel (!%p51_p3) target bundleno = 37 (0x25), region = 28  ;;  %s200_s24 = sand.u32 (%p51_p3), 1, %s1559_s16  }
   0xf   : > { %s1321_s25 = smul.u32 (%p51_p3), 12, %s1567_s18 }
  0x10   : > { %s1434_s26 = smul.u32 (%p51_p3), 192, %s200_s24 }
  0x11   : > { %s1642_s29 = scalar_lea.vmem (%p51_p3), %s1858_s0, %s1321_s25 }
  0x12   : > { %v223_v0 = vld [vmem:[%s1642_s29] sm:$0xff] (%p51_p3)  ;;  %v225_v1 = vld [vmem:[%s1642_s29 + $0x18] sm:$0xff] (%p51_p3)  ;;  %v227_v2 = vld [vmem:[%s1642_s29 + $0x30] sm:$0xff] (%p51_p3)  ;;  %s1647_s30 = scalar_lea.vmem (%p51_p3), [#allocation3], %s1434_s26 }
  0x13   : > { %224 = vst [vmem:[%s1647_s30] sm:$0xff] (%p51_p3), %v223_v0  ;;  %226 = vst [vmem:[%s1647_s30 + $0xc] sm:$0xff] (%p51_p3), %v225_v1  ;;  %v229_v3 = vld [vmem:[%s1642_s29 + $0x48] sm:$0xff] (%p51_p3)  ;;  %v231_v4 = vld [vmem:[%s1642_s29 + $0x60] sm:$0xff] (%p51_p3) }
  0x14   : > { %228 = vst [vmem:[%s1647_s30 + $0x18] sm:$0xff] (%p51_p3), %v227_v2  ;;  %v233_v5 = vld [vmem:[%s1642_s29 + $0x78] sm:$0xff] (%p51_p3)  ;;  %230 = vst [vmem:[%s1647_s30 + $0x24] sm:$0xff] (%p51_p3), %v229_v3  ;;  %v235_v6 = vld [vmem:[%s1642_s29 + $0x90] sm:$0xff] (%p51_p3) }
  0x15   : > { %232 = vst [vmem:[%s1647_s30 + $0x30] sm:$0xff] %v231_v4  ;;  %234 = vst [vmem:[%s1647_s30 + $0x3c] sm:$0xff] %v233_v5  ;;  %v237_v7 = vld [vmem:[%s1642_s29 + $0xa8] sm:$0xff]  ;;  %v239_v8 = vld [vmem:[%s1642_s29 + $0xc0] sm:$0xff] }
  0x16   : > { %236 = vst [vmem:[%s1647_s30 + $0x48] sm:$0xff] %v235_v6  ;;  %238 = vst [vmem:[%s1647_s30 + $0x54] sm:$0xff] %v237_v7  ;;  %v241_v9 = vld [vmem:[%s1642_s29 + $0xd8] sm:$0xff]  ;;  %v243_v10 = vld [vmem:[%s1642_s29 + $0xf0] sm:$0xff] }
  0x17   : > { %240 = vst [vmem:[%s1647_s30 + $0x60] sm:$0xff] %v239_v8  ;;  %v245_v11 = vld [vmem:[%s1642_s29 + $0x108] sm:$0xff]  ;;  %242 = vst [vmem:[%s1647_s30 + $0x6c] sm:$0xff] %v241_v9  ;;  %v247_v12 = vld [vmem:[%s1642_s29 + $0x120] sm:$0xff] }
  0x18   : > { %244 = vst [vmem:[%s1647_s30 + $0x78] sm:$0xff] %v243_v10  ;;  %246 = vst [vmem:[%s1647_s30 + $0x84] sm:$0xff] %v245_v11  ;;  %v249_v13 = vld [vmem:[%s1642_s29 + $0x138] sm:$0xff]  ;;  %v251_v14 = vld [vmem:[%s1642_s29 + $0x150] sm:$0xff] }
  0x19   : > { %248 = vst [vmem:[%s1647_s30 + $0x90] sm:$0xff] %v247_v12  ;;  %250 = vst [vmem:[%s1647_s30 + $0x9c] sm:$0xff] %v249_v13  ;;  %v253_v15 = vld [vmem:[%s1642_s29 + $0x168] sm:$0xff]  ;;  %v1233_v17 = vld [vmem:[%s1642_s29 + $0x20] sm:$0xf] }
  0x1a   : > { %252 = vst [vmem:[%s1647_s30 + $0xa8] sm:$0xff] %v251_v14  ;;  %v1231_v16 = vld [vmem:[%s1642_s29 + $0x8] sm:$0xf]  ;;  %254 = vst [vmem:[%s1647_s30 + $0xb4] sm:$0xff] %v253_v15  ;;  %v1235_v18 = vld [vmem:[%s1642_s29 + $0x38] sm:$0xf] }
  0x1b   : > { %1232 = vst [vmem:[%s1647_s30 + $0x8] sm:$0xf] %v1231_v16  ;;  %1234 = vst [vmem:[%s1647_s30 + $0x14] sm:$0xf] %v1233_v17  ;;  %v1237_v19 = vld [vmem:[%s1642_s29 + $0x50] sm:$0xf] }
  0x1c   : > { %v1239_v20 = vld [vmem:[%s1642_s29 + $0x68] sm:$0xf]  ;;  %1236 = vst [vmem:[%s1647_s30 + $0x20] sm:$0xf] %v1235_v18  ;;  %1238 = vst [vmem:[%s1647_s30 + $0x2c] sm:$0xf] %v1237_v19 }
  0x1d   : > { %1240 = vst [vmem:[%s1647_s30 + $0x38] sm:$0xf] %v1239_v20  ;;  %v1241_v21 = vld [vmem:[%s1642_s29 + $0x80] sm:$0xf]  ;;  %v1243_v22 = vld [vmem:[%s1642_s29 + $0x98] sm:$0xf] }
  0x1e   : > { %v1245_v23 = vld [vmem:[%s1642_s29 + $0xb0] sm:$0xf]  ;;  %1242 = vst [vmem:[%s1647_s30 + $0x44] sm:$0xf] %v1241_v21  ;;  %1244 = vst [vmem:[%s1647_s30 + $0x50] sm:$0xf] %v1243_v22 }
  0x1f   : > { %1246 = vst [vmem:[%s1647_s30 + $0x5c] sm:$0xf] %v1245_v23  ;;  %v1247_v24 = vld [vmem:[%s1642_s29 + $0xc8] sm:$0xf]  ;;  %v1249_v25 = vld [vmem:[%s1642_s29 + $0xe0] sm:$0xf] }
  0x20   : > { %v1251_v26 = vld [vmem:[%s1642_s29 + $0xf8] sm:$0xf]  ;;  %1248 = vst [vmem:[%s1647_s30 + $0x68] sm:$0xf] %v1247_v24  ;;  %1250 = vst [vmem:[%s1647_s30 + $0x74] sm:$0xf] %v1249_v25 }
  0x21   : > { %1252 = vst [vmem:[%s1647_s30 + $0x80] sm:$0xf] %v1251_v26  ;;  %v1253_v27 = vld [vmem:[%s1642_s29 + $0x110] sm:$0xf]  ;;  %v1255_v28 = vld [vmem:[%s1642_s29 + $0x128] sm:$0xf] }
  0x22   : > { %v1257_v29 = vld [vmem:[%s1642_s29 + $0x140] sm:$0xf]  ;;  %1254 = vst [vmem:[%s1647_s30 + $0x8c] sm:$0xf] %v1253_v27  ;;  %1256 = vst [vmem:[%s1647_s30 + $0x98] sm:$0xf] %v1255_v28 }
  0x23   : > { %1258 = vst [vmem:[%s1647_s30 + $0xa4] sm:$0xf] %v1257_v29  ;;  %v1259_v30 = vld [vmem:[%s1642_s29 + $0x158] sm:$0xf]  ;;  %v1261_v31 = vld [vmem:[%s1642_s29 + $0x170] sm:$0xf] }
  0x24   : > { %1260 = vst [vmem:[%s1647_s30 + $0xb0] sm:$0xf] %v1259_v30  ;;  %1262 = vst [vmem:[%s1647_s30 + $0xbc] sm:$0xf] %v1261_v31 }
  0x25 PF: > { %p1263_p6 = scmp.ge.s32.totalorder %s1571_s19, 1  ;;  %p310_p7 = scmp.lt.s32.totalorder %s1571_s19, 3 }
  0x27   : > { %p311_p8 = pnand %p1263_p6, %p310_p7 }
  0x28   : > { %s317_s5 = sand.u32 (!%p311_p8), 1, %s1555_s15   ;;  %s361_s6 = smul.u32 (!%p311_p8), 48, %s1563_s17 }
  0x29   : > { %314 = sbr.rel (%p311_p8) target bundleno = 383 (0x17f), region = 58  ;;  %p1265_p10 = scmp.ne.s32.totalorder (!%p311_p8), %s1563_s17, 0 }
  0x2a   : > { %s1435_s7 = smul.u32 (!%p311_p8), 192, %s317_s5  ;;  %p362_p9 = scmp.lt.s32.totalorder (!%p311_p8), %s361_s6, 95 }
  0x2c   : > { %s1719_s12 = scalar_lea.vmem (!%p311_p8), [#allocation3], %s1435_s7 }
  0x30   : > { %s1870_s6 = smov (!%p362_p9, %s361_s6), 95  ;;  %389 = sbr.rel (%p1265_p10) target bundleno = 58 (0x3a), region = 66 }
  0x31   : > { %s1264_s8 = sshll.u32 %s1870_s6, 2  ;;  %v1573_v32 = vmov (!%p1265_p10), 0.0  }
  0x32   : > { %s1717_s11 = scalar_lea.vmem %s1859_s1, %s1264_s8  ;;  %390 = vst [vmem:[#allocation2] sm:$0xff] (!%p1265_p10), %v1573_v32  ;;  %391 = vst [vmem:[#allocation2 + $0x8] sm:$0xff] (!%p1265_p10), %v1573_v32 }
  0x33   : > { %392 = vst [vmem:[#allocation2 + $0x10] sm:$0xff] (!%p1265_p10), %v1573_v32  ;;  %393 = vst [vmem:[#allocation2 + $0x18] sm:$0xff] (!%p1265_p10), %v1573_v32 }
  0x34   : > { %394 = vst [vmem:[#allocation2 + $0x20] sm:$0xff] (!%p1265_p10), %v1573_v32  ;;  %395 = vst [vmem:[#allocation2 + $0x28] sm:$0xff] (!%p1265_p10), %v1573_v32 }
  0x35   : > { %396 = vst [vmem:[#allocation2 + $0x30] sm:$0xff] (!%p1265_p10), %v1573_v32  ;;  %397 = vst [vmem:[#allocation2 + $0x38] sm:$0xff] (!%p1265_p10), %v1573_v32 }
  0x36   : > { %398 = vst [vmem:[#allocation2 + $0x40] sm:$0xff] (!%p1265_p10), %v1573_v32  ;;  %399 = vst [vmem:[#allocation2 + $0x48] sm:$0xff] (!%p1265_p10), %v1573_v32 }
  0x37   : > { %400 = vst [vmem:[#allocation2 + $0x50] sm:$0xff] %v1573_v32  ;;  %401 = vst [vmem:[#allocation2 + $0x58] sm:$0xff] %v1573_v32 }
  0x38   : > { %402 = vst [vmem:[#allocation2 + $0x60] sm:$0xff] %v1573_v32  ;;  %403 = vst [vmem:[#allocation2 + $0x68] sm:$0xff] %v1573_v32 }
  0x39   : > { %404 = vst [vmem:[#allocation2 + $0x70] sm:$0xff] %v1573_v32  ;;  %405 = vst [vmem:[#allocation2 + $0x78] sm:$0xff] %v1573_v32 }
  0x3a PF: > { %v1477_v33 = vld [vmem:[%s1717_s11 + $0x40] sm:$0xff]   ;;  %v1480_v36 = vld [vmem:[%s1717_s11 + $0x48] sm:$0xff]   ;;  %v1483_v39 = vld [vmem:[%s1717_s11 + $0x50] sm:$0xff]   ;;  %p1314_p11 = scmp.ne.s32.totalorder %s1563_s17, 1 }
  0x3b   : > { %v1478_v34 = vld [vmem:[%s1717_s11] sm:$0xff]   ;;  %1322 = vmatprep.subr.bf16.mxu0 %v1477_v33  ;;  %v1481_v37 = vld [vmem:[%s1717_s11 + $0x8] sm:$0xff]   ;;  %v1484_v40 = vld [vmem:[%s1717_s11 + $0x10] sm:$0xff]  }
  0x3c   : > { %v1479_v35 = vld [vmem:[%s1717_s11 + $0x80] sm:$0xff]   ;;  %1323 = vmatpush3.bf16.msra.mxu0 %v1478_v34  ;;  %v1482_v38 = vld [vmem:[%s1717_s11 + $0x88] sm:$0xff]   ;;  %v1485_v41 = vld [vmem:[%s1717_s11 + $0x90] sm:$0xff]  }
  0x3d   : > { %1402 = vmatprep.subr.bf16.mxu1 %v1479_v35  ;;  %1324 = vmatprep.subr.bf16.mxu0 %v1480_v36  ;;  %v1486_v42 = vld [vmem:[%s1717_s11 + $0x58] sm:$0xff]   ;;  %v1489_v45 = vld [vmem:[%s1717_s11 + $0x60] sm:$0xff]   ;;  %v1492_v48 = vld [vmem:[%s1717_s11 + $0x68] sm:$0xff]  }
  0x3e   : > { %1403 = vmatpush3.bf16.msra.mxu1 %v1479_v35  ;;  %v1487_v43 = vld [vmem:[%s1717_s11 + $0x18] sm:$0xff]   ;;  %v1491_v46 = vld [vmem:[%s1717_s11 + $0xa0] sm:$0xff]   ;;  %v1494_v49 = vld [vmem:[%s1717_s11 + $0xa8] sm:$0xff]  }
  0x3f   : > { %1404 = vmatprep.subr.bf16.mxu1 %v1482_v38  ;;  %v1488_v44 = vld [vmem:[%s1717_s11 + $0x98] sm:$0xff]   ;;  %v1490_v47 = vld [vmem:[%s1717_s11 + $0x20] sm:$0xff]   ;;  %v1493_v50 = vld [vmem:[%s1717_s11 + $0x28] sm:$0xff]  }
  0x40   : > { %1325 = vmatpush3.bf16.msra.mxu0 %v1481_v37  ;;  %v1495_v51 = vld [vmem:[%s1717_s11 + $0x70] sm:$0xff]   ;;  %v1498_v54 = vld [vmem:[%s1717_s11 + $0x78] sm:$0xff]   ;;  %v1501_v59 = vld [vmem:[%s1719_s12] ss:$12 sps:$4 sm:$0xff]  }
  0x41   : > { %1326 = vmatprep.subr.bf16.mxu0 %v1483_v39  ;;  %v1496_v52 = vld [vmem:[%s1717_s11 + $0x30] sm:$0xff]   ;;  %v1500_v55 = vld [vmem:[%s1717_s11 + $0xb8] sm:$0xff]   ;;  %v1505_v61 = vld [vmem:[%s1719_s12 + $0x20] ss:$12 sps:$4 sm:$0xff]  }
  0x42   : > { %1405 = vmatpush3.bf16.msra.mxu1 %v1482_v38  ;;  %v1497_v53 = vld [vmem:[%s1717_s11 + $0xb0] sm:$0xff]   ;;  %v1499_v58 = vld [vmem:[%s1717_s11 + $0x38] sm:$0xff]   ;;  %v1521_v5 = vld [vmem:[%s1719_s12 + $0x80] ss:$12 sps:$4 sm:$0xff]  }
  0x43   : > { %1406 = vmatprep.subr.bf16.mxu1 %v1485_v41  ;;  %v1503_v56 = vld [vmem:[%s1719_s12 + $0x4] ss:$12 sps:$4 sm:$0xff]   ;;  %v1504_v57 = vld [vmem:[%s1719_s12 + $0x8] ss:$12 sps:$4 sm:$0xff]   ;;  %v1514_v4 = vld [vmem:[%s1719_s12 + $0x4c] ss:$12 sps:$4 sm:$0xff]  }
  0x44   : > { %1327 = vmatpush3.bf16.msra.mxu0 %v1484_v40  ;;  %806 = vmatprep.mubr.bf16.mxu0 %v1503_v56  ;;  %v1506_v60 = vld [vmem:[%s1719_s12 + $0x1c] ss:$12 sps:$4 sm:$0xff]   ;;  %v1512_v62 = vld [vmem:[%s1719_s12 + $0x38] ss:$12 sps:$4 sm:$0xff]   ;;  %v1509_v0 = vld [vmem:[%s1719_s12 + $0x34] ss:$12 sps:$4 sm:$0xff]  }
  0x45   : > { %1328 = vmatprep.subr.bf16.mxu0 %v1486_v42  ;;  %1418 = vmatprep.mubr.bf16.mxu1 %v1504_v57  ;;  %v1508_v63 = vld [vmem:[%s1719_s12 + $0x18] ss:$12 sps:$4 sm:$0xff]   ;;  %v1513_v1 = vld [vmem:[%s1719_s12 + $0x50] ss:$12 sps:$4 sm:$0xff]   ;;  %v1520_v2 = vld [vmem:[%s1719_s12 + $0x68] ss:$12 sps:$4 sm:$0xff]  }
  0x46   : > { %1407 = vmatpush3.bf16.msra.mxu1 %v1485_v41  ;;  %v1511_v3 = vld [vmem:[%s1719_s12 + $0x30] ss:$12 sps:$4 sm:$0xff]   ;;  %v1528_v6 = vld [vmem:[%s1719_s12 + $0x98] ss:$12 sps:$4 sm:$0xff]   ;;  %v1516_v7 = vld [vmem:[%s1719_s12 + $0x48] ss:$12 sps:$4 sm:$0xff]  }
  0x47   : > { %1408 = vmatprep.subr.bf16.mxu1 %v1488_v44  ;;  %v1517_v8 = vld [vmem:[%s1719_s12 + $0x64] ss:$12 sps:$4 sm:$0xff]   ;;  %v1519_v10 = vld [vmem:[%s1719_s12 + $0x60] ss:$12 sps:$4 sm:$0xff]   ;;  %v1522_v11 = vld [vmem:[%s1719_s12 + $0x7c] ss:$12 sps:$4 sm:$0xff]  }
  0x48   : > { %1329 = vmatpush3.bf16.msra.mxu0 %v1487_v43  ;;  %v1529_v9 = vld [vmem:[%s1719_s12 + $0xb0] ss:$12 sps:$4 sm:$0xff]   ;;  %v1524_v12 = vld [vmem:[%s1719_s12 + $0x78] ss:$12 sps:$4 sm:$0xff]   ;;  %v1525_v13 = vld [vmem:[%s1719_s12 + $0x94] ss:$12 sps:$4 sm:$0xff]  }
  0x49   : > { %1330 = vmatprep.subr.bf16.mxu0 %v1489_v45  ;;  %v1527_v14 = vld [vmem:[%s1719_s12 + $0x90] ss:$12 sps:$4 sm:$0xff]   ;;  %v1530_v15 = vld [vmem:[%s1719_s12 + $0xac] ss:$12 sps:$4 sm:$0xff]   ;;  %v1532_v16 = vld [vmem:[%s1719_s12 + $0xa8] ss:$12 sps:$4 sm:$0xff]  }
  0x4a   : > { %1409 = vmatpush3.bf16.msra.mxu1 %v1488_v44  ;;  %v406_v23 = vld [vmem:[#allocation2] sm:$0xff]  ;;  %v407_v28 = vld [vmem:[#allocation2 + $0x8] sm:$0xff]  ;;  %v408_v38 = vld [vmem:[#allocation2 + $0x10] sm:$0xff] }
  0x4b   : > { %1410 = vmatprep.subr.bf16.mxu1 %v1491_v46  ;;  %v409_v44 = vld [vmem:[#allocation2 + $0x18] sm:$0xff] }
  0x4c   : > { %1331 = vmatpush3.bf16.msra.mxu0 %v1490_v47 }
  0x4d   : > { %1332 = vmatprep.subr.bf16.mxu0 %v1492_v48 }
  0x4e   : > { %1411 = vmatpush3.bf16.msra.mxu1 %v1491_v46 }
  0x4f   : > { %1412 = vmatprep.subr.bf16.mxu1 %v1494_v49 }
  0x50   : > { %1333 = vmatpush3.bf16.msra.mxu0 %v1493_v50 }
  0x51   : > { %1334 = vmatprep.subr.bf16.mxu0 %v1495_v51 }
  0x52   : > { %1413 = vmatpush3.bf16.msra.mxu1 %v1494_v49 }
  0x53   : > { %1414 = vmatprep.subr.bf16.mxu1 %v1497_v53 }
  0x54   : > { %1335 = vmatpush3.bf16.msra.mxu0 %v1496_v52 }
  0x55   : > { %1336 = vmatprep.subr.bf16.mxu0 %v1498_v54 }
  0x56   : > { %1415 = vmatpush3.bf16.msra.mxu1 %v1497_v53 }
  0x57   : > { %1416 = vmatprep.subr.bf16.mxu1 %v1500_v55 }
  0x58   : > { %1337 = vmatpush3.bf16.msra.mxu0 %v1499_v58 }
  0x5a   : > { %1417 = vmatpush3.bf16.msra.mxu1 %v1500_v55  ;;  %v410_v55 = vld [vmem:[#allocation2 + $0x20] sm:$0xff] }
  0x5b   : > { %807 = vmatmul.mubr.bf16.vlgmr.msra.gmra.mrb[0].mxu0 %v1501_v59 }
  0x5c   : > { %814 = vmatprep.mubr.bf16.mxu0 %v1506_v60  ;;  %v411_v60 = vld [vmem:[#allocation2 + $0x28] sm:$0xff] }
  0x5d   : > { %1419 = vmatmul.mubr.bf16.vlgmr.msra.gmra.mrb[0].mxu1 %v1505_v61 }
  0x5e   : > { %1422 = vmatprep.mubr.bf16.mxu1 %v1512_v62 }
  0x63   : > { %815 = vmatmul.mubr.bf16.gmra.mrb[4].mxu0 %v1508_v63 }
  0x64   : > { %822 = vmatprep.mubr.bf16.mxu0 %v1509_v0 }
  0x65   : > { %1423 = vmatmul.mubr.bf16.gmra.mrb[4].mxu1 %v1513_v1 }
  0x66   : > { %1426 = vmatprep.mubr.bf16.mxu1 %v1520_v2 }
  0x6b   : > { %823 = vmatmul.mubr.bf16.gmra.mrb[8].mxu0 %v1511_v3 }
  0x6c   : > { %830 = vmatprep.mubr.bf16.mxu0 %v1514_v4 }
  0x6d   : > { %1427 = vmatmul.mubr.bf16.gmra.mrb[8].mxu1 %v1521_v5 }
  0x6e   : > { %1430 = vmatprep.mubr.bf16.mxu1 %v1528_v6  ;;  %v412_v6 = vld [vmem:[#allocation2 + $0x30] sm:$0xff] }
  0x73   : > { %831 = vmatmul.mubr.bf16.gmra.mrb[12].mxu0 %v1516_v7 }
  0x74   : > { %838 = vmatprep.mubr.bf16.mxu0 %v1517_v8 }
  0x75   : > { %1431 = vmatmul.mubr.bf16.gmra.mrb[12].mxu1 %v1529_v9 }
  0x7b   : > { %839 = vmatmul.mubr.bf16.gmra.mrb[16].mxu0 %v1519_v10 }
  0x7c   : > { %846 = vmatprep.mubr.bf16.mxu0 %v1522_v11 }
  0x83   : > { %847 = vmatmul.mubr.bf16.gmra.mrb[20].mxu0 %v1524_v12  ;;  %v413_v12 = vld [vmem:[#allocation2 + $0x38] sm:$0xff] }
  0x84   : > { %854 = vmatprep.mubr.bf16.mxu0 %v1525_v13 }
  0x8b   : > { %855 = vmatmul.mubr.bf16.gmra.mrb[24].mxu0 %v1527_v14 }
  0x8c   : > { %862 = vmatprep.mubr.bf16.mxu0 %v1530_v15 }
  0x93   : > { %863 = vmatmul.mubr.bf16.gmra.mrb[28].mxu0 %v1532_v16 }
 0x12e   : > { %v1338_v17 = vpop.f32.mrb[0].mxu0 }
 0x12f   : > { %v1339_v18 = vpop.f32.mrb[1].mxu0 }
 0x130   : > { %v1340_v19 = vadd.f32 %v1339_v18, %v1338_v17  ;;  %v1341_v20 = vpop.f32.mrb[2].mxu0  ;;  %v1420_v21 = vpop.f32.mrb[0].mxu1 }
 0x131   : > { %v1342_v22 = vpop.f32.mrb[3].mxu0  ;;  %v905_v24 = vpop.f32.mrb[1].mxu1 }
 0x132   : > { %v1343_v25 = vadd.f32 %v1342_v22, %v1341_v20  ;;  %v906_v26 = vadd.f32 %v1340_v19, %v905_v24  ;;  %v1421_v27 = vpop.f32.mrb[2].mxu1  ;;  %v414_v22 = vld [vmem:[#allocation2 + $0x40] sm:$0xff] }
 0x133   : > { %v908_v29 = vpop.f32.mrb[3].mxu1 }
 0x134   : > { %v968_v30 = vadd.f32 %v906_v26, %v406_v23  ;;  %v909_v31 = vadd.f32 %v1343_v25, %v908_v29  ;;  %v415_v25 = vld [vmem:[#allocation2 + $0x48] sm:$0xff] }
 0x136   : > { %984 = vst [vmem:[#allocation2] sm:$0xff] %v968_v30  ;;  %v969_v32 = vadd.f32 %v909_v31, %v407_v28  ;;  %v1344_v33 = vpop.f32.mrb[4].mxu0 }
 0x137   : > { %v1345_v34 = vpop.f32.mrb[5].mxu0 }
 0x138   : > { %985 = vst [vmem:[#allocation2 + $0x8] sm:$0xff] %v969_v32  ;;  %v1346_v35 = vadd.f32 %v1345_v34, %v1344_v33  ;;  %v1347_v36 = vpop.f32.mrb[6].mxu0  ;;  %v1424_v37 = vpop.f32.mrb[4].mxu1  ;;  %v416_v33 = vld [vmem:[#allocation2 + $0x50] sm:$0xff] }
 0x139   : > { %v1348_v39 = vpop.f32.mrb[7].mxu0  ;;  %v921_v40 = vpop.f32.mrb[5].mxu1 }
 0x13a   : > { %v914_v41 = vadd.f32 %v1420_v21, %v1346_v35  ;;  %v1349_v42 = vadd.f32 %v1348_v39, %v1347_v36  ;;  %v1425_v43 = vpop.f32.mrb[6].mxu1 }
 0x13b   : > { %v924_v45 = vpop.f32.mrb[7].mxu1 }
 0x13c   : > { %v970_v46 = vadd.f32 %v914_v41, %v408_v38  ;;  %v917_v47 = vadd.f32 %v1421_v27, %v1349_v42 }
 0x13e   : > { %986 = vst [vmem:[#allocation2 + $0x10] sm:$0xff] %v970_v46  ;;  %v971_v48 = vadd.f32 %v917_v47, %v409_v44  ;;  %v1350_v49 = vpop.f32.mrb[8].mxu0  ;;  %v418_v46 = vld [vmem:[#allocation2 + $0x60] sm:$0xff] }
 0x13f   : > { %v1351_v50 = vpop.f32.mrb[9].mxu0 }
 0x140   : > { %987 = vst [vmem:[#allocation2 + $0x18] sm:$0xff] %v971_v48  ;;  %v1352_v51 = vadd.f32 %v1351_v50, %v1350_v49  ;;  %v1353_v52 = vpop.f32.mrb[10].mxu0  ;;  %v1428_v53 = vpop.f32.mrb[8].mxu1  ;;  %v419_v49 = vld [vmem:[#allocation2 + $0x68] sm:$0xff] }
 0x141   : > { %v1354_v54 = vpop.f32.mrb[11].mxu0  ;;  %v937_v56 = vpop.f32.mrb[9].mxu1 }
 0x142   : > { %v1355_v57 = vadd.f32 %v1354_v54, %v1353_v52  ;;  %v922_v58 = vadd.f32 %v1352_v51, %v921_v40  ;;  %v1429_v59 = vpop.f32.mrb[10].mxu1 }
 0x143   : > { %v940_v61 = vpop.f32.mrb[11].mxu1 }
 0x144   : > { %v972_v62 = vadd.f32 %v922_v58, %v410_v55  ;;  %v925_v63 = vadd.f32 %v1355_v57, %v924_v45  ;;  %v420_v57 = vld [vmem:[#allocation2 + $0x70] sm:$0xff] }
 0x146   : > { %988 = vst [vmem:[#allocation2 + $0x20] sm:$0xff] %v972_v62  ;;  %v973_v0 = vadd.f32 %v925_v63, %v411_v60  ;;  %v1356_v1 = vpop.f32.mrb[12].mxu0 }
 0x147   : > { %v1357_v2 = vpop.f32.mrb[13].mxu0 }
 0x148   : > { %989 = vst [vmem:[#allocation2 + $0x28] sm:$0xff] %v973_v0  ;;  %v1358_v3 = vadd.f32 %v1357_v2, %v1356_v1  ;;  %v1359_v4 = vpop.f32.mrb[14].mxu0  ;;  %v1432_v5 = vpop.f32.mrb[12].mxu1  ;;  %v1004_v1 = vld [vmem:[#allocation2] sm:$0xff] (!%p1314_p11) }
 0x149   : > { %v1360_v7 = vpop.f32.mrb[15].mxu0  ;;  %v953_v8 = vpop.f32.mrb[13].mxu1  ;;  %v1315_v2 = vld [vmem:[%s1860_s2] ss:$0 sm:$0xff] (!%p1314_p11) }
 0x14a   : > { %v930_v9 = vadd.f32 %v1424_v37, %v1358_v3  ;;  %v1361_v10 = vadd.f32 %v1360_v7, %v1359_v4  ;;  %v1433_v11 = vpop.f32.mrb[14].mxu1  ;;  %v417_v37 = vld [vmem:[#allocation2 + $0x58] sm:$0xff]  ;;  %v1777_v3 = vld [vmem:[%s1861_s3] ss:$0 sm:$0xff] (!%p1314_p11)  ;;  %v1027_v4 = vmul.f32 (!%p1314_p11), %v1315_v2, %v1004_v1 }
 0x14b   : > { %v956_v13 = vpop.f32.mrb[15].mxu1  ;;  %v1007_v7 = vld [vmem:[#allocation2 + $0x18] sm:$0xff] (!%p1314_p11) }
 0x14c   : > { %v974_v14 = vadd.f32 %v930_v9, %v412_v6  ;;  %v933_v15 = vadd.f32 %v1425_v43, %v1361_v10  ;;  %v1006_v6 = vld [vmem:[#allocation2 + $0x10] sm:$0xff] (!%p1314_p11)  ;;  %v1030_v10 = vmul.f32 (!%p1314_p11), %v1315_v2, %v1007_v7 }
 0x14d   : > { %v1029_v9 = vmul.f32 (!%p1314_p11), %v1315_v2, %v1006_v6 }
 0x14e   : > { %990 = vst [vmem:[#allocation2 + $0x30] sm:$0xff] %v974_v14  ;;  %v975_v16 = vadd.f32 %v933_v15, %v413_v12  ;;  %v1362_v17 = vpop.f32.mrb[16].mxu0  ;;  %v1050_v14 = vadd.f32 (!%p1314_p11), %v1777_v3, %v1027_v4 }
 0x14f   : > { %v1363_v18 = vpop.f32.mrb[17].mxu0  ;;  %v1009_v12 = vld [vmem:[#allocation2 + $0x28] sm:$0xff] (!%p1314_p11) }
 0x150   : > { %991 = vst [vmem:[#allocation2 + $0x38] sm:$0xff] %v975_v16  ;;  %v1364_v19 = vadd.f32 %v1363_v18, %v1362_v17  ;;  %v1365_v20 = vpop.f32.mrb[18].mxu0  ;;  %v1032_v16 = vmul.f32 (!%p1314_p11), %v1315_v2, %v1009_v12 }
 0x151   : > { %v1366_v21 = vpop.f32.mrb[19].mxu0 }
 0x152   : > { %v1367_v23 = vadd.f32 %v1366_v21, %v1365_v20  ;;  %v938_v24 = vadd.f32 %v1364_v19, %v937_v56  ;;  %v1052_v20 = vadd.f32 (!%p1314_p11), %v1777_v3, %v1029_v9  ;;  %v1053_v21 = vadd.f32 (!%p1314_p11), %v1777_v3, %v1030_v10 }
 0x154   : > { %v976_v26 = vadd.f32 %v938_v24, %v414_v22  ;;  %v941_v27 = vadd.f32 %v1367_v23, %v940_v61  ;;  %v421_v61 = vld [vmem:[#allocation2 + $0x78] sm:$0xff]  ;;  %v1066_v24 = vmax.f32 (!%p1314_p11), %v1050_v14, 0.0 }
 0x156   : > { %992 = vst [vmem:[#allocation2 + $0x40] sm:$0xff] %v976_v26  ;;  %v977_v28 = vadd.f32 %v941_v27, %v415_v25  ;;  %v1368_v29 = vpop.f32.mrb[20].mxu0  ;;  %v1055_v26 = vadd.f32 (!%p1314_p11), %v1777_v3, %v1032_v16  ;;  %1082 = vst [vmem:[%s1862_s4] sm:$0xff] (!%p1314_p11), %v1066_v24 }
 0x157   : > { %v1369_v30 = vpop.f32.mrb[21].mxu0  ;;  %v1011_v18 = vld [vmem:[#allocation2 + $0x38] sm:$0xff] (!%p1314_p11) }
 0x158   : > { %993 = vst [vmem:[#allocation2 + $0x48] sm:$0xff] %v977_v28  ;;  %v1370_v31 = vadd.f32 %v1369_v30, %v1368_v29  ;;  %v1371_v32 = vpop.f32.mrb[22].mxu0  ;;  %v1034_v22 = vmul.f32 (!%p1314_p11), %v1315_v2, %v1011_v18 }
 0x159   : > { %v1372_v34 = vpop.f32.mrb[23].mxu0 }
 0x15a   : > { %v946_v35 = vadd.f32 %v1428_v53, %v1370_v31  ;;  %v1373_v36 = vadd.f32 %v1372_v34, %v1371_v32  ;;  %v1068_v32 = vmax.f32 (!%p1314_p11), %v1052_v20, 0.0  ;;  %v1057_v34 = vadd.f32 (!%p1314_p11), %v1777_v3, %v1034_v22 }
 0x15c   : > { %v978_v38 = vadd.f32 %v946_v35, %v416_v33  ;;  %v949_v39 = vadd.f32 %v1429_v59, %v1373_v36  ;;  %v1069_v33 = vmax.f32 (!%p1314_p11), %v1053_v21, 0.0  ;;  %1084 = vst [vmem:[%s1862_s4 + $0x10] sm:$0xff] (!%p1314_p11), %v1068_v32 }
 0x15d   : > { %v1012_v23 = vld [vmem:[#allocation2 + $0x40] sm:$0xff] (!%p1314_p11) }
 0x15e   : > { %994 = vst [vmem:[#allocation2 + $0x50] sm:$0xff] %v978_v38  ;;  %v979_v40 = vadd.f32 %v949_v39, %v417_v37  ;;  %v1374_v41 = vpop.f32.mrb[24].mxu0  ;;  %v1071_v39 = vmax.f32 (!%p1314_p11), %v1055_v26, 0.0  ;;  %1085 = vst [vmem:[%s1862_s4 + $0x18] sm:$0xff] (!%p1314_p11), %v1069_v33 }
 0x15f   : > { %v1375_v42 = vpop.f32.mrb[25].mxu0  ;;  %v1013_v28 = vld [vmem:[#allocation2 + $0x48] sm:$0xff] (!%p1314_p11) }
 0x160   : > { %995 = vst [vmem:[#allocation2 + $0x58] sm:$0xff] %v979_v40  ;;  %v1376_v43 = vadd.f32 %v1375_v42, %v1374_v41  ;;  %v1377_v44 = vpop.f32.mrb[26].mxu0  ;;  %v1035_v41 = vmul.f32 (!%p1314_p11), %v1315_v2, %v1012_v23  ;;  %1087 = vst [vmem:[%s1862_s4 + $0x28] sm:$0xff] (!%p1314_p11), %v1071_v39 }
 0x161   : > { %v1378_v45 = vpop.f32.mrb[27].mxu0 }
 0x162   : > { %v1379_v47 = vadd.f32 %v1378_v45, %v1377_v44  ;;  %v954_v48 = vadd.f32 %v1376_v43, %v953_v8  ;;  %v1073_v43 = vmax.f32 (!%p1314_p11), %v1057_v34, 0.0  ;;  %v1036_v44 = vmul.f32 (!%p1314_p11), %v1315_v2, %v1013_v28 }
 0x164   : > { %v980_v50 = vadd.f32 %v954_v48, %v418_v46  ;;  %v957_v51 = vadd.f32 %v1379_v47, %v956_v13  ;;  %v1010_v13 = vld [vmem:[#allocation2 + $0x30] sm:$0xff] (!%p1314_p11)  ;;  %v1058_v47 = vadd.f32 (!%p1314_p11), %v1777_v3, %v1035_v41  ;;  %1089 = vst [vmem:[%s1862_s4 + $0x38] sm:$0xff] (!%p1314_p11), %v1073_v43 }
 0x165   : > { %v1033_v17 = vmul.f32 (!%p1314_p11), %v1315_v2, %v1010_v13  ;;  %v1014_v29 = vld [vmem:[#allocation2 + $0x50] sm:$0xff] (!%p1314_p11) }
 0x166   : > { %996 = vst [vmem:[#allocation2 + $0x60] sm:$0xff] %v980_v50  ;;  %v981_v52 = vadd.f32 %v957_v51, %v419_v49  ;;  %v1380_v53 = vpop.f32.mrb[28].mxu0  ;;  %v1037_v45 = vmul.f32 (!%p1314_p11), %v1315_v2, %v1014_v29  ;;  %v1059_v51 = vadd.f32 (!%p1314_p11), %v1777_v3, %v1036_v44 }
 0x167   : > { %v1381_v54 = vpop.f32.mrb[29].mxu0  ;;  %v1056_v27 = vadd.f32 (!%p1314_p11), %v1777_v3, %v1033_v17  ;;  %v1015_v30 = vld [vmem:[#allocation2 + $0x58] sm:$0xff] (!%p1314_p11) }
 0x168   : > { %997 = vst [vmem:[#allocation2 + $0x68] sm:$0xff] %v981_v52  ;;  %v1382_v55 = vadd.f32 %v1381_v54, %v1380_v53  ;;  %v1383_v56 = vpop.f32.mrb[30].mxu0  ;;  %v1038_v46 = vmul.f32 (!%p1314_p11), %v1315_v2, %v1015_v30  ;;  %v1060_v52 = vadd.f32 (!%p1314_p11), %v1777_v3, %v1037_v45 }
 0x169   : > { %v1384_v58 = vpop.f32.mrb[31].mxu0  ;;  %v1072_v40 = vmax.f32 (!%p1314_p11), %v1056_v27, 0.0 }
 0x16a   : > { %v962_v59 = vadd.f32 %v1432_v5, %v1382_v55  ;;  %v1385_v60 = vadd.f32 %v1384_v58, %v1383_v56  ;;  %1003 = sbr.rel (%p1314_p11) target bundleno = 383 (0x17f), region = 70  ;;  %v1005_v5 = vld [vmem:[#allocation2 + $0x8] sm:$0xff] (!%p1314_p11)  ;;  %v1061_v53 = vadd.f32 (!%p1314_p11), %v1777_v3, %v1038_v46  ;;  %v1074_v55 = vmax.f32 (!%p1314_p11), %v1058_v47, 0.0 }
 0x16b   : > { %v1028_v8 = vmul.f32 (!%p1314_p11), %v1315_v2, %v1005_v5  ;;  %1088 = vst [vmem:[%s1862_s4 + $0x30] sm:$0xff] (!%p1314_p11), %v1072_v40 }
 0x16c   : > { %v982_v62 = vadd.f32 %v962_v59, %v420_v57  ;;  %v965_v63 = vadd.f32 %v1433_v11, %v1385_v60  ;;  %v1008_v11 = vld [vmem:[#allocation2 + $0x20] sm:$0xff] (!%p1314_p11)  ;;  %v1075_v59 = vmax.f32 (!%p1314_p11), %v1059_v51, 0.0  ;;  %v1076_v60 = vmax.f32 (!%p1314_p11), %v1060_v52, 0.0  ;;  %1090 = vst [vmem:[%s1862_s4 + $0x40] sm:$0xff] (!%p1314_p11), %v1074_v55 }
 0x16d   : > { %v1031_v15 = vmul.f32 (!%p1314_p11), %v1315_v2, %v1008_v11  ;;  %v1051_v19 = vadd.f32 (!%p1314_p11), %v1777_v3, %v1028_v8  ;;  %v1016_v35 = vld [vmem:[#allocation2 + $0x60] sm:$0xff] (!%p1314_p11) }
 0x16e   : > { %998 = vst [vmem:[#allocation2 + $0x70] sm:$0xff] %v982_v62  ;;  %v983_v0 = vadd.f32 %v965_v63, %v421_v61  ;;  %v1039_v48 = vmul.f32 (!%p1314_p11), %v1315_v2, %v1016_v35  ;;  %v1077_v61 = vmax.f32 (!%p1314_p11), %v1061_v53, 0.0  ;;  %1091 = vst [vmem:[%s1862_s4 + $0x48] sm:$0xff] (!%p1314_p11), %v1075_v59 }
 0x16f   : > { %v1054_v25 = vadd.f32 (!%p1314_p11), %v1777_v3, %v1031_v15  ;;  %v1067_v31 = vmax.f32 (!%p1314_p11), %v1051_v19, 0.0  ;;  %v1017_v36 = vld [vmem:[#allocation2 + $0x68] sm:$0xff] (!%p1314_p11)  ;;  %1092 = vst [vmem:[%s1862_s4 + $0x50] sm:$0xff] (!%p1314_p11), %v1076_v60 }
 0x170   : > { %999 = vst [vmem:[#allocation2 + $0x78] sm:$0xff] %v983_v0  ;;  %v1040_v49 = vmul.f32 (!%p1314_p11), %v1315_v2, %v1017_v36  ;;  %v1062_v56 = vadd.f32 (!%p1314_p11), %v1777_v3, %v1039_v48  ;;  %1093 = vst [vmem:[%s1862_s4 + $0x58] sm:$0xff] (!%p1314_p11), %v1077_v61 }
 0x171   : > { %v1070_v38 = vmax.f32 %v1054_v25, 0.0  ;;  %1083 = vst [vmem:[%s1862_s4 + $0x8] sm:$0xff] %v1067_v31 }
 0x172   : > { %v1063_v57 = vadd.f32 %v1777_v3, %v1040_v49  ;;  %v1078_v63 = vmax.f32 %v1062_v56, 0.0 }
 0x173   : > { %1086 = vst [vmem:[%s1862_s4 + $0x20] sm:$0xff] %v1070_v38 }
 0x174   : > { %v1079_v0 = vmax.f32 %v1063_v57, 0.0  ;;  %1094 = vst [vmem:[%s1862_s4 + $0x60] sm:$0xff] %v1078_v63 }
 0x175   : > { %v1018_v37 = vld [vmem:[#allocation2 + $0x70] sm:$0xff] }
 0x176   : > { %v1041_v50 = vmul.f32 %v1315_v2, %v1018_v37  ;;  %1095 = vst [vmem:[%s1862_s4 + $0x68] sm:$0xff] %v1079_v0 }
 0x177   : > { %v1019_v42 = vld [vmem:[#allocation2 + $0x78] sm:$0xff] }
 0x178   : > { %v1042_v54 = vmul.f32 %v1315_v2, %v1019_v42  ;;  %v1064_v58 = vadd.f32 %v1777_v3, %v1041_v50 }
 0x17a   : > { %v1065_v62 = vadd.f32 %v1777_v3, %v1042_v54  ;;  %v1080_v1 = vmax.f32 %v1064_v58, 0.0 }
 0x17c   : > { %v1081_v2 = vmax.f32 %v1065_v62, 0.0  ;;  %1096 = vst [vmem:[%s1862_s4 + $0x70] sm:$0xff] %v1080_v1 }
 0x17e   : > { %1097 = vst [vmem:[%s1862_s4 + $0x78] sm:$0xff] %v1081_v2 }
 0x17f PF: > { %s14_s19 = sadd.s32 1, %s1571_s19   ;;  %s1863_s15 = smov %s1559_s16 }
 0x180   : > { %p11_p12 = scmp.ge.s32.totalorder %s14_s19, 4   ;;  %s1864_s16 = smov %s1634_s23 }
 0x181   : > { %s1865_s17 = smov %s1567_s18  ;;  %s1866_s18 = smov %s1868_s20 }
 0x182   :  { %13 = sbr.rel (!%p11_p12) target bundleno = 3 (0x3), region = 120 }

// kernel: resnet_up_forward.29
= control target key start
LH: loop header
LB: loop body
LE: loop exit
PB: predicated region body
PF: predicated region fallthrough
CT: control target
= control target key end

     0   :  { %s1715_s18 = smov 0   ;;  %s1717_s19 = smov 0   ;;  %s2040_s0 = inlined_call_operand.vmem [shape: bf16[128,768], index: 0, kind: input, shape index: {}]   ;;  %s2041_s1 = inlined_call_operand.vmem [shape: bf16[768,128], index: 1, kind: input, shape index: {}]   ;;  %s2042_s2 = inlined_call_operand.vmem [shape: f32[1,128], index: 2, kind: input, shape index: {}]   ;;  %s2043_s3 = inlined_call_operand.vmem [shape: f32[1,128], index: 3, kind: input, shape index: {}]   ;;  %s2044_s4 = inlined_call_operand.vmem [shape: f32[128,128], index: 4, kind: input, shape index: {}]   ;;  %s2045_s5 = inlined_call_operand.vmem [shape: f32[128,128], index: 5, kind: output, shape index: {}]  }
   0x1   :  { %s1719_s20 = smov 0   ;;  %s1721_s21 = smov 0  }
   0x2   :  { %s1723_s22 = smov 0  }
   0x3 LB: > { %s27_s23 = sadd.s32 1, %s1678_s21  ;;  %p50_p1 = scmp.ne.s32.totalorder %s1670_s19, %s1666_s18  ;;  %s1682_s22 = sphi %s1723_s22, %s15_s22   ;;  %s1678_s21 = sphi %s1721_s21, %s2049_s21   ;;  %s1674_s20 = sphi %s1719_s20, %s2048_s20   ;;  %s1670_s19 = sphi %s1717_s19, %s2047_s19   ;;  %s1666_s18 = sphi %s1715_s18, %s2046_s18  }
   0x4   : > { %p28_p0 = scmp.ge.s32.totalorder %s27_s23, 2  ;;  %p51_p2 = scmp.eq.s32.totalorder %s1682_s22, 0 }
   0x5   : > { %s43_s25 = sadd.s32 1, %s1670_s19  ;;  %p1340_p5 = scmp.ge.s32.totalorder %s1682_s22, 2 }
   0x6   : > { %s2051_s23 = smov (%p28_p0, %s27_s23), 0  ;;  %p52_p3 = por %p51_p2, %p50_p1 }
   0x7   : > { %s39_s24 = ssub.s32 %s1678_s21, %s2051_s23  ;;  %236 = sbr.rel (%p1340_p5) target bundleno = 37 (0x25), region = 28 }
   0x8   : > { %p41_p4 = scmp.eq.s32.totalorder %s39_s24, 0 }
   0xa   : > { %s1750_s26 = scalar_select %p41_p4, %s1670_s19, %s43_s25  }
   0xe   : > { %239 = sbr.rel (!%p52_p3) target bundleno = 37 (0x25), region = 32  ;;  %s241_s27 = sand.u32 (%p52_p3), 1, %s1670_s19  }
   0xf   : > { %s1432_s28 = smul.u32 (%p52_p3), 12, %s1678_s21 }
  0x10   : > { %s1545_s29 = smul.u32 (%p52_p3), 192, %s241_s27 }
  0x11   : > { %s1758_s7 = scalar_lea.vmem (%p52_p3), %s2040_s0, %s1432_s28 }
  0x12   : > { %v264_v0 = vld [vmem:[%s1758_s7] sm:$0xff] (%p52_p3)  ;;  %v266_v1 = vld [vmem:[%s1758_s7 + $0x18] sm:$0xff] (%p52_p3)  ;;  %v268_v2 = vld [vmem:[%s1758_s7 + $0x30] sm:$0xff] (%p52_p3)  ;;  %s1763_s8 = scalar_lea.vmem (%p52_p3), [#allocation3], %s1545_s29 }
  0x13   : > { %265 = vst [vmem:[%s1763_s8] sm:$0xff] (%p52_p3), %v264_v0  ;;  %267 = vst [vmem:[%s1763_s8 + $0xc] sm:$0xff] (%p52_p3), %v266_v1  ;;  %v270_v3 = vld [vmem:[%s1758_s7 + $0x48] sm:$0xff] (%p52_p3)  ;;  %v272_v4 = vld [vmem:[%s1758_s7 + $0x60] sm:$0xff] (%p52_p3) }
  0x14   : > { %269 = vst [vmem:[%s1763_s8 + $0x18] sm:$0xff] (%p52_p3), %v268_v2  ;;  %v274_v5 = vld [vmem:[%s1758_s7 + $0x78] sm:$0xff] (%p52_p3)  ;;  %271 = vst [vmem:[%s1763_s8 + $0x24] sm:$0xff] (%p52_p3), %v270_v3  ;;  %v276_v6 = vld [vmem:[%s1758_s7 + $0x90] sm:$0xff] (%p52_p3) }
  0x15   : > { %273 = vst [vmem:[%s1763_s8 + $0x30] sm:$0xff] %v272_v4  ;;  %275 = vst [vmem:[%s1763_s8 + $0x3c] sm:$0xff] %v274_v5  ;;  %v278_v7 = vld [vmem:[%s1758_s7 + $0xa8] sm:$0xff]  ;;  %v280_v8 = vld [vmem:[%s1758_s7 + $0xc0] sm:$0xff] }
  0x16   : > { %277 = vst [vmem:[%s1763_s8 + $0x48] sm:$0xff] %v276_v6  ;;  %279 = vst [vmem:[%s1763_s8 + $0x54] sm:$0xff] %v278_v7  ;;  %v282_v9 = vld [vmem:[%s1758_s7 + $0xd8] sm:$0xff]  ;;  %v284_v10 = vld [vmem:[%s1758_s7 + $0xf0] sm:$0xff] }
  0x17   : > { %281 = vst [vmem:[%s1763_s8 + $0x60] sm:$0xff] %v280_v8  ;;  %v286_v11 = vld [vmem:[%s1758_s7 + $0x108] sm:$0xff]  ;;  %283 = vst [vmem:[%s1763_s8 + $0x6c] sm:$0xff] %v282_v9  ;;  %v288_v12 = vld [vmem:[%s1758_s7 + $0x120] sm:$0xff] }
  0x18   : > { %285 = vst [vmem:[%s1763_s8 + $0x78] sm:$0xff] %v284_v10  ;;  %287 = vst [vmem:[%s1763_s8 + $0x84] sm:$0xff] %v286_v11  ;;  %v290_v13 = vld [vmem:[%s1758_s7 + $0x138] sm:$0xff]  ;;  %v292_v14 = vld [vmem:[%s1758_s7 + $0x150] sm:$0xff] }
  0x19   : > { %289 = vst [vmem:[%s1763_s8 + $0x90] sm:$0xff] %v288_v12  ;;  %291 = vst [vmem:[%s1763_s8 + $0x9c] sm:$0xff] %v290_v13  ;;  %v294_v15 = vld [vmem:[%s1758_s7 + $0x168] sm:$0xff]  ;;  %v1344_v17 = vld [vmem:[%s1758_s7 + $0x20] sm:$0xf] }
  0x1a   : > { %293 = vst [vmem:[%s1763_s8 + $0xa8] sm:$0xff] %v292_v14  ;;  %v1342_v16 = vld [vmem:[%s1758_s7 + $0x8] sm:$0xf]  ;;  %295 = vst [vmem:[%s1763_s8 + $0xb4] sm:$0xff] %v294_v15  ;;  %v1346_v18 = vld [vmem:[%s1758_s7 + $0x38] sm:$0xf] }
  0x1b   : > { %1343 = vst [vmem:[%s1763_s8 + $0x8] sm:$0xf] %v1342_v16  ;;  %1345 = vst [vmem:[%s1763_s8 + $0x14] sm:$0xf] %v1344_v17  ;;  %v1348_v19 = vld [vmem:[%s1758_s7 + $0x50] sm:$0xf] }
  0x1c   : > { %v1350_v20 = vld [vmem:[%s1758_s7 + $0x68] sm:$0xf]  ;;  %1347 = vst [vmem:[%s1763_s8 + $0x20] sm:$0xf] %v1346_v18  ;;  %1349 = vst [vmem:[%s1763_s8 + $0x2c] sm:$0xf] %v1348_v19 }
  0x1d   : > { %1351 = vst [vmem:[%s1763_s8 + $0x38] sm:$0xf] %v1350_v20  ;;  %v1352_v21 = vld [vmem:[%s1758_s7 + $0x80] sm:$0xf]  ;;  %v1354_v22 = vld [vmem:[%s1758_s7 + $0x98] sm:$0xf] }
  0x1e   : > { %v1356_v23 = vld [vmem:[%s1758_s7 + $0xb0] sm:$0xf]  ;;  %1353 = vst [vmem:[%s1763_s8 + $0x44] sm:$0xf] %v1352_v21  ;;  %1355 = vst [vmem:[%s1763_s8 + $0x50] sm:$0xf] %v1354_v22 }
  0x1f   : > { %1357 = vst [vmem:[%s1763_s8 + $0x5c] sm:$0xf] %v1356_v23  ;;  %v1358_v24 = vld [vmem:[%s1758_s7 + $0xc8] sm:$0xf]  ;;  %v1360_v25 = vld [vmem:[%s1758_s7 + $0xe0] sm:$0xf] }
  0x20   : > { %v1362_v26 = vld [vmem:[%s1758_s7 + $0xf8] sm:$0xf]  ;;  %1359 = vst [vmem:[%s1763_s8 + $0x68] sm:$0xf] %v1358_v24  ;;  %1361 = vst [vmem:[%s1763_s8 + $0x74] sm:$0xf] %v1360_v25 }
  0x21   : > { %1363 = vst [vmem:[%s1763_s8 + $0x80] sm:$0xf] %v1362_v26  ;;  %v1364_v27 = vld [vmem:[%s1758_s7 + $0x110] sm:$0xf]  ;;  %v1366_v28 = vld [vmem:[%s1758_s7 + $0x128] sm:$0xf] }
  0x22   : > { %v1368_v29 = vld [vmem:[%s1758_s7 + $0x140] sm:$0xf]  ;;  %1365 = vst [vmem:[%s1763_s8 + $0x8c] sm:$0xf] %v1364_v27  ;;  %1367 = vst [vmem:[%s1763_s8 + $0x98] sm:$0xf] %v1366_v28 }
  0x23   : > { %1369 = vst [vmem:[%s1763_s8 + $0xa4] sm:$0xf] %v1368_v29  ;;  %v1370_v30 = vld [vmem:[%s1758_s7 + $0x158] sm:$0xf]  ;;  %v1372_v31 = vld [vmem:[%s1758_s7 + $0x170] sm:$0xf] }
  0x24   : > { %1371 = vst [vmem:[%s1763_s8 + $0xb0] sm:$0xf] %v1370_v30  ;;  %1373 = vst [vmem:[%s1763_s8 + $0xbc] sm:$0xf] %v1372_v31 }
  0x25 PF: > { %p1374_p6 = scmp.ge.s32.totalorder %s1682_s22, 1  ;;  %p351_p7 = scmp.lt.s32.totalorder %s1682_s22, 3 }
  0x27   : > { %p352_p8 = pnand %p1374_p6, %p351_p7 }
  0x28   : > { %s358_s9 = sand.u32 (!%p352_p8), 1, %s1666_s18   ;;  %s412_s10 = smul.u32 (!%p352_p8), 48, %s1674_s20 }
  0x29   : > { %355 = sbr.rel (%p352_p8) target bundleno = 385 (0x181), region = 62  ;;  %p1376_p10 = scmp.ne.s32.totalorder (!%p352_p8), %s1674_s20, 0 }
  0x2a   : > { %s1546_s11 = smul.u32 (!%p352_p8), 192, %s358_s9  ;;  %p413_p9 = scmp.lt.s32.totalorder (!%p352_p8), %s412_s10, 95 }
  0x2c   : > { %s1835_s16 = scalar_lea.vmem (!%p352_p8), [#allocation3], %s1546_s11 }
  0x30   : > { %s2053_s10 = smov (!%p413_p9, %s412_s10), 95  ;;  %449 = sbr.rel (%p1376_p10) target bundleno = 58 (0x3a), region = 70 }
  0x31   : > { %s1375_s12 = sshll.u32 %s2053_s10, 2  ;;  %v1684_v32 = vmov (!%p1376_p10), 0.0  }
  0x32   : > { %s1833_s15 = scalar_lea.vmem %s2041_s1, %s1375_s12  ;;  %450 = vst [vmem:[#allocation2] sm:$0xff] (!%p1376_p10), %v1684_v32  ;;  %451 = vst [vmem:[#allocation2 + $0x8] sm:$0xff] (!%p1376_p10), %v1684_v32 }
  0x33   : > { %452 = vst [vmem:[#allocation2 + $0x10] sm:$0xff] (!%p1376_p10), %v1684_v32  ;;  %453 = vst [vmem:[#allocation2 + $0x18] sm:$0xff] (!%p1376_p10), %v1684_v32 }
  0x34   : > { %454 = vst [vmem:[#allocation2 + $0x20] sm:$0xff] (!%p1376_p10), %v1684_v32  ;;  %455 = vst [vmem:[#allocation2 + $0x28] sm:$0xff] (!%p1376_p10), %v1684_v32 }
  0x35   : > { %456 = vst [vmem:[#allocation2 + $0x30] sm:$0xff] (!%p1376_p10), %v1684_v32  ;;  %457 = vst [vmem:[#allocation2 + $0x38] sm:$0xff] (!%p1376_p10), %v1684_v32 }
  0x36   : > { %458 = vst [vmem:[#allocation2 + $0x40] sm:$0xff] (!%p1376_p10), %v1684_v32  ;;  %459 = vst [vmem:[#allocation2 + $0x48] sm:$0xff] (!%p1376_p10), %v1684_v32 }
  0x37   : > { %460 = vst [vmem:[#allocation2 + $0x50] sm:$0xff] %v1684_v32  ;;  %461 = vst [vmem:[#allocation2 + $0x58] sm:$0xff] %v1684_v32 }
  0x38   : > { %462 = vst [vmem:[#allocation2 + $0x60] sm:$0xff] %v1684_v32  ;;  %463 = vst [vmem:[#allocation2 + $0x68] sm:$0xff] %v1684_v32 }
  0x39   : > { %464 = vst [vmem:[#allocation2 + $0x70] sm:$0xff] %v1684_v32  ;;  %465 = vst [vmem:[#allocation2 + $0x78] sm:$0xff] %v1684_v32 }
  0x3a PF: > { %v1588_v33 = vld [vmem:[%s1833_s15 + $0x40] sm:$0xff]   ;;  %v1591_v36 = vld [vmem:[%s1833_s15 + $0x48] sm:$0xff]   ;;  %v1594_v39 = vld [vmem:[%s1833_s15 + $0x50] sm:$0xff]   ;;  %p1425_p11 = scmp.ne.s32.totalorder %s1674_s20, 1 }
  0x3b   : > { %v1589_v34 = vld [vmem:[%s1833_s15] sm:$0xff]   ;;  %1433 = vmatprep.subr.bf16.mxu0 %v1588_v33  ;;  %v1592_v37 = vld [vmem:[%s1833_s15 + $0x8] sm:$0xff]   ;;  %v1595_v40 = vld [vmem:[%s1833_s15 + $0x10] sm:$0xff]  }
  0x3c   : > { %v1590_v35 = vld [vmem:[%s1833_s15 + $0x80] sm:$0xff]   ;;  %1434 = vmatpush3.bf16.msra.mxu0 %v1589_v34  ;;  %v1593_v38 = vld [vmem:[%s1833_s15 + $0x88] sm:$0xff]   ;;  %v1596_v41 = vld [vmem:[%s1833_s15 + $0x90] sm:$0xff]  }
  0x3d   : > { %1513 = vmatprep.subr.bf16.mxu1 %v1590_v35  ;;  %1435 = vmatprep.subr.bf16.mxu0 %v1591_v36  ;;  %v1597_v42 = vld [vmem:[%s1833_s15 + $0x58] sm:$0xff]   ;;  %v1600_v45 = vld [vmem:[%s1833_s15 + $0x60] sm:$0xff]   ;;  %v1603_v48 = vld [vmem:[%s1833_s15 + $0x68] sm:$0xff]  }
  0x3e   : > { %1514 = vmatpush3.bf16.msra.mxu1 %v1590_v35  ;;  %v1598_v43 = vld [vmem:[%s1833_s15 + $0x18] sm:$0xff]   ;;  %v1602_v46 = vld [vmem:[%s1833_s15 + $0xa0] sm:$0xff]   ;;  %v1605_v49 = vld [vmem:[%s1833_s15 + $0xa8] sm:$0xff]  }
  0x3f   : > { %1515 = vmatprep.subr.bf16.mxu1 %v1593_v38  ;;  %v1599_v44 = vld [vmem:[%s1833_s15 + $0x98] sm:$0xff]   ;;  %v1601_v47 = vld [vmem:[%s1833_s15 + $0x20] sm:$0xff]   ;;  %v1604_v50 = vld [vmem:[%s1833_s15 + $0x28] sm:$0xff]  }
  0x40   : > { %1436 = vmatpush3.bf16.msra.mxu0 %v1592_v37  ;;  %v1606_v51 = vld [vmem:[%s1833_s15 + $0x70] sm:$0xff]   ;;  %v1609_v54 = vld [vmem:[%s1833_s15 + $0x78] sm:$0xff]   ;;  %v1612_v59 = vld [vmem:[%s1835_s16] ss:$12 sps:$4 sm:$0xff]  }
  0x41   : > { %1437 = vmatprep.subr.bf16.mxu0 %v1594_v39  ;;  %v1607_v52 = vld [vmem:[%s1833_s15 + $0x30] sm:$0xff]   ;;  %v1611_v55 = vld [vmem:[%s1833_s15 + $0xb8] sm:$0xff]   ;;  %v1616_v61 = vld [vmem:[%s1835_s16 + $0x20] ss:$12 sps:$4 sm:$0xff]  }
  0x42   : > { %1516 = vmatpush3.bf16.msra.mxu1 %v1593_v38  ;;  %v1608_v53 = vld [vmem:[%s1833_s15 + $0xb0] sm:$0xff]   ;;  %v1610_v58 = vld [vmem:[%s1833_s15 + $0x38] sm:$0xff]   ;;  %v1632_v5 = vld [vmem:[%s1835_s16 + $0x80] ss:$12 sps:$4 sm:$0xff]  }
  0x43   : > { %1517 = vmatprep.subr.bf16.mxu1 %v1596_v41  ;;  %v1614_v56 = vld [vmem:[%s1835_s16 + $0x4] ss:$12 sps:$4 sm:$0xff]   ;;  %v1615_v57 = vld [vmem:[%s1835_s16 + $0x8] ss:$12 sps:$4 sm:$0xff]   ;;  %v1625_v4 = vld [vmem:[%s1835_s16 + $0x4c] ss:$12 sps:$4 sm:$0xff]  }
  0x44   : > { %1438 = vmatpush3.bf16.msra.mxu0 %v1595_v40  ;;  %866 = vmatprep.mubr.bf16.mxu0 %v1614_v56  ;;  %v1617_v60 = vld [vmem:[%s1835_s16 + $0x1c] ss:$12 sps:$4 sm:$0xff]   ;;  %v1623_v62 = vld [vmem:[%s1835_s16 + $0x38] ss:$12 sps:$4 sm:$0xff]   ;;  %v1620_v0 = vld [vmem:[%s1835_s16 + $0x34] ss:$12 sps:$4 sm:$0xff]  }
  0x45   : > { %1439 = vmatprep.subr.bf16.mxu0 %v1597_v42  ;;  %1529 = vmatprep.mubr.bf16.mxu1 %v1615_v57  ;;  %v1619_v63 = vld [vmem:[%s1835_s16 + $0x18] ss:$12 sps:$4 sm:$0xff]   ;;  %v1624_v1 = vld [vmem:[%s1835_s16 + $0x50] ss:$12 sps:$4 sm:$0xff]   ;;  %v1631_v2 = vld [vmem:[%s1835_s16 + $0x68] ss:$12 sps:$4 sm:$0xff]  }
  0x46   : > { %1518 = vmatpush3.bf16.msra.mxu1 %v1596_v41  ;;  %v1622_v3 = vld [vmem:[%s1835_s16 + $0x30] ss:$12 sps:$4 sm:$0xff]   ;;  %v1639_v6 = vld [vmem:[%s1835_s16 + $0x98] ss:$12 sps:$4 sm:$0xff]   ;;  %v1627_v7 = vld [vmem:[%s1835_s16 + $0x48] ss:$12 sps:$4 sm:$0xff]  }
  0x47   : > { %1519 = vmatprep.subr.bf16.mxu1 %v1599_v44  ;;  %v1628_v8 = vld [vmem:[%s1835_s16 + $0x64] ss:$12 sps:$4 sm:$0xff]   ;;  %v1630_v10 = vld [vmem:[%s1835_s16 + $0x60] ss:$12 sps:$4 sm:$0xff]   ;;  %v1633_v11 = vld [vmem:[%s1835_s16 + $0x7c] ss:$12 sps:$4 sm:$0xff]  }
  0x48   : > { %1440 = vmatpush3.bf16.msra.mxu0 %v1598_v43  ;;  %v1640_v9 = vld [vmem:[%s1835_s16 + $0xb0] ss:$12 sps:$4 sm:$0xff]   ;;  %v1635_v12 = vld [vmem:[%s1835_s16 + $0x78] ss:$12 sps:$4 sm:$0xff]   ;;  %v1636_v13 = vld [vmem:[%s1835_s16 + $0x94] ss:$12 sps:$4 sm:$0xff]  }
  0x49   : > { %1441 = vmatprep.subr.bf16.mxu0 %v1600_v45  ;;  %v1638_v14 = vld [vmem:[%s1835_s16 + $0x90] ss:$12 sps:$4 sm:$0xff]   ;;  %v1641_v15 = vld [vmem:[%s1835_s16 + $0xac] ss:$12 sps:$4 sm:$0xff]   ;;  %v1643_v16 = vld [vmem:[%s1835_s16 + $0xa8] ss:$12 sps:$4 sm:$0xff]  }
  0x4a   : > { %1520 = vmatpush3.bf16.msra.mxu1 %v1599_v44  ;;  %v466_v23 = vld [vmem:[#allocation2] sm:$0xff]  ;;  %v467_v28 = vld [vmem:[#allocation2 + $0x8] sm:$0xff]  ;;  %v468_v38 = vld [vmem:[#allocation2 + $0x10] sm:$0xff] }
  0x4b   : > { %1521 = vmatprep.subr.bf16.mxu1 %v1602_v46  ;;  %v469_v44 = vld [vmem:[#allocation2 + $0x18] sm:$0xff] }
  0x4c   : > { %1442 = vmatpush3.bf16.msra.mxu0 %v1601_v47 }
  0x4d   : > { %1443 = vmatprep.subr.bf16.mxu0 %v1603_v48 }
  0x4e   : > { %1522 = vmatpush3.bf16.msra.mxu1 %v1602_v46 }
  0x4f   : > { %1523 = vmatprep.subr.bf16.mxu1 %v1605_v49 }
  0x50   : > { %1444 = vmatpush3.bf16.msra.mxu0 %v1604_v50 }
  0x51   : > { %1445 = vmatprep.subr.bf16.mxu0 %v1606_v51 }
  0x52   : > { %1524 = vmatpush3.bf16.msra.mxu1 %v1605_v49 }
  0x53   : > { %1525 = vmatprep.subr.bf16.mxu1 %v1608_v53 }
  0x54   : > { %1446 = vmatpush3.bf16.msra.mxu0 %v1607_v52 }
  0x55   : > { %1447 = vmatprep.subr.bf16.mxu0 %v1609_v54 }
  0x56   : > { %1526 = vmatpush3.bf16.msra.mxu1 %v1608_v53 }
  0x57   : > { %1527 = vmatprep.subr.bf16.mxu1 %v1611_v55 }
  0x58   : > { %1448 = vmatpush3.bf16.msra.mxu0 %v1610_v58 }
  0x5a   : > { %1528 = vmatpush3.bf16.msra.mxu1 %v1611_v55  ;;  %v470_v55 = vld [vmem:[#allocation2 + $0x20] sm:$0xff] }
  0x5b   : > { %867 = vmatmul.mubr.bf16.vlgmr.msra.gmra.mrb[0].mxu0 %v1612_v59 }
  0x5c   : > { %874 = vmatprep.mubr.bf16.mxu0 %v1617_v60  ;;  %v471_v60 = vld [vmem:[#allocation2 + $0x28] sm:$0xff] }
  0x5d   : > { %1530 = vmatmul.mubr.bf16.vlgmr.msra.gmra.mrb[0].mxu1 %v1616_v61 }
  0x5e   : > { %1533 = vmatprep.mubr.bf16.mxu1 %v1623_v62 }
  0x63   : > { %875 = vmatmul.mubr.bf16.gmra.mrb[4].mxu0 %v1619_v63 }
  0x64   : > { %882 = vmatprep.mubr.bf16.mxu0 %v1620_v0 }
  0x65   : > { %1534 = vmatmul.mubr.bf16.gmra.mrb[4].mxu1 %v1624_v1 }
  0x66   : > { %1537 = vmatprep.mubr.bf16.mxu1 %v1631_v2 }
  0x6b   : > { %883 = vmatmul.mubr.bf16.gmra.mrb[8].mxu0 %v1622_v3 }
  0x6c   : > { %890 = vmatprep.mubr.bf16.mxu0 %v1625_v4 }
  0x6d   : > { %1538 = vmatmul.mubr.bf16.gmra.mrb[8].mxu1 %v1632_v5 }
  0x6e   : > { %1541 = vmatprep.mubr.bf16.mxu1 %v1639_v6  ;;  %v472_v6 = vld [vmem:[#allocation2 + $0x30] sm:$0xff] }
  0x73   : > { %891 = vmatmul.mubr.bf16.gmra.mrb[12].mxu0 %v1627_v7 }
  0x74   : > { %898 = vmatprep.mubr.bf16.mxu0 %v1628_v8 }
  0x75   : > { %1542 = vmatmul.mubr.bf16.gmra.mrb[12].mxu1 %v1640_v9 }
  0x7b   : > { %899 = vmatmul.mubr.bf16.gmra.mrb[16].mxu0 %v1630_v10 }
  0x7c   : > { %906 = vmatprep.mubr.bf16.mxu0 %v1633_v11 }
  0x83   : > { %907 = vmatmul.mubr.bf16.gmra.mrb[20].mxu0 %v1635_v12  ;;  %v473_v12 = vld [vmem:[#allocation2 + $0x38] sm:$0xff] }
  0x84   : > { %914 = vmatprep.mubr.bf16.mxu0 %v1636_v13 }
  0x8b   : > { %915 = vmatmul.mubr.bf16.gmra.mrb[24].mxu0 %v1638_v14 }
  0x8c   : > { %922 = vmatprep.mubr.bf16.mxu0 %v1641_v15 }
  0x93   : > { %923 = vmatmul.mubr.bf16.gmra.mrb[28].mxu0 %v1643_v16 }
 0x12e   : > { %v1449_v17 = vpop.f32.mrb[0].mxu0 }
 0x12f   : > { %v1450_v18 = vpop.f32.mrb[1].mxu0 }
 0x130   : > { %v1451_v19 = vadd.f32 %v1450_v18, %v1449_v17  ;;  %v1452_v20 = vpop.f32.mrb[2].mxu0  ;;  %v1531_v21 = vpop.f32.mrb[0].mxu1 }
 0x131   : > { %v1453_v22 = vpop.f32.mrb[3].mxu0  ;;  %v965_v24 = vpop.f32.mrb[1].mxu1 }
 0x132   : > { %v1454_v25 = vadd.f32 %v1453_v22, %v1452_v20  ;;  %v966_v26 = vadd.f32 %v1451_v19, %v965_v24  ;;  %v1532_v27 = vpop.f32.mrb[2].mxu1  ;;  %v474_v22 = vld [vmem:[#allocation2 + $0x40] sm:$0xff] }
 0x133   : > { %v968_v29 = vpop.f32.mrb[3].mxu1 }
 0x134   : > { %v1028_v30 = vadd.f32 %v966_v26, %v466_v23  ;;  %v969_v31 = vadd.f32 %v1454_v25, %v968_v29  ;;  %v475_v25 = vld [vmem:[#allocation2 + $0x48] sm:$0xff] }
 0x136   : > { %1044 = vst [vmem:[#allocation2] sm:$0xff] %v1028_v30  ;;  %v1029_v32 = vadd.f32 %v969_v31, %v467_v28  ;;  %v1455_v33 = vpop.f32.mrb[4].mxu0 }
 0x137   : > { %v1456_v34 = vpop.f32.mrb[5].mxu0 }
 0x138   : > { %1045 = vst [vmem:[#allocation2 + $0x8] sm:$0xff] %v1029_v32  ;;  %v1457_v35 = vadd.f32 %v1456_v34, %v1455_v33  ;;  %v1458_v36 = vpop.f32.mrb[6].mxu0  ;;  %v1535_v37 = vpop.f32.mrb[4].mxu1  ;;  %v476_v33 = vld [vmem:[#allocation2 + $0x50] sm:$0xff] }
 0x139   : > { %v1459_v39 = vpop.f32.mrb[7].mxu0  ;;  %v981_v40 = vpop.f32.mrb[5].mxu1 }
 0x13a   : > { %v974_v41 = vadd.f32 %v1531_v21, %v1457_v35  ;;  %v1460_v42 = vadd.f32 %v1459_v39, %v1458_v36  ;;  %v1536_v43 = vpop.f32.mrb[6].mxu1 }
 0x13b   : > { %v984_v45 = vpop.f32.mrb[7].mxu1 }
 0x13c   : > { %v1030_v46 = vadd.f32 %v974_v41, %v468_v38  ;;  %v977_v47 = vadd.f32 %v1532_v27, %v1460_v42 }
 0x13e   : > { %1046 = vst [vmem:[#allocation2 + $0x10] sm:$0xff] %v1030_v46  ;;  %v1031_v48 = vadd.f32 %v977_v47, %v469_v44  ;;  %v1461_v49 = vpop.f32.mrb[8].mxu0  ;;  %v478_v46 = vld [vmem:[#allocation2 + $0x60] sm:$0xff] }
 0x13f   : > { %v1462_v50 = vpop.f32.mrb[9].mxu0 }
 0x140   : > { %1047 = vst [vmem:[#allocation2 + $0x18] sm:$0xff] %v1031_v48  ;;  %v1463_v51 = vadd.f32 %v1462_v50, %v1461_v49  ;;  %v1464_v52 = vpop.f32.mrb[10].mxu0  ;;  %v1539_v53 = vpop.f32.mrb[8].mxu1  ;;  %v479_v49 = vld [vmem:[#allocation2 + $0x68] sm:$0xff] }
 0x141   : > { %v1465_v54 = vpop.f32.mrb[11].mxu0  ;;  %v997_v56 = vpop.f32.mrb[9].mxu1 }
 0x142   : > { %v1466_v57 = vadd.f32 %v1465_v54, %v1464_v52  ;;  %v982_v58 = vadd.f32 %v1463_v51, %v981_v40  ;;  %v1540_v59 = vpop.f32.mrb[10].mxu1 }
 0x143   : > { %v1000_v61 = vpop.f32.mrb[11].mxu1 }
 0x144   : > { %v1032_v62 = vadd.f32 %v982_v58, %v470_v55  ;;  %v985_v63 = vadd.f32 %v1466_v57, %v984_v45  ;;  %v480_v57 = vld [vmem:[#allocation2 + $0x70] sm:$0xff] }
 0x146   : > { %1048 = vst [vmem:[#allocation2 + $0x20] sm:$0xff] %v1032_v62  ;;  %v1033_v0 = vadd.f32 %v985_v63, %v471_v60  ;;  %v1467_v1 = vpop.f32.mrb[12].mxu0 }
 0x147   : > { %v1468_v2 = vpop.f32.mrb[13].mxu0 }
 0x148   : > { %1049 = vst [vmem:[#allocation2 + $0x28] sm:$0xff] %v1033_v0  ;;  %v1469_v3 = vadd.f32 %v1468_v2, %v1467_v1  ;;  %v1470_v4 = vpop.f32.mrb[14].mxu0  ;;  %v1543_v5 = vpop.f32.mrb[12].mxu1  ;;  %v1064_v1 = vld [vmem:[#allocation2] sm:$0xff] (!%p1425_p11) }
 0x149   : > { %v1471_v7 = vpop.f32.mrb[15].mxu0  ;;  %v1013_v8 = vpop.f32.mrb[13].mxu1  ;;  %v1890_v2 = vld [vmem:[%s2042_s2] ss:$0 sm:$0xff] (!%p1425_p11) }
 0x14a   : > { %v990_v9 = vadd.f32 %v1535_v37, %v1469_v3  ;;  %v1472_v10 = vadd.f32 %v1471_v7, %v1470_v4  ;;  %v1544_v11 = vpop.f32.mrb[14].mxu1  ;;  %v477_v37 = vld [vmem:[#allocation2 + $0x58] sm:$0xff]  ;;  %v1895_v3 = vld [vmem:[%s2043_s3] ss:$0 sm:$0xff] (!%p1425_p11)  ;;  %v1087_v4 = vmul.f32 (!%p1425_p11), %v1890_v2, %v1064_v1 }
 0x14b   : > { %v1016_v13 = vpop.f32.mrb[15].mxu1 }
 0x14c   : > { %v1034_v14 = vadd.f32 %v990_v9, %v472_v6  ;;  %v993_v15 = vadd.f32 %v1536_v43, %v1472_v10  ;;  %v1126_v6 = vld [vmem:[%s2044_s4] sm:$0xff] (!%p1425_p11)  ;;  %v1067_v9 = vld [vmem:[#allocation2 + $0x18] sm:$0xff] (!%p1425_p11)  ;;  %v1110_v10 = vadd.f32 (!%p1425_p11), %v1895_v3, %v1087_v4 }
 0x14e   : > { %1050 = vst [vmem:[#allocation2 + $0x30] sm:$0xff] %v1034_v14  ;;  %v1035_v16 = vadd.f32 %v993_v15, %v473_v12  ;;  %v1473_v17 = vpop.f32.mrb[16].mxu0  ;;  %v1090_v14 = vmul.f32 (!%p1425_p11), %v1890_v2, %v1067_v9  ;;  %v1068_v15 = vld [vmem:[#allocation2 + $0x20] sm:$0xff] (!%p1425_p11) }
 0x14f   : > { %v1474_v18 = vpop.f32.mrb[17].mxu0 }
 0x150   : > { %1051 = vst [vmem:[#allocation2 + $0x38] sm:$0xff] %v1035_v16  ;;  %v1475_v19 = vadd.f32 %v1474_v18, %v1473_v17  ;;  %v1476_v20 = vpop.f32.mrb[18].mxu0  ;;  %v1129_v17 = vld [vmem:[%s2044_s4 + $0x18] sm:$0xff] (!%p1425_p11)  ;;  %v1091_v18 = vmul.f32 (!%p1425_p11), %v1890_v2, %v1068_v15  ;;  %v1139_v15 = vld [vmem:[%s2044_s4 + $0x68] sm:$0xff] (!%p1425_p11) }
 0x151   : > { %v1477_v21 = vpop.f32.mrb[19].mxu0 }
 0x152   : > { %v1478_v23 = vadd.f32 %v1477_v21, %v1476_v20  ;;  %v998_v24 = vadd.f32 %v1475_v19, %v997_v56  ;;  %v1069_v19 = vld [vmem:[#allocation2 + $0x28] sm:$0xff] (!%p1425_p11)  ;;  %v1142_v21 = vadd.f32 (!%p1425_p11), %v1126_v6, %v1110_v10  ;;  %v1137_v6 = vld [vmem:[%s2044_s4 + $0x58] sm:$0xff] (!%p1425_p11) }
 0x154   : > { %v1036_v26 = vadd.f32 %v998_v24, %v474_v22  ;;  %v1001_v27 = vadd.f32 %v1478_v23, %v1000_v61  ;;  %v481_v61 = vld [vmem:[#allocation2 + $0x78] sm:$0xff]  ;;  %v1113_v23 = vadd.f32 (!%p1425_p11), %v1895_v3, %v1090_v14  ;;  %v1130_v24 = vld [vmem:[%s2044_s4 + $0x20] sm:$0xff] (!%p1425_p11) }
 0x155   : > { %v1070_v20 = vld [vmem:[#allocation2 + $0x30] sm:$0xff] (!%p1425_p11) }
 0x156   : > { %1052 = vst [vmem:[#allocation2 + $0x40] sm:$0xff] %v1036_v26  ;;  %v1037_v28 = vadd.f32 %v1001_v27, %v475_v25  ;;  %v1479_v29 = vpop.f32.mrb[20].mxu0  ;;  %v1092_v25 = vmul.f32 (!%p1425_p11), %v1890_v2, %v1069_v19 }
 0x157   : > { %v1480_v30 = vpop.f32.mrb[21].mxu0  ;;  %v1071_v26 = vld [vmem:[#allocation2 + $0x38] sm:$0xff] (!%p1425_p11) }
 0x158   : > { %1053 = vst [vmem:[#allocation2 + $0x48] sm:$0xff] %v1037_v28  ;;  %v1481_v31 = vadd.f32 %v1480_v30, %v1479_v29  ;;  %v1482_v32 = vpop.f32.mrb[22].mxu0  ;;  %v1114_v28 = vadd.f32 (!%p1425_p11), %v1895_v3, %v1091_v18  ;;  %v1131_v29 = vld [vmem:[%s2044_s4 + $0x28] sm:$0xff] (!%p1425_p11)  ;;  %v1093_v30 = vmul.f32 (!%p1425_p11), %v1890_v2, %v1070_v20 }
 0x159   : > { %v1483_v34 = vpop.f32.mrb[23].mxu0 }
 0x15a   : > { %v1006_v35 = vadd.f32 %v1539_v53, %v1481_v31  ;;  %v1484_v36 = vadd.f32 %v1483_v34, %v1482_v32  ;;  %v1094_v31 = vmul.f32 (!%p1425_p11), %v1890_v2, %v1071_v26 }
 0x15c   : > { %v1038_v38 = vadd.f32 %v1006_v35, %v476_v33  ;;  %v1009_v39 = vadd.f32 %v1540_v59, %v1484_v36  ;;  %v1158_v33 = vmax.f32 (!%p1425_p11), %v1142_v21, 0.0  ;;  %v1145_v35 = vadd.f32 (!%p1425_p11), %v1129_v17, %v1113_v23  ;;  %v1141_v23 = vld [vmem:[%s2044_s4 + $0x78] sm:$0xff] (!%p1425_p11) }
 0x15d   : > { %v1072_v32 = vld [vmem:[#allocation2 + $0x40] sm:$0xff] (!%p1425_p11)  ;;  %v1115_v36 = vadd.f32 (!%p1425_p11), %v1895_v3, %v1092_v25 }
 0x15e   : > { %1054 = vst [vmem:[#allocation2 + $0x50] sm:$0xff] %v1038_v38  ;;  %v1039_v40 = vadd.f32 %v1009_v39, %v477_v37  ;;  %v1485_v41 = vpop.f32.mrb[24].mxu0  ;;  %v1132_v37 = vld [vmem:[%s2044_s4 + $0x30] sm:$0xff] (!%p1425_p11)  ;;  %v1133_v38 = vld [vmem:[%s2044_s4 + $0x38] sm:$0xff] (!%p1425_p11)  ;;  %1174 = vst [vmem:[%s2045_s5] sm:$0xff] (!%p1425_p11), %v1158_v33 }
 0x15f   : > { %v1486_v42 = vpop.f32.mrb[25].mxu0  ;;  %v1073_v39 = vld [vmem:[#allocation2 + $0x48] sm:$0xff] (!%p1425_p11) }
 0x160   : > { %1055 = vst [vmem:[#allocation2 + $0x58] sm:$0xff] %v1039_v40  ;;  %v1487_v43 = vadd.f32 %v1486_v42, %v1485_v41  ;;  %v1488_v44 = vpop.f32.mrb[26].mxu0  ;;  %v1146_v41 = vadd.f32 (!%p1425_p11), %v1130_v24, %v1114_v28  ;;  %v1116_v42 = vadd.f32 (!%p1425_p11), %v1895_v3, %v1093_v30 }
 0x161   : > { %v1489_v45 = vpop.f32.mrb[27].mxu0 }
 0x162   : > { %v1490_v47 = vadd.f32 %v1489_v45, %v1488_v44  ;;  %v1014_v48 = vadd.f32 %v1487_v43, %v1013_v8  ;;  %v1066_v8 = vld [vmem:[#allocation2 + $0x10] sm:$0xff] (!%p1425_p11)  ;;  %v1117_v43 = vadd.f32 (!%p1425_p11), %v1895_v3, %v1094_v31 }
 0x163   : > { %v1089_v12 = vmul.f32 (!%p1425_p11), %v1890_v2, %v1066_v8 }
 0x164   : > { %v1040_v50 = vadd.f32 %v1014_v48, %v478_v46  ;;  %v1017_v51 = vadd.f32 %v1490_v47, %v1016_v13  ;;  %v1128_v13 = vld [vmem:[%s2044_s4 + $0x10] sm:$0xff] (!%p1425_p11)  ;;  %v1161_v47 = vmax.f32 (!%p1425_p11), %v1145_v35, 0.0  ;;  %v1147_v48 = vadd.f32 (!%p1425_p11), %v1131_v29, %v1115_v36 }
 0x165   : > { %v1112_v22 = vadd.f32 (!%p1425_p11), %v1895_v3, %v1089_v12  ;;  %v1074_v44 = vld [vmem:[#allocation2 + $0x50] sm:$0xff] (!%p1425_p11) }
 0x166   : > { %1056 = vst [vmem:[#allocation2 + $0x60] sm:$0xff] %v1040_v50  ;;  %v1041_v52 = vadd.f32 %v1017_v51, %v479_v49  ;;  %v1491_v53 = vpop.f32.mrb[28].mxu0  ;;  %v1095_v49 = vmul.f32 (!%p1425_p11), %v1890_v2, %v1072_v32  ;;  %v1162_v51 = vmax.f32 (!%p1425_p11), %v1146_v41, 0.0  ;;  %1177 = vst [vmem:[%s2045_s5 + $0x18] sm:$0xff] (!%p1425_p11), %v1161_v47 }
 0x167   : > { %v1492_v54 = vpop.f32.mrb[29].mxu0  ;;  %v1144_v34 = vadd.f32 (!%p1425_p11), %v1128_v13, %v1112_v22  ;;  %v1075_v45 = vld [vmem:[#allocation2 + $0x58] sm:$0xff] (!%p1425_p11)  ;;  %v1140_v22 = vld [vmem:[%s2044_s4 + $0x70] sm:$0xff] (!%p1425_p11) }
 0x168   : > { %1057 = vst [vmem:[#allocation2 + $0x68] sm:$0xff] %v1041_v52  ;;  %v1493_v55 = vadd.f32 %v1492_v54, %v1491_v53  ;;  %v1494_v56 = vpop.f32.mrb[30].mxu0  ;;  %v1148_v52 = vadd.f32 (!%p1425_p11), %v1132_v37, %v1116_v42  ;;  %v1149_v53 = vadd.f32 (!%p1425_p11), %v1133_v38, %v1117_v43  ;;  %v1134_v54 = vld [vmem:[%s2044_s4 + $0x40] sm:$0xff] (!%p1425_p11)  ;;  %1178 = vst [vmem:[%s2045_s5 + $0x20] sm:$0xff] (!%p1425_p11), %v1162_v51 }
 0x169   : > { %v1495_v58 = vpop.f32.mrb[31].mxu0  ;;  %v1160_v46 = vmax.f32 (!%p1425_p11), %v1144_v34, 0.0 }
 0x16a   : > { %v1022_v59 = vadd.f32 %v1543_v5, %v1493_v55  ;;  %v1496_v60 = vadd.f32 %v1495_v58, %v1494_v56  ;;  %1063 = sbr.rel (%p1425_p11) target bundleno = 385 (0x181), region = 74  ;;  %v1065_v5 = vld [vmem:[#allocation2 + $0x8] sm:$0xff] (!%p1425_p11)  ;;  %v1096_v55 = vmul.f32 (!%p1425_p11), %v1890_v2, %v1073_v39  ;;  %v1118_v58 = vadd.f32 (!%p1425_p11), %v1895_v3, %v1095_v49 }
 0x16b   : > { %v1088_v7 = vmul.f32 (!%p1425_p11), %v1890_v2, %v1065_v5  ;;  %1176 = vst [vmem:[%s2045_s5 + $0x10] sm:$0xff] (!%p1425_p11), %v1160_v46  ;;  %v1165_v1 = vmax.f32 (!%p1425_p11), %v1149_v53, 0.0  ;;  %v1136_v5 = vld [vmem:[%s2044_s4 + $0x50] sm:$0xff] (!%p1425_p11) }
 0x16c   : > { %v1042_v62 = vadd.f32 %v1022_v59, %v480_v57  ;;  %v1025_v63 = vadd.f32 %v1544_v11, %v1496_v60  ;;  %v1127_v11 = vld [vmem:[%s2044_s4 + $0x8] sm:$0xff] (!%p1425_p11)  ;;  %v1163_v57 = vmax.f32 (!%p1425_p11), %v1147_v48, 0.0  ;;  %v1097_v60 = vmul.f32 (!%p1425_p11), %v1890_v2, %v1074_v44 }
 0x16d   : > { %v1111_v16 = vadd.f32 (!%p1425_p11), %v1895_v3, %v1088_v7  ;;  %v1076_v50 = vld [vmem:[#allocation2 + $0x60] sm:$0xff] (!%p1425_p11)  ;;  %v1135_v59 = vld [vmem:[%s2044_s4 + $0x48] sm:$0xff] (!%p1425_p11)  ;;  %v1119_v4 = vadd.f32 (!%p1425_p11), %v1895_v3, %v1096_v55  ;;  %v1150_v8 = vadd.f32 (!%p1425_p11), %v1134_v54, %v1118_v58  ;;  %1181 = vst [vmem:[%s2045_s5 + $0x38] sm:$0xff] (!%p1425_p11), %v1165_v1 }
 0x16e   : > { %1058 = vst [vmem:[#allocation2 + $0x70] sm:$0xff] %v1042_v62  ;;  %v1043_v0 = vadd.f32 %v1025_v63, %v481_v61  ;;  %v1098_v61 = vmul.f32 (!%p1425_p11), %v1890_v2, %v1075_v45  ;;  %v1099_v7 = vmul.f32 (!%p1425_p11), %v1890_v2, %v1076_v50  ;;  %1179 = vst [vmem:[%s2045_s5 + $0x28] sm:$0xff] (!%p1425_p11), %v1163_v57 }
 0x16f   : > { %v1143_v27 = vadd.f32 (!%p1425_p11), %v1127_v11, %v1111_v16  ;;  %v1077_v56 = vld [vmem:[#allocation2 + $0x68] sm:$0xff] (!%p1425_p11)  ;;  %v1120_v9 = vadd.f32 (!%p1425_p11), %v1895_v3, %v1097_v60  ;;  %v1138_v11 = vld [vmem:[%s2044_s4 + $0x60] sm:$0xff] (!%p1425_p11)  ;;  %v1151_v13 = vadd.f32 (!%p1425_p11), %v1135_v59, %v1119_v4  ;;  %v1166_v18 = vmax.f32 (!%p1425_p11), %v1150_v8, 0.0 }
 0x170   : > { %1059 = vst [vmem:[#allocation2 + $0x78] sm:$0xff] %v1043_v0  ;;  %v1164_v0 = vmax.f32 (!%p1425_p11), %v1148_v52, 0.0  ;;  %v1121_v10 = vadd.f32 (!%p1425_p11), %v1895_v3, %v1098_v61  ;;  %v1100_v12 = vmul.f32 (!%p1425_p11), %v1890_v2, %v1077_v56  ;;  %v1122_v14 = vadd.f32 (!%p1425_p11), %v1895_v3, %v1099_v7 }
 0x171   : > { %v1159_v40 = vmax.f32 %v1143_v27, 0.0  ;;  %v1152_v19 = vadd.f32 %v1136_v5, %v1120_v9  ;;  %v1167_v24 = vmax.f32 %v1151_v13, 0.0  ;;  %1182 = vst [vmem:[%s2045_s5 + $0x40] sm:$0xff] %v1166_v18 }
 0x172   : > { %1180 = vst [vmem:[%s2045_s5 + $0x30] sm:$0xff] %v1164_v0  ;;  %v1153_v20 = vadd.f32 %v1137_v6, %v1121_v10  ;;  %v1123_v21 = vadd.f32 %v1895_v3, %v1100_v12  ;;  %v1154_v25 = vadd.f32 %v1138_v11, %v1122_v14 }
 0x173   : > { %1175 = vst [vmem:[%s2045_s5 + $0x8] sm:$0xff] %v1159_v40  ;;  %1183 = vst [vmem:[%s2045_s5 + $0x48] sm:$0xff] %v1167_v24 }
 0x174   : > { %v1169_v28 = vmax.f32 %v1153_v20, 0.0  ;;  %v1155_v29 = vadd.f32 %v1139_v15, %v1123_v21  ;;  %v1170_v30 = vmax.f32 %v1154_v25, 0.0 }
 0x175   : > { %v1078_v62 = vld [vmem:[#allocation2 + $0x70] sm:$0xff] }
 0x176   : > { %v1101_v16 = vmul.f32 %v1890_v2, %v1078_v62  ;;  %1185 = vst [vmem:[%s2045_s5 + $0x58] sm:$0xff] %v1169_v28  ;;  %1186 = vst [vmem:[%s2045_s5 + $0x60] sm:$0xff] %v1170_v30 }
 0x177   : > { %v1079_v63 = vld [vmem:[#allocation2 + $0x78] sm:$0xff] }
 0x178   : > { %v1102_v17 = vmul.f32 %v1890_v2, %v1079_v63  ;;  %v1124_v26 = vadd.f32 %v1895_v3, %v1101_v16  ;;  %v1168_v2 = vmax.f32 %v1152_v19, 0.0 }
 0x17a   : > { %v1125_v27 = vadd.f32 %v1895_v3, %v1102_v17  ;;  %v1156_v31 = vadd.f32 %v1140_v22, %v1124_v26  ;;  %1184 = vst [vmem:[%s2045_s5 + $0x50] sm:$0xff] %v1168_v2  ;;  %v1171_v3 = vmax.f32 %v1155_v29, 0.0 }
 0x17c   : > { %v1157_v32 = vadd.f32 %v1141_v23, %v1125_v27  ;;  %v1172_v33 = vmax.f32 %v1156_v31, 0.0  ;;  %1187 = vst [vmem:[%s2045_s5 + $0x68] sm:$0xff] %v1171_v3 }
 0x17e   : > { %v1173_v34 = vmax.f32 %v1157_v32, 0.0  ;;  %1188 = vst [vmem:[%s2045_s5 + $0x70] sm:$0xff] %v1172_v33 }
 0x180   : > { %1189 = vst [vmem:[%s2045_s5 + $0x78] sm:$0xff] %v1173_v34 }
 0x181 PF: > { %s15_s22 = sadd.s32 1, %s1682_s22   ;;  %s2046_s18 = smov %s1670_s19 }
 0x182   : > { %p12_p12 = scmp.ge.s32.totalorder %s15_s22, 4   ;;  %s2047_s19 = smov %s1750_s26 }
 0x183   : > { %s2048_s20 = smov %s1678_s21  ;;  %s2049_s21 = smov %s2051_s23 }
 0x184   :  { %14 = sbr.rel (!%p12_p12) target bundleno = 3 (0x3), region = 127 }

// kernel: resnet_up_forward.33
= control target key start
LH: loop header
LB: loop body
LE: loop exit
PB: predicated region body
PF: predicated region fallthrough
CT: control target
= control target key end

     0   :  { %s1107_s15 = smov 0   ;;  %s1109_s16 = smov 0   ;;  %s1226_s0 = inlined_call_operand.vmem [shape: bf16[32,768], index: 0, kind: input, shape index: {}]   ;;  %s1227_s1 = inlined_call_operand.vmem [shape: bf16[768,128], index: 1, kind: input, shape index: {}]   ;;  %s1228_s2 = inlined_call_operand.vmem [shape: f32[1,128], index: 2, kind: input, shape index: {}]   ;;  %s1229_s3 = inlined_call_operand.vmem [shape: f32[1,128], index: 3, kind: input, shape index: {}]   ;;  %s1230_s4 = inlined_call_operand.vmem [shape: f32[32,128], index: 4, kind: output, shape index: {}]  }
   0x1   :  { %s1111_s17 = smov 0   ;;  %s1113_s18 = smov 0  }
   0x2   :  { %s1115_s19 = smov 0  }
   0x3 LB: > { %s26_s20 = sadd.s32 1, %s1075_s18  ;;  %p49_p1 = scmp.ne.s32.totalorder %s1067_s16, %s1063_s15  ;;  %s1079_s19 = sphi %s1115_s19, %s14_s19   ;;  %s1075_s18 = sphi %s1113_s18, %s1234_s18   ;;  %s1071_s17 = sphi %s1111_s17, %s1233_s17   ;;  %s1067_s16 = sphi %s1109_s16, %s1232_s16   ;;  %s1063_s15 = sphi %s1107_s15, %s1231_s15  }
   0x4   : > { %p27_p0 = scmp.ge.s32.totalorder %s26_s20, 2  ;;  %p50_p2 = scmp.eq.s32.totalorder %s1079_s19, 0 }
   0x5   : > { %s42_s22 = sadd.s32 1, %s1067_s16  ;;  %p857_p5 = scmp.ge.s32.totalorder %s1079_s19, 2 }
   0x6   : > { %s1236_s20 = smov (%p27_p0, %s26_s20), 0  ;;  %p51_p3 = por %p50_p2, %p49_p1 }
   0x7   : > { %s38_s21 = ssub.s32 %s1075_s18, %s1236_s20  ;;  %195 = sbr.rel (%p857_p5) target bundleno = 23 (0x17), region = 24 }
   0x8   : > { %p40_p4 = scmp.eq.s32.totalorder %s38_s21, 0 }
   0xa   : > { %s1142_s23 = scalar_select %p40_p4, %s1067_s16, %s42_s22  }
   0xe   : > { %198 = sbr.rel (!%p51_p3) target bundleno = 23 (0x17), region = 28  ;;  %s200_s24 = sand.u32 (%p51_p3), 1, %s1067_s16  }
   0xf   : > { %s907_s25 = smul.u32 (%p51_p3), 12, %s1075_s18 }
  0x10   : > { %s966_s26 = smul.u32 (%p51_p3), 48, %s200_s24 }
  0x11   : > { %s208_s29 = scalar_lea.vmem (%p51_p3), %s1226_s0, %s907_s25 }
  0x12   : > { %v223_v0 = vld [vmem:[%s208_s29] sm:$0xff] (%p51_p3)  ;;  %v225_v1 = vld [vmem:[%s208_s29 + $0x18] sm:$0xff] (%p51_p3)  ;;  %v227_v2 = vld [vmem:[%s208_s29 + $0x30] sm:$0xff] (%p51_p3)  ;;  %s202_s30 = scalar_lea.vmem (%p51_p3), [#allocation3], %s966_s26 }
  0x13   : > { %224 = vst [vmem:[%s202_s30] sm:$0xff] (%p51_p3), %v223_v0  ;;  %226 = vst [vmem:[%s202_s30 + $0xc] sm:$0xff] (%p51_p3), %v225_v1  ;;  %v229_v3 = vld [vmem:[%s208_s29 + $0x48] sm:$0xff] (%p51_p3)  ;;  %v861_v5 = vld [vmem:[%s208_s29 + $0x20] sm:$0xf] (%p51_p3) }
  0x14   : > { %228 = vst [vmem:[%s202_s30 + $0x18] sm:$0xff] (%p51_p3), %v227_v2  ;;  %v859_v4 = vld [vmem:[%s208_s29 + $0x8] sm:$0xf] (%p51_p3)  ;;  %230 = vst [vmem:[%s202_s30 + $0x24] sm:$0xff] (%p51_p3), %v229_v3  ;;  %v863_v6 = vld [vmem:[%s208_s29 + $0x38] sm:$0xf] (%p51_p3) }
  0x15   : > { %860 = vst [vmem:[%s202_s30 + $0x8] sm:$0xf] %v859_v4  ;;  %862 = vst [vmem:[%s202_s30 + $0x14] sm:$0xf] %v861_v5  ;;  %v865_v7 = vld [vmem:[%s208_s29 + $0x50] sm:$0xf] }
  0x16   : > { %864 = vst [vmem:[%s202_s30 + $0x20] sm:$0xf] %v863_v6  ;;  %866 = vst [vmem:[%s202_s30 + $0x2c] sm:$0xf] %v865_v7 }
  0x17 PF: > { %p867_p6 = scmp.ge.s32.totalorder %s1079_s19, 1  ;;  %p262_p7 = scmp.lt.s32.totalorder %s1079_s19, 3 }
  0x19   : > { %p263_p8 = pnand %p867_p6, %p262_p7 }
  0x1a   : > { %s269_s5 = sand.u32 (!%p263_p8), 1, %s1063_s15   ;;  %s313_s6 = smul.u32 (!%p263_p8), 48, %s1071_s17 }
  0x1b   : > { %266 = sbr.rel (%p263_p8) target bundleno = 318 (0x13e), region = 58  ;;  %p869_p10 = scmp.ne.s32.totalorder (!%p263_p8), %s1071_s17, 0 }
  0x1c   : > { %s967_s7 = smul.u32 (!%p263_p8), 48, %s269_s5  ;;  %p314_p9 = scmp.lt.s32.totalorder (!%p263_p8), %s313_s6, 95 }
  0x1e   : > { %s1159_s12 = scalar_lea.vmem (!%p263_p8), [#allocation3], %s967_s7 }
  0x22   : > { %s1238_s6 = smov (!%p314_p9, %s313_s6), 95  ;;  %341 = sbr.rel (%p869_p10) target bundleno = 41 (0x29), region = 66 }
  0x23   : > { %s868_s8 = sshll.u32 %s1238_s6, 2  ;;  %v1081_v8 = vmov (!%p869_p10), 0.0  }
  0x24   : > { %s1157_s11 = scalar_lea.vmem %s1227_s1, %s868_s8  ;;  %342 = vst [vmem:[#allocation2] sm:$0xff] (!%p869_p10), %v1081_v8  ;;  %343 = vst [vmem:[#allocation2 + $0x8] sm:$0xff] (!%p869_p10), %v1081_v8 }
  0x25   : > { %344 = vst [vmem:[#allocation2 + $0x10] sm:$0xff] (!%p869_p10), %v1081_v8  ;;  %345 = vst [vmem:[#allocation2 + $0x18] sm:$0xff] (!%p869_p10), %v1081_v8 }
  0x29 PF: > { %v1009_v9 = vld [vmem:[%s1157_s11 + $0x40] sm:$0xff]   ;;  %v1012_v12 = vld [vmem:[%s1157_s11 + $0x48] sm:$0xff]   ;;  %v1015_v15 = vld [vmem:[%s1157_s11 + $0x50] sm:$0xff]   ;;  %p900_p11 = scmp.ne.s32.totalorder %s1071_s17, 1 }
  0x2a   : > { %v1010_v10 = vld [vmem:[%s1157_s11] sm:$0xff]   ;;  %908 = vmatprep.subr.bf16.mxu0 %v1009_v9  ;;  %v1013_v13 = vld [vmem:[%s1157_s11 + $0x8] sm:$0xff]   ;;  %v1016_v16 = vld [vmem:[%s1157_s11 + $0x10] sm:$0xff]  }
  0x2b   : > { %v1011_v11 = vld [vmem:[%s1157_s11 + $0x80] sm:$0xff]   ;;  %909 = vmatpush3.bf16.msra.mxu0 %v1010_v10  ;;  %v1014_v14 = vld [vmem:[%s1157_s11 + $0x88] sm:$0xff]   ;;  %v1017_v17 = vld [vmem:[%s1157_s11 + $0x90] sm:$0xff]  }
  0x2c   : > { %946 = vmatprep.subr.bf16.mxu1 %v1011_v11  ;;  %910 = vmatprep.subr.bf16.mxu0 %v1012_v12  ;;  %v1018_v18 = vld [vmem:[%s1157_s11 + $0x58] sm:$0xff]   ;;  %v1021_v21 = vld [vmem:[%s1157_s11 + $0x60] sm:$0xff]   ;;  %v1024_v24 = vld [vmem:[%s1157_s11 + $0x68] sm:$0xff]  }
  0x2d   : > { %947 = vmatpush3.bf16.msra.mxu1 %v1011_v11  ;;  %v1019_v19 = vld [vmem:[%s1157_s11 + $0x18] sm:$0xff]   ;;  %v1023_v22 = vld [vmem:[%s1157_s11 + $0xa0] sm:$0xff]   ;;  %v1026_v25 = vld [vmem:[%s1157_s11 + $0xa8] sm:$0xff]  }
  0x2e   : > { %948 = vmatprep.subr.bf16.mxu1 %v1014_v14  ;;  %v1020_v20 = vld [vmem:[%s1157_s11 + $0x98] sm:$0xff]   ;;  %v1022_v23 = vld [vmem:[%s1157_s11 + $0x20] sm:$0xff]   ;;  %v1025_v26 = vld [vmem:[%s1157_s11 + $0x28] sm:$0xff]  }
  0x2f   : > { %911 = vmatpush3.bf16.msra.mxu0 %v1013_v13  ;;  %v1027_v27 = vld [vmem:[%s1157_s11 + $0x70] sm:$0xff]   ;;  %v1030_v30 = vld [vmem:[%s1157_s11 + $0x78] sm:$0xff]   ;;  %v346_v45 = vld [vmem:[#allocation2] sm:$0xff] }
  0x30   : > { %912 = vmatprep.subr.bf16.mxu0 %v1015_v15  ;;  %v1028_v28 = vld [vmem:[%s1157_s11 + $0x30] sm:$0xff]   ;;  %v1032_v31 = vld [vmem:[%s1157_s11 + $0xb8] sm:$0xff]   ;;  %v347_v50 = vld [vmem:[#allocation2 + $0x8] sm:$0xff] }
  0x31   : > { %949 = vmatpush3.bf16.msra.mxu1 %v1014_v14  ;;  %v1029_v29 = vld [vmem:[%s1157_s11 + $0xb0] sm:$0xff]   ;;  %v1031_v34 = vld [vmem:[%s1157_s11 + $0x38] sm:$0xff]   ;;  %v901_v4 = vld [vmem:[%s1228_s2] ss:$0 sm:$0xff] (!%p900_p11) }
  0x32   : > { %950 = vmatprep.subr.bf16.mxu1 %v1017_v17  ;;  %v1035_v32 = vld [vmem:[%s1159_s12 + $0x4] ss:$12 sps:$4 sm:$0xff]   ;;  %v1036_v33 = vld [vmem:[%s1159_s12 + $0x8] ss:$12 sps:$4 sm:$0xff]   ;;  %v1033_v35 = vld [vmem:[%s1159_s12] ss:$12 sps:$4 sm:$0xff]  }
  0x33   : > { %913 = vmatpush3.bf16.msra.mxu0 %v1016_v16  ;;  %614 = vmatprep.mubr.bf16.mxu0 %v1035_v32  ;;  %v1038_v36 = vld [vmem:[%s1159_s12 + $0x1c] ss:$12 sps:$4 sm:$0xff]   ;;  %v1037_v37 = vld [vmem:[%s1159_s12 + $0x20] ss:$12 sps:$4 sm:$0xff]   ;;  %v1040_v38 = vld [vmem:[%s1159_s12 + $0x18] ss:$12 sps:$4 sm:$0xff]  }
  0x34   : > { %914 = vmatprep.subr.bf16.mxu0 %v1018_v18  ;;  %962 = vmatprep.mubr.bf16.mxu1 %v1036_v33  ;;  %v348_v59 = vld [vmem:[#allocation2 + $0x10] sm:$0xff]  ;;  %v349_v63 = vld [vmem:[#allocation2 + $0x18] sm:$0xff]  ;;  %v902_v5 = vld [vmem:[%s1229_s3] ss:$0 sm:$0xff] (!%p900_p11) }
  0x35   : > { %951 = vmatpush3.bf16.msra.mxu1 %v1017_v17 }
  0x36   : > { %952 = vmatprep.subr.bf16.mxu1 %v1020_v20 }
  0x37   : > { %915 = vmatpush3.bf16.msra.mxu0 %v1019_v19 }
  0x38   : > { %916 = vmatprep.subr.bf16.mxu0 %v1021_v21 }
  0x39   : > { %953 = vmatpush3.bf16.msra.mxu1 %v1020_v20 }
  0x3a   : > { %954 = vmatprep.subr.bf16.mxu1 %v1023_v22 }
  0x3b   : > { %917 = vmatpush3.bf16.msra.mxu0 %v1022_v23 }
  0x3c   : > { %918 = vmatprep.subr.bf16.mxu0 %v1024_v24 }
  0x3d   : > { %955 = vmatpush3.bf16.msra.mxu1 %v1023_v22 }
  0x3e   : > { %956 = vmatprep.subr.bf16.mxu1 %v1026_v25 }
  0x3f   : > { %919 = vmatpush3.bf16.msra.mxu0 %v1025_v26 }
  0x40   : > { %920 = vmatprep.subr.bf16.mxu0 %v1027_v27 }
  0x41   : > { %957 = vmatpush3.bf16.msra.mxu1 %v1026_v25 }
  0x42   : > { %958 = vmatprep.subr.bf16.mxu1 %v1029_v29 }
  0x43   : > { %921 = vmatpush3.bf16.msra.mxu0 %v1028_v28 }
  0x44   : > { %922 = vmatprep.subr.bf16.mxu0 %v1030_v30 }
  0x45   : > { %959 = vmatpush3.bf16.msra.mxu1 %v1029_v29 }
  0x46   : > { %960 = vmatprep.subr.bf16.mxu1 %v1032_v31 }
  0x47   : > { %923 = vmatpush3.bf16.msra.mxu0 %v1031_v34 }
  0x49   : > { %961 = vmatpush3.bf16.msra.mxu1 %v1032_v31 }
  0x4a   : > { %615 = vmatmul.mubr.bf16.vlgmr.msra.gmra.mrb[0].mxu0 %v1033_v35 }
  0x4b   : > { %622 = vmatprep.mubr.bf16.mxu0 %v1038_v36 }
  0x4c   : > { %963 = vmatmul.mubr.bf16.vlgmr.msra.gmra.mrb[0].mxu1 %v1037_v37 }
  0x52   : > { %623 = vmatmul.mubr.bf16.gmra.mrb[4].mxu0 %v1040_v38 }
 0x11d   : > { %v924_v39 = vpop.f32.mrb[0].mxu0 }
 0x11e   : > { %v925_v40 = vpop.f32.mrb[1].mxu0 }
 0x11f   : > { %v926_v41 = vadd.f32 %v925_v40, %v924_v39  ;;  %v927_v42 = vpop.f32.mrb[2].mxu0  ;;  %v964_v43 = vpop.f32.mrb[0].mxu1 }
 0x120   : > { %v928_v44 = vpop.f32.mrb[3].mxu0  ;;  %v665_v46 = vpop.f32.mrb[1].mxu1 }
 0x121   : > { %v929_v47 = vadd.f32 %v928_v44, %v927_v42  ;;  %v666_v48 = vadd.f32 %v926_v41, %v665_v46  ;;  %v965_v49 = vpop.f32.mrb[2].mxu1 }
 0x122   : > { %v668_v51 = vpop.f32.mrb[3].mxu1 }
 0x123   : > { %v680_v52 = vadd.f32 %v666_v48, %v346_v45  ;;  %v669_v53 = vadd.f32 %v929_v47, %v668_v51 }
 0x125   : > { %684 = vst [vmem:[#allocation2] sm:$0xff] %v680_v52  ;;  %v681_v54 = vadd.f32 %v669_v53, %v347_v50  ;;  %v930_v55 = vpop.f32.mrb[4].mxu0 }
 0x126   : > { %v931_v56 = vpop.f32.mrb[5].mxu0 }
 0x127   : > { %685 = vst [vmem:[#allocation2 + $0x8] sm:$0xff] %v681_v54  ;;  %v932_v57 = vadd.f32 %v931_v56, %v930_v55  ;;  %v933_v58 = vpop.f32.mrb[6].mxu0 }
 0x128   : > { %v934_v60 = vpop.f32.mrb[7].mxu0 }
 0x129   : > { %v674_v61 = vadd.f32 %v964_v43, %v932_v57  ;;  %v935_v62 = vadd.f32 %v934_v60, %v933_v58  ;;  %691 = sbr.rel (%p900_p11) target bundleno = 318 (0x13e), region = 70 }
 0x12b   : > { %v682_v0 = vadd.f32 %v674_v61, %v348_v59  ;;  %v677_v1 = vadd.f32 %v965_v49, %v935_v62 }
 0x12c   : > { %v692_v3 = vld [vmem:[#allocation2] sm:$0xff] (!%p900_p11) }
 0x12d   : > { %686 = vst [vmem:[#allocation2 + $0x10] sm:$0xff] %v682_v0  ;;  %v683_v2 = vadd.f32 %v677_v1, %v349_v63  ;;  %v703_v6 = vmul.f32 (!%p900_p11), %v901_v4, %v692_v3 }
 0x12e   : > { %v693_v7 = vld [vmem:[#allocation2 + $0x8] sm:$0xff] (!%p900_p11) }
 0x12f   : > { %687 = vst [vmem:[#allocation2 + $0x18] sm:$0xff] %v683_v2  ;;  %v704_v10 = vmul.f32 (!%p900_p11), %v901_v4, %v693_v7  ;;  %v714_v13 = vadd.f32 (!%p900_p11), %v902_v5, %v703_v6 }
 0x131   : > { %v715_v14 = vadd.f32 %v902_v5, %v704_v10  ;;  %v718_v17 = vmax.f32 %v714_v13, 0.0 }
 0x133   : > { %v719_v18 = vmax.f32 %v715_v14, 0.0  ;;  %722 = vst [vmem:[%s1230_s4] sm:$0xff] %v718_v17 }
 0x134   : > { %v694_v8 = vld [vmem:[#allocation2 + $0x10] sm:$0xff] }
 0x135   : > { %v705_v11 = vmul.f32 %v901_v4, %v694_v8  ;;  %723 = vst [vmem:[%s1230_s4 + $0x8] sm:$0xff] %v719_v18 }
 0x136   : > { %v695_v9 = vld [vmem:[#allocation2 + $0x18] sm:$0xff] }
 0x137   : > { %v706_v12 = vmul.f32 %v901_v4, %v695_v9  ;;  %v716_v15 = vadd.f32 %v902_v5, %v705_v11 }
 0x139   : > { %v717_v16 = vadd.f32 %v902_v5, %v706_v12  ;;  %v720_v19 = vmax.f32 %v716_v15, 0.0 }
 0x13b   : > { %v721_v20 = vmax.f32 %v717_v16, 0.0  ;;  %724 = vst [vmem:[%s1230_s4 + $0x10] sm:$0xff] %v720_v19 }
 0x13d   : > { %725 = vst [vmem:[%s1230_s4 + $0x18] sm:$0xff] %v721_v20 }
 0x13e PF: > { %s14_s19 = sadd.s32 1, %s1079_s19   ;;  %s1231_s15 = smov %s1067_s16 }
 0x13f   : > { %p11_p12 = scmp.ge.s32.totalorder %s14_s19, 4   ;;  %s1232_s16 = smov %s1142_s23 }
 0x140   : > { %s1233_s17 = smov %s1075_s18  ;;  %s1234_s18 = smov %s1236_s20 }
 0x141   :  { %13 = sbr.rel (!%p11_p12) target bundleno = 3 (0x3), region = 120 }

// kernel: resnet_up_forward.32
= control target key start
LH: loop header
LB: loop body
LE: loop exit
PB: predicated region body
PF: predicated region fallthrough
CT: control target
= control target key end

     0   :  { %s329_s1 = inlined_call_operand.vmem [shape: bf16[128,128], index: 1, kind: input, shape index: {}]   ;;  %s330_s0 = inlined_call_operand.vmem [shape: bf16[32,128], index: 0, kind: input, shape index: {}]   ;;  %s331_s2 = inlined_call_operand.vmem [shape: f32[1,128], index: 2, kind: input, shape index: {}]   ;;  %s332_s3 = inlined_call_operand.vmem [shape: f32[1,128], index: 3, kind: input, shape index: {}]   ;;  %s333_s4 = inlined_call_operand.vmem [shape: f32[32,128], index: 4, kind: output, shape index: {}]  }
   0x1   :  { %v246_v0 = vld [vmem:[%s329_s1] sm:$0xff]   ;;  %v247_v1 = vld [vmem:[%s329_s1 + $0x8] sm:$0xff]   ;;  %v248_v2 = vld [vmem:[%s329_s1 + $0x10] sm:$0xff]  }
   0x2   :  { %226 = vmatprep.subr.bf16.mxu0 %v246_v0  ;;  %v249_v3 = vld [vmem:[%s329_s1 + $0x18] sm:$0xff]   ;;  %v254_v4 = vld [vmem:[%s330_s0] sm:$0xff]   ;;  %v251_v6 = vld [vmem:[%s329_s1 + $0x28] sm:$0xff]  }
   0x3   :  { %227 = vmatpush3.bf16.msra.mxu0 %v246_v0  ;;  %242 = vmatprep.mubr.bf16.mxu0 %v254_v4  ;;  %v250_v5 = vld [vmem:[%s329_s1 + $0x20] sm:$0xff]   ;;  %v252_v7 = vld [vmem:[%s329_s1 + $0x30] sm:$0xff]   ;;  %v253_v8 = vld [vmem:[%s329_s1 + $0x38] sm:$0xff]  }
   0x4   :  { %228 = vmatprep.subr.bf16.mxu0 %v247_v1  ;;  %v255_v9 = vld [vmem:[%s330_s0 + $0x8] sm:$0xff]   ;;  %v214_v10 = vld [vmem:[%s331_s2] ss:$0 sm:$0xff] }
   0x5   :  { %v215_v12 = vld [vmem:[%s332_s3] ss:$0 sm:$0xff] }
   0x7   :  { %229 = vmatpush3.bf16.msra.mxu0 %v247_v1 }
   0x8   :  { %230 = vmatprep.subr.bf16.mxu0 %v248_v2 }
   0xb   :  { %231 = vmatpush3.bf16.msra.mxu0 %v248_v2 }
   0xc   :  { %232 = vmatprep.subr.bf16.mxu0 %v249_v3 }
   0xf   :  { %233 = vmatpush3.bf16.msra.mxu0 %v249_v3 }
  0x10   :  { %234 = vmatprep.subr.bf16.mxu0 %v250_v5 }
  0x13   :  { %235 = vmatpush3.bf16.msra.mxu0 %v250_v5 }
  0x14   :  { %236 = vmatprep.subr.bf16.mxu0 %v251_v6 }
  0x17   :  { %237 = vmatpush3.bf16.msra.mxu0 %v251_v6 }
  0x18   :  { %238 = vmatprep.subr.bf16.mxu0 %v252_v7 }
  0x1b   :  { %239 = vmatpush3.bf16.msra.mxu0 %v252_v7 }
  0x1c   :  { %240 = vmatprep.subr.bf16.mxu0 %v253_v8 }
  0x1f   :  { %241 = vmatpush3.bf16.msra.mxu0 %v253_v8 }
  0x22   :  { %243 = vmatmul.mubr.bf16.vlgmr.msra.gmra.mrb[0].mxu0 %v255_v9 }
  0xf5   :  { %v244_v11 = vpop.f32.mrb[0].mxu0 }
  0xf6   :  { %v183_v13 = vmul.f32 %v244_v11, %v214_v10  ;;  %v144_v14 = vpop.f32.mrb[1].mxu0 }
  0xf7   :  { %v181_v15 = vmul.f32 %v214_v10, %v144_v14  ;;  %v245_v16 = vpop.f32.mrb[2].mxu0 }
  0xf8   :  { %v194_v17 = vadd.f32 %v215_v12, %v183_v13  ;;  %v184_v18 = vmul.f32 %v245_v16, %v214_v10  ;;  %v147_v19 = vpop.f32.mrb[3].mxu0 }
  0xf9   :  { %v192_v20 = vadd.f32 %v215_v12, %v181_v15  ;;  %v182_v21 = vmul.f32 %v214_v10, %v147_v19 }
  0xfa   :  { %198 = vst [vmem:[%s333_s4 + $0x10] sm:$0xff] %v194_v17  ;;  %v195_v22 = vadd.f32 %v215_v12, %v184_v18 }
  0xfb   :  { %196 = vst [vmem:[%s333_s4] sm:$0xff] %v192_v20  ;;  %v193_v23 = vadd.f32 %v215_v12, %v182_v21 }
  0xfc   :  { %199 = vst [vmem:[%s333_s4 + $0x18] sm:$0xff] %v195_v22 }
  0xfd   :  { %197 = vst [vmem:[%s333_s4 + $0x8] sm:$0xff] %v193_v23 }

// kernel: resnet_up_forward.34
= control target key start
LH: loop header
LB: loop body
LE: loop exit
PB: predicated region body
PF: predicated region fallthrough
CT: control target
= control target key end

     0   :  { %s1199_s18 = smov 0   ;;  %s1201_s19 = smov 0   ;;  %s1330_s0 = inlined_call_operand.vmem [shape: bf16[32,1152], index: 0, kind: input, shape index: {}]   ;;  %s1331_s1 = inlined_call_operand.vmem [shape: bf16[1152,128], index: 1, kind: input, shape index: {}]   ;;  %s1332_s2 = inlined_call_operand.vmem [shape: f32[1,128], index: 2, kind: input, shape index: {}]   ;;  %s1333_s3 = inlined_call_operand.vmem [shape: f32[1,128], index: 3, kind: input, shape index: {}]   ;;  %s1334_s4 = inlined_call_operand.vmem [shape: f32[32,128], index: 4, kind: input, shape index: {}]   ;;  %s1335_s5 = inlined_call_operand.vmem [shape: f32[32,128], index: 5, kind: output, shape index: {}]  }
   0x1   :  { %s1203_s20 = smov 0   ;;  %s1205_s21 = smov 0  }
   0x2   :  { %s1207_s22 = smov 0  }
   0x3 LB: > { %s27_s23 = sadd.s32 1, %s1162_s21  ;;  %p50_p1 = scmp.ne.s32.totalorder %s1154_s19, %s1150_s18  ;;  %s1166_s22 = sphi %s1207_s22, %s15_s22   ;;  %s1162_s21 = sphi %s1205_s21, %s1339_s21   ;;  %s1158_s20 = sphi %s1203_s20, %s1338_s20   ;;  %s1154_s19 = sphi %s1201_s19, %s1337_s19   ;;  %s1150_s18 = sphi %s1199_s18, %s1336_s18  }
   0x4   : > { %p28_p0 = scmp.ge.s32.totalorder %s27_s23, 3  ;;  %p51_p2 = scmp.eq.s32.totalorder %s1166_s22, 0 }
   0x5   : > { %s43_s25 = sadd.s32 1, %s1154_s19  ;;  %p944_p5 = scmp.ge.s32.totalorder %s1166_s22, 3 }
   0x6   : > { %s1341_s23 = smov (%p28_p0, %s27_s23), 0  ;;  %p52_p3 = por %p51_p2, %p50_p1 }
   0x7   : > { %s39_s24 = ssub.s32 %s1162_s21, %s1341_s23  ;;  %236 = sbr.rel (%p944_p5) target bundleno = 23 (0x17), region = 28 }
   0x8   : > { %p41_p4 = scmp.eq.s32.totalorder %s39_s24, 0 }
   0xa   : > { %s1234_s26 = scalar_select %p41_p4, %s1154_s19, %s43_s25  }
   0xe   : > { %239 = sbr.rel (!%p52_p3) target bundleno = 23 (0x17), region = 32  ;;  %s241_s27 = sand.u32 (%p52_p3), 1, %s1154_s19  }
   0xf   : > { %s994_s28 = smul.u32 (%p52_p3), 12, %s1162_s21 }
  0x10   : > { %s1053_s29 = smul.u32 (%p52_p3), 48, %s241_s27 }
  0x11   : > { %s249_s7 = scalar_lea.vmem (%p52_p3), %s1330_s0, %s994_s28 }
  0x12   : > { %v264_v0 = vld [vmem:[%s249_s7] sm:$0xff] (%p52_p3)  ;;  %v268_v2 = vld [vmem:[%s249_s7 + $0x48] sm:$0xff] (%p52_p3)  ;;  %s243_s8 = scalar_lea.vmem (%p52_p3), [#allocation3], %s1053_s29  ;;  %v950_v6 = vld [vmem:[%s249_s7 + $0x50] sm:$0xf] (%p52_p3) }
  0x13   : > { %v266_v1 = vld [vmem:[%s249_s7 + $0x24] sm:$0xff] (%p52_p3)  ;;  %265 = vst [vmem:[%s243_s8] sm:$0xff] (%p52_p3), %v264_v0  ;;  %269 = vst [vmem:[%s243_s8 + $0x18] sm:$0xff] (%p52_p3), %v268_v2  ;;  %v270_v3 = vld [vmem:[%s249_s7 + $0x6c] sm:$0xff] (%p52_p3) }
  0x14   : > { %267 = vst [vmem:[%s243_s8 + $0xc] sm:$0xff] (%p52_p3), %v266_v1  ;;  %v946_v4 = vld [vmem:[%s249_s7 + $0x8] sm:$0xf] (%p52_p3)  ;;  %v948_v5 = vld [vmem:[%s249_s7 + $0x2c] sm:$0xf] (%p52_p3)  ;;  %271 = vst [vmem:[%s243_s8 + $0x24] sm:$0xff] (%p52_p3), %v270_v3 }
  0x15   : > { %947 = vst [vmem:[%s243_s8 + $0x8] sm:$0xf] %v946_v4  ;;  %949 = vst [vmem:[%s243_s8 + $0x14] sm:$0xf] %v948_v5  ;;  %v952_v7 = vld [vmem:[%s249_s7 + $0x74] sm:$0xf] }
  0x16   : > { %951 = vst [vmem:[%s243_s8 + $0x20] sm:$0xf] %v950_v6  ;;  %953 = vst [vmem:[%s243_s8 + $0x2c] sm:$0xf] %v952_v7 }
  0x17 PF: > { %p954_p6 = scmp.ge.s32.totalorder %s1166_s22, 1  ;;  %p303_p7 = scmp.lt.s32.totalorder %s1166_s22, 4 }
  0x19   : > { %p304_p8 = pnand %p954_p6, %p303_p7 }
  0x1a   : > { %s310_s9 = sand.u32 (!%p304_p8), 1, %s1150_s18   ;;  %s364_s10 = smul.u32 (!%p304_p8), 48, %s1158_s20 }
  0x1b   : > { %307 = sbr.rel (%p304_p8) target bundleno = 320 (0x140), region = 62  ;;  %p956_p10 = scmp.ne.s32.totalorder (!%p304_p8), %s1158_s20, 0 }
  0x1c   : > { %s1054_s11 = smul.u32 (!%p304_p8), 48, %s310_s9  ;;  %p365_p9 = scmp.lt.s32.totalorder (!%p304_p8), %s364_s10, 143 }
  0x1e   : > { %s1251_s16 = scalar_lea.vmem (!%p304_p8), [#allocation3], %s1054_s11 }
  0x22   : > { %s1343_s10 = smov (!%p365_p9, %s364_s10), 143  ;;  %401 = sbr.rel (%p956_p10) target bundleno = 41 (0x29), region = 70 }
  0x23   : > { %s955_s12 = sshll.u32 %s1343_s10, 2  ;;  %v1168_v8 = vmov (!%p956_p10), 0.0  }
  0x24   : > { %s1249_s15 = scalar_lea.vmem %s1331_s1, %s955_s12  ;;  %402 = vst [vmem:[#allocation2] sm:$0xff] (!%p956_p10), %v1168_v8  ;;  %403 = vst [vmem:[#allocation2 + $0x8] sm:$0xff] (!%p956_p10), %v1168_v8 }
  0x25   : > { %404 = vst [vmem:[#allocation2 + $0x10] sm:$0xff] (!%p956_p10), %v1168_v8  ;;  %405 = vst [vmem:[#allocation2 + $0x18] sm:$0xff] (!%p956_p10), %v1168_v8 }
  0x29 PF: > { %v1096_v9 = vld [vmem:[%s1249_s15 + $0x40] sm:$0xff]   ;;  %v1099_v12 = vld [vmem:[%s1249_s15 + $0x48] sm:$0xff]   ;;  %v1102_v15 = vld [vmem:[%s1249_s15 + $0x50] sm:$0xff]   ;;  %p987_p11 = scmp.ne.s32.totalorder %s1158_s20, 2 }
  0x2a   : > { %v1097_v10 = vld [vmem:[%s1249_s15] sm:$0xff]   ;;  %995 = vmatprep.subr.bf16.mxu0 %v1096_v9  ;;  %v1100_v13 = vld [vmem:[%s1249_s15 + $0x8] sm:$0xff]   ;;  %v1103_v16 = vld [vmem:[%s1249_s15 + $0x10] sm:$0xff]  }
  0x2b   : > { %v1098_v11 = vld [vmem:[%s1249_s15 + $0x80] sm:$0xff]   ;;  %996 = vmatpush3.bf16.msra.mxu0 %v1097_v10  ;;  %v1101_v14 = vld [vmem:[%s1249_s15 + $0x88] sm:$0xff]   ;;  %v1104_v17 = vld [vmem:[%s1249_s15 + $0x90] sm:$0xff]  }
  0x2c   : > { %1033 = vmatprep.subr.bf16.mxu1 %v1098_v11  ;;  %997 = vmatprep.subr.bf16.mxu0 %v1099_v12  ;;  %v1105_v18 = vld [vmem:[%s1249_s15 + $0x58] sm:$0xff]   ;;  %v1108_v21 = vld [vmem:[%s1249_s15 + $0x60] sm:$0xff]   ;;  %v1111_v24 = vld [vmem:[%s1249_s15 + $0x68] sm:$0xff]  }
  0x2d   : > { %1034 = vmatpush3.bf16.msra.mxu1 %v1098_v11  ;;  %v1106_v19 = vld [vmem:[%s1249_s15 + $0x18] sm:$0xff]   ;;  %v1110_v22 = vld [vmem:[%s1249_s15 + $0xa0] sm:$0xff]   ;;  %v1113_v25 = vld [vmem:[%s1249_s15 + $0xa8] sm:$0xff]  }
  0x2e   : > { %1035 = vmatprep.subr.bf16.mxu1 %v1101_v14  ;;  %v1107_v20 = vld [vmem:[%s1249_s15 + $0x98] sm:$0xff]   ;;  %v1109_v23 = vld [vmem:[%s1249_s15 + $0x20] sm:$0xff]   ;;  %v1112_v26 = vld [vmem:[%s1249_s15 + $0x28] sm:$0xff]  }
  0x2f   : > { %998 = vmatpush3.bf16.msra.mxu0 %v1100_v13  ;;  %v1114_v27 = vld [vmem:[%s1249_s15 + $0x70] sm:$0xff]   ;;  %v1117_v30 = vld [vmem:[%s1249_s15 + $0x78] sm:$0xff]   ;;  %v406_v45 = vld [vmem:[#allocation2] sm:$0xff] }
  0x30   : > { %999 = vmatprep.subr.bf16.mxu0 %v1102_v15  ;;  %v1115_v28 = vld [vmem:[%s1249_s15 + $0x30] sm:$0xff]   ;;  %v1119_v31 = vld [vmem:[%s1249_s15 + $0xb8] sm:$0xff]   ;;  %v407_v50 = vld [vmem:[#allocation2 + $0x8] sm:$0xff] }
  0x31   : > { %1036 = vmatpush3.bf16.msra.mxu1 %v1101_v14  ;;  %v1116_v29 = vld [vmem:[%s1249_s15 + $0xb0] sm:$0xff]   ;;  %v1118_v34 = vld [vmem:[%s1249_s15 + $0x38] sm:$0xff]   ;;  %v988_v4 = vld [vmem:[%s1332_s2] ss:$0 sm:$0xff] (!%p987_p11) }
  0x32   : > { %1037 = vmatprep.subr.bf16.mxu1 %v1104_v17  ;;  %v1122_v32 = vld [vmem:[%s1251_s16 + $0x4] ss:$12 sps:$4 sm:$0xff]   ;;  %v1123_v33 = vld [vmem:[%s1251_s16 + $0x8] ss:$12 sps:$4 sm:$0xff]   ;;  %v1120_v35 = vld [vmem:[%s1251_s16] ss:$12 sps:$4 sm:$0xff]  }
  0x33   : > { %1000 = vmatpush3.bf16.msra.mxu0 %v1103_v16  ;;  %674 = vmatprep.mubr.bf16.mxu0 %v1122_v32  ;;  %v1125_v36 = vld [vmem:[%s1251_s16 + $0x1c] ss:$12 sps:$4 sm:$0xff]   ;;  %v1124_v37 = vld [vmem:[%s1251_s16 + $0x20] ss:$12 sps:$4 sm:$0xff]   ;;  %v1127_v38 = vld [vmem:[%s1251_s16 + $0x18] ss:$12 sps:$4 sm:$0xff]  }
  0x34   : > { %1001 = vmatprep.subr.bf16.mxu0 %v1105_v18  ;;  %1049 = vmatprep.mubr.bf16.mxu1 %v1123_v33  ;;  %v408_v59 = vld [vmem:[#allocation2 + $0x10] sm:$0xff]  ;;  %v409_v63 = vld [vmem:[#allocation2 + $0x18] sm:$0xff]  ;;  %v989_v5 = vld [vmem:[%s1333_s3] ss:$0 sm:$0xff] (!%p987_p11) }
  0x35   : > { %1038 = vmatpush3.bf16.msra.mxu1 %v1104_v17  ;;  %v778_v8 = vld [vmem:[%s1334_s4] sm:$0xff] (!%p987_p11)  ;;  %v779_v13 = vld [vmem:[%s1334_s4 + $0x8] sm:$0xff] (!%p987_p11)  ;;  %v780_v17 = vld [vmem:[%s1334_s4 + $0x10] sm:$0xff] (!%p987_p11) }
  0x36   : > { %1039 = vmatprep.subr.bf16.mxu1 %v1107_v20  ;;  %v781_v18 = vld [vmem:[%s1334_s4 + $0x18] sm:$0xff] (!%p987_p11) }
  0x37   : > { %1002 = vmatpush3.bf16.msra.mxu0 %v1106_v19 }
  0x38   : > { %1003 = vmatprep.subr.bf16.mxu0 %v1108_v21 }
  0x39   : > { %1040 = vmatpush3.bf16.msra.mxu1 %v1107_v20 }
  0x3a   : > { %1041 = vmatprep.subr.bf16.mxu1 %v1110_v22 }
  0x3b   : > { %1004 = vmatpush3.bf16.msra.mxu0 %v1109_v23 }
  0x3c   : > { %1005 = vmatprep.subr.bf16.mxu0 %v1111_v24 }
  0x3d   : > { %1042 = vmatpush3.bf16.msra.mxu1 %v1110_v22 }
  0x3e   : > { %1043 = vmatprep.subr.bf16.mxu1 %v1113_v25 }
  0x3f   : > { %1006 = vmatpush3.bf16.msra.mxu0 %v1112_v26 }
  0x40   : > { %1007 = vmatprep.subr.bf16.mxu0 %v1114_v27 }
  0x41   : > { %1044 = vmatpush3.bf16.msra.mxu1 %v1113_v25 }
  0x42   : > { %1045 = vmatprep.subr.bf16.mxu1 %v1116_v29 }
  0x43   : > { %1008 = vmatpush3.bf16.msra.mxu0 %v1115_v28 }
  0x44   : > { %1009 = vmatprep.subr.bf16.mxu0 %v1117_v30 }
  0x45   : > { %1046 = vmatpush3.bf16.msra.mxu1 %v1116_v29 }
  0x46   : > { %1047 = vmatprep.subr.bf16.mxu1 %v1119_v31 }
  0x47   : > { %1010 = vmatpush3.bf16.msra.mxu0 %v1118_v34 }
  0x49   : > { %1048 = vmatpush3.bf16.msra.mxu1 %v1119_v31 }
  0x4a   : > { %675 = vmatmul.mubr.bf16.vlgmr.msra.gmra.mrb[0].mxu0 %v1120_v35 }
  0x4b   : > { %682 = vmatprep.mubr.bf16.mxu0 %v1125_v36 }
  0x4c   : > { %1050 = vmatmul.mubr.bf16.vlgmr.msra.gmra.mrb[0].mxu1 %v1124_v37 }
  0x52   : > { %683 = vmatmul.mubr.bf16.gmra.mrb[4].mxu0 %v1127_v38 }
 0x11d   : > { %v1011_v39 = vpop.f32.mrb[0].mxu0 }
 0x11e   : > { %v1012_v40 = vpop.f32.mrb[1].mxu0 }
 0x11f   : > { %v1013_v41 = vadd.f32 %v1012_v40, %v1011_v39  ;;  %v1014_v42 = vpop.f32.mrb[2].mxu0  ;;  %v1051_v43 = vpop.f32.mrb[0].mxu1 }
 0x120   : > { %v1015_v44 = vpop.f32.mrb[3].mxu0  ;;  %v725_v46 = vpop.f32.mrb[1].mxu1 }
 0x121   : > { %v1016_v47 = vadd.f32 %v1015_v44, %v1014_v42  ;;  %v726_v48 = vadd.f32 %v1013_v41, %v725_v46  ;;  %v1052_v49 = vpop.f32.mrb[2].mxu1 }
 0x122   : > { %v728_v51 = vpop.f32.mrb[3].mxu1 }
 0x123   : > { %v740_v52 = vadd.f32 %v726_v48, %v406_v45  ;;  %v729_v53 = vadd.f32 %v1016_v47, %v728_v51 }
 0x125   : > { %744 = vst [vmem:[#allocation2] sm:$0xff] %v740_v52  ;;  %v741_v54 = vadd.f32 %v729_v53, %v407_v50  ;;  %v1017_v55 = vpop.f32.mrb[4].mxu0 }
 0x126   : > { %v1018_v56 = vpop.f32.mrb[5].mxu0 }
 0x127   : > { %745 = vst [vmem:[#allocation2 + $0x8] sm:$0xff] %v741_v54  ;;  %v1019_v57 = vadd.f32 %v1018_v56, %v1017_v55  ;;  %v1020_v58 = vpop.f32.mrb[6].mxu0 }
 0x128   : > { %v1021_v60 = vpop.f32.mrb[7].mxu0 }
 0x129   : > { %v734_v61 = vadd.f32 %v1051_v43, %v1019_v57  ;;  %v1022_v62 = vadd.f32 %v1021_v60, %v1020_v58  ;;  %751 = sbr.rel (%p987_p11) target bundleno = 320 (0x140), region = 74 }
 0x12b   : > { %v742_v0 = vadd.f32 %v734_v61, %v408_v59  ;;  %v737_v1 = vadd.f32 %v1052_v49, %v1022_v62 }
 0x12c   : > { %v752_v3 = vld [vmem:[#allocation2] sm:$0xff] (!%p987_p11) }
 0x12d   : > { %746 = vst [vmem:[#allocation2 + $0x10] sm:$0xff] %v742_v0  ;;  %v743_v2 = vadd.f32 %v737_v1, %v409_v63  ;;  %v763_v6 = vmul.f32 (!%p987_p11), %v988_v4, %v752_v3 }
 0x12e   : > { %v753_v7 = vld [vmem:[#allocation2 + $0x8] sm:$0xff] (!%p987_p11) }
 0x12f   : > { %747 = vst [vmem:[#allocation2 + $0x18] sm:$0xff] %v743_v2  ;;  %v764_v9 = vmul.f32 (!%p987_p11), %v988_v4, %v753_v7  ;;  %v774_v12 = vadd.f32 (!%p987_p11), %v989_v5, %v763_v6 }
 0x131   : > { %v775_v16 = vadd.f32 %v989_v5, %v764_v9  ;;  %v782_v19 = vadd.f32 %v778_v8, %v774_v12 }
 0x133   : > { %v783_v22 = vadd.f32 %v779_v13, %v775_v16  ;;  %v786_v23 = vmax.f32 %v782_v19, 0.0 }
 0x134   : > { %v754_v10 = vld [vmem:[#allocation2 + $0x10] sm:$0xff] }
 0x135   : > { %v765_v14 = vmul.f32 %v988_v4, %v754_v10  ;;  %v787_v26 = vmax.f32 %v783_v22, 0.0  ;;  %790 = vst [vmem:[%s1335_s5] sm:$0xff] %v786_v23 }
 0x136   : > { %v755_v11 = vld [vmem:[#allocation2 + $0x18] sm:$0xff] }
 0x137   : > { %v766_v15 = vmul.f32 %v988_v4, %v755_v11  ;;  %v776_v20 = vadd.f32 %v989_v5, %v765_v14  ;;  %791 = vst [vmem:[%s1335_s5 + $0x8] sm:$0xff] %v787_v26 }
 0x139   : > { %v777_v21 = vadd.f32 %v989_v5, %v766_v15  ;;  %v784_v24 = vadd.f32 %v780_v17, %v776_v20 }
 0x13b   : > { %v785_v25 = vadd.f32 %v781_v18, %v777_v21  ;;  %v788_v27 = vmax.f32 %v784_v24, 0.0 }
 0x13d   : > { %v789_v28 = vmax.f32 %v785_v25, 0.0  ;;  %792 = vst [vmem:[%s1335_s5 + $0x10] sm:$0xff] %v788_v27 }
 0x13f   : > { %793 = vst [vmem:[%s1335_s5 + $0x18] sm:$0xff] %v789_v28 }
 0x140 PF: > { %s15_s22 = sadd.s32 1, %s1166_s22   ;;  %s1336_s18 = smov %s1154_s19 }
 0x141   : > { %p12_p12 = scmp.ge.s32.totalorder %s15_s22, 5   ;;  %s1337_s19 = smov %s1234_s26 }
 0x142   : > { %s1338_s20 = smov %s1162_s21  ;;  %s1339_s21 = smov %s1341_s23 }
 0x143   :  { %14 = sbr.rel (!%p12_p12) target bundleno = 3 (0x3), region = 127 }

// kernel: resnet_up_forward.35
= control target key start
LH: loop header
LB: loop body
LE: loop exit
PB: predicated region body
PF: predicated region fallthrough
CT: control target
= control target key end

     0   :  { %s1107_s15 = smov 0   ;;  %s1109_s16 = smov 0   ;;  %s1226_s0 = inlined_call_operand.vmem [shape: bf16[32,1152], index: 0, kind: input, shape index: {}]   ;;  %s1227_s1 = inlined_call_operand.vmem [shape: bf16[1152,128], index: 1, kind: input, shape index: {}]   ;;  %s1228_s2 = inlined_call_operand.vmem [shape: f32[1,128], index: 2, kind: input, shape index: {}]   ;;  %s1229_s3 = inlined_call_operand.vmem [shape: f32[1,128], index: 3, kind: input, shape index: {}]   ;;  %s1230_s4 = inlined_call_operand.vmem [shape: f32[32,128], index: 4, kind: output, shape index: {}]  }
   0x1   :  { %s1111_s17 = smov 0   ;;  %s1113_s18 = smov 0  }
   0x2   :  { %s1115_s19 = smov 0  }
   0x3 LB: > { %s26_s20 = sadd.s32 1, %s1075_s18  ;;  %p49_p1 = scmp.ne.s32.totalorder %s1067_s16, %s1063_s15  ;;  %s1079_s19 = sphi %s1115_s19, %s14_s19   ;;  %s1075_s18 = sphi %s1113_s18, %s1234_s18   ;;  %s1071_s17 = sphi %s1111_s17, %s1233_s17   ;;  %s1067_s16 = sphi %s1109_s16, %s1232_s16   ;;  %s1063_s15 = sphi %s1107_s15, %s1231_s15  }
   0x4   : > { %p27_p0 = scmp.ge.s32.totalorder %s26_s20, 3  ;;  %p50_p2 = scmp.eq.s32.totalorder %s1079_s19, 0 }
   0x5   : > { %s42_s22 = sadd.s32 1, %s1067_s16  ;;  %p857_p5 = scmp.ge.s32.totalorder %s1079_s19, 3 }
   0x6   : > { %s1236_s20 = smov (%p27_p0, %s26_s20), 0  ;;  %p51_p3 = por %p50_p2, %p49_p1 }
   0x7   : > { %s38_s21 = ssub.s32 %s1075_s18, %s1236_s20  ;;  %195 = sbr.rel (%p857_p5) target bundleno = 23 (0x17), region = 24 }
   0x8   : > { %p40_p4 = scmp.eq.s32.totalorder %s38_s21, 0 }
   0xa   : > { %s1142_s23 = scalar_select %p40_p4, %s1067_s16, %s42_s22  }
   0xe   : > { %198 = sbr.rel (!%p51_p3) target bundleno = 23 (0x17), region = 28  ;;  %s200_s24 = sand.u32 (%p51_p3), 1, %s1067_s16  }
   0xf   : > { %s907_s25 = smul.u32 (%p51_p3), 12, %s1075_s18 }
  0x10   : > { %s966_s26 = smul.u32 (%p51_p3), 48, %s200_s24 }
  0x11   : > { %s208_s29 = scalar_lea.vmem (%p51_p3), %s1226_s0, %s907_s25 }
  0x12   : > { %v223_v0 = vld [vmem:[%s208_s29] sm:$0xff] (%p51_p3)  ;;  %v227_v2 = vld [vmem:[%s208_s29 + $0x48] sm:$0xff] (%p51_p3)  ;;  %s202_s30 = scalar_lea.vmem (%p51_p3), [#allocation3], %s966_s26  ;;  %v863_v6 = vld [vmem:[%s208_s29 + $0x50] sm:$0xf] (%p51_p3) }
  0x13   : > { %v225_v1 = vld [vmem:[%s208_s29 + $0x24] sm:$0xff] (%p51_p3)  ;;  %224 = vst [vmem:[%s202_s30] sm:$0xff] (%p51_p3), %v223_v0  ;;  %228 = vst [vmem:[%s202_s30 + $0x18] sm:$0xff] (%p51_p3), %v227_v2  ;;  %v229_v3 = vld [vmem:[%s208_s29 + $0x6c] sm:$0xff] (%p51_p3) }
  0x14   : > { %226 = vst [vmem:[%s202_s30 + $0xc] sm:$0xff] (%p51_p3), %v225_v1  ;;  %v859_v4 = vld [vmem:[%s208_s29 + $0x8] sm:$0xf] (%p51_p3)  ;;  %v861_v5 = vld [vmem:[%s208_s29 + $0x2c] sm:$0xf] (%p51_p3)  ;;  %230 = vst [vmem:[%s202_s30 + $0x24] sm:$0xff] (%p51_p3), %v229_v3 }
  0x15   : > { %860 = vst [vmem:[%s202_s30 + $0x8] sm:$0xf] %v859_v4  ;;  %862 = vst [vmem:[%s202_s30 + $0x14] sm:$0xf] %v861_v5  ;;  %v865_v7 = vld [vmem:[%s208_s29 + $0x74] sm:$0xf] }
  0x16   : > { %864 = vst [vmem:[%s202_s30 + $0x20] sm:$0xf] %v863_v6  ;;  %866 = vst [vmem:[%s202_s30 + $0x2c] sm:$0xf] %v865_v7 }
  0x17 PF: > { %p867_p6 = scmp.ge.s32.totalorder %s1079_s19, 1  ;;  %p262_p7 = scmp.lt.s32.totalorder %s1079_s19, 4 }
  0x19   : > { %p263_p8 = pnand %p867_p6, %p262_p7 }
  0x1a   : > { %s269_s5 = sand.u32 (!%p263_p8), 1, %s1063_s15   ;;  %s313_s6 = smul.u32 (!%p263_p8), 48, %s1071_s17 }
  0x1b   : > { %266 = sbr.rel (%p263_p8) target bundleno = 318 (0x13e), region = 58  ;;  %p869_p10 = scmp.ne.s32.totalorder (!%p263_p8), %s1071_s17, 0 }
  0x1c   : > { %s967_s7 = smul.u32 (!%p263_p8), 48, %s269_s5  ;;  %p314_p9 = scmp.lt.s32.totalorder (!%p263_p8), %s313_s6, 143 }
  0x1e   : > { %s1159_s12 = scalar_lea.vmem (!%p263_p8), [#allocation3], %s967_s7 }
  0x22   : > { %s1238_s6 = smov (!%p314_p9, %s313_s6), 143  ;;  %341 = sbr.rel (%p869_p10) target bundleno = 41 (0x29), region = 66 }
  0x23   : > { %s868_s8 = sshll.u32 %s1238_s6, 2  ;;  %v1081_v8 = vmov (!%p869_p10), 0.0  }
  0x24   : > { %s1157_s11 = scalar_lea.vmem %s1227_s1, %s868_s8  ;;  %342 = vst [vmem:[#allocation2] sm:$0xff] (!%p869_p10), %v1081_v8  ;;  %343 = vst [vmem:[#allocation2 + $0x8] sm:$0xff] (!%p869_p10), %v1081_v8 }
  0x25   : > { %344 = vst [vmem:[#allocation2 + $0x10] sm:$0xff] (!%p869_p10), %v1081_v8  ;;  %345 = vst [vmem:[#allocation2 + $0x18] sm:$0xff] (!%p869_p10), %v1081_v8 }
  0x29 PF: > { %v1009_v9 = vld [vmem:[%s1157_s11 + $0x40] sm:$0xff]   ;;  %v1012_v12 = vld [vmem:[%s1157_s11 + $0x48] sm:$0xff]   ;;  %v1015_v15 = vld [vmem:[%s1157_s11 + $0x50] sm:$0xff]   ;;  %p900_p11 = scmp.ne.s32.totalorder %s1071_s17, 2 }
  0x2a   : > { %v1010_v10 = vld [vmem:[%s1157_s11] sm:$0xff]   ;;  %908 = vmatprep.subr.bf16.mxu0 %v1009_v9  ;;  %v1013_v13 = vld [vmem:[%s1157_s11 + $0x8] sm:$0xff]   ;;  %v1016_v16 = vld [vmem:[%s1157_s11 + $0x10] sm:$0xff]  }
  0x2b   : > { %v1011_v11 = vld [vmem:[%s1157_s11 + $0x80] sm:$0xff]   ;;  %909 = vmatpush3.bf16.msra.mxu0 %v1010_v10  ;;  %v1014_v14 = vld [vmem:[%s1157_s11 + $0x88] sm:$0xff]   ;;  %v1017_v17 = vld [vmem:[%s1157_s11 + $0x90] sm:$0xff]  }
  0x2c   : > { %946 = vmatprep.subr.bf16.mxu1 %v1011_v11  ;;  %910 = vmatprep.subr.bf16.mxu0 %v1012_v12  ;;  %v1018_v18 = vld [vmem:[%s1157_s11 + $0x58] sm:$0xff]   ;;  %v1021_v21 = vld [vmem:[%s1157_s11 + $0x60] sm:$0xff]   ;;  %v1024_v24 = vld [vmem:[%s1157_s11 + $0x68] sm:$0xff]  }
  0x2d   : > { %947 = vmatpush3.bf16.msra.mxu1 %v1011_v11  ;;  %v1019_v19 = vld [vmem:[%s1157_s11 + $0x18] sm:$0xff]   ;;  %v1023_v22 = vld [vmem:[%s1157_s11 + $0xa0] sm:$0xff]   ;;  %v1026_v25 = vld [vmem:[%s1157_s11 + $0xa8] sm:$0xff]  }
  0x2e   : > { %948 = vmatprep.subr.bf16.mxu1 %v1014_v14  ;;  %v1020_v20 = vld [vmem:[%s1157_s11 + $0x98] sm:$0xff]   ;;  %v1022_v23 = vld [vmem:[%s1157_s11 + $0x20] sm:$0xff]   ;;  %v1025_v26 = vld [vmem:[%s1157_s11 + $0x28] sm:$0xff]  }
  0x2f   : > { %911 = vmatpush3.bf16.msra.mxu0 %v1013_v13  ;;  %v1027_v27 = vld [vmem:[%s1157_s11 + $0x70] sm:$0xff]   ;;  %v1030_v30 = vld [vmem:[%s1157_s11 + $0x78] sm:$0xff]   ;;  %v346_v45 = vld [vmem:[#allocation2] sm:$0xff] }
  0x30   : > { %912 = vmatprep.subr.bf16.mxu0 %v1015_v15  ;;  %v1028_v28 = vld [vmem:[%s1157_s11 + $0x30] sm:$0xff]   ;;  %v1032_v31 = vld [vmem:[%s1157_s11 + $0xb8] sm:$0xff]   ;;  %v347_v50 = vld [vmem:[#allocation2 + $0x8] sm:$0xff] }
  0x31   : > { %949 = vmatpush3.bf16.msra.mxu1 %v1014_v14  ;;  %v1029_v29 = vld [vmem:[%s1157_s11 + $0xb0] sm:$0xff]   ;;  %v1031_v34 = vld [vmem:[%s1157_s11 + $0x38] sm:$0xff]   ;;  %v901_v4 = vld [vmem:[%s1228_s2] ss:$0 sm:$0xff] (!%p900_p11) }
  0x32   : > { %950 = vmatprep.subr.bf16.mxu1 %v1017_v17  ;;  %v1035_v32 = vld [vmem:[%s1159_s12 + $0x4] ss:$12 sps:$4 sm:$0xff]   ;;  %v1036_v33 = vld [vmem:[%s1159_s12 + $0x8] ss:$12 sps:$4 sm:$0xff]   ;;  %v1033_v35 = vld [vmem:[%s1159_s12] ss:$12 sps:$4 sm:$0xff]  }
  0x33   : > { %913 = vmatpush3.bf16.msra.mxu0 %v1016_v16  ;;  %614 = vmatprep.mubr.bf16.mxu0 %v1035_v32  ;;  %v1038_v36 = vld [vmem:[%s1159_s12 + $0x1c] ss:$12 sps:$4 sm:$0xff]   ;;  %v1037_v37 = vld [vmem:[%s1159_s12 + $0x20] ss:$12 sps:$4 sm:$0xff]   ;;  %v1040_v38 = vld [vmem:[%s1159_s12 + $0x18] ss:$12 sps:$4 sm:$0xff]  }
  0x34   : > { %914 = vmatprep.subr.bf16.mxu0 %v1018_v18  ;;  %962 = vmatprep.mubr.bf16.mxu1 %v1036_v33  ;;  %v348_v59 = vld [vmem:[#allocation2 + $0x10] sm:$0xff]  ;;  %v349_v63 = vld [vmem:[#allocation2 + $0x18] sm:$0xff]  ;;  %v902_v5 = vld [vmem:[%s1229_s3] ss:$0 sm:$0xff] (!%p900_p11) }
  0x35   : > { %951 = vmatpush3.bf16.msra.mxu1 %v1017_v17 }
  0x36   : > { %952 = vmatprep.subr.bf16.mxu1 %v1020_v20 }
  0x37   : > { %915 = vmatpush3.bf16.msra.mxu0 %v1019_v19 }
  0x38   : > { %916 = vmatprep.subr.bf16.mxu0 %v1021_v21 }
  0x39   : > { %953 = vmatpush3.bf16.msra.mxu1 %v1020_v20 }
  0x3a   : > { %954 = vmatprep.subr.bf16.mxu1 %v1023_v22 }
  0x3b   : > { %917 = vmatpush3.bf16.msra.mxu0 %v1022_v23 }
  0x3c   : > { %918 = vmatprep.subr.bf16.mxu0 %v1024_v24 }
  0x3d   : > { %955 = vmatpush3.bf16.msra.mxu1 %v1023_v22 }
  0x3e   : > { %956 = vmatprep.subr.bf16.mxu1 %v1026_v25 }
  0x3f   : > { %919 = vmatpush3.bf16.msra.mxu0 %v1025_v26 }
  0x40   : > { %920 = vmatprep.subr.bf16.mxu0 %v1027_v27 }
  0x41   : > { %957 = vmatpush3.bf16.msra.mxu1 %v1026_v25 }
  0x42   : > { %958 = vmatprep.subr.bf16.mxu1 %v1029_v29 }
  0x43   : > { %921 = vmatpush3.bf16.msra.mxu0 %v1028_v28 }
  0x44   : > { %922 = vmatprep.subr.bf16.mxu0 %v1030_v30 }
  0x45   : > { %959 = vmatpush3.bf16.msra.mxu1 %v1029_v29 }
  0x46   : > { %960 = vmatprep.subr.bf16.mxu1 %v1032_v31 }
  0x47   : > { %923 = vmatpush3.bf16.msra.mxu0 %v1031_v34 }
  0x49   : > { %961 = vmatpush3.bf16.msra.mxu1 %v1032_v31 }
  0x4a   : > { %615 = vmatmul.mubr.bf16.vlgmr.msra.gmra.mrb[0].mxu0 %v1033_v35 }
  0x4b   : > { %622 = vmatprep.mubr.bf16.mxu0 %v1038_v36 }
  0x4c   : > { %963 = vmatmul.mubr.bf16.vlgmr.msra.gmra.mrb[0].mxu1 %v1037_v37 }
  0x52   : > { %623 = vmatmul.mubr.bf16.gmra.mrb[4].mxu0 %v1040_v38 }
 0x11d   : > { %v924_v39 = vpop.f32.mrb[0].mxu0 }
 0x11e   : > { %v925_v40 = vpop.f32.mrb[1].mxu0 }
 0x11f   : > { %v926_v41 = vadd.f32 %v925_v40, %v924_v39  ;;  %v927_v42 = vpop.f32.mrb[2].mxu0  ;;  %v964_v43 = vpop.f32.mrb[0].mxu1 }
 0x120   : > { %v928_v44 = vpop.f32.mrb[3].mxu0  ;;  %v665_v46 = vpop.f32.mrb[1].mxu1 }
 0x121   : > { %v929_v47 = vadd.f32 %v928_v44, %v927_v42  ;;  %v666_v48 = vadd.f32 %v926_v41, %v665_v46  ;;  %v965_v49 = vpop.f32.mrb[2].mxu1 }
 0x122   : > { %v668_v51 = vpop.f32.mrb[3].mxu1 }
 0x123   : > { %v680_v52 = vadd.f32 %v666_v48, %v346_v45  ;;  %v669_v53 = vadd.f32 %v929_v47, %v668_v51 }
 0x125   : > { %684 = vst [vmem:[#allocation2] sm:$0xff] %v680_v52  ;;  %v681_v54 = vadd.f32 %v669_v53, %v347_v50  ;;  %v930_v55 = vpop.f32.mrb[4].mxu0 }
 0x126   : > { %v931_v56 = vpop.f32.mrb[5].mxu0 }
 0x127   : > { %685 = vst [vmem:[#allocation2 + $0x8] sm:$0xff] %v681_v54  ;;  %v932_v57 = vadd.f32 %v931_v56, %v930_v55  ;;  %v933_v58 = vpop.f32.mrb[6].mxu0 }
 0x128   : > { %v934_v60 = vpop.f32.mrb[7].mxu0 }
 0x129   : > { %v674_v61 = vadd.f32 %v964_v43, %v932_v57  ;;  %v935_v62 = vadd.f32 %v934_v60, %v933_v58  ;;  %691 = sbr.rel (%p900_p11) target bundleno = 318 (0x13e), region = 70 }
 0x12b   : > { %v682_v0 = vadd.f32 %v674_v61, %v348_v59  ;;  %v677_v1 = vadd.f32 %v965_v49, %v935_v62 }
 0x12c   : > { %v692_v3 = vld [vmem:[#allocation2] sm:$0xff] (!%p900_p11) }
 0x12d   : > { %686 = vst [vmem:[#allocation2 + $0x10] sm:$0xff] %v682_v0  ;;  %v683_v2 = vadd.f32 %v677_v1, %v349_v63  ;;  %v703_v6 = vmul.f32 (!%p900_p11), %v901_v4, %v692_v3 }
 0x12e   : > { %v693_v7 = vld [vmem:[#allocation2 + $0x8] sm:$0xff] (!%p900_p11) }
 0x12f   : > { %687 = vst [vmem:[#allocation2 + $0x18] sm:$0xff] %v683_v2  ;;  %v704_v10 = vmul.f32 (!%p900_p11), %v901_v4, %v693_v7  ;;  %v714_v13 = vadd.f32 (!%p900_p11), %v902_v5, %v703_v6 }
 0x131   : > { %v715_v14 = vadd.f32 %v902_v5, %v704_v10  ;;  %v718_v17 = vmax.f32 %v714_v13, 0.0 }
 0x133   : > { %v719_v18 = vmax.f32 %v715_v14, 0.0  ;;  %722 = vst [vmem:[%s1230_s4] sm:$0xff] %v718_v17 }
 0x134   : > { %v694_v8 = vld [vmem:[#allocation2 + $0x10] sm:$0xff] }
 0x135   : > { %v705_v11 = vmul.f32 %v901_v4, %v694_v8  ;;  %723 = vst [vmem:[%s1230_s4 + $0x8] sm:$0xff] %v719_v18 }
 0x136   : > { %v695_v9 = vld [vmem:[#allocation2 + $0x18] sm:$0xff] }
 0x137   : > { %v706_v12 = vmul.f32 %v901_v4, %v695_v9  ;;  %v716_v15 = vadd.f32 %v902_v5, %v705_v11 }
 0x139   : > { %v717_v16 = vadd.f32 %v902_v5, %v706_v12  ;;  %v720_v19 = vmax.f32 %v716_v15, 0.0 }
 0x13b   : > { %v721_v20 = vmax.f32 %v717_v16, 0.0  ;;  %724 = vst [vmem:[%s1230_s4 + $0x10] sm:$0xff] %v720_v19 }
 0x13d   : > { %725 = vst [vmem:[%s1230_s4 + $0x18] sm:$0xff] %v721_v20 }
 0x13e PF: > { %s14_s19 = sadd.s32 1, %s1079_s19   ;;  %s1231_s15 = smov %s1067_s16 }
 0x13f   : > { %p11_p12 = scmp.ge.s32.totalorder %s14_s19, 5   ;;  %s1232_s16 = smov %s1142_s23 }
 0x140   : > { %s1233_s17 = smov %s1075_s18  ;;  %s1234_s18 = smov %s1236_s20 }
 0x141   :  { %13 = sbr.rel (!%p11_p12) target bundleno = 3 (0x3), region = 120 }

// kernel: resnet_up_forward.38
= control target key start
LH: loop header
LB: loop body
LE: loop exit
PB: predicated region body
PF: predicated region fallthrough
CT: control target
= control target key end

     0   :  { %s1217_s15 = smov 0   ;;  %s1219_s16 = smov 0   ;;  %s1357_s0 = inlined_call_operand.vmem [shape: bf16[16,1152], index: 0, kind: input, shape index: {}]   ;;  %s1358_s1 = inlined_call_operand.vmem [shape: bf16[1152,256], index: 1, kind: input, shape index: {}]   ;;  %s1359_s2 = inlined_call_operand.vmem [shape: f32[1,256], index: 2, kind: input, shape index: {}]   ;;  %s1360_s3 = inlined_call_operand.vmem [shape: f32[1,256], index: 3, kind: input, shape index: {}]   ;;  %s1361_s4 = inlined_call_operand.vmem [shape: f32[16,256], index: 4, kind: output, shape index: {}]  }
   0x1   :  { %s1221_s17 = smov 0   ;;  %s1223_s18 = smov 0  }
   0x2   :  { %s1225_s19 = smov 0  }
   0x3 LB: > { %s26_s20 = sadd.s32 1, %s1184_s18  ;;  %p49_p1 = scmp.ne.s32.totalorder %s1176_s16, %s1172_s15  ;;  %s1188_s19 = sphi %s1225_s19, %s14_s19   ;;  %s1184_s18 = sphi %s1223_s18, %s1365_s18   ;;  %s1180_s17 = sphi %s1221_s17, %s1364_s17   ;;  %s1176_s16 = sphi %s1219_s16, %s1363_s16   ;;  %s1172_s15 = sphi %s1217_s15, %s1362_s15  }
   0x4   : > { %p27_p0 = scmp.ge.s32.totalorder %s26_s20, 3  ;;  %p50_p2 = scmp.eq.s32.totalorder %s1188_s19, 0 }
   0x5   : > { %s42_s22 = sadd.s32 1, %s1176_s16  ;;  %p958_p5 = scmp.ge.s32.totalorder %s1188_s19, 3 }
   0x6   : > { %s1367_s20 = smov (%p27_p0, %s26_s20), 0  ;;  %p51_p3 = por %p50_p2, %p49_p1 }
   0x7   : > { %s38_s21 = ssub.s32 %s1184_s18, %s1367_s20  ;;  %199 = sbr.rel (%p958_p5) target bundleno = 21 (0x15), region = 24 }
   0x8   : > { %p40_p4 = scmp.eq.s32.totalorder %s38_s21, 0 }
   0xa   : > { %s1252_s23 = scalar_select %p40_p4, %s1176_s16, %s42_s22  }
   0xe   : > { %202 = sbr.rel (!%p51_p3) target bundleno = 21 (0x15), region = 28  ;;  %s204_s24 = sand.u32 (%p51_p3), 1, %s1176_s16  }
   0xf   : > { %s1024_s25 = smul.u32 (%p51_p3), 12, %s1184_s18 }
  0x10   : > { %s1030_s26 = smul.u32 (%p51_p3), 24, %s204_s24 }
  0x11   : > { %s212_s29 = scalar_lea.vmem (%p51_p3), %s1357_s0, %s1024_s25 }
  0x12   : > { %v227_v0 = vld [vmem:[%s212_s29] sm:$0xff] (%p51_p3)  ;;  %v960_v2 = vld [vmem:[%s212_s29 + $0x8] sm:$0xf] (%p51_p3)  ;;  %s206_s30 = scalar_lea.vmem (%p51_p3), [#allocation3], %s1030_s26  ;;  %v962_v3 = vld [vmem:[%s212_s29 + $0x2c] sm:$0xf] (%p51_p3) }
  0x13   : > { %v229_v1 = vld [vmem:[%s212_s29 + $0x24] sm:$0xff] (%p51_p3)  ;;  %228 = vst [vmem:[%s206_s30] sm:$0xff] (%p51_p3), %v227_v0  ;;  %961 = vst [vmem:[%s206_s30 + $0x8] sm:$0xf] (%p51_p3), %v960_v2 }
  0x14   : > { %230 = vst [vmem:[%s206_s30 + $0xc] sm:$0xff] (%p51_p3), %v229_v1  ;;  %963 = vst [vmem:[%s206_s30 + $0x14] sm:$0xf] (%p51_p3), %v962_v3 }
  0x15 PF: > { %p964_p6 = scmp.ge.s32.totalorder %s1188_s19, 1  ;;  %p261_p7 = scmp.lt.s32.totalorder %s1188_s19, 4 }
  0x17   : > { %p262_p8 = pnand %p964_p6, %p261_p7 }
  0x18   : > { %s268_s5 = sand.u32 (!%p262_p8), 1, %s1172_s15   ;;  %s318_s6 = smul.u32 (!%p262_p8), 48, %s1180_s17 }
  0x19   : > { %265 = sbr.rel (%p262_p8) target bundleno = 338 (0x152), region = 58  ;;  %p967_p10 = scmp.ne.s32.totalorder (!%p262_p8), %s1180_s17, 0 }
  0x1a   : > { %s1031_s7 = smul.u32 (!%p262_p8), 24, %s268_s5  ;;  %p320_p9 = scmp.lt.s32.totalorder (!%p262_p8), %s318_s6, 143 }
  0x1c   : > { %s1269_s12 = scalar_lea.vmem (!%p262_p8), [#allocation3], %s1031_s7 }
  0x20   : > { %s1369_s6 = smov (!%p320_p9, %s318_s6), 143  ;;  %356 = sbr.rel (%p967_p10) target bundleno = 39 (0x27), region = 66 }
  0x21   : > { %s1025_s8 = sshll.u32 %s1369_s6, 3  ;;  %v1190_v4 = vmov (!%p967_p10), 0.0  }
  0x22   : > { %s1267_s11 = scalar_lea.vmem %s1358_s1, %s1025_s8  ;;  %357 = vst [vmem:[#allocation2] sm:$0xff] (!%p967_p10), %v1190_v4  ;;  %358 = vst [vmem:[#allocation2 + $0x8] sm:$0xff] (!%p967_p10), %v1190_v4 }
  0x23   : > { %359 = vst [vmem:[#allocation2 + $0x10] sm:$0xff] (!%p967_p10), %v1190_v4  ;;  %360 = vst [vmem:[#allocation2 + $0x18] sm:$0xff] (!%p967_p10), %v1190_v4 }
  0x27 PF: > { %v1074_v5 = vld [vmem:[%s1267_s11 + $0x4] ss:$8 sps:$4 sm:$0xff]   ;;  %v1076_v6 = vld [vmem:[%s1267_s11] ss:$8 sps:$4 sm:$0xff]   ;;  %v1191_v7 = vmov 0   ;;  %p1019_p11 = scmp.ne.s32.totalorder %s1180_s17, 2 }
  0x28   : > { %748 = vmatprep.mubr.bf16.mxu0 %v1191_v7  ;;  %673 = vmatprep.subr.bf16.mxu1 %v1074_v5  ;;  %v1077_v8 = vld [vmem:[%s1267_s11 + $0x14] ss:$8 sps:$4 sm:$0xff]   ;;  %v1079_v9 = vld [vmem:[%s1267_s11 + $0x10] ss:$8 sps:$4 sm:$0xff]   ;;  %v1080_v10 = vld [vmem:[%s1267_s11 + $0x24] ss:$8 sps:$4 sm:$0xff]  }
  0x29   : > { %674 = vmatpush1.bf16.msra.mxu1 %v1076_v6  ;;  %v1082_v11 = vld [vmem:[%s1267_s11 + $0x20] ss:$8 sps:$4 sm:$0xff]   ;;  %v1083_v12 = vld [vmem:[%s1267_s11 + $0x34] ss:$8 sps:$4 sm:$0xff]   ;;  %v1085_v13 = vld [vmem:[%s1267_s11 + $0x30] ss:$8 sps:$4 sm:$0xff]  }
  0x2a   : > { %675 = vmatprep.subr.bf16.mxu1 %v1077_v8  ;;  %v1098_v14 = vld [vmem:[%s1267_s11 + $0x104] ss:$8 sps:$4 sm:$0xff]   ;;  %v1100_v15 = vld [vmem:[%s1267_s11 + $0x100] ss:$8 sps:$4 sm:$0xff]   ;;  %v1104_v17 = vld [vmem:[%s1267_s11 + $0x114] ss:$8 sps:$4 sm:$0xff]  }
  0x2b   : > { %v1086_v16 = vld [vmem:[%s1267_s11 + $0x44] ss:$8 sps:$4 sm:$0xff]   ;;  %716 = vmatprep.subr.bf16.mxu0 %v1098_v14  ;;  %v1106_v18 = vld [vmem:[%s1267_s11 + $0x110] ss:$8 sps:$4 sm:$0xff]   ;;  %v1088_v19 = vld [vmem:[%s1267_s11 + $0x40] ss:$8 sps:$4 sm:$0xff]  }
  0x2c   : > { %717 = vmatpush1.bf16.msra.mxu0 %v1100_v15  ;;  %v1089_v20 = vld [vmem:[%s1267_s11 + $0x54] ss:$8 sps:$4 sm:$0xff]   ;;  %v1110_v21 = vld [vmem:[%s1267_s11 + $0x124] ss:$8 sps:$4 sm:$0xff]   ;;  %v1112_v22 = vld [vmem:[%s1267_s11 + $0x120] ss:$8 sps:$4 sm:$0xff]  }
  0x2d   : > { %676 = vmatpush1.bf16.msra.mxu1 %v1079_v9  ;;  %718 = vmatprep.subr.bf16.mxu0 %v1104_v17  ;;  %v1091_v23 = vld [vmem:[%s1267_s11 + $0x50] ss:$8 sps:$4 sm:$0xff]   ;;  %v1116_v24 = vld [vmem:[%s1267_s11 + $0x134] ss:$8 sps:$4 sm:$0xff]   ;;  %v1092_v25 = vld [vmem:[%s1267_s11 + $0x64] ss:$8 sps:$4 sm:$0xff]  }
  0x2e   : > { %677 = vmatprep.subr.bf16.mxu1 %v1080_v10  ;;  %v1118_v26 = vld [vmem:[%s1267_s11 + $0x130] ss:$8 sps:$4 sm:$0xff]   ;;  %v1094_v27 = vld [vmem:[%s1267_s11 + $0x60] ss:$8 sps:$4 sm:$0xff]   ;;  %v1122_v28 = vld [vmem:[%s1267_s11 + $0x144] ss:$8 sps:$4 sm:$0xff]  }
  0x2f   : > { %v1095_v29 = vld [vmem:[%s1267_s11 + $0x74] ss:$8 sps:$4 sm:$0xff]   ;;  %v1124_v30 = vld [vmem:[%s1267_s11 + $0x140] ss:$8 sps:$4 sm:$0xff]   ;;  %v1097_v31 = vld [vmem:[%s1267_s11 + $0x70] ss:$8 sps:$4 sm:$0xff]  }
  0x30   : > { %719 = vmatpush1.bf16.msra.mxu0 %v1106_v18  ;;  %v1128_v32 = vld [vmem:[%s1267_s11 + $0x154] ss:$8 sps:$4 sm:$0xff]   ;;  %v1101_v33 = vld [vmem:[%s1267_s11 + $0x84] ss:$8 sps:$4 sm:$0xff]   ;;  %v1130_v34 = vld [vmem:[%s1267_s11 + $0x150] ss:$8 sps:$4 sm:$0xff]  }
  0x31   : > { %678 = vmatpush1.bf16.msra.mxu1 %v1082_v11  ;;  %720 = vmatprep.subr.bf16.mxu0 %v1110_v21  ;;  %v1103_v35 = vld [vmem:[%s1267_s11 + $0x80] ss:$8 sps:$4 sm:$0xff]   ;;  %v1134_v36 = vld [vmem:[%s1267_s11 + $0x164] ss:$8 sps:$4 sm:$0xff]   ;;  %v1107_v37 = vld [vmem:[%s1267_s11 + $0x94] ss:$8 sps:$4 sm:$0xff]  }
  0x32   : > { %679 = vmatprep.subr.bf16.mxu1 %v1083_v12  ;;  %v1136_v38 = vld [vmem:[%s1267_s11 + $0x160] ss:$8 sps:$4 sm:$0xff]   ;;  %v1109_v40 = vld [vmem:[%s1267_s11 + $0x90] ss:$8 sps:$4 sm:$0xff]   ;;  %v1140_v41 = vld [vmem:[%s1267_s11 + $0x174] ss:$8 sps:$4 sm:$0xff]  }
  0x33   : > { %v1149_v39 = vld [vmem:[%s1269_s12 + $0x4] ss:$12 sps:$4 sm:$0xff]   ;;  %v1146_v46 = vld [vmem:[%s1269_s12 + $0x8] ss:$12 sps:$4 sm:$0xff]   ;;  %v1147_v56 = vld [vmem:[%s1269_s12] ss:$12 sps:$4 sm:$0xff]  }
  0x34   : > { %721 = vmatpush1.bf16.msra.mxu0 %v1112_v22  ;;  %v1113_v42 = vld [vmem:[%s1267_s11 + $0xa4] ss:$8 sps:$4 sm:$0xff]   ;;  %705 = vmatprep.mubr.bf16.mxu1 %v1149_v39  ;;  %v1142_v43 = vld [vmem:[%s1267_s11 + $0x170] ss:$8 sps:$4 sm:$0xff]   ;;  %v1115_v44 = vld [vmem:[%s1267_s11 + $0xa0] ss:$8 sps:$4 sm:$0xff]  }
  0x35   : > { %680 = vmatpush1.bf16.msra.mxu1 %v1085_v13  ;;  %722 = vmatprep.subr.bf16.mxu0 %v1116_v24  ;;  %v1119_v45 = vld [vmem:[%s1267_s11 + $0xb4] ss:$8 sps:$4 sm:$0xff]   ;;  %v1121_v47 = vld [vmem:[%s1267_s11 + $0xb0] ss:$8 sps:$4 sm:$0xff]   ;;  %v1125_v48 = vld [vmem:[%s1267_s11 + $0xc4] ss:$8 sps:$4 sm:$0xff]   ;;  %v777_v13 = vlaneseq (!%p1019_p11) }
  0x36   : > { %681 = vmatprep.subr.bf16.mxu1 %v1086_v16  ;;  %v1127_v49 = vld [vmem:[%s1267_s11 + $0xc0] ss:$8 sps:$4 sm:$0xff]   ;;  %v1131_v50 = vld [vmem:[%s1267_s11 + $0xd4] ss:$8 sps:$4 sm:$0xff]   ;;  %v1133_v51 = vld [vmem:[%s1267_s11 + $0xd0] ss:$8 sps:$4 sm:$0xff]  }
  0x37   : > { %v1137_v52 = vld [vmem:[%s1267_s11 + $0xe4] ss:$8 sps:$4 sm:$0xff]   ;;  %v1139_v53 = vld [vmem:[%s1267_s11 + $0xe0] ss:$8 sps:$4 sm:$0xff]   ;;  %v1143_v54 = vld [vmem:[%s1267_s11 + $0xf4] ss:$8 sps:$4 sm:$0xff]  }
  0x38   : > { %723 = vmatpush1.bf16.msra.mxu0 %v1118_v26  ;;  %v1145_v55 = vld [vmem:[%s1267_s11 + $0xf0] ss:$8 sps:$4 sm:$0xff]   ;;  %v361_v61 = vld [vmem:[#allocation2] sm:$0xff]  ;;  %v362_v0 = vld [vmem:[#allocation2 + $0x8] sm:$0xff]  ;;  %v778_v14 = vshrl.u32 (!%p1019_p11), %v777_v13, 7 }
  0x39   : > { %682 = vmatpush1.bf16.msra.mxu1 %v1088_v19  ;;  %724 = vmatprep.subr.bf16.mxu0 %v1122_v28  ;;  %v363_v3 = vld [vmem:[#allocation2 + $0x10] sm:$0xff]  ;;  %v364_v7 = vld [vmem:[#allocation2 + $0x18] sm:$0xff]  ;;  %v775_v15 = vld [vmem:[%s1359_s2] sm:$0x3] (!%p1019_p11) }
  0x3a   : > { %683 = vmatprep.subr.bf16.mxu1 %v1089_v20  ;;  %v791_v16 = vld [vmem:[%s1360_s3] sm:$0x3] (!%p1019_p11)  ;;  %v779_v18 = vsub.s32 (!%p1019_p11), 0, %v778_v14  ;;  %v783_v19 = vsub.s32 (!%p1019_p11), 1, %v778_v14 }
  0x3c   : > { %725 = vmatpush1.bf16.msra.mxu0 %v1124_v30  ;;  %v796_v24 = vrot.slane (!%p1019_p11), %v791_v16, %v779_v18  ;;  %v800_v26 = vrot.slane (!%p1019_p11), %v791_v16, %v783_v19 }
  0x3d   : > { %684 = vmatpush1.bf16.msra.mxu1 %v1091_v23  ;;  %726 = vmatprep.subr.bf16.mxu0 %v1128_v32  ;;  %v780_v23 = vrot.slane (!%p1019_p11), %v775_v15, %v779_v18 }
  0x3e   : > { %685 = vmatprep.subr.bf16.mxu1 %v1092_v25  ;;  %v784_v25 = vrot.slane (!%p1019_p11), %v775_v15, %v783_v19 }
  0x40   : > { %727 = vmatpush1.bf16.msra.mxu0 %v1130_v34 }
  0x41   : > { %686 = vmatpush1.bf16.msra.mxu1 %v1094_v27  ;;  %728 = vmatprep.subr.bf16.mxu0 %v1134_v36 }
  0x42   : > { %687 = vmatprep.subr.bf16.mxu1 %v1095_v29 }
  0x44   : > { %729 = vmatpush1.bf16.msra.mxu0 %v1136_v38 }
  0x45   : > { %688 = vmatpush1.bf16.msra.mxu1 %v1097_v31  ;;  %730 = vmatprep.subr.bf16.mxu0 %v1140_v41 }
  0x46   : > { %689 = vmatprep.subr.bf16.mxu1 %v1101_v33 }
  0x48   : > { %731 = vmatpush1.bf16.msra.mxu0 %v1142_v43 }
  0x49   : > { %690 = vmatpush1.bf16.msra.mxu1 %v1103_v35 }
  0x4a   : > { %691 = vmatprep.subr.bf16.mxu1 %v1107_v37 }
  0x4b   : > { %749 = vmatmul.mubr.bf16.vlgmr.msra.gmra.mrb[0].mxu0 %v1146_v46 }
  0x4d   : > { %692 = vmatpush1.bf16.msra.mxu1 %v1109_v40 }
  0x4e   : > { %693 = vmatprep.subr.bf16.mxu1 %v1113_v42 }
  0x51   : > { %694 = vmatpush1.bf16.msra.mxu1 %v1115_v44 }
  0x52   : > { %695 = vmatprep.subr.bf16.mxu1 %v1119_v45 }
  0x55   : > { %696 = vmatpush1.bf16.msra.mxu1 %v1121_v47 }
  0x56   : > { %697 = vmatprep.subr.bf16.mxu1 %v1125_v48 }
  0x59   : > { %698 = vmatpush1.bf16.msra.mxu1 %v1127_v49 }
  0x5a   : > { %699 = vmatprep.subr.bf16.mxu1 %v1131_v50 }
  0x5d   : > { %700 = vmatpush1.bf16.msra.mxu1 %v1133_v51 }
  0x5e   : > { %701 = vmatprep.subr.bf16.mxu1 %v1137_v52 }
  0x61   : > { %702 = vmatpush1.bf16.msra.mxu1 %v1139_v53 }
  0x62   : > { %703 = vmatprep.subr.bf16.mxu1 %v1143_v54 }
  0x65   : > { %704 = vmatpush1.bf16.msra.mxu1 %v1145_v55 }
  0x68   : > { %706 = vmatmul.mubr.bf16.vlgmr.msra.gmra.mrb[0].mxu1 %v1147_v56 }
 0x11e   : > { %v750_v57 = vpop.f32.mrb[0].mxu0 }
 0x11f   : > { %v752_v58 = vpop.f32.mrb[1].mxu0 }
 0x120   : > { %v754_v59 = vpop.f32.mrb[2].mxu0 }
 0x121   : > { %v756_v60 = vpop.f32.mrb[3].mxu0 }
 0x13b   : > { %v707_v62 = vpop.f32.mrb[0].mxu1 }
 0x13c   : > { %v751_v63 = vadd.f32 %v750_v57, %v707_v62  ;;  %v709_v1 = vpop.f32.mrb[1].mxu1 }
 0x13d   : > { %v753_v2 = vadd.f32 %v752_v58, %v709_v1  ;;  %v711_v4 = vpop.f32.mrb[2].mxu1  ;;  %770 = sbr.rel (%p1019_p11) target bundleno = 338 (0x152), region = 70 }
 0x13e   : > { %v759_v5 = vadd.f32 %v751_v63, %v361_v61  ;;  %v755_v6 = vadd.f32 %v754_v59, %v711_v4  ;;  %v713_v8 = vpop.f32.mrb[3].mxu1 }
 0x13f   : > { %v760_v9 = vadd.f32 %v753_v2, %v362_v0  ;;  %v757_v10 = vadd.f32 %v756_v60, %v713_v8 }
 0x140   : > { %763 = vst [vmem:[#allocation2] sm:$0xff] %v759_v5  ;;  %v761_v11 = vadd.f32 %v755_v6, %v363_v3 }
 0x141   : > { %764 = vst [vmem:[#allocation2 + $0x8] sm:$0xff] %v760_v9  ;;  %v762_v12 = vadd.f32 %v757_v10, %v364_v7 }
 0x142   : > { %765 = vst [vmem:[#allocation2 + $0x10] sm:$0xff] %v761_v11 }
 0x143   : > { %766 = vst [vmem:[#allocation2 + $0x18] sm:$0xff] %v762_v12 }
 0x147   : > { %v771_v17 = vld [vmem:[#allocation2] sm:$0xff] }
 0x148   : > { %v772_v20 = vld [vmem:[#allocation2 + $0x8] sm:$0xff]  ;;  %v787_v27 = vmul.f32 %v780_v23, %v771_v17 }
 0x149   : > { %v773_v21 = vld [vmem:[#allocation2 + $0x10] sm:$0xff]  ;;  %v788_v28 = vmul.f32 %v784_v25, %v772_v20 }
 0x14a   : > { %v774_v22 = vld [vmem:[#allocation2 + $0x18] sm:$0xff]  ;;  %v789_v29 = vmul.f32 %v780_v23, %v773_v21  ;;  %v803_v31 = vadd.f32 %v796_v24, %v787_v27 }
 0x14b   : > { %v790_v30 = vmul.f32 %v784_v25, %v774_v22  ;;  %v804_v32 = vadd.f32 %v800_v26, %v788_v28 }
 0x14c   : > { %v805_v33 = vadd.f32 %v796_v24, %v789_v29  ;;  %v807_v35 = vmax.f32 %v803_v31, 0.0 }
 0x14d   : > { %v806_v34 = vadd.f32 %v800_v26, %v790_v30  ;;  %v808_v36 = vmax.f32 %v804_v32, 0.0 }
 0x14e   : > { %v809_v37 = vmax.f32 %v805_v33, 0.0  ;;  %811 = vst [vmem:[%s1361_s4] sm:$0xff] %v807_v35 }
 0x14f   : > { %v810_v38 = vmax.f32 %v806_v34, 0.0  ;;  %812 = vst [vmem:[%s1361_s4 + $0x8] sm:$0xff] %v808_v36 }
 0x150   : > { %813 = vst [vmem:[%s1361_s4 + $0x10] sm:$0xff] %v809_v37 }
 0x151   : > { %814 = vst [vmem:[%s1361_s4 + $0x18] sm:$0xff] %v810_v38 }
 0x152 PF: > { %s14_s19 = sadd.s32 1, %s1188_s19   ;;  %s1362_s15 = smov %s1176_s16 }
 0x153   : > { %p11_p12 = scmp.ge.s32.totalorder %s14_s19, 5   ;;  %s1363_s16 = smov %s1252_s23 }
 0x154   : > { %s1364_s17 = smov %s1184_s18  ;;  %s1365_s18 = smov %s1367_s20 }
 0x155   :  { %13 = sbr.rel (!%p11_p12) target bundleno = 3 (0x3), region = 120 }

// kernel: resnet_up_forward.37
= control target key start
LH: loop header
LB: loop body
LE: loop exit
PB: predicated region body
PF: predicated region fallthrough
CT: control target
= control target key end

     0   :  { %v275_v1 = vmov 0   ;;  %v194_v18 = vlaneseq  ;;  %s370_s1 = inlined_call_operand.vmem [shape: bf16[128,256], index: 1, kind: input, shape index: {}]   ;;  %s371_s0 = inlined_call_operand.vmem [shape: bf16[16,128], index: 0, kind: input, shape index: {}]   ;;  %s372_s2 = inlined_call_operand.vmem [shape: f32[1,256], index: 2, kind: input, shape index: {}]   ;;  %s373_s3 = inlined_call_operand.vmem [shape: f32[1,256], index: 3, kind: input, shape index: {}]   ;;  %s374_s4 = inlined_call_operand.vmem [shape: f32[16,256], index: 4, kind: output, shape index: {}]  }
   0x1   :  { %v250_v0 = vld [vmem:[%s370_s1 + $0x4] ss:$8 sps:$4 sm:$0xff]   ;;  %166 = vmatprep.mubr.bf16.mxu0 %v275_v1  ;;  %v252_v2 = vld [vmem:[%s370_s1] ss:$8 sps:$4 sm:$0xff]   ;;  %v253_v3 = vld [vmem:[%s370_s1 + $0x14] ss:$8 sps:$4 sm:$0xff]  }
   0x2   :  { %134 = vmatprep.subr.bf16.mxu0 %v250_v0  ;;  %v255_v4 = vld [vmem:[%s370_s1 + $0x10] ss:$8 sps:$4 sm:$0xff]   ;;  %v256_v5 = vld [vmem:[%s370_s1 + $0x24] ss:$8 sps:$4 sm:$0xff]   ;;  %v258_v6 = vld [vmem:[%s370_s1 + $0x20] ss:$8 sps:$4 sm:$0xff]  }
   0x3   :  { %135 = vmatpush1.bf16.msra.mxu0 %v252_v2  ;;  %v259_v7 = vld [vmem:[%s370_s1 + $0x34] ss:$8 sps:$4 sm:$0xff]   ;;  %v261_v8 = vld [vmem:[%s370_s1 + $0x30] ss:$8 sps:$4 sm:$0xff]   ;;  %v262_v9 = vld [vmem:[%s370_s1 + $0x44] ss:$8 sps:$4 sm:$0xff]  }
   0x4   :  { %136 = vmatprep.subr.bf16.mxu0 %v253_v3  ;;  %v264_v10 = vld [vmem:[%s370_s1 + $0x40] ss:$8 sps:$4 sm:$0xff]   ;;  %v265_v11 = vld [vmem:[%s370_s1 + $0x54] ss:$8 sps:$4 sm:$0xff]   ;;  %v267_v12 = vld [vmem:[%s370_s1 + $0x50] ss:$8 sps:$4 sm:$0xff]  }
   0x5   :  { %v268_v13 = vld [vmem:[%s370_s1 + $0x64] ss:$8 sps:$4 sm:$0xff]   ;;  %v270_v14 = vld [vmem:[%s370_s1 + $0x60] ss:$8 sps:$4 sm:$0xff]   ;;  %v271_v15 = vld [vmem:[%s370_s1 + $0x74] ss:$8 sps:$4 sm:$0xff]  }
   0x6   :  { %v273_v16 = vld [vmem:[%s370_s1 + $0x70] ss:$8 sps:$4 sm:$0xff]   ;;  %v274_v17 = vld [vmem:[%s371_s0] sm:$0xff]   ;;  %v195_v19 = vshrl.u32 %v194_v18, 7 }
   0x7   :  { %137 = vmatpush1.bf16.msra.mxu0 %v255_v4  ;;  %v192_v21 = vld [vmem:[%s372_s2] sm:$0x3] }
   0x8   :  { %138 = vmatprep.subr.bf16.mxu0 %v256_v5  ;;  %v196_v20 = vsub.s32 0, %v195_v19  ;;  %v200_v22 = vsub.s32 1, %v195_v19  ;;  %v208_v23 = vld [vmem:[%s373_s3] sm:$0x3] }
   0xa   :  { %v197_v24 = vrot.slane %v192_v21, %v196_v20  ;;  %v201_v25 = vrot.slane %v192_v21, %v200_v22  ;;  %v213_v26 = vrot.slane %v208_v23, %v196_v20  ;;  %v217_v28 = vrot.slane %v208_v23, %v200_v22 }
   0xb   :  { %139 = vmatpush1.bf16.msra.mxu0 %v258_v6 }
   0xc   :  { %140 = vmatprep.subr.bf16.mxu0 %v259_v7 }
   0xf   :  { %141 = vmatpush1.bf16.msra.mxu0 %v261_v8 }
  0x10   :  { %142 = vmatprep.subr.bf16.mxu0 %v262_v9 }
  0x13   :  { %143 = vmatpush1.bf16.msra.mxu0 %v264_v10 }
  0x14   :  { %144 = vmatprep.subr.bf16.mxu0 %v265_v11 }
  0x17   :  { %145 = vmatpush1.bf16.msra.mxu0 %v267_v12 }
  0x18   :  { %146 = vmatprep.subr.bf16.mxu0 %v268_v13 }
  0x1b   :  { %147 = vmatpush1.bf16.msra.mxu0 %v270_v14 }
  0x1c   :  { %148 = vmatprep.subr.bf16.mxu0 %v271_v15 }
  0x1f   :  { %149 = vmatpush1.bf16.msra.mxu0 %v273_v16 }
  0x22   :  { %167 = vmatmul.mubr.bf16.vlgmr.msra.gmra.mrb[0].mxu0 %v274_v17 }
  0xf5   :  { %v168_v27 = vpop.f32.mrb[0].mxu0 }
  0xf6   :  { %v204_v29 = vmul.f32 %v197_v24, %v168_v27  ;;  %v170_v30 = vpop.f32.mrb[1].mxu0 }
  0xf7   :  { %v205_v31 = vmul.f32 %v201_v25, %v170_v30  ;;  %v172_v32 = vpop.f32.mrb[2].mxu0 }
  0xf8   :  { %v220_v33 = vadd.f32 %v213_v26, %v204_v29  ;;  %v206_v34 = vmul.f32 %v197_v24, %v172_v32  ;;  %v174_v35 = vpop.f32.mrb[3].mxu0 }
  0xf9   :  { %v221_v36 = vadd.f32 %v217_v28, %v205_v31  ;;  %v207_v37 = vmul.f32 %v201_v25, %v174_v35 }
  0xfa   :  { %224 = vst [vmem:[%s374_s4] sm:$0xff] %v220_v33  ;;  %v222_v38 = vadd.f32 %v213_v26, %v206_v34 }
  0xfb   :  { %225 = vst [vmem:[%s374_s4 + $0x8] sm:$0xff] %v221_v36  ;;  %v223_v39 = vadd.f32 %v217_v28, %v207_v37 }
  0xfc   :  { %226 = vst [vmem:[%s374_s4 + $0x10] sm:$0xff] %v222_v38 }
  0xfd   :  { %227 = vst [vmem:[%s374_s4 + $0x18] sm:$0xff] %v223_v39 }

// kernel: resnet_up_forward.40
= control target key start
LH: loop header
LB: loop body
LE: loop exit
PB: predicated region body
PF: predicated region fallthrough
CT: control target
= control target key end

     0   :  { %s1342_s15 = smov 0   ;;  %s1344_s16 = smov 0   ;;  %s1499_s0 = inlined_call_operand.vmem [shape: bf16[16,2560], index: 0, kind: input, shape index: {}]   ;;  %s1500_s1 = inlined_call_operand.vmem [shape: bf16[2560,256], index: 1, kind: input, shape index: {}]   ;;  %s1501_s2 = inlined_call_operand.vmem [shape: f32[1,256], index: 2, kind: input, shape index: {}]   ;;  %s1502_s3 = inlined_call_operand.vmem [shape: f32[1,256], index: 3, kind: input, shape index: {}]   ;;  %s1503_s4 = inlined_call_operand.vmem [shape: f32[16,256], index: 4, kind: output, shape index: {}]  }
   0x1   :  { %s1346_s17 = smov 0   ;;  %s1348_s18 = smov 0  }
   0x2   :  { %s1350_s19 = smov 0  }
   0x3 LB: > { %s26_s20 = sadd.s32 1, %s1310_s18  ;;  %p49_p1 = scmp.ne.s32.totalorder %s1302_s16, %s1298_s15  ;;  %s1314_s19 = sphi %s1350_s19, %s14_s19   ;;  %s1310_s18 = sphi %s1348_s18, %s1507_s18   ;;  %s1306_s17 = sphi %s1346_s17, %s1506_s17   ;;  %s1302_s16 = sphi %s1344_s16, %s1505_s16   ;;  %s1298_s15 = sphi %s1342_s15, %s1504_s15  }
   0x4   : > { %p27_p0 = scmp.ge.s32.totalorder %s26_s20, 5  ;;  %p50_p2 = scmp.eq.s32.totalorder %s1314_s19, 0 }
   0x5   : > { %s42_s22 = sadd.s32 1, %s1302_s16  ;;  %p1044_p5 = scmp.ge.s32.totalorder %s1314_s19, 5 }
   0x6   : > { %s1509_s20 = smov (%p27_p0, %s26_s20), 0  ;;  %p51_p3 = por %p50_p2, %p49_p1 }
   0x7   : > { %s38_s21 = ssub.s32 %s1310_s18, %s1509_s20  ;;  %199 = sbr.rel (%p1044_p5) target bundleno = 21 (0x15), region = 24 }
   0x8   : > { %p40_p4 = scmp.eq.s32.totalorder %s38_s21, 0 }
   0xa   : > { %s1377_s23 = scalar_select %p40_p4, %s1302_s16, %s42_s22  }
   0xe   : > { %202 = sbr.rel (!%p51_p3) target bundleno = 21 (0x15), region = 28  ;;  %s204_s24 = sand.u32 (%p51_p3), 1, %s1302_s16  }
   0xf   : > { %s1127_s25 = sshll.u32 (%p51_p3), %s1310_s18, 4  ;;  %s1045_s26 = sshll.u32 (%p51_p3), %s204_s24, 5 }
  0x10   : > { %s212_s29 = scalar_lea.vmem (%p51_p3), %s1499_s0, %s1127_s25  ;;  %s206_s30 = scalar_lea.vmem (%p51_p3), [#allocation3], %s1045_s26 }
  0x11   : > { %v225_v0 = vld [vmem:[%s212_s29] sm:$0xff] (%p51_p3)  ;;  %v227_v1 = vld [vmem:[%s212_s29 + $0x8] sm:$0xff] (%p51_p3)  ;;  %v229_v2 = vld [vmem:[%s212_s29 + $0x50] sm:$0xff] (%p51_p3) }
  0x12   : > { %226 = vst [vmem:[%s206_s30] sm:$0xff] (%p51_p3), %v225_v0  ;;  %228 = vst [vmem:[%s206_s30 + $0x8] sm:$0xff] (%p51_p3), %v227_v1  ;;  %v231_v3 = vld [vmem:[%s212_s29 + $0x58] sm:$0xff] (%p51_p3) }
  0x13   : > { %230 = vst [vmem:[%s206_s30 + $0x10] sm:$0xff] (%p51_p3), %v229_v2  ;;  %232 = vst [vmem:[%s206_s30 + $0x18] sm:$0xff] (%p51_p3), %v231_v3 }
  0x15 PF: > { %p1048_p6 = scmp.ge.s32.totalorder %s1314_s19, 1  ;;  %p252_p7 = scmp.lt.s32.totalorder %s1314_s19, 6 }
  0x17   : > { %p253_p8 = pnand %p1048_p6, %p252_p7 }
  0x18   : > { %s259_s5 = sand.u32 (!%p253_p8), 1, %s1298_s15   ;;  %s1050_s6 = sshll.u32 (!%p253_p8), %s1306_s17, 6 }
  0x19   : > { %256 = sbr.rel (%p253_p8) target bundleno = 339 (0x153), region = 55  ;;  %s1049_s7 = sshll.u32 (!%p253_p8), %s259_s5, 5 }
  0x1a   : > { %p311_p9 = scmp.lt.s32.totalorder (!%p253_p8), %s1050_s6, 319  ;;  %s1394_s12 = scalar_lea.vmem (!%p253_p8), [#allocation3], %s1049_s7 }
  0x1b   : > { %p1053_p10 = scmp.ne.s32.totalorder (!%p253_p8), %s1306_s17, 0 }
  0x20   : > { %s1511_s6 = smov (!%p311_p9, %s1050_s6), 319  ;;  %346 = sbr.rel (%p1053_p10) target bundleno = 39 (0x27), region = 63 }
  0x21   : > { %s1128_s8 = sshll.u32 %s1511_s6, 3  ;;  %v1316_v4 = vmov (!%p1053_p10), 0.0  }
  0x22   : > { %s1392_s11 = scalar_lea.vmem %s1500_s1, %s1128_s8  ;;  %347 = vst [vmem:[#allocation2] sm:$0xff] (!%p1053_p10), %v1316_v4  ;;  %348 = vst [vmem:[#allocation2 + $0x8] sm:$0xff] (!%p1053_p10), %v1316_v4 }
  0x23   : > { %349 = vst [vmem:[#allocation2 + $0x10] sm:$0xff] (!%p1053_p10), %v1316_v4  ;;  %350 = vst [vmem:[#allocation2 + $0x18] sm:$0xff] (!%p1053_p10), %v1316_v4 }
  0x27 PF: > { %v1174_v5 = vld [vmem:[%s1392_s11 + $0x4] ss:$8 sps:$4 sm:$0xff]   ;;  %v1178_v7 = vld [vmem:[%s1392_s11] ss:$8 sps:$4 sm:$0xff]   ;;  %v1180_v9 = vld [vmem:[%s1392_s11 + $0x14] ss:$8 sps:$4 sm:$0xff]  }
  0x28   : > { %v1176_v6 = vld [vmem:[%s1392_s11 + $0x104] ss:$8 sps:$4 sm:$0xff]   ;;  %763 = vmatprep.subr.bf16.mxu1 %v1174_v5  ;;  %v1179_v8 = vld [vmem:[%s1392_s11 + $0x100] ss:$8 sps:$4 sm:$0xff]   ;;  %v1182_v10 = vld [vmem:[%s1392_s11 + $0x114] ss:$8 sps:$4 sm:$0xff]  }
  0x29   : > { %806 = vmatprep.subr.bf16.mxu0 %v1176_v6  ;;  %764 = vmatpush1.bf16.msra.mxu1 %v1178_v7  ;;  %v1184_v11 = vld [vmem:[%s1392_s11 + $0x10] ss:$8 sps:$4 sm:$0xff]   ;;  %v1186_v13 = vld [vmem:[%s1392_s11 + $0x24] ss:$8 sps:$4 sm:$0xff]   ;;  %v1190_v15 = vld [vmem:[%s1392_s11 + $0x20] ss:$8 sps:$4 sm:$0xff]  }
  0x2a   : > { %807 = vmatpush1.bf16.msra.mxu0 %v1179_v8  ;;  %765 = vmatprep.subr.bf16.mxu1 %v1180_v9  ;;  %v1185_v12 = vld [vmem:[%s1392_s11 + $0x110] ss:$8 sps:$4 sm:$0xff]   ;;  %v1188_v14 = vld [vmem:[%s1392_s11 + $0x124] ss:$8 sps:$4 sm:$0xff]   ;;  %v1191_v16 = vld [vmem:[%s1392_s11 + $0x120] ss:$8 sps:$4 sm:$0xff]  }
  0x2b   : > { %808 = vmatprep.subr.bf16.mxu0 %v1182_v10  ;;  %v1192_v17 = vld [vmem:[%s1392_s11 + $0x34] ss:$8 sps:$4 sm:$0xff]   ;;  %v1196_v19 = vld [vmem:[%s1392_s11 + $0x30] ss:$8 sps:$4 sm:$0xff]   ;;  %v1198_v21 = vld [vmem:[%s1392_s11 + $0x44] ss:$8 sps:$4 sm:$0xff]  }
  0x2c   : > { %v1194_v18 = vld [vmem:[%s1392_s11 + $0x134] ss:$8 sps:$4 sm:$0xff]   ;;  %v1197_v20 = vld [vmem:[%s1392_s11 + $0x130] ss:$8 sps:$4 sm:$0xff]   ;;  %v1200_v22 = vld [vmem:[%s1392_s11 + $0x144] ss:$8 sps:$4 sm:$0xff]  }
  0x2d   : > { %766 = vmatpush1.bf16.msra.mxu1 %v1184_v11  ;;  %v1202_v23 = vld [vmem:[%s1392_s11 + $0x40] ss:$8 sps:$4 sm:$0xff]   ;;  %v1204_v25 = vld [vmem:[%s1392_s11 + $0x54] ss:$8 sps:$4 sm:$0xff]   ;;  %v1208_v27 = vld [vmem:[%s1392_s11 + $0x50] ss:$8 sps:$4 sm:$0xff]  }
  0x2e   : > { %809 = vmatpush1.bf16.msra.mxu0 %v1185_v12  ;;  %767 = vmatprep.subr.bf16.mxu1 %v1186_v13  ;;  %v1203_v24 = vld [vmem:[%s1392_s11 + $0x140] ss:$8 sps:$4 sm:$0xff]   ;;  %v1206_v26 = vld [vmem:[%s1392_s11 + $0x154] ss:$8 sps:$4 sm:$0xff]   ;;  %v1209_v28 = vld [vmem:[%s1392_s11 + $0x150] ss:$8 sps:$4 sm:$0xff]  }
  0x2f   : > { %810 = vmatprep.subr.bf16.mxu0 %v1188_v14  ;;  %v1210_v29 = vld [vmem:[%s1392_s11 + $0x64] ss:$8 sps:$4 sm:$0xff]   ;;  %v1214_v31 = vld [vmem:[%s1392_s11 + $0x60] ss:$8 sps:$4 sm:$0xff]   ;;  %v1216_v33 = vld [vmem:[%s1392_s11 + $0x74] ss:$8 sps:$4 sm:$0xff]  }
  0x30   : > { %v1212_v30 = vld [vmem:[%s1392_s11 + $0x164] ss:$8 sps:$4 sm:$0xff]   ;;  %v1215_v32 = vld [vmem:[%s1392_s11 + $0x160] ss:$8 sps:$4 sm:$0xff]   ;;  %v1218_v34 = vld [vmem:[%s1392_s11 + $0x174] ss:$8 sps:$4 sm:$0xff]  }
  0x31   : > { %768 = vmatpush1.bf16.msra.mxu1 %v1190_v15  ;;  %v1220_v35 = vld [vmem:[%s1392_s11 + $0x70] ss:$8 sps:$4 sm:$0xff]   ;;  %v1222_v37 = vld [vmem:[%s1392_s11 + $0x84] ss:$8 sps:$4 sm:$0xff]   ;;  %v1226_v39 = vld [vmem:[%s1392_s11 + $0x80] ss:$8 sps:$4 sm:$0xff]  }
  0x32   : > { %811 = vmatpush1.bf16.msra.mxu0 %v1191_v16  ;;  %769 = vmatprep.subr.bf16.mxu1 %v1192_v17  ;;  %v1221_v36 = vld [vmem:[%s1392_s11 + $0x170] ss:$8 sps:$4 sm:$0xff]   ;;  %v1224_v38 = vld [vmem:[%s1392_s11 + $0x184] ss:$8 sps:$4 sm:$0xff]   ;;  %v1227_v40 = vld [vmem:[%s1392_s11 + $0x180] ss:$8 sps:$4 sm:$0xff]  }
  0x33   : > { %812 = vmatprep.subr.bf16.mxu0 %v1194_v18  ;;  %v1228_v41 = vld [vmem:[%s1392_s11 + $0x94] ss:$8 sps:$4 sm:$0xff]   ;;  %v1232_v43 = vld [vmem:[%s1392_s11 + $0x90] ss:$8 sps:$4 sm:$0xff]   ;;  %v1234_v45 = vld [vmem:[%s1392_s11 + $0xa4] ss:$8 sps:$4 sm:$0xff]  }
  0x34   : > { %v1230_v42 = vld [vmem:[%s1392_s11 + $0x194] ss:$8 sps:$4 sm:$0xff]   ;;  %v1233_v44 = vld [vmem:[%s1392_s11 + $0x190] ss:$8 sps:$4 sm:$0xff]   ;;  %v1236_v46 = vld [vmem:[%s1392_s11 + $0x1a4] ss:$8 sps:$4 sm:$0xff]  }
  0x35   : > { %770 = vmatpush1.bf16.msra.mxu1 %v1196_v19  ;;  %v1238_v47 = vld [vmem:[%s1392_s11 + $0xa0] ss:$8 sps:$4 sm:$0xff]   ;;  %v1240_v49 = vld [vmem:[%s1392_s11 + $0xb4] ss:$8 sps:$4 sm:$0xff]   ;;  %v1244_v51 = vld [vmem:[%s1392_s11 + $0xb0] ss:$8 sps:$4 sm:$0xff]  }
  0x36   : > { %813 = vmatpush1.bf16.msra.mxu0 %v1197_v20  ;;  %771 = vmatprep.subr.bf16.mxu1 %v1198_v21  ;;  %v1239_v48 = vld [vmem:[%s1392_s11 + $0x1a0] ss:$8 sps:$4 sm:$0xff]   ;;  %v1242_v50 = vld [vmem:[%s1392_s11 + $0x1b4] ss:$8 sps:$4 sm:$0xff]   ;;  %v1245_v53 = vld [vmem:[%s1392_s11 + $0x1b0] ss:$8 sps:$4 sm:$0xff]  }
  0x37   : > { %814 = vmatprep.subr.bf16.mxu0 %v1200_v22  ;;  %v1272_v52 = vld [vmem:[%s1394_s12 + $0x4] ss:$16 sps:$4 sm:$0xff]   ;;  %v1275_v56 = vld [vmem:[%s1394_s12 + $0xc] ss:$16 sps:$4 sm:$0xff]   ;;  %v1250_v57 = vld [vmem:[%s1392_s11 + $0xc0] ss:$8 sps:$4 sm:$0xff]  }
  0x38   : > { %v1246_v54 = vld [vmem:[%s1392_s11 + $0xc4] ss:$8 sps:$4 sm:$0xff]   ;;  %795 = vmatprep.mubr.bf16.mxu1 %v1272_v52  ;;  %838 = vmatprep.mubr.bf16.mxu0 %v1275_v56  ;;  %v1251_v58 = vld [vmem:[%s1392_s11 + $0x1c0] ss:$8 sps:$4 sm:$0xff]   ;;  %v1252_v59 = vld [vmem:[%s1392_s11 + $0xd4] ss:$8 sps:$4 sm:$0xff]  }
  0x39   : > { %772 = vmatpush1.bf16.msra.mxu1 %v1202_v23  ;;  %v1248_v55 = vld [vmem:[%s1392_s11 + $0x1c4] ss:$8 sps:$4 sm:$0xff]   ;;  %v1254_v60 = vld [vmem:[%s1392_s11 + $0x1d4] ss:$8 sps:$4 sm:$0xff]   ;;  %v1256_v61 = vld [vmem:[%s1392_s11 + $0xd0] ss:$8 sps:$4 sm:$0xff]  }
  0x3a   : > { %815 = vmatpush1.bf16.msra.mxu0 %v1203_v24  ;;  %773 = vmatprep.subr.bf16.mxu1 %v1204_v25  ;;  %v1257_v62 = vld [vmem:[%s1392_s11 + $0x1d0] ss:$8 sps:$4 sm:$0xff]   ;;  %v1258_v63 = vld [vmem:[%s1392_s11 + $0xe4] ss:$8 sps:$4 sm:$0xff]   ;;  %v1262_v1 = vld [vmem:[%s1392_s11 + $0xe0] ss:$8 sps:$4 sm:$0xff]  }
  0x3b   : > { %816 = vmatprep.subr.bf16.mxu0 %v1206_v26  ;;  %v1260_v0 = vld [vmem:[%s1392_s11 + $0x1e4] ss:$8 sps:$4 sm:$0xff]   ;;  %v1263_v2 = vld [vmem:[%s1392_s11 + $0x1e0] ss:$8 sps:$4 sm:$0xff]   ;;  %v1264_v3 = vld [vmem:[%s1392_s11 + $0xf4] ss:$8 sps:$4 sm:$0xff]  }
  0x3c   : > { %v1266_v4 = vld [vmem:[%s1392_s11 + $0x1f4] ss:$8 sps:$4 sm:$0xff]   ;;  %v1268_v5 = vld [vmem:[%s1392_s11 + $0xf0] ss:$8 sps:$4 sm:$0xff]   ;;  %v351_v10 = vld [vmem:[#allocation2] sm:$0xff]  ;;  %p1122_p11 = scmp.ne.s32.totalorder %s1306_s17, 4 }
  0x3d   : > { %774 = vmatpush1.bf16.msra.mxu1 %v1208_v27  ;;  %v1269_v6 = vld [vmem:[%s1392_s11 + $0x1f0] ss:$8 sps:$4 sm:$0xff]   ;;  %v352_v14 = vld [vmem:[#allocation2 + $0x8] sm:$0xff] }
  0x3e   : > { %817 = vmatpush1.bf16.msra.mxu0 %v1209_v28  ;;  %775 = vmatprep.subr.bf16.mxu1 %v1210_v29  ;;  %v1270_v7 = vld [vmem:[%s1394_s12] ss:$16 sps:$4 sm:$0xff]   ;;  %v1273_v8 = vld [vmem:[%s1394_s12 + $0x8] ss:$16 sps:$4 sm:$0xff]   ;;  %v867_v29 = vlaneseq (!%p1122_p11) }
  0x3f   : > { %818 = vmatprep.subr.bf16.mxu0 %v1212_v30  ;;  %v353_v18 = vld [vmem:[#allocation2 + $0x10] sm:$0xff]  ;;  %v354_v23 = vld [vmem:[#allocation2 + $0x18] sm:$0xff] }
  0x40   : > { %v868_v30 = vshrl.u32 (!%p1122_p11), %v867_v29, 7 }
  0x41   : > { %776 = vmatpush1.bf16.msra.mxu1 %v1214_v31  ;;  %v865_v31 = vld [vmem:[%s1501_s2] sm:$0x3] (!%p1122_p11) }
  0x42   : > { %819 = vmatpush1.bf16.msra.mxu0 %v1215_v32  ;;  %777 = vmatprep.subr.bf16.mxu1 %v1216_v33  ;;  %v881_v32 = vld [vmem:[%s1502_s3] sm:$0x3] (!%p1122_p11) }
  0x43   : > { %820 = vmatprep.subr.bf16.mxu0 %v1218_v34  ;;  %v869_v34 = vsub.s32 (!%p1122_p11), 0, %v868_v30 }
  0x45   : > { %778 = vmatpush1.bf16.msra.mxu1 %v1220_v35  ;;  %v873_v35 = vsub.s32 (!%p1122_p11), 1, %v868_v30 }
  0x46   : > { %821 = vmatpush1.bf16.msra.mxu0 %v1221_v36  ;;  %779 = vmatprep.subr.bf16.mxu1 %v1222_v37 }
  0x47   : > { %822 = vmatprep.subr.bf16.mxu0 %v1224_v38 }
  0x49   : > { %780 = vmatpush1.bf16.msra.mxu1 %v1226_v39  ;;  %v870_v39 = vrot.slane (!%p1122_p11), %v865_v31, %v869_v34 }
  0x4a   : > { %823 = vmatpush1.bf16.msra.mxu0 %v1227_v40  ;;  %781 = vmatprep.subr.bf16.mxu1 %v1228_v41  ;;  %v886_v40 = vrot.slane (!%p1122_p11), %v881_v32, %v869_v34  ;;  %v874_v41 = vrot.slane (!%p1122_p11), %v865_v31, %v873_v35 }
  0x4b   : > { %824 = vmatprep.subr.bf16.mxu0 %v1230_v42  ;;  %v890_v42 = vrot.slane (!%p1122_p11), %v881_v32, %v873_v35 }
  0x4d   : > { %782 = vmatpush1.bf16.msra.mxu1 %v1232_v43 }
  0x4e   : > { %825 = vmatpush1.bf16.msra.mxu0 %v1233_v44  ;;  %783 = vmatprep.subr.bf16.mxu1 %v1234_v45 }
  0x4f   : > { %826 = vmatprep.subr.bf16.mxu0 %v1236_v46 }
  0x51   : > { %784 = vmatpush1.bf16.msra.mxu1 %v1238_v47 }
  0x52   : > { %827 = vmatpush1.bf16.msra.mxu0 %v1239_v48  ;;  %785 = vmatprep.subr.bf16.mxu1 %v1240_v49 }
  0x53   : > { %828 = vmatprep.subr.bf16.mxu0 %v1242_v50 }
  0x55   : > { %786 = vmatpush1.bf16.msra.mxu1 %v1244_v51 }
  0x56   : > { %829 = vmatpush1.bf16.msra.mxu0 %v1245_v53  ;;  %787 = vmatprep.subr.bf16.mxu1 %v1246_v54 }
  0x57   : > { %830 = vmatprep.subr.bf16.mxu0 %v1248_v55 }
  0x59   : > { %788 = vmatpush1.bf16.msra.mxu1 %v1250_v57 }
  0x5a   : > { %831 = vmatpush1.bf16.msra.mxu0 %v1251_v58  ;;  %789 = vmatprep.subr.bf16.mxu1 %v1252_v59 }
  0x5b   : > { %832 = vmatprep.subr.bf16.mxu0 %v1254_v60 }
  0x5d   : > { %790 = vmatpush1.bf16.msra.mxu1 %v1256_v61 }
  0x5e   : > { %833 = vmatpush1.bf16.msra.mxu0 %v1257_v62  ;;  %791 = vmatprep.subr.bf16.mxu1 %v1258_v63 }
  0x5f   : > { %834 = vmatprep.subr.bf16.mxu0 %v1260_v0 }
  0x61   : > { %792 = vmatpush1.bf16.msra.mxu1 %v1262_v1 }
  0x62   : > { %835 = vmatpush1.bf16.msra.mxu0 %v1263_v2  ;;  %793 = vmatprep.subr.bf16.mxu1 %v1264_v3 }
  0x63   : > { %836 = vmatprep.subr.bf16.mxu0 %v1266_v4 }
  0x65   : > { %794 = vmatpush1.bf16.msra.mxu1 %v1268_v5 }
  0x66   : > { %837 = vmatpush1.bf16.msra.mxu0 %v1269_v6 }
  0x68   : > { %796 = vmatmul.mubr.bf16.vlgmr.msra.gmra.mrb[0].mxu1 %v1270_v7 }
  0x69   : > { %839 = vmatmul.mubr.bf16.vlgmr.msra.gmra.mrb[0].mxu0 %v1273_v8 }
 0x13b   : > { %v797_v9 = vpop.f32.mrb[0].mxu1 }
 0x13c   : > { %v840_v11 = vpop.f32.mrb[0].mxu0  ;;  %v799_v13 = vpop.f32.mrb[1].mxu1 }
 0x13d   : > { %v841_v12 = vadd.f32 %v840_v11, %v797_v9  ;;  %v842_v15 = vpop.f32.mrb[1].mxu0  ;;  %v801_v17 = vpop.f32.mrb[2].mxu1 }
 0x13e   : > { %v843_v16 = vadd.f32 %v842_v15, %v799_v13  ;;  %v844_v19 = vpop.f32.mrb[2].mxu0  ;;  %v803_v22 = vpop.f32.mrb[3].mxu1  ;;  %860 = sbr.rel (%p1122_p11) target bundleno = 339 (0x153), region = 67 }
 0x13f   : > { %v849_v20 = vadd.f32 %v841_v12, %v351_v10  ;;  %v845_v21 = vadd.f32 %v844_v19, %v801_v17  ;;  %v846_v24 = vpop.f32.mrb[3].mxu0 }
 0x140   : > { %v850_v25 = vadd.f32 %v843_v16, %v352_v14  ;;  %v847_v26 = vadd.f32 %v846_v24, %v803_v22 }
 0x141   : > { %853 = vst [vmem:[#allocation2] sm:$0xff] %v849_v20  ;;  %v851_v27 = vadd.f32 %v845_v21, %v353_v18 }
 0x142   : > { %854 = vst [vmem:[#allocation2 + $0x8] sm:$0xff] %v850_v25  ;;  %v852_v28 = vadd.f32 %v847_v26, %v354_v23 }
 0x143   : > { %855 = vst [vmem:[#allocation2 + $0x10] sm:$0xff] %v851_v27 }
 0x144   : > { %856 = vst [vmem:[#allocation2 + $0x18] sm:$0xff] %v852_v28 }
 0x148   : > { %v861_v33 = vld [vmem:[#allocation2] sm:$0xff] }
 0x149   : > { %v862_v36 = vld [vmem:[#allocation2 + $0x8] sm:$0xff]  ;;  %v877_v43 = vmul.f32 %v870_v39, %v861_v33 }
 0x14a   : > { %v863_v37 = vld [vmem:[#allocation2 + $0x10] sm:$0xff]  ;;  %v878_v44 = vmul.f32 %v874_v41, %v862_v36 }
 0x14b   : > { %v864_v38 = vld [vmem:[#allocation2 + $0x18] sm:$0xff]  ;;  %v879_v45 = vmul.f32 %v870_v39, %v863_v37  ;;  %v893_v47 = vadd.f32 %v886_v40, %v877_v43 }
 0x14c   : > { %v880_v46 = vmul.f32 %v874_v41, %v864_v38  ;;  %v894_v48 = vadd.f32 %v890_v42, %v878_v44 }
 0x14d   : > { %v895_v49 = vadd.f32 %v886_v40, %v879_v45  ;;  %v897_v51 = vmax.f32 %v893_v47, 0.0 }
 0x14e   : > { %v896_v50 = vadd.f32 %v890_v42, %v880_v46  ;;  %v898_v52 = vmax.f32 %v894_v48, 0.0 }
 0x14f   : > { %v899_v53 = vmax.f32 %v895_v49, 0.0  ;;  %901 = vst [vmem:[%s1503_s4] sm:$0xff] %v897_v51 }
 0x150   : > { %v900_v54 = vmax.f32 %v896_v50, 0.0  ;;  %902 = vst [vmem:[%s1503_s4 + $0x8] sm:$0xff] %v898_v52 }
 0x151   : > { %903 = vst [vmem:[%s1503_s4 + $0x10] sm:$0xff] %v899_v53 }
 0x152   : > { %904 = vst [vmem:[%s1503_s4 + $0x18] sm:$0xff] %v900_v54 }
 0x153 PF: > { %s14_s19 = sadd.s32 1, %s1314_s19   ;;  %s1504_s15 = smov %s1302_s16 }
 0x154   : > { %p11_p12 = scmp.ge.s32.totalorder %s14_s19, 7   ;;  %s1505_s16 = smov %s1377_s23 }
 0x155   : > { %s1506_s17 = smov %s1310_s18  ;;  %s1507_s18 = smov %s1509_s20 }
 0x156   :  { %13 = sbr.rel (!%p11_p12) target bundleno = 3 (0x3), region = 111 }

// kernel: resnet_up_forward.39
= control target key start
LH: loop header
LB: loop body
LE: loop exit
PB: predicated region body
PF: predicated region fallthrough
CT: control target
= control target key end

     0   :  { %s1445_s18 = smov 0   ;;  %s1447_s19 = smov 0   ;;  %s1614_s0 = inlined_call_operand.vmem [shape: bf16[16,2560], index: 0, kind: input, shape index: {}]   ;;  %s1615_s1 = inlined_call_operand.vmem [shape: bf16[2560,256], index: 1, kind: input, shape index: {}]   ;;  %s1616_s2 = inlined_call_operand.vmem [shape: f32[1,256], index: 2, kind: input, shape index: {}]   ;;  %s1617_s3 = inlined_call_operand.vmem [shape: f32[1,256], index: 3, kind: input, shape index: {}]   ;;  %s1618_s4 = inlined_call_operand.vmem [shape: f32[16,256], index: 4, kind: input, shape index: {}]   ;;  %s1619_s5 = inlined_call_operand.vmem [shape: f32[16,256], index: 5, kind: output, shape index: {}]  }
   0x1   :  { %s1449_s20 = smov 0   ;;  %s1451_s21 = smov 0  }
   0x2   :  { %s1453_s22 = smov 0  }
   0x3 LB: > { %s27_s23 = sadd.s32 1, %s1408_s21  ;;  %p50_p1 = scmp.ne.s32.totalorder %s1400_s19, %s1396_s18  ;;  %s1412_s22 = sphi %s1453_s22, %s15_s22   ;;  %s1408_s21 = sphi %s1451_s21, %s1623_s21   ;;  %s1404_s20 = sphi %s1449_s20, %s1622_s20   ;;  %s1400_s19 = sphi %s1447_s19, %s1621_s19   ;;  %s1396_s18 = sphi %s1445_s18, %s1620_s18  }
   0x4   : > { %p28_p0 = scmp.ge.s32.totalorder %s27_s23, 5  ;;  %p51_p2 = scmp.eq.s32.totalorder %s1412_s22, 0 }
   0x5   : > { %s43_s25 = sadd.s32 1, %s1400_s19  ;;  %p1142_p5 = scmp.ge.s32.totalorder %s1412_s22, 5 }
   0x6   : > { %s1625_s23 = smov (%p28_p0, %s27_s23), 0  ;;  %p52_p3 = por %p51_p2, %p50_p1 }
   0x7   : > { %s39_s24 = ssub.s32 %s1408_s21, %s1625_s23  ;;  %243 = sbr.rel (%p1142_p5) target bundleno = 21 (0x15), region = 28 }
   0x8   : > { %p41_p4 = scmp.eq.s32.totalorder %s39_s24, 0 }
   0xa   : > { %s1480_s26 = scalar_select %p41_p4, %s1400_s19, %s43_s25  }
   0xe   : > { %246 = sbr.rel (!%p52_p3) target bundleno = 21 (0x15), region = 32  ;;  %s248_s27 = sand.u32 (%p52_p3), 1, %s1400_s19  }
   0xf   : > { %s1225_s28 = sshll.u32 (%p52_p3), %s1408_s21, 4  ;;  %s1143_s29 = sshll.u32 (%p52_p3), %s248_s27, 5 }
  0x10   : > { %s256_s7 = scalar_lea.vmem (%p52_p3), %s1614_s0, %s1225_s28  ;;  %s250_s8 = scalar_lea.vmem (%p52_p3), [#allocation3], %s1143_s29 }
  0x11   : > { %v269_v0 = vld [vmem:[%s256_s7] sm:$0xff] (%p52_p3)  ;;  %v271_v1 = vld [vmem:[%s256_s7 + $0x8] sm:$0xff] (%p52_p3)  ;;  %v273_v2 = vld [vmem:[%s256_s7 + $0x50] sm:$0xff] (%p52_p3) }
  0x12   : > { %270 = vst [vmem:[%s250_s8] sm:$0xff] (%p52_p3), %v269_v0  ;;  %272 = vst [vmem:[%s250_s8 + $0x8] sm:$0xff] (%p52_p3), %v271_v1  ;;  %v275_v3 = vld [vmem:[%s256_s7 + $0x58] sm:$0xff] (%p52_p3) }
  0x13   : > { %274 = vst [vmem:[%s250_s8 + $0x10] sm:$0xff] (%p52_p3), %v273_v2  ;;  %276 = vst [vmem:[%s250_s8 + $0x18] sm:$0xff] (%p52_p3), %v275_v3 }
  0x15 PF: > { %p1146_p6 = scmp.ge.s32.totalorder %s1412_s22, 1  ;;  %p296_p7 = scmp.lt.s32.totalorder %s1412_s22, 6 }
  0x17   : > { %p297_p8 = pnand %p1146_p6, %p296_p7 }
  0x18   : > { %s303_s9 = sand.u32 (!%p297_p8), 1, %s1396_s18   ;;  %s1148_s10 = sshll.u32 (!%p297_p8), %s1404_s20, 6 }
  0x19   : > { %300 = sbr.rel (%p297_p8) target bundleno = 341 (0x155), region = 59  ;;  %s1147_s11 = sshll.u32 (!%p297_p8), %s303_s9, 5 }
  0x1a   : > { %p367_p9 = scmp.lt.s32.totalorder (!%p297_p8), %s1148_s10, 319  ;;  %s1497_s16 = scalar_lea.vmem (!%p297_p8), [#allocation3], %s1147_s11 }
  0x1b   : > { %p1151_p10 = scmp.ne.s32.totalorder (!%p297_p8), %s1404_s20, 0 }
  0x20   : > { %s1627_s10 = smov (!%p367_p9, %s1148_s10), 319  ;;  %414 = sbr.rel (%p1151_p10) target bundleno = 39 (0x27), region = 67 }
  0x21   : > { %s1226_s12 = sshll.u32 %s1627_s10, 3  ;;  %v1414_v4 = vmov (!%p1151_p10), 0.0  }
  0x22   : > { %s1495_s15 = scalar_lea.vmem %s1615_s1, %s1226_s12  ;;  %415 = vst [vmem:[#allocation2] sm:$0xff] (!%p1151_p10), %v1414_v4  ;;  %416 = vst [vmem:[#allocation2 + $0x8] sm:$0xff] (!%p1151_p10), %v1414_v4 }
  0x23   : > { %417 = vst [vmem:[#allocation2 + $0x10] sm:$0xff] (!%p1151_p10), %v1414_v4  ;;  %418 = vst [vmem:[#allocation2 + $0x18] sm:$0xff] (!%p1151_p10), %v1414_v4 }
  0x27 PF: > { %v1272_v5 = vld [vmem:[%s1495_s15 + $0x4] ss:$8 sps:$4 sm:$0xff]   ;;  %v1276_v7 = vld [vmem:[%s1495_s15] ss:$8 sps:$4 sm:$0xff]   ;;  %v1278_v9 = vld [vmem:[%s1495_s15 + $0x14] ss:$8 sps:$4 sm:$0xff]  }
  0x28   : > { %v1274_v6 = vld [vmem:[%s1495_s15 + $0x104] ss:$8 sps:$4 sm:$0xff]   ;;  %831 = vmatprep.subr.bf16.mxu1 %v1272_v5  ;;  %v1277_v8 = vld [vmem:[%s1495_s15 + $0x100] ss:$8 sps:$4 sm:$0xff]   ;;  %v1280_v10 = vld [vmem:[%s1495_s15 + $0x114] ss:$8 sps:$4 sm:$0xff]  }
  0x29   : > { %874 = vmatprep.subr.bf16.mxu0 %v1274_v6  ;;  %832 = vmatpush1.bf16.msra.mxu1 %v1276_v7  ;;  %v1282_v11 = vld [vmem:[%s1495_s15 + $0x10] ss:$8 sps:$4 sm:$0xff]   ;;  %v1284_v13 = vld [vmem:[%s1495_s15 + $0x24] ss:$8 sps:$4 sm:$0xff]   ;;  %v1288_v15 = vld [vmem:[%s1495_s15 + $0x20] ss:$8 sps:$4 sm:$0xff]  }
  0x2a   : > { %875 = vmatpush1.bf16.msra.mxu0 %v1277_v8  ;;  %833 = vmatprep.subr.bf16.mxu1 %v1278_v9  ;;  %v1283_v12 = vld [vmem:[%s1495_s15 + $0x110] ss:$8 sps:$4 sm:$0xff]   ;;  %v1286_v14 = vld [vmem:[%s1495_s15 + $0x124] ss:$8 sps:$4 sm:$0xff]   ;;  %v1289_v16 = vld [vmem:[%s1495_s15 + $0x120] ss:$8 sps:$4 sm:$0xff]  }
  0x2b   : > { %876 = vmatprep.subr.bf16.mxu0 %v1280_v10  ;;  %v1290_v17 = vld [vmem:[%s1495_s15 + $0x34] ss:$8 sps:$4 sm:$0xff]   ;;  %v1294_v19 = vld [vmem:[%s1495_s15 + $0x30] ss:$8 sps:$4 sm:$0xff]   ;;  %v1296_v21 = vld [vmem:[%s1495_s15 + $0x44] ss:$8 sps:$4 sm:$0xff]  }
  0x2c   : > { %v1292_v18 = vld [vmem:[%s1495_s15 + $0x134] ss:$8 sps:$4 sm:$0xff]   ;;  %v1295_v20 = vld [vmem:[%s1495_s15 + $0x130] ss:$8 sps:$4 sm:$0xff]   ;;  %v1298_v22 = vld [vmem:[%s1495_s15 + $0x144] ss:$8 sps:$4 sm:$0xff]  }
  0x2d   : > { %834 = vmatpush1.bf16.msra.mxu1 %v1282_v11  ;;  %v1300_v23 = vld [vmem:[%s1495_s15 + $0x40] ss:$8 sps:$4 sm:$0xff]   ;;  %v1302_v25 = vld [vmem:[%s1495_s15 + $0x54] ss:$8 sps:$4 sm:$0xff]   ;;  %v1306_v27 = vld [vmem:[%s1495_s15 + $0x50] ss:$8 sps:$4 sm:$0xff]  }
  0x2e   : > { %877 = vmatpush1.bf16.msra.mxu0 %v1283_v12  ;;  %835 = vmatprep.subr.bf16.mxu1 %v1284_v13  ;;  %v1301_v24 = vld [vmem:[%s1495_s15 + $0x140] ss:$8 sps:$4 sm:$0xff]   ;;  %v1304_v26 = vld [vmem:[%s1495_s15 + $0x154] ss:$8 sps:$4 sm:$0xff]   ;;  %v1307_v28 = vld [vmem:[%s1495_s15 + $0x150] ss:$8 sps:$4 sm:$0xff]  }
  0x2f   : > { %878 = vmatprep.subr.bf16.mxu0 %v1286_v14  ;;  %v1308_v29 = vld [vmem:[%s1495_s15 + $0x64] ss:$8 sps:$4 sm:$0xff]   ;;  %v1312_v31 = vld [vmem:[%s1495_s15 + $0x60] ss:$8 sps:$4 sm:$0xff]   ;;  %v1314_v33 = vld [vmem:[%s1495_s15 + $0x74] ss:$8 sps:$4 sm:$0xff]  }
  0x30   : > { %v1310_v30 = vld [vmem:[%s1495_s15 + $0x164] ss:$8 sps:$4 sm:$0xff]   ;;  %v1313_v32 = vld [vmem:[%s1495_s15 + $0x160] ss:$8 sps:$4 sm:$0xff]   ;;  %v1316_v34 = vld [vmem:[%s1495_s15 + $0x174] ss:$8 sps:$4 sm:$0xff]  }
  0x31   : > { %836 = vmatpush1.bf16.msra.mxu1 %v1288_v15  ;;  %v1318_v35 = vld [vmem:[%s1495_s15 + $0x70] ss:$8 sps:$4 sm:$0xff]   ;;  %v1320_v37 = vld [vmem:[%s1495_s15 + $0x84] ss:$8 sps:$4 sm:$0xff]   ;;  %v1324_v39 = vld [vmem:[%s1495_s15 + $0x80] ss:$8 sps:$4 sm:$0xff]  }
  0x32   : > { %879 = vmatpush1.bf16.msra.mxu0 %v1289_v16  ;;  %837 = vmatprep.subr.bf16.mxu1 %v1290_v17  ;;  %v1319_v36 = vld [vmem:[%s1495_s15 + $0x170] ss:$8 sps:$4 sm:$0xff]   ;;  %v1322_v38 = vld [vmem:[%s1495_s15 + $0x184] ss:$8 sps:$4 sm:$0xff]   ;;  %v1325_v40 = vld [vmem:[%s1495_s15 + $0x180] ss:$8 sps:$4 sm:$0xff]  }
  0x33   : > { %880 = vmatprep.subr.bf16.mxu0 %v1292_v18  ;;  %v1326_v41 = vld [vmem:[%s1495_s15 + $0x94] ss:$8 sps:$4 sm:$0xff]   ;;  %v1330_v43 = vld [vmem:[%s1495_s15 + $0x90] ss:$8 sps:$4 sm:$0xff]   ;;  %v1332_v45 = vld [vmem:[%s1495_s15 + $0xa4] ss:$8 sps:$4 sm:$0xff]  }
  0x34   : > { %v1328_v42 = vld [vmem:[%s1495_s15 + $0x194] ss:$8 sps:$4 sm:$0xff]   ;;  %v1331_v44 = vld [vmem:[%s1495_s15 + $0x190] ss:$8 sps:$4 sm:$0xff]   ;;  %v1334_v46 = vld [vmem:[%s1495_s15 + $0x1a4] ss:$8 sps:$4 sm:$0xff]  }
  0x35   : > { %838 = vmatpush1.bf16.msra.mxu1 %v1294_v19  ;;  %v1336_v47 = vld [vmem:[%s1495_s15 + $0xa0] ss:$8 sps:$4 sm:$0xff]   ;;  %v1338_v49 = vld [vmem:[%s1495_s15 + $0xb4] ss:$8 sps:$4 sm:$0xff]   ;;  %v1342_v51 = vld [vmem:[%s1495_s15 + $0xb0] ss:$8 sps:$4 sm:$0xff]  }
  0x36   : > { %881 = vmatpush1.bf16.msra.mxu0 %v1295_v20  ;;  %839 = vmatprep.subr.bf16.mxu1 %v1296_v21  ;;  %v1337_v48 = vld [vmem:[%s1495_s15 + $0x1a0] ss:$8 sps:$4 sm:$0xff]   ;;  %v1340_v50 = vld [vmem:[%s1495_s15 + $0x1b4] ss:$8 sps:$4 sm:$0xff]   ;;  %v1343_v53 = vld [vmem:[%s1495_s15 + $0x1b0] ss:$8 sps:$4 sm:$0xff]  }
  0x37   : > { %882 = vmatprep.subr.bf16.mxu0 %v1298_v22  ;;  %v1370_v52 = vld [vmem:[%s1497_s16 + $0x4] ss:$16 sps:$4 sm:$0xff]   ;;  %v1373_v56 = vld [vmem:[%s1497_s16 + $0xc] ss:$16 sps:$4 sm:$0xff]   ;;  %v1348_v57 = vld [vmem:[%s1495_s15 + $0xc0] ss:$8 sps:$4 sm:$0xff]  }
  0x38   : > { %v1344_v54 = vld [vmem:[%s1495_s15 + $0xc4] ss:$8 sps:$4 sm:$0xff]   ;;  %863 = vmatprep.mubr.bf16.mxu1 %v1370_v52  ;;  %906 = vmatprep.mubr.bf16.mxu0 %v1373_v56  ;;  %v1349_v58 = vld [vmem:[%s1495_s15 + $0x1c0] ss:$8 sps:$4 sm:$0xff]   ;;  %v1350_v59 = vld [vmem:[%s1495_s15 + $0xd4] ss:$8 sps:$4 sm:$0xff]  }
  0x39   : > { %840 = vmatpush1.bf16.msra.mxu1 %v1300_v23  ;;  %v1346_v55 = vld [vmem:[%s1495_s15 + $0x1c4] ss:$8 sps:$4 sm:$0xff]   ;;  %v1352_v60 = vld [vmem:[%s1495_s15 + $0x1d4] ss:$8 sps:$4 sm:$0xff]   ;;  %v1354_v61 = vld [vmem:[%s1495_s15 + $0xd0] ss:$8 sps:$4 sm:$0xff]  }
  0x3a   : > { %883 = vmatpush1.bf16.msra.mxu0 %v1301_v24  ;;  %841 = vmatprep.subr.bf16.mxu1 %v1302_v25  ;;  %v1355_v62 = vld [vmem:[%s1495_s15 + $0x1d0] ss:$8 sps:$4 sm:$0xff]   ;;  %v1356_v63 = vld [vmem:[%s1495_s15 + $0xe4] ss:$8 sps:$4 sm:$0xff]   ;;  %v1360_v1 = vld [vmem:[%s1495_s15 + $0xe0] ss:$8 sps:$4 sm:$0xff]  }
  0x3b   : > { %884 = vmatprep.subr.bf16.mxu0 %v1304_v26  ;;  %v1358_v0 = vld [vmem:[%s1495_s15 + $0x1e4] ss:$8 sps:$4 sm:$0xff]   ;;  %v1361_v2 = vld [vmem:[%s1495_s15 + $0x1e0] ss:$8 sps:$4 sm:$0xff]   ;;  %v1362_v3 = vld [vmem:[%s1495_s15 + $0xf4] ss:$8 sps:$4 sm:$0xff]  }
  0x3c   : > { %v1364_v4 = vld [vmem:[%s1495_s15 + $0x1f4] ss:$8 sps:$4 sm:$0xff]   ;;  %v1366_v5 = vld [vmem:[%s1495_s15 + $0xf0] ss:$8 sps:$4 sm:$0xff]   ;;  %v419_v10 = vld [vmem:[#allocation2] sm:$0xff]  ;;  %p1220_p11 = scmp.ne.s32.totalorder %s1404_s20, 4 }
  0x3d   : > { %842 = vmatpush1.bf16.msra.mxu1 %v1306_v27  ;;  %v1367_v6 = vld [vmem:[%s1495_s15 + $0x1f0] ss:$8 sps:$4 sm:$0xff]   ;;  %v420_v14 = vld [vmem:[#allocation2 + $0x8] sm:$0xff] }
  0x3e   : > { %885 = vmatpush1.bf16.msra.mxu0 %v1307_v28  ;;  %843 = vmatprep.subr.bf16.mxu1 %v1308_v29  ;;  %v1368_v7 = vld [vmem:[%s1497_s16] ss:$16 sps:$4 sm:$0xff]   ;;  %v1371_v8 = vld [vmem:[%s1497_s16 + $0x8] ss:$16 sps:$4 sm:$0xff]   ;;  %v935_v29 = vlaneseq (!%p1220_p11) }
  0x3f   : > { %886 = vmatprep.subr.bf16.mxu0 %v1310_v30  ;;  %v421_v18 = vld [vmem:[#allocation2 + $0x10] sm:$0xff]  ;;  %v422_v23 = vld [vmem:[#allocation2 + $0x18] sm:$0xff] }
  0x40   : > { %v936_v30 = vshrl.u32 (!%p1220_p11), %v935_v29, 7 }
  0x41   : > { %844 = vmatpush1.bf16.msra.mxu1 %v1312_v31  ;;  %v933_v31 = vld [vmem:[%s1616_s2] sm:$0x3] (!%p1220_p11) }
  0x42   : > { %887 = vmatpush1.bf16.msra.mxu0 %v1313_v32  ;;  %845 = vmatprep.subr.bf16.mxu1 %v1314_v33  ;;  %v949_v32 = vld [vmem:[%s1617_s3] sm:$0x3] (!%p1220_p11) }
  0x43   : > { %888 = vmatprep.subr.bf16.mxu0 %v1316_v34  ;;  %v937_v34 = vsub.s32 (!%p1220_p11), 0, %v936_v30 }
  0x45   : > { %846 = vmatpush1.bf16.msra.mxu1 %v1318_v35  ;;  %v941_v35 = vsub.s32 (!%p1220_p11), 1, %v936_v30 }
  0x46   : > { %889 = vmatpush1.bf16.msra.mxu0 %v1319_v36  ;;  %847 = vmatprep.subr.bf16.mxu1 %v1320_v37 }
  0x47   : > { %890 = vmatprep.subr.bf16.mxu0 %v1322_v38 }
  0x49   : > { %848 = vmatpush1.bf16.msra.mxu1 %v1324_v39  ;;  %v938_v39 = vrot.slane (!%p1220_p11), %v933_v31, %v937_v34 }
  0x4a   : > { %891 = vmatpush1.bf16.msra.mxu0 %v1325_v40  ;;  %849 = vmatprep.subr.bf16.mxu1 %v1326_v41  ;;  %v954_v40 = vrot.slane (!%p1220_p11), %v949_v32, %v937_v34  ;;  %v942_v41 = vrot.slane (!%p1220_p11), %v933_v31, %v941_v35 }
  0x4b   : > { %892 = vmatprep.subr.bf16.mxu0 %v1328_v42  ;;  %v958_v42 = vrot.slane (!%p1220_p11), %v949_v32, %v941_v35 }
  0x4d   : > { %850 = vmatpush1.bf16.msra.mxu1 %v1330_v43 }
  0x4e   : > { %893 = vmatpush1.bf16.msra.mxu0 %v1331_v44  ;;  %851 = vmatprep.subr.bf16.mxu1 %v1332_v45  ;;  %v965_v44 = vld [vmem:[%s1618_s4] sm:$0xff] (!%p1220_p11) }
  0x4f   : > { %894 = vmatprep.subr.bf16.mxu0 %v1334_v46 }
  0x51   : > { %852 = vmatpush1.bf16.msra.mxu1 %v1336_v47 }
  0x52   : > { %895 = vmatpush1.bf16.msra.mxu0 %v1337_v48  ;;  %853 = vmatprep.subr.bf16.mxu1 %v1338_v49  ;;  %v966_v48 = vld [vmem:[%s1618_s4 + $0x8] sm:$0xff] (!%p1220_p11)  ;;  %v967_v49 = vld [vmem:[%s1618_s4 + $0x10] sm:$0xff] (!%p1220_p11) }
  0x53   : > { %896 = vmatprep.subr.bf16.mxu0 %v1340_v50  ;;  %v968_v50 = vld [vmem:[%s1618_s4 + $0x18] sm:$0xff] (!%p1220_p11) }
  0x55   : > { %854 = vmatpush1.bf16.msra.mxu1 %v1342_v51 }
  0x56   : > { %897 = vmatpush1.bf16.msra.mxu0 %v1343_v53  ;;  %855 = vmatprep.subr.bf16.mxu1 %v1344_v54 }
  0x57   : > { %898 = vmatprep.subr.bf16.mxu0 %v1346_v55 }
  0x59   : > { %856 = vmatpush1.bf16.msra.mxu1 %v1348_v57 }
  0x5a   : > { %899 = vmatpush1.bf16.msra.mxu0 %v1349_v58  ;;  %857 = vmatprep.subr.bf16.mxu1 %v1350_v59 }
  0x5b   : > { %900 = vmatprep.subr.bf16.mxu0 %v1352_v60 }
  0x5d   : > { %858 = vmatpush1.bf16.msra.mxu1 %v1354_v61 }
  0x5e   : > { %901 = vmatpush1.bf16.msra.mxu0 %v1355_v62  ;;  %859 = vmatprep.subr.bf16.mxu1 %v1356_v63 }
  0x5f   : > { %902 = vmatprep.subr.bf16.mxu0 %v1358_v0 }
  0x61   : > { %860 = vmatpush1.bf16.msra.mxu1 %v1360_v1 }
  0x62   : > { %903 = vmatpush1.bf16.msra.mxu0 %v1361_v2  ;;  %861 = vmatprep.subr.bf16.mxu1 %v1362_v3 }
  0x63   : > { %904 = vmatprep.subr.bf16.mxu0 %v1364_v4 }
  0x65   : > { %862 = vmatpush1.bf16.msra.mxu1 %v1366_v5 }
  0x66   : > { %905 = vmatpush1.bf16.msra.mxu0 %v1367_v6 }
  0x68   : > { %864 = vmatmul.mubr.bf16.vlgmr.msra.gmra.mrb[0].mxu1 %v1368_v7 }
  0x69   : > { %907 = vmatmul.mubr.bf16.vlgmr.msra.gmra.mrb[0].mxu0 %v1371_v8 }
 0x13b   : > { %v865_v9 = vpop.f32.mrb[0].mxu1 }
 0x13c   : > { %v908_v11 = vpop.f32.mrb[0].mxu0  ;;  %v867_v13 = vpop.f32.mrb[1].mxu1 }
 0x13d   : > { %v909_v12 = vadd.f32 %v908_v11, %v865_v9  ;;  %v910_v15 = vpop.f32.mrb[1].mxu0  ;;  %v869_v17 = vpop.f32.mrb[2].mxu1 }
 0x13e   : > { %v911_v16 = vadd.f32 %v910_v15, %v867_v13  ;;  %v912_v19 = vpop.f32.mrb[2].mxu0  ;;  %v871_v22 = vpop.f32.mrb[3].mxu1  ;;  %928 = sbr.rel (%p1220_p11) target bundleno = 341 (0x155), region = 71 }
 0x13f   : > { %v917_v20 = vadd.f32 %v909_v12, %v419_v10  ;;  %v913_v21 = vadd.f32 %v912_v19, %v869_v17  ;;  %v914_v24 = vpop.f32.mrb[3].mxu0 }
 0x140   : > { %v918_v25 = vadd.f32 %v911_v16, %v420_v14  ;;  %v915_v26 = vadd.f32 %v914_v24, %v871_v22 }
 0x141   : > { %921 = vst [vmem:[#allocation2] sm:$0xff] %v917_v20  ;;  %v919_v27 = vadd.f32 %v913_v21, %v421_v18 }
 0x142   : > { %922 = vst [vmem:[#allocation2 + $0x8] sm:$0xff] %v918_v25  ;;  %v920_v28 = vadd.f32 %v915_v26, %v422_v23 }
 0x143   : > { %923 = vst [vmem:[#allocation2 + $0x10] sm:$0xff] %v919_v27 }
 0x144   : > { %924 = vst [vmem:[#allocation2 + $0x18] sm:$0xff] %v920_v28 }
 0x148   : > { %v929_v33 = vld [vmem:[#allocation2] sm:$0xff] }
 0x149   : > { %v930_v36 = vld [vmem:[#allocation2 + $0x8] sm:$0xff]  ;;  %v945_v43 = vmul.f32 %v938_v39, %v929_v33 }
 0x14a   : > { %v931_v37 = vld [vmem:[#allocation2 + $0x10] sm:$0xff]  ;;  %v946_v45 = vmul.f32 %v942_v41, %v930_v36 }
 0x14b   : > { %v932_v38 = vld [vmem:[#allocation2 + $0x18] sm:$0xff]  ;;  %v947_v46 = vmul.f32 %v938_v39, %v931_v37  ;;  %v961_v51 = vadd.f32 %v954_v40, %v945_v43 }
 0x14c   : > { %v948_v47 = vmul.f32 %v942_v41, %v932_v38  ;;  %v962_v52 = vadd.f32 %v958_v42, %v946_v45 }
 0x14d   : > { %v963_v53 = vadd.f32 %v954_v40, %v947_v46  ;;  %v969_v55 = vadd.f32 %v965_v44, %v961_v51 }
 0x14e   : > { %v964_v54 = vadd.f32 %v958_v42, %v948_v47  ;;  %v970_v56 = vadd.f32 %v966_v48, %v962_v52 }
 0x14f   : > { %v971_v57 = vadd.f32 %v967_v49, %v963_v53  ;;  %v973_v59 = vmax.f32 %v969_v55, 0.0 }
 0x150   : > { %v972_v58 = vadd.f32 %v968_v50, %v964_v54  ;;  %v974_v60 = vmax.f32 %v970_v56, 0.0 }
 0x151   : > { %v975_v61 = vmax.f32 %v971_v57, 0.0  ;;  %977 = vst [vmem:[%s1619_s5] sm:$0xff] %v973_v59 }
 0x152   : > { %v976_v62 = vmax.f32 %v972_v58, 0.0  ;;  %978 = vst [vmem:[%s1619_s5 + $0x8] sm:$0xff] %v974_v60 }
 0x153   : > { %979 = vst [vmem:[%s1619_s5 + $0x10] sm:$0xff] %v975_v61 }
 0x154   : > { %980 = vst [vmem:[%s1619_s5 + $0x18] sm:$0xff] %v976_v62 }
 0x155 PF: > { %s15_s22 = sadd.s32 1, %s1412_s22   ;;  %s1620_s18 = smov %s1400_s19 }
 0x156   : > { %p12_p12 = scmp.ge.s32.totalorder %s15_s22, 7   ;;  %s1621_s19 = smov %s1480_s26 }
 0x157   : > { %s1622_s20 = smov %s1408_s21  ;;  %s1623_s21 = smov %s1625_s23 }
 0x158   :  { %14 = sbr.rel (!%p12_p12) target bundleno = 3 (0x3), region = 118 }

// kernel: resnet_up_forward.43
= control target key start
LH: loop header
LB: loop body
LE: loop exit
PB: predicated region body
PF: predicated region fallthrough
CT: control target
= control target key end

     0   :  { %s2114_s0 = inlined_call_operand.vmem [shape: bf16[16,2560], index: 0, kind: input, shape index: {}]   ;;  %s2115_s1 = inlined_call_operand.vmem [shape: bf16[2560,512], index: 1, kind: input, shape index: {}]   ;;  %s2116_s2 = inlined_call_operand.vmem [shape: f32[1,512], index: 2, kind: input, shape index: {}]   ;;  %s2117_s3 = inlined_call_operand.vmem [shape: f32[1,512], index: 3, kind: input, shape index: {}]   ;;  %s2118_s4 = inlined_call_operand.vmem [shape: f32[16,512], index: 4, kind: output, shape index: {}]  }
   0x1   :  { %2121 = sst [smem:[#allocation8_spill]] %s2114_s0 }
   0x2   :  { %2122 = sst [smem:[#allocation9_spill]] %s2115_s1 }
   0x3   :  { %s1719_s15 = smov 0   ;;  %s1721_s16 = smov 0  }
   0x4   :  { %s1723_s17 = smov 0   ;;  %s1725_s18 = smov 0  }
   0x5   :  { %s1727_s19 = smov 0   ;;  %s1729_s20 = smov 0  }
   0x6   :  { %s1731_s21 = smov 0   ;;  %s1733_s22 = smov 0  }
   0x7   :  { %s1735_s23 = smov 0   ;;  %s1737_s24 = smov 0  }
   0x8   :  { %s1739_s25 = smov 0  }
   0x9 LB: > { %s1314_s26 = sadd.s32 4294967295, %s1691_s25   ;;  %s26_s27 = sadd.s32 1, %s1683_s23  ;;  %s1691_s25 = sphi %s1739_s25, %s14_s25   ;;  %s1687_s24 = sphi %s1737_s24, %s2141_s24   ;;  %s1683_s23 = sphi %s1735_s23, %s2140_s23   ;;  %s1679_s22 = sphi %s1733_s22, %s2139_s22   ;;  %s1675_s21 = sphi %s1731_s21, %s2138_s21   ;;  %s1671_s20 = sphi %s1729_s20, %s2137_s20   ;;  %s1667_s19 = sphi %s1727_s19, %s2136_s19   ;;  %s1663_s18 = sphi %s1725_s18, %s2135_s18   ;;  %s1659_s17 = sphi %s1723_s17, %s2134_s17   ;;  %s1655_s16 = sphi %s1721_s16, %s2133_s16   ;;  %s1651_s15 = sphi %s1719_s15, %s2132_s15  }
   0xa   : > { %p27_p0 = scmp.ge.s32.totalorder %s26_s27, 5  ;;  %s29_s28 = sadd.s32 1, %s1687_s24 }
   0xb   : > { %s42_s29 = sadd.s32 1, %s1671_s20  ;;  %p49_p1 = scmp.ne.s32.totalorder %s1671_s20, %s1667_s19 }
   0xc   : > { %s2143_s27 = smov (%p27_p0, %s26_s27), 0  ;;  %s2145_s28 = smov (!%p27_p0, %s29_s28), %s1687_s24 }
   0xd   : > { %2123 = sst [smem:[#allocation6_spill]] %s2143_s27  ;;  %s38_s30 = ssub.s32 %s1683_s23, %s2143_s27 }
   0xe   : > { %p50_p2 = scmp.eq.s32.totalorder %s1691_s25, 0  ;;  %p31_p3 = scmp.ge.s32.totalorder %s2145_s28, 2 }
   0xf   : > { %p40_p4 = scmp.eq.s32.totalorder %s38_s30, 0  ;;  %s70_s6 = sadd.s32 1, %s1663_s18 }
  0x10   : > { %p1786_p5 = por %p50_p2, %p49_p1  ;;  %s2147_s28 = smov (%p31_p3, %s2145_s28), 0 }
  0x11   : > { %2125 = sst [smem:[#allocation7_spill]] %s2147_s28  ;;  %s66_s8 = ssub.s32 %s1687_s24, %s2147_s28 }
  0x12   : > { %s1794_s7 = scalar_select %p40_p4, %s1671_s20, %s42_s29  }
  0x13   : > { %p77_p6 = scmp.ne.s32.totalorder %s1663_s18, %s1659_s17  ;;  %s67_s9 = sor.u32 %s66_s8, %s38_s30 }
  0x14   : > { %p148_p7 = scmp.eq.s32.totalorder %s66_s8, 0  ;;  %p68_p8 = scmp.eq.s32.totalorder %s67_s9, 0 }
  0x15   : > { %p1800_p9 = por %p77_p6, %p50_p2  ;;  %s150_s11 = sadd.s32 1, %s1655_s16 }
  0x16   : > { %p160_p10 = scmp.ne.s32.totalorder %s1655_s16, %s1651_s15  ;;  %p161_p11 = scmp.eq.s32.totalorder %s1314_s26, 9 }
  0x17   : > { %s1808_s12 = scalar_select %p68_p8, %s1663_s18, %s70_s6  }
  0x18   : > { %s1811_s13 = scalar_select %p148_p7, %s1655_s16, %s150_s11  }
  0x19   : > { %p1813_p12 = por %p161_p11, %p160_p10  ;;  %p1317_p13 = scmp.ge.s32.totalorder %s1691_s25, 10 }
  0x1b   : > { %183 = sbr.rel (%p1317_p13) target bundleno = 88 (0x58), region = 16 }
  0x22   : > { %186 = sbr.rel (!%p1786_p5) target bundleno = 46 (0x2e), region = 20  ;;  %s188_s29 = sand.u32 (%p1786_p5), 1, %s1671_s20  }
  0x23   : > { %s1407_s30 = sshll.u32 (%p1786_p5), %s1683_s23, 4  ;;  %s1318_s8 = sshll.u32 (%p1786_p5), %s188_s29, 5 }
  0x24   : > { %s2128_s0 = sld [smem:[#allocation8_spill]] (%p1786_p5)  ;;  %s190_s26 = scalar_lea.vmem (%p1786_p5), [#allocation3], %s1318_s8 }
  0x2a   : > { %s196_s11 = scalar_lea.vmem %s2128_s0, %s1407_s30 }
  0x2b   : > { %v209_v0 = vld [vmem:[%s196_s11] sm:$0xff]  ;;  %v211_v1 = vld [vmem:[%s196_s11 + $0x8] sm:$0xff]  ;;  %v213_v2 = vld [vmem:[%s196_s11 + $0x50] sm:$0xff] }
  0x2c   : > { %210 = vst [vmem:[%s190_s26] sm:$0xff] %v209_v0  ;;  %212 = vst [vmem:[%s190_s26 + $0x8] sm:$0xff] %v211_v1  ;;  %v215_v3 = vld [vmem:[%s196_s11 + $0x58] sm:$0xff] }
  0x2d   : > { %214 = vst [vmem:[%s190_s26 + $0x10] sm:$0xff] %v213_v2  ;;  %216 = vst [vmem:[%s190_s26 + $0x18] sm:$0xff] %v215_v3 }
  0x2e PF: > { %222 = sbr.rel (!%p1800_p9) target bundleno = 88 (0x58), region = 43  ;;  %s224_s5 = sand.u32 (%p1800_p9), 1, %s1663_s18  }
  0x2f   : > { %s1323_s29 = sshll.u32 (%p1800_p9), %s1687_s24, 1  ;;  %s1321_s6 = sshll.u32 (%p1800_p9), %s224_s5, 9 }
  0x30   : > { %s1408_s30 = sshll.u32 (%p1800_p9), %s1683_s23, 8  ;;  %s2129_s1 = sld [smem:[#allocation9_spill]] (%p1800_p9) }
  0x31   : > { %s230_s9 = sadd.s32 (%p1800_p9), %s1408_s30, %s1323_s29  ;;  %s1838_s10 = scalar_lea.vmem (%p1800_p9), [#allocation4], %s1321_s6 }
  0x32   : > { %s1325_s0 = sshll.u32 (%p1800_p9), %s230_s9, 2 }
  0x36   : > { %s1833_s27 = scalar_lea.vmem %s2129_s1, %s1325_s0 }
  0x37   : > { %v386_v4 = vld [vmem:[%s1833_s27] sm:$0xff]  ;;  %v388_v5 = vld [vmem:[%s1833_s27 + $0x10] sm:$0xff] }
  0x38   : > { %v390_v6 = vld [vmem:[%s1833_s27 + $0x20] sm:$0xff]  ;;  %387 = vst [vmem:[%s1838_s10] sm:$0xff] %v386_v4  ;;  %389 = vst [vmem:[%s1838_s10 + $0x8] sm:$0xff] %v388_v5  ;;  %v392_v7 = vld [vmem:[%s1833_s27 + $0x30] sm:$0xff] }
  0x39   : > { %391 = vst [vmem:[%s1838_s10 + $0x10] sm:$0xff] %v390_v6  ;;  %v394_v8 = vld [vmem:[%s1833_s27 + $0x40] sm:$0xff]  ;;  %v396_v9 = vld [vmem:[%s1833_s27 + $0x50] sm:$0xff]  ;;  %393 = vst [vmem:[%s1838_s10 + $0x18] sm:$0xff] %v392_v7 }
  0x3a   : > { %395 = vst [vmem:[%s1838_s10 + $0x20] sm:$0xff] %v394_v8  ;;  %397 = vst [vmem:[%s1838_s10 + $0x28] sm:$0xff] %v396_v9  ;;  %v398_v10 = vld [vmem:[%s1833_s27 + $0x60] sm:$0xff]  ;;  %v400_v11 = vld [vmem:[%s1833_s27 + $0x70] sm:$0xff] }
  0x3b   : > { %v402_v12 = vld [vmem:[%s1833_s27 + $0x80] sm:$0xff]  ;;  %399 = vst [vmem:[%s1838_s10 + $0x30] sm:$0xff] %v398_v10  ;;  %401 = vst [vmem:[%s1838_s10 + $0x38] sm:$0xff] %v400_v11  ;;  %v404_v13 = vld [vmem:[%s1833_s27 + $0x90] sm:$0xff] }
  0x3c   : > { %403 = vst [vmem:[%s1838_s10 + $0x40] sm:$0xff] %v402_v12  ;;  %v406_v14 = vld [vmem:[%s1833_s27 + $0xa0] sm:$0xff]  ;;  %v408_v15 = vld [vmem:[%s1833_s27 + $0xb0] sm:$0xff]  ;;  %405 = vst [vmem:[%s1838_s10 + $0x48] sm:$0xff] %v404_v13 }
  0x3d   : > { %407 = vst [vmem:[%s1838_s10 + $0x50] sm:$0xff] %v406_v14  ;;  %409 = vst [vmem:[%s1838_s10 + $0x58] sm:$0xff] %v408_v15  ;;  %v410_v16 = vld [vmem:[%s1833_s27 + $0xc0] sm:$0xff]  ;;  %v412_v17 = vld [vmem:[%s1833_s27 + $0xd0] sm:$0xff] }
  0x3e   : > { %v414_v18 = vld [vmem:[%s1833_s27 + $0xe0] sm:$0xff]  ;;  %411 = vst [vmem:[%s1838_s10 + $0x60] sm:$0xff] %v410_v16  ;;  %413 = vst [vmem:[%s1838_s10 + $0x68] sm:$0xff] %v412_v17  ;;  %v416_v19 = vld [vmem:[%s1833_s27 + $0xf0] sm:$0xff] }
  0x3f   : > { %415 = vst [vmem:[%s1838_s10 + $0x70] sm:$0xff] %v414_v18  ;;  %v418_v20 = vld [vmem:[%s1833_s27 + $0x100] sm:$0xff]  ;;  %v420_v21 = vld [vmem:[%s1833_s27 + $0x110] sm:$0xff]  ;;  %417 = vst [vmem:[%s1838_s10 + $0x78] sm:$0xff] %v416_v19 }
  0x40   : > { %419 = vst [vmem:[%s1838_s10 + $0x80] sm:$0xff] %v418_v20  ;;  %421 = vst [vmem:[%s1838_s10 + $0x88] sm:$0xff] %v420_v21  ;;  %v422_v22 = vld [vmem:[%s1833_s27 + $0x120] sm:$0xff]  ;;  %v424_v23 = vld [vmem:[%s1833_s27 + $0x130] sm:$0xff] }
  0x41   : > { %v426_v24 = vld [vmem:[%s1833_s27 + $0x140] sm:$0xff]  ;;  %423 = vst [vmem:[%s1838_s10 + $0x90] sm:$0xff] %v422_v22  ;;  %425 = vst [vmem:[%s1838_s10 + $0x98] sm:$0xff] %v424_v23  ;;  %v428_v25 = vld [vmem:[%s1833_s27 + $0x150] sm:$0xff] }
  0x42   : > { %427 = vst [vmem:[%s1838_s10 + $0xa0] sm:$0xff] %v426_v24  ;;  %v430_v26 = vld [vmem:[%s1833_s27 + $0x160] sm:$0xff]  ;;  %v432_v27 = vld [vmem:[%s1833_s27 + $0x170] sm:$0xff]  ;;  %429 = vst [vmem:[%s1838_s10 + $0xa8] sm:$0xff] %v428_v25 }
  0x43   : > { %431 = vst [vmem:[%s1838_s10 + $0xb0] sm:$0xff] %v430_v26  ;;  %433 = vst [vmem:[%s1838_s10 + $0xb8] sm:$0xff] %v432_v27  ;;  %v434_v28 = vld [vmem:[%s1833_s27 + $0x180] sm:$0xff]  ;;  %v436_v29 = vld [vmem:[%s1833_s27 + $0x190] sm:$0xff] }
  0x44   : > { %v438_v30 = vld [vmem:[%s1833_s27 + $0x1a0] sm:$0xff]  ;;  %435 = vst [vmem:[%s1838_s10 + $0xc0] sm:$0xff] %v434_v28  ;;  %437 = vst [vmem:[%s1838_s10 + $0xc8] sm:$0xff] %v436_v29  ;;  %v440_v31 = vld [vmem:[%s1833_s27 + $0x1b0] sm:$0xff] }
  0x45   : > { %439 = vst [vmem:[%s1838_s10 + $0xd0] sm:$0xff] %v438_v30  ;;  %v442_v32 = vld [vmem:[%s1833_s27 + $0x1c0] sm:$0xff]  ;;  %v444_v33 = vld [vmem:[%s1833_s27 + $0x1d0] sm:$0xff]  ;;  %441 = vst [vmem:[%s1838_s10 + $0xd8] sm:$0xff] %v440_v31 }
  0x46   : > { %443 = vst [vmem:[%s1838_s10 + $0xe0] sm:$0xff] %v442_v32  ;;  %445 = vst [vmem:[%s1838_s10 + $0xe8] sm:$0xff] %v444_v33  ;;  %v446_v34 = vld [vmem:[%s1833_s27 + $0x1e0] sm:$0xff]  ;;  %v448_v35 = vld [vmem:[%s1833_s27 + $0x1f0] sm:$0xff] }
  0x47   : > { %v450_v36 = vld [vmem:[%s1833_s27 + $0x200] sm:$0xff]  ;;  %447 = vst [vmem:[%s1838_s10 + $0xf0] sm:$0xff] %v446_v34  ;;  %449 = vst [vmem:[%s1838_s10 + $0xf8] sm:$0xff] %v448_v35  ;;  %v452_v37 = vld [vmem:[%s1833_s27 + $0x210] sm:$0xff] }
  0x48   : > { %451 = vst [vmem:[%s1838_s10 + $0x100] sm:$0xff] %v450_v36  ;;  %v454_v38 = vld [vmem:[%s1833_s27 + $0x220] sm:$0xff]  ;;  %v456_v39 = vld [vmem:[%s1833_s27 + $0x230] sm:$0xff]  ;;  %453 = vst [vmem:[%s1838_s10 + $0x108] sm:$0xff] %v452_v37 }
  0x49   : > { %455 = vst [vmem:[%s1838_s10 + $0x110] sm:$0xff] %v454_v38  ;;  %457 = vst [vmem:[%s1838_s10 + $0x118] sm:$0xff] %v456_v39  ;;  %v458_v40 = vld [vmem:[%s1833_s27 + $0x240] sm:$0xff]  ;;  %v460_v41 = vld [vmem:[%s1833_s27 + $0x250] sm:$0xff] }
  0x4a   : > { %v462_v42 = vld [vmem:[%s1833_s27 + $0x260] sm:$0xff]  ;;  %459 = vst [vmem:[%s1838_s10 + $0x120] sm:$0xff] %v458_v40  ;;  %461 = vst [vmem:[%s1838_s10 + $0x128] sm:$0xff] %v460_v41  ;;  %v464_v43 = vld [vmem:[%s1833_s27 + $0x270] sm:$0xff] }
  0x4b   : > { %463 = vst [vmem:[%s1838_s10 + $0x130] sm:$0xff] %v462_v42  ;;  %v466_v44 = vld [vmem:[%s1833_s27 + $0x280] sm:$0xff]  ;;  %v468_v45 = vld [vmem:[%s1833_s27 + $0x290] sm:$0xff]  ;;  %465 = vst [vmem:[%s1838_s10 + $0x138] sm:$0xff] %v464_v43 }
  0x4c   : > { %467 = vst [vmem:[%s1838_s10 + $0x140] sm:$0xff] %v466_v44  ;;  %469 = vst [vmem:[%s1838_s10 + $0x148] sm:$0xff] %v468_v45  ;;  %v470_v46 = vld [vmem:[%s1833_s27 + $0x2a0] sm:$0xff]  ;;  %v472_v47 = vld [vmem:[%s1833_s27 + $0x2b0] sm:$0xff] }
  0x4d   : > { %v474_v48 = vld [vmem:[%s1833_s27 + $0x2c0] sm:$0xff]  ;;  %471 = vst [vmem:[%s1838_s10 + $0x150] sm:$0xff] %v470_v46  ;;  %473 = vst [vmem:[%s1838_s10 + $0x158] sm:$0xff] %v472_v47  ;;  %v476_v49 = vld [vmem:[%s1833_s27 + $0x2d0] sm:$0xff] }
  0x4e   : > { %475 = vst [vmem:[%s1838_s10 + $0x160] sm:$0xff] %v474_v48  ;;  %v478_v50 = vld [vmem:[%s1833_s27 + $0x2e0] sm:$0xff]  ;;  %v480_v51 = vld [vmem:[%s1833_s27 + $0x2f0] sm:$0xff]  ;;  %477 = vst [vmem:[%s1838_s10 + $0x168] sm:$0xff] %v476_v49 }
  0x4f   : > { %479 = vst [vmem:[%s1838_s10 + $0x170] sm:$0xff] %v478_v50  ;;  %481 = vst [vmem:[%s1838_s10 + $0x178] sm:$0xff] %v480_v51  ;;  %v482_v52 = vld [vmem:[%s1833_s27 + $0x300] sm:$0xff]  ;;  %v484_v53 = vld [vmem:[%s1833_s27 + $0x310] sm:$0xff] }
  0x50   : > { %v486_v54 = vld [vmem:[%s1833_s27 + $0x320] sm:$0xff]  ;;  %483 = vst [vmem:[%s1838_s10 + $0x180] sm:$0xff] %v482_v52  ;;  %485 = vst [vmem:[%s1838_s10 + $0x188] sm:$0xff] %v484_v53  ;;  %v488_v55 = vld [vmem:[%s1833_s27 + $0x330] sm:$0xff] }
  0x51   : > { %487 = vst [vmem:[%s1838_s10 + $0x190] sm:$0xff] %v486_v54  ;;  %v490_v56 = vld [vmem:[%s1833_s27 + $0x340] sm:$0xff]  ;;  %v492_v57 = vld [vmem:[%s1833_s27 + $0x350] sm:$0xff]  ;;  %489 = vst [vmem:[%s1838_s10 + $0x198] sm:$0xff] %v488_v55 }
  0x52   : > { %491 = vst [vmem:[%s1838_s10 + $0x1a0] sm:$0xff] %v490_v56  ;;  %493 = vst [vmem:[%s1838_s10 + $0x1a8] sm:$0xff] %v492_v57  ;;  %v494_v58 = vld [vmem:[%s1833_s27 + $0x360] sm:$0xff]  ;;  %v496_v59 = vld [vmem:[%s1833_s27 + $0x370] sm:$0xff] }
  0x53   : > { %v498_v60 = vld [vmem:[%s1833_s27 + $0x380] sm:$0xff]  ;;  %495 = vst [vmem:[%s1838_s10 + $0x1b0] sm:$0xff] %v494_v58  ;;  %497 = vst [vmem:[%s1838_s10 + $0x1b8] sm:$0xff] %v496_v59  ;;  %v500_v61 = vld [vmem:[%s1833_s27 + $0x390] sm:$0xff] }
  0x54   : > { %499 = vst [vmem:[%s1838_s10 + $0x1c0] sm:$0xff] %v498_v60  ;;  %v502_v62 = vld [vmem:[%s1833_s27 + $0x3a0] sm:$0xff]  ;;  %v504_v63 = vld [vmem:[%s1833_s27 + $0x3b0] sm:$0xff]  ;;  %501 = vst [vmem:[%s1838_s10 + $0x1c8] sm:$0xff] %v500_v61 }
  0x55   : > { %503 = vst [vmem:[%s1838_s10 + $0x1d0] sm:$0xff] %v502_v62  ;;  %505 = vst [vmem:[%s1838_s10 + $0x1d8] sm:$0xff] %v504_v63  ;;  %v506_v0 = vld [vmem:[%s1833_s27 + $0x3c0] sm:$0xff]  ;;  %v508_v1 = vld [vmem:[%s1833_s27 + $0x3d0] sm:$0xff] }
  0x56   : > { %v510_v2 = vld [vmem:[%s1833_s27 + $0x3e0] sm:$0xff]  ;;  %507 = vst [vmem:[%s1838_s10 + $0x1e0] sm:$0xff] %v506_v0  ;;  %509 = vst [vmem:[%s1838_s10 + $0x1e8] sm:$0xff] %v508_v1  ;;  %v512_v3 = vld [vmem:[%s1833_s27 + $0x3f0] sm:$0xff] }
  0x57   : > { %511 = vst [vmem:[%s1838_s10 + $0x1f0] sm:$0xff] %v510_v2  ;;  %513 = vst [vmem:[%s1838_s10 + $0x1f8] sm:$0xff] %v512_v3 }
  0x58 PF: > { %p1326_p0 = scmp.ge.s32.totalorder %s1691_s25, 1  ;;  %p534_p1 = scmp.lt.s32.totalorder %s1691_s25, 11 }
  0x5a   : > { %p535_p2 = pnand %p1326_p0, %p534_p1 }
  0x5b   : > { %s541_s0 = sand.u32 (!%p535_p2), 1, %s1667_s19   ;;  %s548_s28 = sand.u32 (!%p535_p2), 1, %s1659_s17  }
  0x5c   : > { %538 = sbr.rel (%p535_p2) target bundleno = 414 (0x19e), region = 89  ;;  %s1327_s11 = sshll.u32 (!%p535_p2), %s541_s0, 5 }
  0x5d   : > { %s1328_s26 = sshll.u32 (!%p535_p2), %s548_s28, 9  ;;  %s581_s5 = sand.u32 (!%p535_p2), 1, %s1651_s15  }
  0x5e   : > { %s1330_s29 = sshll.u32 (!%p535_p2), %s1679_s22, 1  ;;  %s1329_s27 = sshll.u32 (!%p535_p2), %s581_s5, 5 }
  0x5f   : > { %p589_p3 = scmp.lt.s32.totalorder (!%p535_p2), %s1330_s29, 3  ;;  %s1981_s19 = scalar_lea.vmem (!%p535_p2), [#allocation3], %s1327_s11 }
  0x60   : > { %s1983_s17 = scalar_lea.vmem (!%p535_p2), [#allocation4], %s1328_s26  ;;  %s1985_s15 = scalar_lea.vmem (!%p535_p2), [#allocation5], %s1329_s27 }
  0x61   : > { %p1332_p4 = scmp.ne.s32.totalorder (!%p535_p2), %s1675_s21, 0 }
  0x63   : > { %s2149_s29 = smov (!%p589_p3, %s1330_s29), 3  ;;  %603 = sbr.rel (%p1332_p4) target bundleno = 106 (0x6a), region = 101 }
  0x64   : > { %s591_s9 = scalar_lea.vmem %s2116_s2, %s2149_s29  ;;  %s596_s1 = scalar_lea.vmem %s2117_s3, %s2149_s29  ;;  %v1693_v4 = vmov (!%p1332_p4), 0.0  }
  0x65   : > { %604 = vst [vmem:[#allocation2] sm:$0xff] (!%p1332_p4), %v1693_v4  ;;  %605 = vst [vmem:[#allocation2 + $0x8] sm:$0xff] (!%p1332_p4), %v1693_v4 }
  0x66   : > { %606 = vst [vmem:[#allocation2 + $0x10] sm:$0xff] (!%p1332_p4), %v1693_v4  ;;  %607 = vst [vmem:[#allocation2 + $0x18] sm:$0xff] (!%p1332_p4), %v1693_v4 }
  0x6a PF: > { %v1503_v5 = vld [vmem:[%s1983_s17 + $0x4] ss:$8 sps:$4 sm:$0xff]   ;;  %v1507_v7 = vld [vmem:[%s1983_s17] ss:$8 sps:$4 sm:$0xff]   ;;  %v1509_v9 = vld [vmem:[%s1983_s17 + $0x14] ss:$8 sps:$4 sm:$0xff]  }
  0x6b   : > { %v1505_v6 = vld [vmem:[%s1983_s17 + $0x104] ss:$8 sps:$4 sm:$0xff]   ;;  %1020 = vmatprep.subr.bf16.mxu1 %v1503_v5  ;;  %v1508_v8 = vld [vmem:[%s1983_s17 + $0x100] ss:$8 sps:$4 sm:$0xff]   ;;  %v1511_v10 = vld [vmem:[%s1983_s17 + $0x114] ss:$8 sps:$4 sm:$0xff]  }
  0x6c   : > { %1063 = vmatprep.subr.bf16.mxu0 %v1505_v6  ;;  %1021 = vmatpush1.bf16.msra.mxu1 %v1507_v7  ;;  %v1513_v11 = vld [vmem:[%s1983_s17 + $0x10] ss:$8 sps:$4 sm:$0xff]   ;;  %v1515_v13 = vld [vmem:[%s1983_s17 + $0x24] ss:$8 sps:$4 sm:$0xff]   ;;  %v1519_v15 = vld [vmem:[%s1983_s17 + $0x20] ss:$8 sps:$4 sm:$0xff]  }
  0x6d   : > { %1064 = vmatpush1.bf16.msra.mxu0 %v1508_v8  ;;  %1022 = vmatprep.subr.bf16.mxu1 %v1509_v9  ;;  %v1514_v12 = vld [vmem:[%s1983_s17 + $0x110] ss:$8 sps:$4 sm:$0xff]   ;;  %v1517_v14 = vld [vmem:[%s1983_s17 + $0x124] ss:$8 sps:$4 sm:$0xff]   ;;  %v1520_v16 = vld [vmem:[%s1983_s17 + $0x120] ss:$8 sps:$4 sm:$0xff]  }
  0x6e   : > { %1065 = vmatprep.subr.bf16.mxu0 %v1511_v10  ;;  %v1521_v17 = vld [vmem:[%s1983_s17 + $0x34] ss:$8 sps:$4 sm:$0xff]   ;;  %v1525_v19 = vld [vmem:[%s1983_s17 + $0x30] ss:$8 sps:$4 sm:$0xff]   ;;  %v1527_v21 = vld [vmem:[%s1983_s17 + $0x44] ss:$8 sps:$4 sm:$0xff]  }
  0x6f   : > { %v1523_v18 = vld [vmem:[%s1983_s17 + $0x134] ss:$8 sps:$4 sm:$0xff]   ;;  %v1526_v20 = vld [vmem:[%s1983_s17 + $0x130] ss:$8 sps:$4 sm:$0xff]   ;;  %v1529_v22 = vld [vmem:[%s1983_s17 + $0x144] ss:$8 sps:$4 sm:$0xff]  }
  0x70   : > { %1023 = vmatpush1.bf16.msra.mxu1 %v1513_v11  ;;  %v1531_v23 = vld [vmem:[%s1983_s17 + $0x40] ss:$8 sps:$4 sm:$0xff]   ;;  %v1533_v25 = vld [vmem:[%s1983_s17 + $0x54] ss:$8 sps:$4 sm:$0xff]   ;;  %v1537_v27 = vld [vmem:[%s1983_s17 + $0x50] ss:$8 sps:$4 sm:$0xff]  }
  0x71   : > { %1066 = vmatpush1.bf16.msra.mxu0 %v1514_v12  ;;  %1024 = vmatprep.subr.bf16.mxu1 %v1515_v13  ;;  %v1532_v24 = vld [vmem:[%s1983_s17 + $0x140] ss:$8 sps:$4 sm:$0xff]   ;;  %v1535_v26 = vld [vmem:[%s1983_s17 + $0x154] ss:$8 sps:$4 sm:$0xff]   ;;  %v1538_v28 = vld [vmem:[%s1983_s17 + $0x150] ss:$8 sps:$4 sm:$0xff]  }
  0x72   : > { %1067 = vmatprep.subr.bf16.mxu0 %v1517_v14  ;;  %v1539_v29 = vld [vmem:[%s1983_s17 + $0x64] ss:$8 sps:$4 sm:$0xff]   ;;  %v1543_v31 = vld [vmem:[%s1983_s17 + $0x60] ss:$8 sps:$4 sm:$0xff]   ;;  %v1545_v33 = vld [vmem:[%s1983_s17 + $0x74] ss:$8 sps:$4 sm:$0xff]  }
  0x73   : > { %v1541_v30 = vld [vmem:[%s1983_s17 + $0x164] ss:$8 sps:$4 sm:$0xff]   ;;  %v1544_v32 = vld [vmem:[%s1983_s17 + $0x160] ss:$8 sps:$4 sm:$0xff]   ;;  %v1547_v34 = vld [vmem:[%s1983_s17 + $0x174] ss:$8 sps:$4 sm:$0xff]  }
  0x74   : > { %1025 = vmatpush1.bf16.msra.mxu1 %v1519_v15  ;;  %v1549_v35 = vld [vmem:[%s1983_s17 + $0x70] ss:$8 sps:$4 sm:$0xff]   ;;  %v1551_v37 = vld [vmem:[%s1983_s17 + $0x84] ss:$8 sps:$4 sm:$0xff]   ;;  %v1555_v39 = vld [vmem:[%s1983_s17 + $0x80] ss:$8 sps:$4 sm:$0xff]  }
  0x75   : > { %1068 = vmatpush1.bf16.msra.mxu0 %v1520_v16  ;;  %1026 = vmatprep.subr.bf16.mxu1 %v1521_v17  ;;  %v1550_v36 = vld [vmem:[%s1983_s17 + $0x170] ss:$8 sps:$4 sm:$0xff]   ;;  %v1553_v38 = vld [vmem:[%s1983_s17 + $0x184] ss:$8 sps:$4 sm:$0xff]   ;;  %v1556_v40 = vld [vmem:[%s1983_s17 + $0x180] ss:$8 sps:$4 sm:$0xff]  }
  0x76   : > { %1069 = vmatprep.subr.bf16.mxu0 %v1523_v18  ;;  %v1557_v41 = vld [vmem:[%s1983_s17 + $0x94] ss:$8 sps:$4 sm:$0xff]   ;;  %v1561_v43 = vld [vmem:[%s1983_s17 + $0x90] ss:$8 sps:$4 sm:$0xff]   ;;  %v1563_v45 = vld [vmem:[%s1983_s17 + $0xa4] ss:$8 sps:$4 sm:$0xff]  }
  0x77   : > { %v1559_v42 = vld [vmem:[%s1983_s17 + $0x194] ss:$8 sps:$4 sm:$0xff]   ;;  %v1562_v44 = vld [vmem:[%s1983_s17 + $0x190] ss:$8 sps:$4 sm:$0xff]   ;;  %v1565_v46 = vld [vmem:[%s1983_s17 + $0x1a4] ss:$8 sps:$4 sm:$0xff]  }
  0x78   : > { %1027 = vmatpush1.bf16.msra.mxu1 %v1525_v19  ;;  %v1567_v47 = vld [vmem:[%s1983_s17 + $0xa0] ss:$8 sps:$4 sm:$0xff]   ;;  %v1569_v49 = vld [vmem:[%s1983_s17 + $0xb4] ss:$8 sps:$4 sm:$0xff]   ;;  %v1573_v51 = vld [vmem:[%s1983_s17 + $0xb0] ss:$8 sps:$4 sm:$0xff]  }
  0x79   : > { %1070 = vmatpush1.bf16.msra.mxu0 %v1526_v20  ;;  %1028 = vmatprep.subr.bf16.mxu1 %v1527_v21  ;;  %v1568_v48 = vld [vmem:[%s1983_s17 + $0x1a0] ss:$8 sps:$4 sm:$0xff]   ;;  %v1571_v50 = vld [vmem:[%s1983_s17 + $0x1b4] ss:$8 sps:$4 sm:$0xff]   ;;  %v1574_v53 = vld [vmem:[%s1983_s17 + $0x1b0] ss:$8 sps:$4 sm:$0xff]  }
  0x7a   : > { %1071 = vmatprep.subr.bf16.mxu0 %v1529_v22  ;;  %v1601_v52 = vld [vmem:[%s1981_s19 + $0x4] ss:$16 sps:$4 sm:$0xff]   ;;  %v1604_v56 = vld [vmem:[%s1981_s19 + $0xc] ss:$16 sps:$4 sm:$0xff]   ;;  %v1579_v57 = vld [vmem:[%s1983_s17 + $0xc0] ss:$8 sps:$4 sm:$0xff]  }
  0x7b   : > { %v1575_v54 = vld [vmem:[%s1983_s17 + $0xc4] ss:$8 sps:$4 sm:$0xff]   ;;  %1052 = vmatprep.mubr.bf16.mxu1 %v1601_v52  ;;  %1095 = vmatprep.mubr.bf16.mxu0 %v1604_v56  ;;  %v1580_v58 = vld [vmem:[%s1983_s17 + $0x1c0] ss:$8 sps:$4 sm:$0xff]   ;;  %v1581_v59 = vld [vmem:[%s1983_s17 + $0xd4] ss:$8 sps:$4 sm:$0xff]  }
  0x7c   : > { %1029 = vmatpush1.bf16.msra.mxu1 %v1531_v23  ;;  %v1577_v55 = vld [vmem:[%s1983_s17 + $0x1c4] ss:$8 sps:$4 sm:$0xff]   ;;  %v1583_v60 = vld [vmem:[%s1983_s17 + $0x1d4] ss:$8 sps:$4 sm:$0xff]   ;;  %v1585_v61 = vld [vmem:[%s1983_s17 + $0xd0] ss:$8 sps:$4 sm:$0xff]  }
  0x7d   : > { %1072 = vmatpush1.bf16.msra.mxu0 %v1532_v24  ;;  %1030 = vmatprep.subr.bf16.mxu1 %v1533_v25  ;;  %v1586_v62 = vld [vmem:[%s1983_s17 + $0x1d0] ss:$8 sps:$4 sm:$0xff]   ;;  %v1587_v63 = vld [vmem:[%s1983_s17 + $0xe4] ss:$8 sps:$4 sm:$0xff]   ;;  %v1591_v1 = vld [vmem:[%s1983_s17 + $0xe0] ss:$8 sps:$4 sm:$0xff]  }
  0x7e   : > { %1073 = vmatprep.subr.bf16.mxu0 %v1535_v26  ;;  %v1589_v0 = vld [vmem:[%s1983_s17 + $0x1e4] ss:$8 sps:$4 sm:$0xff]   ;;  %v1592_v2 = vld [vmem:[%s1983_s17 + $0x1e0] ss:$8 sps:$4 sm:$0xff]   ;;  %v1593_v3 = vld [vmem:[%s1983_s17 + $0xf4] ss:$8 sps:$4 sm:$0xff]  }
  0x7f   : > { %v1595_v4 = vld [vmem:[%s1983_s17 + $0x1f4] ss:$8 sps:$4 sm:$0xff]   ;;  %v1597_v5 = vld [vmem:[%s1983_s17 + $0xf0] ss:$8 sps:$4 sm:$0xff]   ;;  %v608_v10 = vld [vmem:[#allocation2] sm:$0xff]  ;;  %p1401_p5 = scmp.ne.s32.totalorder %s1675_s21, 4 }
  0x80   : > { %1031 = vmatpush1.bf16.msra.mxu1 %v1537_v27  ;;  %v1598_v6 = vld [vmem:[%s1983_s17 + $0x1f0] ss:$8 sps:$4 sm:$0xff]   ;;  %v609_v14 = vld [vmem:[#allocation2 + $0x8] sm:$0xff] }
  0x81   : > { %1074 = vmatpush1.bf16.msra.mxu0 %v1538_v28  ;;  %1032 = vmatprep.subr.bf16.mxu1 %v1539_v29  ;;  %v1599_v7 = vld [vmem:[%s1981_s19] ss:$16 sps:$4 sm:$0xff]   ;;  %v1602_v8 = vld [vmem:[%s1981_s19 + $0x8] ss:$16 sps:$4 sm:$0xff]   ;;  %v1124_v29 = vlaneseq (!%p1401_p5) }
  0x82   : > { %1075 = vmatprep.subr.bf16.mxu0 %v1541_v30  ;;  %v610_v18 = vld [vmem:[#allocation2 + $0x10] sm:$0xff]  ;;  %v611_v23 = vld [vmem:[#allocation2 + $0x18] sm:$0xff] }
  0x83   : > { %v1125_v30 = vshrl.u32 (!%p1401_p5), %v1124_v29, 7 }
  0x84   : > { %1033 = vmatpush1.bf16.msra.mxu1 %v1543_v31  ;;  %v1122_v31 = vld [vmem:[%s591_s9] sm:$0x3] (!%p1401_p5) }
  0x85   : > { %1076 = vmatpush1.bf16.msra.mxu0 %v1544_v32  ;;  %1034 = vmatprep.subr.bf16.mxu1 %v1545_v33  ;;  %v1138_v32 = vld [vmem:[%s596_s1] sm:$0x3] (!%p1401_p5) }
  0x86   : > { %1077 = vmatprep.subr.bf16.mxu0 %v1547_v34  ;;  %v1126_v34 = vsub.s32 (!%p1401_p5), 0, %v1125_v30 }
  0x88   : > { %1035 = vmatpush1.bf16.msra.mxu1 %v1549_v35  ;;  %v1130_v35 = vsub.s32 (!%p1401_p5), 1, %v1125_v30 }
  0x89   : > { %1078 = vmatpush1.bf16.msra.mxu0 %v1550_v36  ;;  %1036 = vmatprep.subr.bf16.mxu1 %v1551_v37 }
  0x8a   : > { %1079 = vmatprep.subr.bf16.mxu0 %v1553_v38 }
  0x8c   : > { %1037 = vmatpush1.bf16.msra.mxu1 %v1555_v39  ;;  %v1127_v39 = vrot.slane (!%p1401_p5), %v1122_v31, %v1126_v34 }
  0x8d   : > { %1080 = vmatpush1.bf16.msra.mxu0 %v1556_v40  ;;  %1038 = vmatprep.subr.bf16.mxu1 %v1557_v41  ;;  %v1143_v40 = vrot.slane (!%p1401_p5), %v1138_v32, %v1126_v34  ;;  %v1131_v41 = vrot.slane (!%p1401_p5), %v1122_v31, %v1130_v35 }
  0x8e   : > { %1081 = vmatprep.subr.bf16.mxu0 %v1559_v42  ;;  %v1147_v42 = vrot.slane (!%p1401_p5), %v1138_v32, %v1130_v35 }
  0x90   : > { %1039 = vmatpush1.bf16.msra.mxu1 %v1561_v43 }
  0x91   : > { %1082 = vmatpush1.bf16.msra.mxu0 %v1562_v44  ;;  %1040 = vmatprep.subr.bf16.mxu1 %v1563_v45 }
  0x92   : > { %1083 = vmatprep.subr.bf16.mxu0 %v1565_v46 }
  0x94   : > { %1041 = vmatpush1.bf16.msra.mxu1 %v1567_v47 }
  0x95   : > { %1084 = vmatpush1.bf16.msra.mxu0 %v1568_v48  ;;  %1042 = vmatprep.subr.bf16.mxu1 %v1569_v49 }
  0x96   : > { %1085 = vmatprep.subr.bf16.mxu0 %v1571_v50 }
  0x98   : > { %1043 = vmatpush1.bf16.msra.mxu1 %v1573_v51 }
  0x99   : > { %1086 = vmatpush1.bf16.msra.mxu0 %v1574_v53  ;;  %1044 = vmatprep.subr.bf16.mxu1 %v1575_v54 }
  0x9a   : > { %1087 = vmatprep.subr.bf16.mxu0 %v1577_v55 }
  0x9c   : > { %1045 = vmatpush1.bf16.msra.mxu1 %v1579_v57 }
  0x9d   : > { %1088 = vmatpush1.bf16.msra.mxu0 %v1580_v58  ;;  %1046 = vmatprep.subr.bf16.mxu1 %v1581_v59 }
  0x9e   : > { %1089 = vmatprep.subr.bf16.mxu0 %v1583_v60 }
  0xa0   : > { %1047 = vmatpush1.bf16.msra.mxu1 %v1585_v61 }
  0xa1   : > { %1090 = vmatpush1.bf16.msra.mxu0 %v1586_v62  ;;  %1048 = vmatprep.subr.bf16.mxu1 %v1587_v63 }
  0xa2   : > { %1091 = vmatprep.subr.bf16.mxu0 %v1589_v0 }
  0xa4   : > { %1049 = vmatpush1.bf16.msra.mxu1 %v1591_v1 }
  0xa5   : > { %1092 = vmatpush1.bf16.msra.mxu0 %v1592_v2  ;;  %1050 = vmatprep.subr.bf16.mxu1 %v1593_v3 }
  0xa6   : > { %1093 = vmatprep.subr.bf16.mxu0 %v1595_v4 }
  0xa8   : > { %1051 = vmatpush1.bf16.msra.mxu1 %v1597_v5 }
  0xa9   : > { %1094 = vmatpush1.bf16.msra.mxu0 %v1598_v6 }
  0xab   : > { %1053 = vmatmul.mubr.bf16.vlgmr.msra.gmra.mrb[0].mxu1 %v1599_v7 }
  0xac   : > { %1096 = vmatmul.mubr.bf16.vlgmr.msra.gmra.mrb[0].mxu0 %v1602_v8 }
 0x17e   : > { %v1054_v9 = vpop.f32.mrb[0].mxu1 }
 0x17f   : > { %v1097_v11 = vpop.f32.mrb[0].mxu0  ;;  %v1056_v13 = vpop.f32.mrb[1].mxu1 }
 0x180   : > { %v1098_v12 = vadd.f32 %v1097_v11, %v1054_v9  ;;  %v1099_v15 = vpop.f32.mrb[1].mxu0  ;;  %v1058_v17 = vpop.f32.mrb[2].mxu1 }
 0x181   : > { %v1100_v16 = vadd.f32 %v1099_v15, %v1056_v13  ;;  %v1101_v19 = vpop.f32.mrb[2].mxu0  ;;  %v1060_v22 = vpop.f32.mrb[3].mxu1  ;;  %1117 = sbr.rel (%p1401_p5) target bundleno = 406 (0x196), region = 105 }
 0x182   : > { %v1106_v20 = vadd.f32 %v1098_v12, %v608_v10  ;;  %v1102_v21 = vadd.f32 %v1101_v19, %v1058_v17  ;;  %v1103_v24 = vpop.f32.mrb[3].mxu0 }
 0x183   : > { %v1107_v25 = vadd.f32 %v1100_v16, %v609_v14  ;;  %v1104_v26 = vadd.f32 %v1103_v24, %v1060_v22 }
 0x184   : > { %1110 = vst [vmem:[#allocation2] sm:$0xff] %v1106_v20  ;;  %v1108_v27 = vadd.f32 %v1102_v21, %v610_v18 }
 0x185   : > { %1111 = vst [vmem:[#allocation2 + $0x8] sm:$0xff] %v1107_v25  ;;  %v1109_v28 = vadd.f32 %v1104_v26, %v611_v23 }
 0x186   : > { %1112 = vst [vmem:[#allocation2 + $0x10] sm:$0xff] %v1108_v27 }
 0x187   : > { %1113 = vst [vmem:[#allocation2 + $0x18] sm:$0xff] %v1109_v28 }
 0x18b   : > { %v1118_v33 = vld [vmem:[#allocation2] sm:$0xff] }
 0x18c   : > { %v1119_v36 = vld [vmem:[#allocation2 + $0x8] sm:$0xff]  ;;  %v1134_v43 = vmul.f32 %v1127_v39, %v1118_v33 }
 0x18d   : > { %v1120_v37 = vld [vmem:[#allocation2 + $0x10] sm:$0xff]  ;;  %v1135_v44 = vmul.f32 %v1131_v41, %v1119_v36 }
 0x18e   : > { %v1121_v38 = vld [vmem:[#allocation2 + $0x18] sm:$0xff]  ;;  %v1136_v45 = vmul.f32 %v1127_v39, %v1120_v37  ;;  %v1150_v47 = vadd.f32 %v1143_v40, %v1134_v43 }
 0x18f   : > { %v1137_v46 = vmul.f32 %v1131_v41, %v1121_v38  ;;  %v1151_v48 = vadd.f32 %v1147_v42, %v1135_v44 }
 0x190   : > { %v1152_v49 = vadd.f32 %v1143_v40, %v1136_v45  ;;  %v1154_v51 = vmax.f32 %v1150_v47, 0.0 }
 0x191   : > { %v1153_v50 = vadd.f32 %v1147_v42, %v1137_v46  ;;  %v1155_v52 = vmax.f32 %v1151_v48, 0.0 }
 0x192   : > { %v1156_v53 = vmax.f32 %v1152_v49, 0.0  ;;  %1158 = vst [vmem:[%s1985_s15] sm:$0xff] %v1154_v51 }
 0x193   : > { %v1157_v54 = vmax.f32 %v1153_v50, 0.0  ;;  %1159 = vst [vmem:[%s1985_s15 + $0x8] sm:$0xff] %v1155_v52 }
 0x194   : > { %1160 = vst [vmem:[%s1985_s15 + $0x10] sm:$0xff] %v1156_v53 }
 0x195   : > { %1161 = vst [vmem:[%s1985_s15 + $0x18] sm:$0xff] %v1157_v54 }
 0x196 PF: > { %1168 = sbr.rel (!%p1813_p12) target bundleno = 414 (0x19e), region = 109  ;;  %s1409_s1 = sshll.u32 (%p1813_p12), %s1679_s22, 4 }
 0x197   : > { %s1174_s29 = scalar_lea.vmem (%p1813_p12), %s2118_s4, %s1409_s1 }
 0x199   : > { %v1187_v55 = vld [vmem:[%s1985_s15] sm:$0xff] (%p1813_p12) }
 0x19a   : > { %v1189_v56 = vld [vmem:[%s1985_s15 + $0x8] sm:$0xff] (%p1813_p12)  ;;  %1188 = vst [vmem:[%s1174_s29] sm:$0xff] (%p1813_p12), %v1187_v55 }
 0x19b   : > { %v1191_v57 = vld [vmem:[%s1985_s15 + $0x10] sm:$0xff] (%p1813_p12)  ;;  %1190 = vst [vmem:[%s1174_s29 + $0x8] sm:$0xff] (%p1813_p12), %v1189_v56 }
 0x19c   : > { %v1193_v58 = vld [vmem:[%s1985_s15 + $0x18] sm:$0xff] (%p1813_p12)  ;;  %1192 = vst [vmem:[%s1174_s29 + $0x20] sm:$0xff] (%p1813_p12), %v1191_v57 }
 0x19d   : > { %1194 = vst [vmem:[%s1174_s29 + $0x28] sm:$0xff] %v1193_v58 }
 0x19e PF: > { %s14_s25 = sadd.s32 1, %s1691_s25   ;;  %s2130_s14 = sld [smem:[#allocation6_spill]] }
 0x19f   : > { %p11_p6 = scmp.ge.s32.totalorder %s14_s25, 12   ;;  %s2131_s27 = sld [smem:[#allocation7_spill]] }
 0x1a0   : > { %s2132_s15 = smov %s1655_s16  ;;  %s2133_s16 = smov %s1811_s13 }
 0x1a1   : > { %s2134_s17 = smov %s1663_s18  ;;  %s2135_s18 = smov %s1808_s12 }
 0x1a2   : > { %s2136_s19 = smov %s1671_s20  ;;  %s2137_s20 = smov %s1794_s7 }
 0x1a3   : > { %s2138_s21 = smov %s1683_s23  ;;  %s2139_s22 = smov %s1687_s24 }
 0x1a4   : > { %s2140_s23 = smov %s2130_s14  ;;  %13 = sbr.rel (!%p11_p6) target bundleno = 9 (0x9), region = 177 }
 0x1a5   : > { %s2141_s24 = smov %s2131_s27 }

// kernel: resnet_up_forward.42
= control target key start
LH: loop header
LB: loop body
LE: loop exit
PB: predicated region body
PF: predicated region fallthrough
CT: control target
= control target key end

     0   :  { %s1129_s15 = smov 0   ;;  %s1131_s16 = smov 0   ;;  %s1320_s0 = inlined_call_operand.vmem [shape: bf16[16,256], index: 0, kind: input, shape index: {}]   ;;  %s1321_s1 = inlined_call_operand.vmem [shape: bf16[256,512], index: 1, kind: input, shape index: {}]   ;;  %s1322_s2 = inlined_call_operand.vmem [shape: f32[1,512], index: 2, kind: input, shape index: {}]   ;;  %s1323_s3 = inlined_call_operand.vmem [shape: f32[1,512], index: 3, kind: input, shape index: {}]   ;;  %s1324_s4 = inlined_call_operand.vmem [shape: f32[16,512], index: 4, kind: output, shape index: {}]  }
   0x1   :  { %s1133_s17 = smov 0   ;;  %s1135_s18 = smov 0  }
   0x2   :  { %s1137_s19 = smov 0  }
   0x3 LB: > { %s29_s20 = sadd.s32 1, %s1098_s18  ;;  %s919_s21 = sadd.s32 4294967295, %s1102_s19   ;;  %s1102_s19 = sphi %s1137_s19, %s14_s19   ;;  %s1098_s18 = sphi %s1135_s18, %s1329_s18   ;;  %s1094_s17 = sphi %s1133_s17, %s1328_s17   ;;  %s1090_s16 = sphi %s1131_s16, %s1327_s16   ;;  %s1086_s15 = sphi %s1129_s15, %s1326_s15  }
   0x4   : > { %p31_p0 = scmp.ge.s32.totalorder %s29_s20, 2  ;;  %p77_p1 = scmp.ne.s32.totalorder %s1090_s16, %s1086_s15 }
   0x5   : > { %p78_p2 = scmp.eq.s32.totalorder %s1102_s19, 0  ;;  %p161_p4 = scmp.eq.s32.totalorder %s919_s21, 1 }
   0x6   : > { %s1331_s20 = smov (%p31_p0, %s29_s20), 0  ;;  %s70_s23 = sadd.s32 1, %s1090_s16 }
   0x7   : > { %p79_p3 = por %p78_p2, %p77_p1  ;;  %s66_s22 = ssub.s32 %s1098_s18, %s1331_s20 }
   0x8   : > { %p68_p5 = scmp.eq.s32.totalorder %s66_s22, 0  ;;  %p1164_p6 = por %p161_p4, %p77_p1 }
   0x9   : > { %p923_p7 = scmp.ge.s32.totalorder %s1102_s19, 2 }
   0xa   : > { %s1169_s25 = scalar_select %p68_p5, %s1090_s16, %s70_s23  }
   0xb   : > { %198 = sbr.rel (%p923_p7) target bundleno = 38 (0x26), region = 20 }
  0x12   : > { %201 = sbr.rel (!%p79_p3) target bundleno = 38 (0x26), region = 24  ;;  %s203_s26 = sand.u32 (%p79_p3), 1, %s1090_s16  }
  0x13   : > { %s971_s27 = sshll.u32 (%p79_p3), %s1098_s18, 3  ;;  %s924_s28 = sshll.u32 (%p79_p3), %s203_s26, 8 }
  0x14   : > { %s1177_s5 = scalar_lea.vmem (%p79_p3), %s1321_s1, %s971_s27  ;;  %s1182_s6 = scalar_lea.vmem (%p79_p3), [#allocation3], %s924_s28 }
  0x15   : > { %v301_v0 = vld [vmem:[%s1177_s5] sm:$0xff] (%p79_p3)  ;;  %v303_v1 = vld [vmem:[%s1177_s5 + $0x10] sm:$0xff] (%p79_p3) }
  0x16   : > { %v305_v2 = vld [vmem:[%s1177_s5 + $0x20] sm:$0xff] (%p79_p3)  ;;  %302 = vst [vmem:[%s1182_s6] sm:$0xff] (%p79_p3), %v301_v0  ;;  %304 = vst [vmem:[%s1182_s6 + $0x8] sm:$0xff] (%p79_p3), %v303_v1  ;;  %v307_v3 = vld [vmem:[%s1177_s5 + $0x30] sm:$0xff] (%p79_p3) }
  0x17   : > { %306 = vst [vmem:[%s1182_s6 + $0x10] sm:$0xff] (%p79_p3), %v305_v2  ;;  %v309_v4 = vld [vmem:[%s1177_s5 + $0x40] sm:$0xff] (%p79_p3)  ;;  %v311_v5 = vld [vmem:[%s1177_s5 + $0x50] sm:$0xff] (%p79_p3)  ;;  %308 = vst [vmem:[%s1182_s6 + $0x18] sm:$0xff] (%p79_p3), %v307_v3 }
  0x18   : > { %310 = vst [vmem:[%s1182_s6 + $0x20] sm:$0xff] (%p79_p3), %v309_v4  ;;  %312 = vst [vmem:[%s1182_s6 + $0x28] sm:$0xff] (%p79_p3), %v311_v5  ;;  %v313_v6 = vld [vmem:[%s1177_s5 + $0x60] sm:$0xff] (%p79_p3)  ;;  %v315_v7 = vld [vmem:[%s1177_s5 + $0x70] sm:$0xff] (%p79_p3) }
  0x19   : > { %v317_v8 = vld [vmem:[%s1177_s5 + $0x80] sm:$0xff]  ;;  %314 = vst [vmem:[%s1182_s6 + $0x30] sm:$0xff] %v313_v6  ;;  %316 = vst [vmem:[%s1182_s6 + $0x38] sm:$0xff] %v315_v7  ;;  %v319_v9 = vld [vmem:[%s1177_s5 + $0x90] sm:$0xff] }
  0x1a   : > { %318 = vst [vmem:[%s1182_s6 + $0x40] sm:$0xff] %v317_v8  ;;  %v321_v10 = vld [vmem:[%s1177_s5 + $0xa0] sm:$0xff]  ;;  %v323_v11 = vld [vmem:[%s1177_s5 + $0xb0] sm:$0xff]  ;;  %320 = vst [vmem:[%s1182_s6 + $0x48] sm:$0xff] %v319_v9 }
  0x1b   : > { %322 = vst [vmem:[%s1182_s6 + $0x50] sm:$0xff] %v321_v10  ;;  %324 = vst [vmem:[%s1182_s6 + $0x58] sm:$0xff] %v323_v11  ;;  %v325_v12 = vld [vmem:[%s1177_s5 + $0xc0] sm:$0xff]  ;;  %v327_v13 = vld [vmem:[%s1177_s5 + $0xd0] sm:$0xff] }
  0x1c   : > { %v329_v14 = vld [vmem:[%s1177_s5 + $0xe0] sm:$0xff]  ;;  %326 = vst [vmem:[%s1182_s6 + $0x60] sm:$0xff] %v325_v12  ;;  %328 = vst [vmem:[%s1182_s6 + $0x68] sm:$0xff] %v327_v13  ;;  %v331_v15 = vld [vmem:[%s1177_s5 + $0xf0] sm:$0xff] }
  0x1d   : > { %330 = vst [vmem:[%s1182_s6 + $0x70] sm:$0xff] %v329_v14  ;;  %v333_v16 = vld [vmem:[%s1177_s5 + $0x100] sm:$0xff]  ;;  %v335_v17 = vld [vmem:[%s1177_s5 + $0x110] sm:$0xff]  ;;  %332 = vst [vmem:[%s1182_s6 + $0x78] sm:$0xff] %v331_v15 }
  0x1e   : > { %334 = vst [vmem:[%s1182_s6 + $0x80] sm:$0xff] %v333_v16  ;;  %336 = vst [vmem:[%s1182_s6 + $0x88] sm:$0xff] %v335_v17  ;;  %v337_v18 = vld [vmem:[%s1177_s5 + $0x120] sm:$0xff]  ;;  %v339_v19 = vld [vmem:[%s1177_s5 + $0x130] sm:$0xff] }
  0x1f   : > { %v341_v20 = vld [vmem:[%s1177_s5 + $0x140] sm:$0xff]  ;;  %338 = vst [vmem:[%s1182_s6 + $0x90] sm:$0xff] %v337_v18  ;;  %340 = vst [vmem:[%s1182_s6 + $0x98] sm:$0xff] %v339_v19  ;;  %v343_v21 = vld [vmem:[%s1177_s5 + $0x150] sm:$0xff] }
  0x20   : > { %342 = vst [vmem:[%s1182_s6 + $0xa0] sm:$0xff] %v341_v20  ;;  %v345_v22 = vld [vmem:[%s1177_s5 + $0x160] sm:$0xff]  ;;  %v347_v23 = vld [vmem:[%s1177_s5 + $0x170] sm:$0xff]  ;;  %344 = vst [vmem:[%s1182_s6 + $0xa8] sm:$0xff] %v343_v21 }
  0x21   : > { %346 = vst [vmem:[%s1182_s6 + $0xb0] sm:$0xff] %v345_v22  ;;  %348 = vst [vmem:[%s1182_s6 + $0xb8] sm:$0xff] %v347_v23  ;;  %v349_v24 = vld [vmem:[%s1177_s5 + $0x180] sm:$0xff]  ;;  %v351_v25 = vld [vmem:[%s1177_s5 + $0x190] sm:$0xff] }
  0x22   : > { %v353_v26 = vld [vmem:[%s1177_s5 + $0x1a0] sm:$0xff]  ;;  %350 = vst [vmem:[%s1182_s6 + $0xc0] sm:$0xff] %v349_v24  ;;  %352 = vst [vmem:[%s1182_s6 + $0xc8] sm:$0xff] %v351_v25  ;;  %v355_v27 = vld [vmem:[%s1177_s5 + $0x1b0] sm:$0xff] }
  0x23   : > { %354 = vst [vmem:[%s1182_s6 + $0xd0] sm:$0xff] %v353_v26  ;;  %v357_v28 = vld [vmem:[%s1177_s5 + $0x1c0] sm:$0xff]  ;;  %v359_v29 = vld [vmem:[%s1177_s5 + $0x1d0] sm:$0xff]  ;;  %356 = vst [vmem:[%s1182_s6 + $0xd8] sm:$0xff] %v355_v27 }
  0x24   : > { %358 = vst [vmem:[%s1182_s6 + $0xe0] sm:$0xff] %v357_v28  ;;  %360 = vst [vmem:[%s1182_s6 + $0xe8] sm:$0xff] %v359_v29  ;;  %v361_v30 = vld [vmem:[%s1177_s5 + $0x1e0] sm:$0xff]  ;;  %v363_v31 = vld [vmem:[%s1177_s5 + $0x1f0] sm:$0xff] }
  0x25   : > { %362 = vst [vmem:[%s1182_s6 + $0xf0] sm:$0xff] %v361_v30  ;;  %364 = vst [vmem:[%s1182_s6 + $0xf8] sm:$0xff] %v363_v31 }
  0x26 PF: > { %p927_p8 = scmp.ge.s32.totalorder %s1102_s19, 1  ;;  %p385_p9 = scmp.lt.s32.totalorder %s1102_s19, 3 }
  0x28   : > { %p386_p10 = pnand %p927_p8, %p385_p9 }
  0x29   : > { %s392_s7 = sand.u32 (!%p386_p10), 1, %s1086_s15   ;;  %v1063_v32 = vld [vmem:[%s1320_s0 + $0x4] ss:$8 sps:$4 sm:$0xff] (!%p386_p10)   ;;  %v1061_v1 = vld [vmem:[%s1320_s0] ss:$8 sps:$4 sm:$0xff] (!%p386_p10)   ;;  %s930_s14 = sshll.u32 (!%p386_p10), %s1094_s17, 1  ;;  %v736_v2 = vlaneseq (!%p386_p10) }
  0x2a   : > { %389 = sbr.rel (%p386_p10) target bundleno = 337 (0x151), region = 70  ;;  %s928_s8 = sshll.u32 (!%p386_p10), %s392_s7, 8  ;;  %708 = vmatprep.mubr.bf16.mxu0 (!%p386_p10), %v1063_v32 }
  0x2b   : > { %s1253_s11 = scalar_lea.vmem (!%p386_p10), [#allocation3], %s928_s8  ;;  %p449_p11 = scmp.lt.s32.totalorder (!%p386_p10), %s930_s14, 3  ;;  %v737_v3 = vshrl.u32 (!%p386_p10), %v736_v2, 7 }
  0x2c   : > { %v1013_v33 = vld [vmem:[%s1253_s11 + $0x4] ss:$8 sps:$4 sm:$0xff] (!%p386_p10)   ;;  %v1015_v34 = vld [vmem:[%s1253_s11] ss:$8 sps:$4 sm:$0xff] (!%p386_p10)   ;;  %v1016_v35 = vld [vmem:[%s1253_s11 + $0x14] ss:$8 sps:$4 sm:$0xff] (!%p386_p10)  }
  0x2d   : > { %676 = vmatprep.subr.bf16.mxu0 (!%p386_p10), %v1013_v33  ;;  %v1018_v36 = vld [vmem:[%s1253_s11 + $0x10] ss:$8 sps:$4 sm:$0xff] (!%p386_p10)   ;;  %v1019_v37 = vld [vmem:[%s1253_s11 + $0x24] ss:$8 sps:$4 sm:$0xff] (!%p386_p10)   ;;  %v1021_v38 = vld [vmem:[%s1253_s11 + $0x20] ss:$8 sps:$4 sm:$0xff] (!%p386_p10)  }
  0x2e   : > { %677 = vmatpush1.bf16.msra.mxu0 (!%p386_p10), %v1015_v34  ;;  %v1022_v39 = vld [vmem:[%s1253_s11 + $0x34] ss:$8 sps:$4 sm:$0xff] (!%p386_p10)   ;;  %v1024_v40 = vld [vmem:[%s1253_s11 + $0x30] ss:$8 sps:$4 sm:$0xff] (!%p386_p10)   ;;  %v1025_v41 = vld [vmem:[%s1253_s11 + $0x44] ss:$8 sps:$4 sm:$0xff] (!%p386_p10)  }
  0x2f   : > { %678 = vmatprep.subr.bf16.mxu0 (!%p386_p10), %v1016_v35  ;;  %v1027_v42 = vld [vmem:[%s1253_s11 + $0x40] ss:$8 sps:$4 sm:$0xff] (!%p386_p10)   ;;  %v1028_v43 = vld [vmem:[%s1253_s11 + $0x54] ss:$8 sps:$4 sm:$0xff] (!%p386_p10)   ;;  %v1030_v44 = vld [vmem:[%s1253_s11 + $0x50] ss:$8 sps:$4 sm:$0xff] (!%p386_p10)  }
  0x30   : > { %v1031_v45 = vld [vmem:[%s1253_s11 + $0x64] ss:$8 sps:$4 sm:$0xff] (!%p386_p10)   ;;  %v1033_v46 = vld [vmem:[%s1253_s11 + $0x60] ss:$8 sps:$4 sm:$0xff] (!%p386_p10)   ;;  %v1034_v47 = vld [vmem:[%s1253_s11 + $0x74] ss:$8 sps:$4 sm:$0xff] (!%p386_p10)  }
  0x31   : > { %v1036_v48 = vld [vmem:[%s1253_s11 + $0x70] ss:$8 sps:$4 sm:$0xff]   ;;  %v1037_v49 = vld [vmem:[%s1253_s11 + $0x84] ss:$8 sps:$4 sm:$0xff]   ;;  %v1039_v50 = vld [vmem:[%s1253_s11 + $0x80] ss:$8 sps:$4 sm:$0xff]  }
  0x32   : > { %679 = vmatpush1.bf16.msra.mxu0 %v1018_v36  ;;  %v1040_v51 = vld [vmem:[%s1253_s11 + $0x94] ss:$8 sps:$4 sm:$0xff]   ;;  %v1042_v52 = vld [vmem:[%s1253_s11 + $0x90] ss:$8 sps:$4 sm:$0xff]   ;;  %v1043_v53 = vld [vmem:[%s1253_s11 + $0xa4] ss:$8 sps:$4 sm:$0xff]  }
  0x33   : > { %680 = vmatprep.subr.bf16.mxu0 %v1019_v37  ;;  %v1045_v54 = vld [vmem:[%s1253_s11 + $0xa0] ss:$8 sps:$4 sm:$0xff]   ;;  %v1046_v55 = vld [vmem:[%s1253_s11 + $0xb4] ss:$8 sps:$4 sm:$0xff]   ;;  %v1048_v56 = vld [vmem:[%s1253_s11 + $0xb0] ss:$8 sps:$4 sm:$0xff]  }
  0x34   : > { %v1049_v57 = vld [vmem:[%s1253_s11 + $0xc4] ss:$8 sps:$4 sm:$0xff]   ;;  %v1051_v58 = vld [vmem:[%s1253_s11 + $0xc0] ss:$8 sps:$4 sm:$0xff]   ;;  %v1052_v59 = vld [vmem:[%s1253_s11 + $0xd4] ss:$8 sps:$4 sm:$0xff]  }
  0x35   : > { %v1054_v60 = vld [vmem:[%s1253_s11 + $0xd0] ss:$8 sps:$4 sm:$0xff]   ;;  %v1055_v61 = vld [vmem:[%s1253_s11 + $0xe4] ss:$8 sps:$4 sm:$0xff]   ;;  %v1057_v62 = vld [vmem:[%s1253_s11 + $0xe0] ss:$8 sps:$4 sm:$0xff]  }
  0x36   : > { %681 = vmatpush1.bf16.msra.mxu0 %v1021_v38  ;;  %v1058_v63 = vld [vmem:[%s1253_s11 + $0xf4] ss:$8 sps:$4 sm:$0xff]   ;;  %v1060_v0 = vld [vmem:[%s1253_s11 + $0xf0] ss:$8 sps:$4 sm:$0xff]   ;;  %s1333_s14 = smov (!%p449_p11, %s930_s14), 3  ;;  %v738_v4 = vsub.s32 0, %v737_v3 }
  0x37   : > { %682 = vmatprep.subr.bf16.mxu0 %v1022_v39  ;;  %s451_s23 = scalar_lea.vmem %s1322_s2, %s1333_s14  ;;  %s456_s28 = scalar_lea.vmem %s1323_s3, %s1333_s14  ;;  %v742_v6 = vsub.s32 1, %v737_v3 }
  0x38   : > { %v734_v5 = vld [vmem:[%s451_s23] sm:$0x3]  ;;  %s929_s29 = sshll.u32 %s392_s7, 5  ;;  %s972_s15 = sshll.u32 (%p1164_p6), %s1094_s17, 4 }
  0x39   : > { %v750_v7 = vld [vmem:[%s456_s28] sm:$0x3]  ;;  %v739_v8 = vrot.slane %v734_v5, %v738_v4  ;;  %v743_v9 = vrot.slane %v734_v5, %v742_v6  ;;  %s433_s30 = scalar_lea.vmem [#allocation4], %s929_s29  ;;  %s782_s7 = scalar_lea.vmem (%p1164_p6), %s1324_s4, %s972_s15 }
  0x3a   : > { %683 = vmatpush1.bf16.msra.mxu0 %v1024_v40  ;;  %v755_v10 = vrot.slane %v750_v7, %v738_v4  ;;  %v759_v12 = vrot.slane %v750_v7, %v742_v6 }
  0x3b   : > { %684 = vmatprep.subr.bf16.mxu0 %v1025_v41 }
  0x3e   : > { %685 = vmatpush1.bf16.msra.mxu0 %v1027_v42 }
  0x3f   : > { %686 = vmatprep.subr.bf16.mxu0 %v1028_v43 }
  0x42   : > { %687 = vmatpush1.bf16.msra.mxu0 %v1030_v44 }
  0x43   : > { %688 = vmatprep.subr.bf16.mxu0 %v1031_v45 }
  0x46   : > { %689 = vmatpush1.bf16.msra.mxu0 %v1033_v46 }
  0x47   : > { %690 = vmatprep.subr.bf16.mxu0 %v1034_v47 }
  0x4a   : > { %691 = vmatpush1.bf16.msra.mxu0 %v1036_v48 }
  0x4b   : > { %692 = vmatprep.subr.bf16.mxu0 %v1037_v49 }
  0x4e   : > { %693 = vmatpush1.bf16.msra.mxu0 %v1039_v50 }
  0x4f   : > { %694 = vmatprep.subr.bf16.mxu0 %v1040_v51 }
  0x52   : > { %695 = vmatpush1.bf16.msra.mxu0 %v1042_v52 }
  0x53   : > { %696 = vmatprep.subr.bf16.mxu0 %v1043_v53 }
  0x56   : > { %697 = vmatpush1.bf16.msra.mxu0 %v1045_v54 }
  0x57   : > { %698 = vmatprep.subr.bf16.mxu0 %v1046_v55 }
  0x5a   : > { %699 = vmatpush1.bf16.msra.mxu0 %v1048_v56 }
  0x5b   : > { %700 = vmatprep.subr.bf16.mxu0 %v1049_v57 }
  0x5e   : > { %701 = vmatpush1.bf16.msra.mxu0 %v1051_v58 }
  0x5f   : > { %702 = vmatprep.subr.bf16.mxu0 %v1052_v59 }
  0x62   : > { %703 = vmatpush1.bf16.msra.mxu0 %v1054_v60 }
  0x63   : > { %704 = vmatprep.subr.bf16.mxu0 %v1055_v61 }
  0x66   : > { %705 = vmatpush1.bf16.msra.mxu0 %v1057_v62 }
  0x67   : > { %706 = vmatprep.subr.bf16.mxu0 %v1058_v63 }
  0x6a   : > { %707 = vmatpush1.bf16.msra.mxu0 %v1060_v0 }
  0x6d   : > { %709 = vmatmul.mubr.bf16.vlgmr.msra.gmra.mrb[0].mxu0 %v1061_v1 }
 0x140   : > { %v710_v11 = vpop.f32.mrb[0].mxu0 }
 0x141   : > { %v746_v13 = vmul.f32 %v739_v8, %v710_v11  ;;  %v712_v14 = vpop.f32.mrb[1].mxu0 }
 0x142   : > { %v747_v15 = vmul.f32 %v743_v9, %v712_v14  ;;  %v714_v16 = vpop.f32.mrb[2].mxu0  ;;  %776 = sbr.rel (!%p1164_p6) target bundleno = 337 (0x151), region = 86 }
 0x143   : > { %v762_v17 = vadd.f32 %v755_v10, %v746_v13  ;;  %v748_v18 = vmul.f32 %v739_v8, %v714_v16  ;;  %v716_v19 = vpop.f32.mrb[3].mxu0 }
 0x144   : > { %v763_v20 = vadd.f32 %v759_v12, %v747_v15  ;;  %v749_v21 = vmul.f32 %v743_v9, %v716_v19 }
 0x145   : > { %766 = vst [vmem:[%s433_s30] sm:$0xff] %v762_v17  ;;  %v764_v22 = vadd.f32 %v755_v10, %v748_v18 }
 0x146   : > { %767 = vst [vmem:[%s433_s30 + $0x8] sm:$0xff] %v763_v20  ;;  %v765_v23 = vadd.f32 %v759_v12, %v749_v21 }
 0x147   : > { %768 = vst [vmem:[%s433_s30 + $0x10] sm:$0xff] %v764_v22 }
 0x148   : > { %769 = vst [vmem:[%s433_s30 + $0x18] sm:$0xff] %v765_v23 }
 0x14c   : > { %v795_v24 = vld [vmem:[%s433_s30] sm:$0xff] }
 0x14d   : > { %v797_v25 = vld [vmem:[%s433_s30 + $0x8] sm:$0xff]  ;;  %796 = vst [vmem:[%s782_s7] sm:$0xff] %v795_v24 }
 0x14e   : > { %v799_v26 = vld [vmem:[%s433_s30 + $0x10] sm:$0xff]  ;;  %798 = vst [vmem:[%s782_s7 + $0x8] sm:$0xff] %v797_v25 }
 0x14f   : > { %v801_v27 = vld [vmem:[%s433_s30 + $0x18] sm:$0xff]  ;;  %800 = vst [vmem:[%s782_s7 + $0x20] sm:$0xff] %v799_v26 }
 0x150   : > { %802 = vst [vmem:[%s782_s7 + $0x28] sm:$0xff] %v801_v27 }
 0x151 PF: > { %s14_s19 = sadd.s32 1, %s1102_s19   ;;  %s1326_s15 = smov %s1090_s16 }
 0x152   : > { %p11_p12 = scmp.ge.s32.totalorder %s14_s19, 4   ;;  %s1327_s16 = smov %s1169_s25 }
 0x153   : > { %s1328_s17 = smov %s1098_s18  ;;  %s1329_s18 = smov %s1331_s20 }
 0x154   :  { %13 = sbr.rel (!%p11_p12) target bundleno = 3 (0x3), region = 149 }

// kernel: resnet_up_forward.44
= control target key start
LH: loop header
LB: loop body
LE: loop exit
PB: predicated region body
PF: predicated region fallthrough
CT: control target
= control target key end

     0   :  { %s2256_s0 = inlined_call_operand.vmem [shape: bf16[16,4608], index: 0, kind: input, shape index: {}]   ;;  %s2257_s1 = inlined_call_operand.vmem [shape: bf16[4608,512], index: 1, kind: input, shape index: {}]   ;;  %s2258_s2 = inlined_call_operand.vmem [shape: f32[1,512], index: 2, kind: input, shape index: {}]   ;;  %s2259_s3 = inlined_call_operand.vmem [shape: f32[1,512], index: 3, kind: input, shape index: {}]   ;;  %s2260_s4 = inlined_call_operand.vmem [shape: f32[16,512], index: 4, kind: input, shape index: {}]   ;;  %s2261_s5 = inlined_call_operand.vmem [shape: f32[16,512], index: 5, kind: output, shape index: {}]  }
   0x1   :  { %2265 = sst [smem:[#allocation11_spill]] %s2256_s0 }
   0x2   :  { %s1838_s18 = smov 0   ;;  %s1840_s19 = smov 0  }
   0x3   :  { %s1842_s20 = smov 0   ;;  %s1844_s21 = smov 0  }
   0x4   :  { %s1846_s22 = smov 0   ;;  %s1848_s23 = smov 0  }
   0x5   :  { %s1850_s24 = smov 0   ;;  %s1852_s25 = smov 0  }
   0x6   :  { %s1854_s26 = smov 0   ;;  %s1856_s27 = smov 0  }
   0x7   :  { %s1858_s28 = smov 0  }
   0x8 LB: > { %2266 = sst [smem:[#allocation7_spill]] %s1785_s23  ;;  %s1423_s29 = sadd.s32 4294967295, %s1805_s28   ;;  %s1805_s28 = sphi %s1858_s28, %s15_s28   ;;  %s1801_s27 = sphi %s1856_s27, %s2286_s27   ;;  %s1797_s26 = sphi %s1854_s26, %s2285_s26   ;;  %s1793_s25 = sphi %s1852_s25, %s2284_s25   ;;  %s1789_s24 = sphi %s1850_s24, %s2283_s24   ;;  %s1785_s23 = sphi %s1848_s23, %s2276_s23   ;;  %s1781_s22 = sphi %s1846_s22, %s2275_s22   ;;  %s1777_s21 = sphi %s1844_s21, %s2282_s21   ;;  %s1773_s20 = sphi %s1842_s20, %s2281_s20   ;;  %s1769_s19 = sphi %s1840_s19, %s2280_s19   ;;  %s1765_s18 = sphi %s1838_s18, %s2279_s18  }
   0x9   : > { %s27_s30 = sadd.s32 1, %s1797_s26  ;;  %s30_s6 = sadd.s32 1, %s1801_s27 }
   0xa   : > { %p28_p0 = scmp.ge.s32.totalorder %s27_s30, 9  ;;  %s43_s7 = sadd.s32 1, %s1785_s23 }
   0xb   : > { %p50_p1 = scmp.ne.s32.totalorder %s1785_s23, %s1781_s22  ;;  %p51_p2 = scmp.eq.s32.totalorder %s1805_s28, 0 }
   0xc   : > { %s2288_s30 = smov (%p28_p0, %s27_s30), 0  ;;  %s2290_s6 = smov (!%p28_p0, %s30_s6), %s1801_s27 }
   0xd   : > { %2267 = sst [smem:[#allocation8_spill]] %s2288_s30  ;;  %s39_s8 = ssub.s32 %s1797_s26, %s2288_s30 }
   0xe   : > { %p32_p3 = scmp.ge.s32.totalorder %s2290_s6, 2  ;;  %p41_p4 = scmp.eq.s32.totalorder %s39_s8, 0 }
   0xf   : > { %p1907_p5 = por %p51_p2, %p50_p1  ;;  %s71_s10 = sadd.s32 1, %s1777_s21 }
  0x10   : > { %s2292_s6 = smov (%p32_p3, %s2290_s6), 0  ;;  %p78_p6 = scmp.ne.s32.totalorder %s1777_s21, %s1773_s20 }
  0x11   : > { %2269 = sst [smem:[#allocation9_spill]] %s2292_s6  ;;  %s67_s12 = ssub.s32 %s1801_s27, %s2292_s6 }
  0x12   : > { %s1915_s11 = scalar_select %p41_p4, %s1785_s23, %s43_s7  }
  0x13   : > { %s68_s13 = sor.u32 %s67_s12, %s39_s8  ;;  %p149_p7 = scmp.eq.s32.totalorder %s67_s12, 0 }
  0x14   : > { %2270 = sst [smem:[#allocation10_spill]] %s1915_s11  ;;  %p69_p8 = scmp.eq.s32.totalorder %s68_s13, 0 }
  0x15   : > { %p1923_p9 = por %p78_p6, %p51_p2  ;;  %s151_s15 = sadd.s32 1, %s1769_s19 }
  0x16   : > { %p158_p10 = scmp.ne.s32.totalorder %s1769_s19, %s1765_s18  ;;  %p190_p12 = scmp.eq.s32.totalorder %s1423_s29, 17 }
  0x17   : > { %s1931_s16 = scalar_select %p69_p8, %s1777_s21, %s71_s10  }
  0x18   : > { %s1934_s17 = scalar_select %p149_p7, %s1769_s19, %s151_s15  }
  0x19   : > { %p1938_p11 = por %p158_p10, %p51_p2  ;;  %p1942_p13 = por %p190_p12, %p158_p10 }
  0x1a   : > { %p1426_p0 = scmp.ge.s32.totalorder %s1805_s28, 18 }
  0x1c   : > { %212 = sbr.rel (%p1426_p0) target bundleno = 93 (0x5d), region = 16 }
  0x23   : > { %215 = sbr.rel (!%p1907_p5) target bundleno = 47 (0x2f), region = 20  ;;  %s217_s10 = sand.u32 (%p1907_p5), 1, %s1785_s23  }
  0x24   : > { %s1520_s12 = sshll.u32 (%p1907_p5), %s1797_s26, 4  ;;  %s1427_s13 = sshll.u32 (%p1907_p5), %s217_s10, 5 }
  0x25   : > { %s2274_s0 = sld [smem:[#allocation11_spill]] (%p1907_p5)  ;;  %s219_s29 = scalar_lea.vmem (%p1907_p5), [#allocation3], %s1427_s13 }
  0x2b   : > { %s225_s30 = scalar_lea.vmem %s2274_s0, %s1520_s12 }
  0x2c   : > { %v238_v0 = vld [vmem:[%s225_s30] sm:$0xff]  ;;  %v240_v1 = vld [vmem:[%s225_s30 + $0x8] sm:$0xff]  ;;  %v242_v2 = vld [vmem:[%s225_s30 + $0x90] sm:$0xff] }
  0x2d   : > { %239 = vst [vmem:[%s219_s29] sm:$0xff] %v238_v0  ;;  %241 = vst [vmem:[%s219_s29 + $0x8] sm:$0xff] %v240_v1  ;;  %v244_v3 = vld [vmem:[%s225_s30 + $0x98] sm:$0xff] }
  0x2e   : > { %243 = vst [vmem:[%s219_s29 + $0x10] sm:$0xff] %v242_v2  ;;  %245 = vst [vmem:[%s219_s29 + $0x18] sm:$0xff] %v244_v3 }
  0x2f PF: > { %251 = sbr.rel (!%p1923_p9) target bundleno = 86 (0x56), region = 43  ;;  %s253_s9 = sand.u32 (%p1923_p9), 1, %s1777_s21  }
  0x30   : > { %s1432_s10 = sshll.u32 (%p1923_p9), %s1801_s27, 1  ;;  %s1430_s6 = sshll.u32 (%p1923_p9), %s253_s9, 9 }
  0x31   : > { %s1521_s12 = sshll.u32 (%p1923_p9), %s1797_s26, 8  ;;  %s1967_s30 = scalar_lea.vmem (%p1923_p9), [#allocation4], %s1430_s6 }
  0x32   : > { %s259_s15 = sadd.s32 (%p1923_p9), %s1521_s12, %s1432_s10 }
  0x33   : > { %s1434_s0 = sshll.u32 (%p1923_p9), %s259_s15, 2 }
  0x34   : > { %s1962_s23 = scalar_lea.vmem (%p1923_p9), %s2257_s1, %s1434_s0 }
  0x35   : > { %v415_v4 = vld [vmem:[%s1962_s23] sm:$0xff] (%p1923_p9)  ;;  %v417_v5 = vld [vmem:[%s1962_s23 + $0x10] sm:$0xff] (%p1923_p9) }
  0x36   : > { %v419_v6 = vld [vmem:[%s1962_s23 + $0x20] sm:$0xff]  ;;  %416 = vst [vmem:[%s1967_s30] sm:$0xff] %v415_v4  ;;  %418 = vst [vmem:[%s1967_s30 + $0x8] sm:$0xff] %v417_v5  ;;  %v421_v7 = vld [vmem:[%s1962_s23 + $0x30] sm:$0xff] }
  0x37   : > { %420 = vst [vmem:[%s1967_s30 + $0x10] sm:$0xff] %v419_v6  ;;  %v423_v8 = vld [vmem:[%s1962_s23 + $0x40] sm:$0xff]  ;;  %v425_v9 = vld [vmem:[%s1962_s23 + $0x50] sm:$0xff]  ;;  %422 = vst [vmem:[%s1967_s30 + $0x18] sm:$0xff] %v421_v7 }
  0x38   : > { %424 = vst [vmem:[%s1967_s30 + $0x20] sm:$0xff] %v423_v8  ;;  %426 = vst [vmem:[%s1967_s30 + $0x28] sm:$0xff] %v425_v9  ;;  %v427_v10 = vld [vmem:[%s1962_s23 + $0x60] sm:$0xff]  ;;  %v429_v11 = vld [vmem:[%s1962_s23 + $0x70] sm:$0xff] }
  0x39   : > { %v431_v12 = vld [vmem:[%s1962_s23 + $0x80] sm:$0xff]  ;;  %428 = vst [vmem:[%s1967_s30 + $0x30] sm:$0xff] %v427_v10  ;;  %430 = vst [vmem:[%s1967_s30 + $0x38] sm:$0xff] %v429_v11  ;;  %v433_v13 = vld [vmem:[%s1962_s23 + $0x90] sm:$0xff] }
  0x3a   : > { %432 = vst [vmem:[%s1967_s30 + $0x40] sm:$0xff] %v431_v12  ;;  %v435_v14 = vld [vmem:[%s1962_s23 + $0xa0] sm:$0xff]  ;;  %v437_v15 = vld [vmem:[%s1962_s23 + $0xb0] sm:$0xff]  ;;  %434 = vst [vmem:[%s1967_s30 + $0x48] sm:$0xff] %v433_v13 }
  0x3b   : > { %436 = vst [vmem:[%s1967_s30 + $0x50] sm:$0xff] %v435_v14  ;;  %438 = vst [vmem:[%s1967_s30 + $0x58] sm:$0xff] %v437_v15  ;;  %v439_v16 = vld [vmem:[%s1962_s23 + $0xc0] sm:$0xff]  ;;  %v441_v17 = vld [vmem:[%s1962_s23 + $0xd0] sm:$0xff] }
  0x3c   : > { %v443_v18 = vld [vmem:[%s1962_s23 + $0xe0] sm:$0xff]  ;;  %440 = vst [vmem:[%s1967_s30 + $0x60] sm:$0xff] %v439_v16  ;;  %442 = vst [vmem:[%s1967_s30 + $0x68] sm:$0xff] %v441_v17  ;;  %v445_v19 = vld [vmem:[%s1962_s23 + $0xf0] sm:$0xff] }
  0x3d   : > { %444 = vst [vmem:[%s1967_s30 + $0x70] sm:$0xff] %v443_v18  ;;  %v447_v20 = vld [vmem:[%s1962_s23 + $0x100] sm:$0xff]  ;;  %v449_v21 = vld [vmem:[%s1962_s23 + $0x110] sm:$0xff]  ;;  %446 = vst [vmem:[%s1967_s30 + $0x78] sm:$0xff] %v445_v19 }
  0x3e   : > { %448 = vst [vmem:[%s1967_s30 + $0x80] sm:$0xff] %v447_v20  ;;  %450 = vst [vmem:[%s1967_s30 + $0x88] sm:$0xff] %v449_v21  ;;  %v451_v22 = vld [vmem:[%s1962_s23 + $0x120] sm:$0xff]  ;;  %v453_v23 = vld [vmem:[%s1962_s23 + $0x130] sm:$0xff] }
  0x3f   : > { %v455_v24 = vld [vmem:[%s1962_s23 + $0x140] sm:$0xff]  ;;  %452 = vst [vmem:[%s1967_s30 + $0x90] sm:$0xff] %v451_v22  ;;  %454 = vst [vmem:[%s1967_s30 + $0x98] sm:$0xff] %v453_v23  ;;  %v457_v25 = vld [vmem:[%s1962_s23 + $0x150] sm:$0xff] }
  0x40   : > { %456 = vst [vmem:[%s1967_s30 + $0xa0] sm:$0xff] %v455_v24  ;;  %v459_v26 = vld [vmem:[%s1962_s23 + $0x160] sm:$0xff]  ;;  %v461_v27 = vld [vmem:[%s1962_s23 + $0x170] sm:$0xff]  ;;  %458 = vst [vmem:[%s1967_s30 + $0xa8] sm:$0xff] %v457_v25 }
  0x41   : > { %460 = vst [vmem:[%s1967_s30 + $0xb0] sm:$0xff] %v459_v26  ;;  %462 = vst [vmem:[%s1967_s30 + $0xb8] sm:$0xff] %v461_v27  ;;  %v463_v28 = vld [vmem:[%s1962_s23 + $0x180] sm:$0xff]  ;;  %v465_v29 = vld [vmem:[%s1962_s23 + $0x190] sm:$0xff] }
  0x42   : > { %v467_v30 = vld [vmem:[%s1962_s23 + $0x1a0] sm:$0xff]  ;;  %464 = vst [vmem:[%s1967_s30 + $0xc0] sm:$0xff] %v463_v28  ;;  %466 = vst [vmem:[%s1967_s30 + $0xc8] sm:$0xff] %v465_v29  ;;  %v469_v31 = vld [vmem:[%s1962_s23 + $0x1b0] sm:$0xff] }
  0x43   : > { %468 = vst [vmem:[%s1967_s30 + $0xd0] sm:$0xff] %v467_v30  ;;  %v471_v32 = vld [vmem:[%s1962_s23 + $0x1c0] sm:$0xff]  ;;  %v473_v33 = vld [vmem:[%s1962_s23 + $0x1d0] sm:$0xff]  ;;  %470 = vst [vmem:[%s1967_s30 + $0xd8] sm:$0xff] %v469_v31 }
  0x44   : > { %472 = vst [vmem:[%s1967_s30 + $0xe0] sm:$0xff] %v471_v32  ;;  %474 = vst [vmem:[%s1967_s30 + $0xe8] sm:$0xff] %v473_v33  ;;  %v475_v34 = vld [vmem:[%s1962_s23 + $0x1e0] sm:$0xff]  ;;  %v477_v35 = vld [vmem:[%s1962_s23 + $0x1f0] sm:$0xff] }
  0x45   : > { %v479_v36 = vld [vmem:[%s1962_s23 + $0x200] sm:$0xff]  ;;  %476 = vst [vmem:[%s1967_s30 + $0xf0] sm:$0xff] %v475_v34  ;;  %478 = vst [vmem:[%s1967_s30 + $0xf8] sm:$0xff] %v477_v35  ;;  %v481_v37 = vld [vmem:[%s1962_s23 + $0x210] sm:$0xff] }
  0x46   : > { %480 = vst [vmem:[%s1967_s30 + $0x100] sm:$0xff] %v479_v36  ;;  %v483_v38 = vld [vmem:[%s1962_s23 + $0x220] sm:$0xff]  ;;  %v485_v39 = vld [vmem:[%s1962_s23 + $0x230] sm:$0xff]  ;;  %482 = vst [vmem:[%s1967_s30 + $0x108] sm:$0xff] %v481_v37 }
  0x47   : > { %484 = vst [vmem:[%s1967_s30 + $0x110] sm:$0xff] %v483_v38  ;;  %486 = vst [vmem:[%s1967_s30 + $0x118] sm:$0xff] %v485_v39  ;;  %v487_v40 = vld [vmem:[%s1962_s23 + $0x240] sm:$0xff]  ;;  %v489_v41 = vld [vmem:[%s1962_s23 + $0x250] sm:$0xff] }
  0x48   : > { %v491_v42 = vld [vmem:[%s1962_s23 + $0x260] sm:$0xff]  ;;  %488 = vst [vmem:[%s1967_s30 + $0x120] sm:$0xff] %v487_v40  ;;  %490 = vst [vmem:[%s1967_s30 + $0x128] sm:$0xff] %v489_v41  ;;  %v493_v43 = vld [vmem:[%s1962_s23 + $0x270] sm:$0xff] }
  0x49   : > { %492 = vst [vmem:[%s1967_s30 + $0x130] sm:$0xff] %v491_v42  ;;  %v495_v44 = vld [vmem:[%s1962_s23 + $0x280] sm:$0xff]  ;;  %v497_v45 = vld [vmem:[%s1962_s23 + $0x290] sm:$0xff]  ;;  %494 = vst [vmem:[%s1967_s30 + $0x138] sm:$0xff] %v493_v43 }
  0x4a   : > { %496 = vst [vmem:[%s1967_s30 + $0x140] sm:$0xff] %v495_v44  ;;  %498 = vst [vmem:[%s1967_s30 + $0x148] sm:$0xff] %v497_v45  ;;  %v499_v46 = vld [vmem:[%s1962_s23 + $0x2a0] sm:$0xff]  ;;  %v501_v47 = vld [vmem:[%s1962_s23 + $0x2b0] sm:$0xff] }
  0x4b   : > { %v503_v48 = vld [vmem:[%s1962_s23 + $0x2c0] sm:$0xff]  ;;  %500 = vst [vmem:[%s1967_s30 + $0x150] sm:$0xff] %v499_v46  ;;  %502 = vst [vmem:[%s1967_s30 + $0x158] sm:$0xff] %v501_v47  ;;  %v505_v49 = vld [vmem:[%s1962_s23 + $0x2d0] sm:$0xff] }
  0x4c   : > { %504 = vst [vmem:[%s1967_s30 + $0x160] sm:$0xff] %v503_v48  ;;  %v507_v50 = vld [vmem:[%s1962_s23 + $0x2e0] sm:$0xff]  ;;  %v509_v51 = vld [vmem:[%s1962_s23 + $0x2f0] sm:$0xff]  ;;  %506 = vst [vmem:[%s1967_s30 + $0x168] sm:$0xff] %v505_v49 }
  0x4d   : > { %508 = vst [vmem:[%s1967_s30 + $0x170] sm:$0xff] %v507_v50  ;;  %510 = vst [vmem:[%s1967_s30 + $0x178] sm:$0xff] %v509_v51  ;;  %v511_v52 = vld [vmem:[%s1962_s23 + $0x300] sm:$0xff]  ;;  %v513_v53 = vld [vmem:[%s1962_s23 + $0x310] sm:$0xff] }
  0x4e   : > { %v515_v54 = vld [vmem:[%s1962_s23 + $0x320] sm:$0xff]  ;;  %512 = vst [vmem:[%s1967_s30 + $0x180] sm:$0xff] %v511_v52  ;;  %514 = vst [vmem:[%s1967_s30 + $0x188] sm:$0xff] %v513_v53  ;;  %v517_v55 = vld [vmem:[%s1962_s23 + $0x330] sm:$0xff] }
  0x4f   : > { %516 = vst [vmem:[%s1967_s30 + $0x190] sm:$0xff] %v515_v54  ;;  %v519_v56 = vld [vmem:[%s1962_s23 + $0x340] sm:$0xff]  ;;  %v521_v57 = vld [vmem:[%s1962_s23 + $0x350] sm:$0xff]  ;;  %518 = vst [vmem:[%s1967_s30 + $0x198] sm:$0xff] %v517_v55 }
  0x50   : > { %520 = vst [vmem:[%s1967_s30 + $0x1a0] sm:$0xff] %v519_v56  ;;  %522 = vst [vmem:[%s1967_s30 + $0x1a8] sm:$0xff] %v521_v57  ;;  %v523_v58 = vld [vmem:[%s1962_s23 + $0x360] sm:$0xff]  ;;  %v525_v59 = vld [vmem:[%s1962_s23 + $0x370] sm:$0xff] }
  0x51   : > { %v527_v60 = vld [vmem:[%s1962_s23 + $0x380] sm:$0xff]  ;;  %524 = vst [vmem:[%s1967_s30 + $0x1b0] sm:$0xff] %v523_v58  ;;  %526 = vst [vmem:[%s1967_s30 + $0x1b8] sm:$0xff] %v525_v59  ;;  %v529_v61 = vld [vmem:[%s1962_s23 + $0x390] sm:$0xff] }
  0x52   : > { %528 = vst [vmem:[%s1967_s30 + $0x1c0] sm:$0xff] %v527_v60  ;;  %v531_v62 = vld [vmem:[%s1962_s23 + $0x3a0] sm:$0xff]  ;;  %v533_v63 = vld [vmem:[%s1962_s23 + $0x3b0] sm:$0xff]  ;;  %530 = vst [vmem:[%s1967_s30 + $0x1c8] sm:$0xff] %v529_v61 }
  0x53   : > { %532 = vst [vmem:[%s1967_s30 + $0x1d0] sm:$0xff] %v531_v62  ;;  %534 = vst [vmem:[%s1967_s30 + $0x1d8] sm:$0xff] %v533_v63  ;;  %v535_v0 = vld [vmem:[%s1962_s23 + $0x3c0] sm:$0xff]  ;;  %v537_v1 = vld [vmem:[%s1962_s23 + $0x3d0] sm:$0xff] }
  0x54   : > { %v539_v2 = vld [vmem:[%s1962_s23 + $0x3e0] sm:$0xff]  ;;  %536 = vst [vmem:[%s1967_s30 + $0x1e0] sm:$0xff] %v535_v0  ;;  %538 = vst [vmem:[%s1967_s30 + $0x1e8] sm:$0xff] %v537_v1  ;;  %v541_v3 = vld [vmem:[%s1962_s23 + $0x3f0] sm:$0xff] }
  0x55   : > { %540 = vst [vmem:[%s1967_s30 + $0x1f0] sm:$0xff] %v539_v2  ;;  %542 = vst [vmem:[%s1967_s30 + $0x1f8] sm:$0xff] %v541_v3 }
  0x56 PF: > { %564 = sbr.rel (!%p1938_p11) target bundleno = 93 (0x5d), region = 89  ;;  %s566_s0 = sand.u32 (%p1938_p11), 1, %s1769_s19  }
  0x57   : > { %s1522_s11 = sshll.u32 (%p1938_p11), %s1801_s27, 4  ;;  %s1435_s14 = sshll.u32 (%p1938_p11), %s566_s0, 5 }
  0x58   : > { %s574_s10 = scalar_lea.vmem (%p1938_p11), %s2260_s4, %s1522_s11  ;;  %s568_s6 = scalar_lea.vmem (%p1938_p11), [#allocation5], %s1435_s14 }
  0x59   : > { %v587_v4 = vld [vmem:[%s574_s10] sm:$0xff] (%p1938_p11)  ;;  %v589_v5 = vld [vmem:[%s574_s10 + $0x8] sm:$0xff] (%p1938_p11) }
  0x5a   : > { %v591_v6 = vld [vmem:[%s574_s10 + $0x20] sm:$0xff] (%p1938_p11)  ;;  %588 = vst [vmem:[%s568_s6] sm:$0xff] (%p1938_p11), %v587_v4  ;;  %590 = vst [vmem:[%s568_s6 + $0x8] sm:$0xff] (%p1938_p11), %v589_v5  ;;  %v593_v7 = vld [vmem:[%s574_s10 + $0x28] sm:$0xff] (%p1938_p11) }
  0x5b   : > { %592 = vst [vmem:[%s568_s6 + $0x10] sm:$0xff] (%p1938_p11), %v591_v6  ;;  %594 = vst [vmem:[%s568_s6 + $0x18] sm:$0xff] (%p1938_p11), %v593_v7 }
  0x5d PF: > { %p1438_p1 = scmp.ge.s32.totalorder %s1805_s28, 1  ;;  %p599_p2 = scmp.lt.s32.totalorder %s1805_s28, 19 }
  0x5f   : > { %p600_p3 = pnand %p1438_p1, %p599_p2 }
  0x60   : > { %s606_s23 = sand.u32 (!%p600_p3), 1, %s1781_s22   ;;  %s613_s7 = sand.u32 (!%p600_p3), 1, %s1773_s20  }
  0x61   : > { %603 = sbr.rel (%p600_p3) target bundleno = 421 (0x1a5), region = 112  ;;  %s1439_s12 = sshll.u32 (!%p600_p3), %s606_s23, 5 }
  0x62   : > { %s1440_s15 = sshll.u32 (!%p600_p3), %s613_s7, 9  ;;  %s620_s13 = sand.u32 (!%p600_p3), 1, %s1765_s18  }
  0x63   : > { %s1443_s30 = sshll.u32 (!%p600_p3), %s1793_s25, 1  ;;  %s1441_s0 = sshll.u32 (!%p600_p3), %s620_s13, 5 }
  0x64   : > { %p667_p4 = scmp.lt.s32.totalorder (!%p600_p3), %s1443_s30, 3  ;;  %s2117_s22 = scalar_lea.vmem (!%p600_p3), [#allocation3], %s1439_s12 }
  0x65   : > { %s2119_s20 = scalar_lea.vmem (!%p600_p3), [#allocation4], %s1440_s15  ;;  %s2121_s18 = scalar_lea.vmem (!%p600_p3), [#allocation5], %s1441_s0 }
  0x66   : > { %s2123_s23 = scalar_lea.vmem (!%p600_p3), [#allocation6], %s1441_s0  ;;  %p1445_p5 = scmp.ne.s32.totalorder (!%p600_p3), %s1789_s24, 0 }
  0x68   : > { %s2294_s30 = smov (!%p667_p4, %s1443_s30), 3  ;;  %683 = sbr.rel (%p1445_p5) target bundleno = 111 (0x6f), region = 128 }
  0x69   : > { %s669_s29 = scalar_lea.vmem %s2258_s2, %s2294_s30  ;;  %s674_s6 = scalar_lea.vmem %s2259_s3, %s2294_s30  ;;  %v1807_v8 = vmov (!%p1445_p5), 0.0  }
  0x6a   : > { %684 = vst [vmem:[#allocation2] sm:$0xff] (!%p1445_p5), %v1807_v8  ;;  %685 = vst [vmem:[#allocation2 + $0x8] sm:$0xff] (!%p1445_p5), %v1807_v8 }
  0x6b   : > { %686 = vst [vmem:[#allocation2 + $0x10] sm:$0xff] (!%p1445_p5), %v1807_v8  ;;  %687 = vst [vmem:[#allocation2 + $0x18] sm:$0xff] (!%p1445_p5), %v1807_v8 }
  0x6f PF: > { %v1617_v9 = vld [vmem:[%s2119_s20 + $0x4] ss:$8 sps:$4 sm:$0xff]   ;;  %v1621_v11 = vld [vmem:[%s2119_s20] ss:$8 sps:$4 sm:$0xff]   ;;  %v1623_v13 = vld [vmem:[%s2119_s20 + $0x14] ss:$8 sps:$4 sm:$0xff]  }
  0x70   : > { %v1619_v10 = vld [vmem:[%s2119_s20 + $0x104] ss:$8 sps:$4 sm:$0xff]   ;;  %1100 = vmatprep.subr.bf16.mxu1 %v1617_v9  ;;  %v1622_v12 = vld [vmem:[%s2119_s20 + $0x100] ss:$8 sps:$4 sm:$0xff]   ;;  %v1625_v14 = vld [vmem:[%s2119_s20 + $0x114] ss:$8 sps:$4 sm:$0xff]  }
  0x71   : > { %1143 = vmatprep.subr.bf16.mxu0 %v1619_v10  ;;  %1101 = vmatpush1.bf16.msra.mxu1 %v1621_v11  ;;  %v1627_v15 = vld [vmem:[%s2119_s20 + $0x10] ss:$8 sps:$4 sm:$0xff]   ;;  %v1629_v17 = vld [vmem:[%s2119_s20 + $0x24] ss:$8 sps:$4 sm:$0xff]   ;;  %v1633_v19 = vld [vmem:[%s2119_s20 + $0x20] ss:$8 sps:$4 sm:$0xff]  }
  0x72   : > { %1144 = vmatpush1.bf16.msra.mxu0 %v1622_v12  ;;  %1102 = vmatprep.subr.bf16.mxu1 %v1623_v13  ;;  %v1628_v16 = vld [vmem:[%s2119_s20 + $0x110] ss:$8 sps:$4 sm:$0xff]   ;;  %v1631_v18 = vld [vmem:[%s2119_s20 + $0x124] ss:$8 sps:$4 sm:$0xff]   ;;  %v1634_v20 = vld [vmem:[%s2119_s20 + $0x120] ss:$8 sps:$4 sm:$0xff]  }
  0x73   : > { %1145 = vmatprep.subr.bf16.mxu0 %v1625_v14  ;;  %v1635_v21 = vld [vmem:[%s2119_s20 + $0x34] ss:$8 sps:$4 sm:$0xff]   ;;  %v1639_v23 = vld [vmem:[%s2119_s20 + $0x30] ss:$8 sps:$4 sm:$0xff]   ;;  %v1641_v25 = vld [vmem:[%s2119_s20 + $0x44] ss:$8 sps:$4 sm:$0xff]  }
  0x74   : > { %v1637_v22 = vld [vmem:[%s2119_s20 + $0x134] ss:$8 sps:$4 sm:$0xff]   ;;  %v1640_v24 = vld [vmem:[%s2119_s20 + $0x130] ss:$8 sps:$4 sm:$0xff]   ;;  %v1643_v26 = vld [vmem:[%s2119_s20 + $0x144] ss:$8 sps:$4 sm:$0xff]  }
  0x75   : > { %1103 = vmatpush1.bf16.msra.mxu1 %v1627_v15  ;;  %v1645_v27 = vld [vmem:[%s2119_s20 + $0x40] ss:$8 sps:$4 sm:$0xff]   ;;  %v1647_v29 = vld [vmem:[%s2119_s20 + $0x54] ss:$8 sps:$4 sm:$0xff]   ;;  %v1651_v31 = vld [vmem:[%s2119_s20 + $0x50] ss:$8 sps:$4 sm:$0xff]  }
  0x76   : > { %1146 = vmatpush1.bf16.msra.mxu0 %v1628_v16  ;;  %1104 = vmatprep.subr.bf16.mxu1 %v1629_v17  ;;  %v1646_v28 = vld [vmem:[%s2119_s20 + $0x140] ss:$8 sps:$4 sm:$0xff]   ;;  %v1649_v30 = vld [vmem:[%s2119_s20 + $0x154] ss:$8 sps:$4 sm:$0xff]   ;;  %v1652_v32 = vld [vmem:[%s2119_s20 + $0x150] ss:$8 sps:$4 sm:$0xff]  }
  0x77   : > { %1147 = vmatprep.subr.bf16.mxu0 %v1631_v18  ;;  %v1653_v33 = vld [vmem:[%s2119_s20 + $0x64] ss:$8 sps:$4 sm:$0xff]   ;;  %v1657_v35 = vld [vmem:[%s2119_s20 + $0x60] ss:$8 sps:$4 sm:$0xff]   ;;  %v1659_v37 = vld [vmem:[%s2119_s20 + $0x74] ss:$8 sps:$4 sm:$0xff]  }
  0x78   : > { %v1655_v34 = vld [vmem:[%s2119_s20 + $0x164] ss:$8 sps:$4 sm:$0xff]   ;;  %v1658_v36 = vld [vmem:[%s2119_s20 + $0x160] ss:$8 sps:$4 sm:$0xff]   ;;  %v1661_v38 = vld [vmem:[%s2119_s20 + $0x174] ss:$8 sps:$4 sm:$0xff]  }
  0x79   : > { %1105 = vmatpush1.bf16.msra.mxu1 %v1633_v19  ;;  %v1663_v39 = vld [vmem:[%s2119_s20 + $0x70] ss:$8 sps:$4 sm:$0xff]   ;;  %v1665_v41 = vld [vmem:[%s2119_s20 + $0x84] ss:$8 sps:$4 sm:$0xff]   ;;  %v1669_v43 = vld [vmem:[%s2119_s20 + $0x80] ss:$8 sps:$4 sm:$0xff]  }
  0x7a   : > { %1148 = vmatpush1.bf16.msra.mxu0 %v1634_v20  ;;  %1106 = vmatprep.subr.bf16.mxu1 %v1635_v21  ;;  %v1664_v40 = vld [vmem:[%s2119_s20 + $0x170] ss:$8 sps:$4 sm:$0xff]   ;;  %v1667_v42 = vld [vmem:[%s2119_s20 + $0x184] ss:$8 sps:$4 sm:$0xff]   ;;  %v1670_v44 = vld [vmem:[%s2119_s20 + $0x180] ss:$8 sps:$4 sm:$0xff]  }
  0x7b   : > { %1149 = vmatprep.subr.bf16.mxu0 %v1637_v22  ;;  %v1671_v45 = vld [vmem:[%s2119_s20 + $0x94] ss:$8 sps:$4 sm:$0xff]   ;;  %v1675_v47 = vld [vmem:[%s2119_s20 + $0x90] ss:$8 sps:$4 sm:$0xff]   ;;  %v1677_v49 = vld [vmem:[%s2119_s20 + $0xa4] ss:$8 sps:$4 sm:$0xff]  }
  0x7c   : > { %v1673_v46 = vld [vmem:[%s2119_s20 + $0x194] ss:$8 sps:$4 sm:$0xff]   ;;  %v1676_v48 = vld [vmem:[%s2119_s20 + $0x190] ss:$8 sps:$4 sm:$0xff]   ;;  %v1679_v50 = vld [vmem:[%s2119_s20 + $0x1a4] ss:$8 sps:$4 sm:$0xff]  }
  0x7d   : > { %1107 = vmatpush1.bf16.msra.mxu1 %v1639_v23  ;;  %v1681_v51 = vld [vmem:[%s2119_s20 + $0xa0] ss:$8 sps:$4 sm:$0xff]   ;;  %v1683_v53 = vld [vmem:[%s2119_s20 + $0xb4] ss:$8 sps:$4 sm:$0xff]   ;;  %v1687_v55 = vld [vmem:[%s2119_s20 + $0xb0] ss:$8 sps:$4 sm:$0xff]  }
  0x7e   : > { %1150 = vmatpush1.bf16.msra.mxu0 %v1640_v24  ;;  %1108 = vmatprep.subr.bf16.mxu1 %v1641_v25  ;;  %v1682_v52 = vld [vmem:[%s2119_s20 + $0x1a0] ss:$8 sps:$4 sm:$0xff]   ;;  %v1685_v54 = vld [vmem:[%s2119_s20 + $0x1b4] ss:$8 sps:$4 sm:$0xff]   ;;  %v1688_v57 = vld [vmem:[%s2119_s20 + $0x1b0] ss:$8 sps:$4 sm:$0xff]  }
  0x7f   : > { %1151 = vmatprep.subr.bf16.mxu0 %v1643_v26  ;;  %v1715_v56 = vld [vmem:[%s2117_s22 + $0x4] ss:$16 sps:$4 sm:$0xff]   ;;  %v1718_v60 = vld [vmem:[%s2117_s22 + $0xc] ss:$16 sps:$4 sm:$0xff]   ;;  %v1693_v61 = vld [vmem:[%s2119_s20 + $0xc0] ss:$8 sps:$4 sm:$0xff]  }
  0x80   : > { %v1689_v58 = vld [vmem:[%s2119_s20 + $0xc4] ss:$8 sps:$4 sm:$0xff]   ;;  %1132 = vmatprep.mubr.bf16.mxu1 %v1715_v56  ;;  %1175 = vmatprep.mubr.bf16.mxu0 %v1718_v60  ;;  %v1694_v62 = vld [vmem:[%s2119_s20 + $0x1c0] ss:$8 sps:$4 sm:$0xff]   ;;  %v1695_v63 = vld [vmem:[%s2119_s20 + $0xd4] ss:$8 sps:$4 sm:$0xff]  }
  0x81   : > { %1109 = vmatpush1.bf16.msra.mxu1 %v1645_v27  ;;  %v1691_v59 = vld [vmem:[%s2119_s20 + $0x1c4] ss:$8 sps:$4 sm:$0xff]   ;;  %v1697_v0 = vld [vmem:[%s2119_s20 + $0x1d4] ss:$8 sps:$4 sm:$0xff]   ;;  %v1699_v1 = vld [vmem:[%s2119_s20 + $0xd0] ss:$8 sps:$4 sm:$0xff]  }
  0x82   : > { %1152 = vmatpush1.bf16.msra.mxu0 %v1646_v28  ;;  %1110 = vmatprep.subr.bf16.mxu1 %v1647_v29  ;;  %v1700_v2 = vld [vmem:[%s2119_s20 + $0x1d0] ss:$8 sps:$4 sm:$0xff]   ;;  %v1701_v3 = vld [vmem:[%s2119_s20 + $0xe4] ss:$8 sps:$4 sm:$0xff]   ;;  %v1705_v5 = vld [vmem:[%s2119_s20 + $0xe0] ss:$8 sps:$4 sm:$0xff]  }
  0x83   : > { %1153 = vmatprep.subr.bf16.mxu0 %v1649_v30  ;;  %v1703_v4 = vld [vmem:[%s2119_s20 + $0x1e4] ss:$8 sps:$4 sm:$0xff]   ;;  %v1706_v6 = vld [vmem:[%s2119_s20 + $0x1e0] ss:$8 sps:$4 sm:$0xff]   ;;  %v1707_v7 = vld [vmem:[%s2119_s20 + $0xf4] ss:$8 sps:$4 sm:$0xff]  }
  0x84   : > { %v1709_v8 = vld [vmem:[%s2119_s20 + $0x1f4] ss:$8 sps:$4 sm:$0xff]   ;;  %v1711_v9 = vld [vmem:[%s2119_s20 + $0xf0] ss:$8 sps:$4 sm:$0xff]   ;;  %v688_v14 = vld [vmem:[#allocation2] sm:$0xff]  ;;  %p1514_p6 = scmp.ne.s32.totalorder %s1789_s24, 8 }
  0x85   : > { %1111 = vmatpush1.bf16.msra.mxu1 %v1651_v31  ;;  %v1712_v10 = vld [vmem:[%s2119_s20 + $0x1f0] ss:$8 sps:$4 sm:$0xff]   ;;  %v689_v18 = vld [vmem:[#allocation2 + $0x8] sm:$0xff] }
  0x86   : > { %1154 = vmatpush1.bf16.msra.mxu0 %v1652_v32  ;;  %1112 = vmatprep.subr.bf16.mxu1 %v1653_v33  ;;  %v1713_v11 = vld [vmem:[%s2117_s22] ss:$16 sps:$4 sm:$0xff]   ;;  %v1716_v12 = vld [vmem:[%s2117_s22 + $0x8] ss:$16 sps:$4 sm:$0xff]   ;;  %v1204_v33 = vlaneseq (!%p1514_p6) }
  0x87   : > { %1155 = vmatprep.subr.bf16.mxu0 %v1655_v34  ;;  %v690_v22 = vld [vmem:[#allocation2 + $0x10] sm:$0xff]  ;;  %v691_v27 = vld [vmem:[#allocation2 + $0x18] sm:$0xff] }
  0x88   : > { %v1205_v34 = vshrl.u32 (!%p1514_p6), %v1204_v33, 7 }
  0x89   : > { %1113 = vmatpush1.bf16.msra.mxu1 %v1657_v35  ;;  %v1202_v35 = vld [vmem:[%s669_s29] sm:$0x3] (!%p1514_p6) }
  0x8a   : > { %1156 = vmatpush1.bf16.msra.mxu0 %v1658_v36  ;;  %1114 = vmatprep.subr.bf16.mxu1 %v1659_v37  ;;  %v1218_v36 = vld [vmem:[%s674_s6] sm:$0x3] (!%p1514_p6) }
  0x8b   : > { %1157 = vmatprep.subr.bf16.mxu0 %v1661_v38  ;;  %v1206_v38 = vsub.s32 (!%p1514_p6), 0, %v1205_v34 }
  0x8d   : > { %1115 = vmatpush1.bf16.msra.mxu1 %v1663_v39  ;;  %v1210_v39 = vsub.s32 (!%p1514_p6), 1, %v1205_v34 }
  0x8e   : > { %1158 = vmatpush1.bf16.msra.mxu0 %v1664_v40  ;;  %1116 = vmatprep.subr.bf16.mxu1 %v1665_v41 }
  0x8f   : > { %1159 = vmatprep.subr.bf16.mxu0 %v1667_v42 }
  0x91   : > { %1117 = vmatpush1.bf16.msra.mxu1 %v1669_v43  ;;  %v1207_v43 = vrot.slane (!%p1514_p6), %v1202_v35, %v1206_v38 }
  0x92   : > { %1160 = vmatpush1.bf16.msra.mxu0 %v1670_v44  ;;  %1118 = vmatprep.subr.bf16.mxu1 %v1671_v45  ;;  %v1223_v44 = vrot.slane (!%p1514_p6), %v1218_v36, %v1206_v38  ;;  %v1211_v45 = vrot.slane (!%p1514_p6), %v1202_v35, %v1210_v39 }
  0x93   : > { %1161 = vmatprep.subr.bf16.mxu0 %v1673_v46  ;;  %v1227_v46 = vrot.slane (!%p1514_p6), %v1218_v36, %v1210_v39 }
  0x95   : > { %1119 = vmatpush1.bf16.msra.mxu1 %v1675_v47 }
  0x96   : > { %1162 = vmatpush1.bf16.msra.mxu0 %v1676_v48  ;;  %1120 = vmatprep.subr.bf16.mxu1 %v1677_v49  ;;  %v1234_v48 = vld [vmem:[%s2121_s18] sm:$0xff] (!%p1514_p6) }
  0x97   : > { %1163 = vmatprep.subr.bf16.mxu0 %v1679_v50 }
  0x99   : > { %1121 = vmatpush1.bf16.msra.mxu1 %v1681_v51 }
  0x9a   : > { %1164 = vmatpush1.bf16.msra.mxu0 %v1682_v52  ;;  %1122 = vmatprep.subr.bf16.mxu1 %v1683_v53  ;;  %v1235_v52 = vld [vmem:[%s2121_s18 + $0x8] sm:$0xff] (!%p1514_p6)  ;;  %v1236_v53 = vld [vmem:[%s2121_s18 + $0x10] sm:$0xff] (!%p1514_p6) }
  0x9b   : > { %1165 = vmatprep.subr.bf16.mxu0 %v1685_v54  ;;  %v1237_v54 = vld [vmem:[%s2121_s18 + $0x18] sm:$0xff] (!%p1514_p6) }
  0x9d   : > { %1123 = vmatpush1.bf16.msra.mxu1 %v1687_v55 }
  0x9e   : > { %1166 = vmatpush1.bf16.msra.mxu0 %v1688_v57  ;;  %1124 = vmatprep.subr.bf16.mxu1 %v1689_v58 }
  0x9f   : > { %1167 = vmatprep.subr.bf16.mxu0 %v1691_v59 }
  0xa1   : > { %1125 = vmatpush1.bf16.msra.mxu1 %v1693_v61 }
  0xa2   : > { %1168 = vmatpush1.bf16.msra.mxu0 %v1694_v62  ;;  %1126 = vmatprep.subr.bf16.mxu1 %v1695_v63 }
  0xa3   : > { %1169 = vmatprep.subr.bf16.mxu0 %v1697_v0 }
  0xa5   : > { %1127 = vmatpush1.bf16.msra.mxu1 %v1699_v1 }
  0xa6   : > { %1170 = vmatpush1.bf16.msra.mxu0 %v1700_v2  ;;  %1128 = vmatprep.subr.bf16.mxu1 %v1701_v3 }
  0xa7   : > { %1171 = vmatprep.subr.bf16.mxu0 %v1703_v4 }
  0xa9   : > { %1129 = vmatpush1.bf16.msra.mxu1 %v1705_v5 }
  0xaa   : > { %1172 = vmatpush1.bf16.msra.mxu0 %v1706_v6  ;;  %1130 = vmatprep.subr.bf16.mxu1 %v1707_v7 }
  0xab   : > { %1173 = vmatprep.subr.bf16.mxu0 %v1709_v8 }
  0xad   : > { %1131 = vmatpush1.bf16.msra.mxu1 %v1711_v9 }
  0xae   : > { %1174 = vmatpush1.bf16.msra.mxu0 %v1712_v10 }
  0xb0   : > { %1133 = vmatmul.mubr.bf16.vlgmr.msra.gmra.mrb[0].mxu1 %v1713_v11 }
  0xb1   : > { %1176 = vmatmul.mubr.bf16.vlgmr.msra.gmra.mrb[0].mxu0 %v1716_v12 }
 0x183   : > { %v1134_v13 = vpop.f32.mrb[0].mxu1 }
 0x184   : > { %v1177_v15 = vpop.f32.mrb[0].mxu0  ;;  %v1136_v17 = vpop.f32.mrb[1].mxu1 }
 0x185   : > { %v1178_v16 = vadd.f32 %v1177_v15, %v1134_v13  ;;  %v1179_v19 = vpop.f32.mrb[1].mxu0  ;;  %v1138_v21 = vpop.f32.mrb[2].mxu1 }
 0x186   : > { %v1180_v20 = vadd.f32 %v1179_v19, %v1136_v17  ;;  %v1181_v23 = vpop.f32.mrb[2].mxu0  ;;  %v1140_v26 = vpop.f32.mrb[3].mxu1  ;;  %1197 = sbr.rel (%p1514_p6) target bundleno = 413 (0x19d), region = 132 }
 0x187   : > { %v1186_v24 = vadd.f32 %v1178_v16, %v688_v14  ;;  %v1182_v25 = vadd.f32 %v1181_v23, %v1138_v21  ;;  %v1183_v28 = vpop.f32.mrb[3].mxu0 }
 0x188   : > { %v1187_v29 = vadd.f32 %v1180_v20, %v689_v18  ;;  %v1184_v30 = vadd.f32 %v1183_v28, %v1140_v26 }
 0x189   : > { %1190 = vst [vmem:[#allocation2] sm:$0xff] %v1186_v24  ;;  %v1188_v31 = vadd.f32 %v1182_v25, %v690_v22 }
 0x18a   : > { %1191 = vst [vmem:[#allocation2 + $0x8] sm:$0xff] %v1187_v29  ;;  %v1189_v32 = vadd.f32 %v1184_v30, %v691_v27 }
 0x18b   : > { %1192 = vst [vmem:[#allocation2 + $0x10] sm:$0xff] %v1188_v31 }
 0x18c   : > { %1193 = vst [vmem:[#allocation2 + $0x18] sm:$0xff] %v1189_v32 }
 0x190   : > { %v1198_v37 = vld [vmem:[#allocation2] sm:$0xff] }
 0x191   : > { %v1199_v40 = vld [vmem:[#allocation2 + $0x8] sm:$0xff]  ;;  %v1214_v47 = vmul.f32 %v1207_v43, %v1198_v37 }
 0x192   : > { %v1200_v41 = vld [vmem:[#allocation2 + $0x10] sm:$0xff]  ;;  %v1215_v49 = vmul.f32 %v1211_v45, %v1199_v40 }
 0x193   : > { %v1201_v42 = vld [vmem:[#allocation2 + $0x18] sm:$0xff]  ;;  %v1216_v50 = vmul.f32 %v1207_v43, %v1200_v41  ;;  %v1230_v55 = vadd.f32 %v1223_v44, %v1214_v47 }
 0x194   : > { %v1217_v51 = vmul.f32 %v1211_v45, %v1201_v42  ;;  %v1231_v56 = vadd.f32 %v1227_v46, %v1215_v49 }
 0x195   : > { %v1232_v57 = vadd.f32 %v1223_v44, %v1216_v50  ;;  %v1238_v59 = vadd.f32 %v1234_v48, %v1230_v55 }
 0x196   : > { %v1233_v58 = vadd.f32 %v1227_v46, %v1217_v51  ;;  %v1239_v60 = vadd.f32 %v1235_v52, %v1231_v56 }
 0x197   : > { %v1240_v61 = vadd.f32 %v1236_v53, %v1232_v57  ;;  %v1242_v63 = vmax.f32 %v1238_v59, 0.0 }
 0x198   : > { %v1241_v62 = vadd.f32 %v1237_v54, %v1233_v58  ;;  %v1243_v0 = vmax.f32 %v1239_v60, 0.0 }
 0x199   : > { %v1244_v1 = vmax.f32 %v1240_v61, 0.0  ;;  %1246 = vst [vmem:[%s2123_s23] sm:$0xff] %v1242_v63 }
 0x19a   : > { %v1245_v2 = vmax.f32 %v1241_v62, 0.0  ;;  %1247 = vst [vmem:[%s2123_s23 + $0x8] sm:$0xff] %v1243_v0 }
 0x19b   : > { %1248 = vst [vmem:[%s2123_s23 + $0x10] sm:$0xff] %v1244_v1 }
 0x19c   : > { %1249 = vst [vmem:[%s2123_s23 + $0x18] sm:$0xff] %v1245_v2 }
 0x19d PF: > { %1256 = sbr.rel (!%p1942_p13) target bundleno = 421 (0x1a5), region = 136  ;;  %s1523_s24 = sshll.u32 (%p1942_p13), %s1793_s25, 4 }
 0x19e   : > { %s1262_s11 = scalar_lea.vmem (%p1942_p13), %s2261_s5, %s1523_s24 }
 0x1a0   : > { %v1275_v3 = vld [vmem:[%s2123_s23] sm:$0xff] (%p1942_p13) }
 0x1a1   : > { %v1277_v4 = vld [vmem:[%s2123_s23 + $0x8] sm:$0xff] (%p1942_p13)  ;;  %1276 = vst [vmem:[%s1262_s11] sm:$0xff] (%p1942_p13), %v1275_v3 }
 0x1a2   : > { %v1279_v5 = vld [vmem:[%s2123_s23 + $0x10] sm:$0xff] (%p1942_p13)  ;;  %1278 = vst [vmem:[%s1262_s11 + $0x8] sm:$0xff] (%p1942_p13), %v1277_v4 }
 0x1a3   : > { %v1281_v6 = vld [vmem:[%s2123_s23 + $0x18] sm:$0xff] (%p1942_p13)  ;;  %1280 = vst [vmem:[%s1262_s11 + $0x20] sm:$0xff] (%p1942_p13), %v1279_v5 }
 0x1a4   : > { %1282 = vst [vmem:[%s1262_s11 + $0x28] sm:$0xff] %v1281_v6 }
 0x1a5 PF: > { %s15_s28 = sadd.s32 1, %s1805_s28   ;;  %s2275_s22 = sld [smem:[#allocation7_spill]] }
 0x1a6   : > { %p12_p7 = scmp.ge.s32.totalorder %s15_s28, 20   ;;  %s2276_s23 = sld [smem:[#allocation10_spill]] }
 0x1a7   : > { %s2277_s8 = sld [smem:[#allocation8_spill]]  ;;  %s2278_s14 = sld [smem:[#allocation9_spill]] }
 0x1a8   : > { %s2279_s18 = smov %s1769_s19  ;;  %s2280_s19 = smov %s1934_s17 }
 0x1a9   : > { %s2281_s20 = smov %s1777_s21  ;;  %s2282_s21 = smov %s1931_s16 }
 0x1aa   : > { %s2283_s24 = smov %s1797_s26  ;;  %s2284_s25 = smov %s1801_s27 }
 0x1ab   :  { %14 = sbr.rel (!%p12_p7) target bundleno = 8 (0x8), region = 212 }
 0x1ad   : > { %s2285_s26 = smov %s2277_s8  ;;  %s2286_s27 = smov %s2278_s14 }

// kernel: resnet_up_forward.45
= control target key start
LH: loop header
LB: loop body
LE: loop exit
PB: predicated region body
PF: predicated region fallthrough
CT: control target
= control target key end

     0   :  { %s2114_s0 = inlined_call_operand.vmem [shape: bf16[16,4608], index: 0, kind: input, shape index: {}]   ;;  %s2115_s1 = inlined_call_operand.vmem [shape: bf16[4608,512], index: 1, kind: input, shape index: {}]   ;;  %s2116_s2 = inlined_call_operand.vmem [shape: f32[1,512], index: 2, kind: input, shape index: {}]   ;;  %s2117_s3 = inlined_call_operand.vmem [shape: f32[1,512], index: 3, kind: input, shape index: {}]   ;;  %s2118_s4 = inlined_call_operand.vmem [shape: f32[16,512], index: 4, kind: output, shape index: {}]  }
   0x1   :  { %2121 = sst [smem:[#allocation8_spill]] %s2114_s0 }
   0x2   :  { %2122 = sst [smem:[#allocation9_spill]] %s2115_s1 }
   0x3   :  { %s1719_s15 = smov 0   ;;  %s1721_s16 = smov 0  }
   0x4   :  { %s1723_s17 = smov 0   ;;  %s1725_s18 = smov 0  }
   0x5   :  { %s1727_s19 = smov 0   ;;  %s1729_s20 = smov 0  }
   0x6   :  { %s1731_s21 = smov 0   ;;  %s1733_s22 = smov 0  }
   0x7   :  { %s1735_s23 = smov 0   ;;  %s1737_s24 = smov 0  }
   0x8   :  { %s1739_s25 = smov 0  }
   0x9 LB: > { %s1314_s26 = sadd.s32 4294967295, %s1691_s25   ;;  %s26_s27 = sadd.s32 1, %s1683_s23  ;;  %s1691_s25 = sphi %s1739_s25, %s14_s25   ;;  %s1687_s24 = sphi %s1737_s24, %s2141_s24   ;;  %s1683_s23 = sphi %s1735_s23, %s2140_s23   ;;  %s1679_s22 = sphi %s1733_s22, %s2139_s22   ;;  %s1675_s21 = sphi %s1731_s21, %s2138_s21   ;;  %s1671_s20 = sphi %s1729_s20, %s2137_s20   ;;  %s1667_s19 = sphi %s1727_s19, %s2136_s19   ;;  %s1663_s18 = sphi %s1725_s18, %s2135_s18   ;;  %s1659_s17 = sphi %s1723_s17, %s2134_s17   ;;  %s1655_s16 = sphi %s1721_s16, %s2133_s16   ;;  %s1651_s15 = sphi %s1719_s15, %s2132_s15  }
   0xa   : > { %p27_p0 = scmp.ge.s32.totalorder %s26_s27, 9  ;;  %s29_s28 = sadd.s32 1, %s1687_s24 }
   0xb   : > { %s42_s29 = sadd.s32 1, %s1671_s20  ;;  %p49_p1 = scmp.ne.s32.totalorder %s1671_s20, %s1667_s19 }
   0xc   : > { %s2143_s27 = smov (%p27_p0, %s26_s27), 0  ;;  %s2145_s28 = smov (!%p27_p0, %s29_s28), %s1687_s24 }
   0xd   : > { %2123 = sst [smem:[#allocation6_spill]] %s2143_s27  ;;  %s38_s30 = ssub.s32 %s1683_s23, %s2143_s27 }
   0xe   : > { %p50_p2 = scmp.eq.s32.totalorder %s1691_s25, 0  ;;  %p31_p3 = scmp.ge.s32.totalorder %s2145_s28, 2 }
   0xf   : > { %p40_p4 = scmp.eq.s32.totalorder %s38_s30, 0  ;;  %s70_s6 = sadd.s32 1, %s1663_s18 }
  0x10   : > { %p1786_p5 = por %p50_p2, %p49_p1  ;;  %s2147_s28 = smov (%p31_p3, %s2145_s28), 0 }
  0x11   : > { %2125 = sst [smem:[#allocation7_spill]] %s2147_s28  ;;  %s66_s8 = ssub.s32 %s1687_s24, %s2147_s28 }
  0x12   : > { %s1794_s7 = scalar_select %p40_p4, %s1671_s20, %s42_s29  }
  0x13   : > { %p77_p6 = scmp.ne.s32.totalorder %s1663_s18, %s1659_s17  ;;  %s67_s9 = sor.u32 %s66_s8, %s38_s30 }
  0x14   : > { %p148_p7 = scmp.eq.s32.totalorder %s66_s8, 0  ;;  %p68_p8 = scmp.eq.s32.totalorder %s67_s9, 0 }
  0x15   : > { %p1800_p9 = por %p77_p6, %p50_p2  ;;  %s150_s11 = sadd.s32 1, %s1655_s16 }
  0x16   : > { %p160_p10 = scmp.ne.s32.totalorder %s1655_s16, %s1651_s15  ;;  %p161_p11 = scmp.eq.s32.totalorder %s1314_s26, 17 }
  0x17   : > { %s1808_s12 = scalar_select %p68_p8, %s1663_s18, %s70_s6  }
  0x18   : > { %s1811_s13 = scalar_select %p148_p7, %s1655_s16, %s150_s11  }
  0x19   : > { %p1813_p12 = por %p161_p11, %p160_p10  ;;  %p1317_p13 = scmp.ge.s32.totalorder %s1691_s25, 18 }
  0x1b   : > { %183 = sbr.rel (%p1317_p13) target bundleno = 88 (0x58), region = 16 }
  0x22   : > { %186 = sbr.rel (!%p1786_p5) target bundleno = 46 (0x2e), region = 20  ;;  %s188_s29 = sand.u32 (%p1786_p5), 1, %s1671_s20  }
  0x23   : > { %s1407_s30 = sshll.u32 (%p1786_p5), %s1683_s23, 4  ;;  %s1318_s8 = sshll.u32 (%p1786_p5), %s188_s29, 5 }
  0x24   : > { %s2128_s0 = sld [smem:[#allocation8_spill]] (%p1786_p5)  ;;  %s190_s26 = scalar_lea.vmem (%p1786_p5), [#allocation3], %s1318_s8 }
  0x2a   : > { %s196_s11 = scalar_lea.vmem %s2128_s0, %s1407_s30 }
  0x2b   : > { %v209_v0 = vld [vmem:[%s196_s11] sm:$0xff]  ;;  %v211_v1 = vld [vmem:[%s196_s11 + $0x8] sm:$0xff]  ;;  %v213_v2 = vld [vmem:[%s196_s11 + $0x90] sm:$0xff] }
  0x2c   : > { %210 = vst [vmem:[%s190_s26] sm:$0xff] %v209_v0  ;;  %212 = vst [vmem:[%s190_s26 + $0x8] sm:$0xff] %v211_v1  ;;  %v215_v3 = vld [vmem:[%s196_s11 + $0x98] sm:$0xff] }
  0x2d   : > { %214 = vst [vmem:[%s190_s26 + $0x10] sm:$0xff] %v213_v2  ;;  %216 = vst [vmem:[%s190_s26 + $0x18] sm:$0xff] %v215_v3 }
  0x2e PF: > { %222 = sbr.rel (!%p1800_p9) target bundleno = 88 (0x58), region = 43  ;;  %s224_s5 = sand.u32 (%p1800_p9), 1, %s1663_s18  }
  0x2f   : > { %s1323_s29 = sshll.u32 (%p1800_p9), %s1687_s24, 1  ;;  %s1321_s6 = sshll.u32 (%p1800_p9), %s224_s5, 9 }
  0x30   : > { %s1408_s30 = sshll.u32 (%p1800_p9), %s1683_s23, 8  ;;  %s2129_s1 = sld [smem:[#allocation9_spill]] (%p1800_p9) }
  0x31   : > { %s230_s9 = sadd.s32 (%p1800_p9), %s1408_s30, %s1323_s29  ;;  %s1838_s10 = scalar_lea.vmem (%p1800_p9), [#allocation4], %s1321_s6 }
  0x32   : > { %s1325_s0 = sshll.u32 (%p1800_p9), %s230_s9, 2 }
  0x36   : > { %s1833_s27 = scalar_lea.vmem %s2129_s1, %s1325_s0 }
  0x37   : > { %v386_v4 = vld [vmem:[%s1833_s27] sm:$0xff]  ;;  %v388_v5 = vld [vmem:[%s1833_s27 + $0x10] sm:$0xff] }
  0x38   : > { %v390_v6 = vld [vmem:[%s1833_s27 + $0x20] sm:$0xff]  ;;  %387 = vst [vmem:[%s1838_s10] sm:$0xff] %v386_v4  ;;  %389 = vst [vmem:[%s1838_s10 + $0x8] sm:$0xff] %v388_v5  ;;  %v392_v7 = vld [vmem:[%s1833_s27 + $0x30] sm:$0xff] }
  0x39   : > { %391 = vst [vmem:[%s1838_s10 + $0x10] sm:$0xff] %v390_v6  ;;  %v394_v8 = vld [vmem:[%s1833_s27 + $0x40] sm:$0xff]  ;;  %v396_v9 = vld [vmem:[%s1833_s27 + $0x50] sm:$0xff]  ;;  %393 = vst [vmem:[%s1838_s10 + $0x18] sm:$0xff] %v392_v7 }
  0x3a   : > { %395 = vst [vmem:[%s1838_s10 + $0x20] sm:$0xff] %v394_v8  ;;  %397 = vst [vmem:[%s1838_s10 + $0x28] sm:$0xff] %v396_v9  ;;  %v398_v10 = vld [vmem:[%s1833_s27 + $0x60] sm:$0xff]  ;;  %v400_v11 = vld [vmem:[%s1833_s27 + $0x70] sm:$0xff] }
  0x3b   : > { %v402_v12 = vld [vmem:[%s1833_s27 + $0x80] sm:$0xff]  ;;  %399 = vst [vmem:[%s1838_s10 + $0x30] sm:$0xff] %v398_v10  ;;  %401 = vst [vmem:[%s1838_s10 + $0x38] sm:$0xff] %v400_v11  ;;  %v404_v13 = vld [vmem:[%s1833_s27 + $0x90] sm:$0xff] }
  0x3c   : > { %403 = vst [vmem:[%s1838_s10 + $0x40] sm:$0xff] %v402_v12  ;;  %v406_v14 = vld [vmem:[%s1833_s27 + $0xa0] sm:$0xff]  ;;  %v408_v15 = vld [vmem:[%s1833_s27 + $0xb0] sm:$0xff]  ;;  %405 = vst [vmem:[%s1838_s10 + $0x48] sm:$0xff] %v404_v13 }
  0x3d   : > { %407 = vst [vmem:[%s1838_s10 + $0x50] sm:$0xff] %v406_v14  ;;  %409 = vst [vmem:[%s1838_s10 + $0x58] sm:$0xff] %v408_v15  ;;  %v410_v16 = vld [vmem:[%s1833_s27 + $0xc0] sm:$0xff]  ;;  %v412_v17 = vld [vmem:[%s1833_s27 + $0xd0] sm:$0xff] }
  0x3e   : > { %v414_v18 = vld [vmem:[%s1833_s27 + $0xe0] sm:$0xff]  ;;  %411 = vst [vmem:[%s1838_s10 + $0x60] sm:$0xff] %v410_v16  ;;  %413 = vst [vmem:[%s1838_s10 + $0x68] sm:$0xff] %v412_v17  ;;  %v416_v19 = vld [vmem:[%s1833_s27 + $0xf0] sm:$0xff] }
  0x3f   : > { %415 = vst [vmem:[%s1838_s10 + $0x70] sm:$0xff] %v414_v18  ;;  %v418_v20 = vld [vmem:[%s1833_s27 + $0x100] sm:$0xff]  ;;  %v420_v21 = vld [vmem:[%s1833_s27 + $0x110] sm:$0xff]  ;;  %417 = vst [vmem:[%s1838_s10 + $0x78] sm:$0xff] %v416_v19 }
  0x40   : > { %419 = vst [vmem:[%s1838_s10 + $0x80] sm:$0xff] %v418_v20  ;;  %421 = vst [vmem:[%s1838_s10 + $0x88] sm:$0xff] %v420_v21  ;;  %v422_v22 = vld [vmem:[%s1833_s27 + $0x120] sm:$0xff]  ;;  %v424_v23 = vld [vmem:[%s1833_s27 + $0x130] sm:$0xff] }
  0x41   : > { %v426_v24 = vld [vmem:[%s1833_s27 + $0x140] sm:$0xff]  ;;  %423 = vst [vmem:[%s1838_s10 + $0x90] sm:$0xff] %v422_v22  ;;  %425 = vst [vmem:[%s1838_s10 + $0x98] sm:$0xff] %v424_v23  ;;  %v428_v25 = vld [vmem:[%s1833_s27 + $0x150] sm:$0xff] }
  0x42   : > { %427 = vst [vmem:[%s1838_s10 + $0xa0] sm:$0xff] %v426_v24  ;;  %v430_v26 = vld [vmem:[%s1833_s27 + $0x160] sm:$0xff]  ;;  %v432_v27 = vld [vmem:[%s1833_s27 + $0x170] sm:$0xff]  ;;  %429 = vst [vmem:[%s1838_s10 + $0xa8] sm:$0xff] %v428_v25 }
  0x43   : > { %431 = vst [vmem:[%s1838_s10 + $0xb0] sm:$0xff] %v430_v26  ;;  %433 = vst [vmem:[%s1838_s10 + $0xb8] sm:$0xff] %v432_v27  ;;  %v434_v28 = vld [vmem:[%s1833_s27 + $0x180] sm:$0xff]  ;;  %v436_v29 = vld [vmem:[%s1833_s27 + $0x190] sm:$0xff] }
  0x44   : > { %v438_v30 = vld [vmem:[%s1833_s27 + $0x1a0] sm:$0xff]  ;;  %435 = vst [vmem:[%s1838_s10 + $0xc0] sm:$0xff] %v434_v28  ;;  %437 = vst [vmem:[%s1838_s10 + $0xc8] sm:$0xff] %v436_v29  ;;  %v440_v31 = vld [vmem:[%s1833_s27 + $0x1b0] sm:$0xff] }
  0x45   : > { %439 = vst [vmem:[%s1838_s10 + $0xd0] sm:$0xff] %v438_v30  ;;  %v442_v32 = vld [vmem:[%s1833_s27 + $0x1c0] sm:$0xff]  ;;  %v444_v33 = vld [vmem:[%s1833_s27 + $0x1d0] sm:$0xff]  ;;  %441 = vst [vmem:[%s1838_s10 + $0xd8] sm:$0xff] %v440_v31 }
  0x46   : > { %443 = vst [vmem:[%s1838_s10 + $0xe0] sm:$0xff] %v442_v32  ;;  %445 = vst [vmem:[%s1838_s10 + $0xe8] sm:$0xff] %v444_v33  ;;  %v446_v34 = vld [vmem:[%s1833_s27 + $0x1e0] sm:$0xff]  ;;  %v448_v35 = vld [vmem:[%s1833_s27 + $0x1f0] sm:$0xff] }
  0x47   : > { %v450_v36 = vld [vmem:[%s1833_s27 + $0x200] sm:$0xff]  ;;  %447 = vst [vmem:[%s1838_s10 + $0xf0] sm:$0xff] %v446_v34  ;;  %449 = vst [vmem:[%s1838_s10 + $0xf8] sm:$0xff] %v448_v35  ;;  %v452_v37 = vld [vmem:[%s1833_s27 + $0x210] sm:$0xff] }
  0x48   : > { %451 = vst [vmem:[%s1838_s10 + $0x100] sm:$0xff] %v450_v36  ;;  %v454_v38 = vld [vmem:[%s1833_s27 + $0x220] sm:$0xff]  ;;  %v456_v39 = vld [vmem:[%s1833_s27 + $0x230] sm:$0xff]  ;;  %453 = vst [vmem:[%s1838_s10 + $0x108] sm:$0xff] %v452_v37 }
  0x49   : > { %455 = vst [vmem:[%s1838_s10 + $0x110] sm:$0xff] %v454_v38  ;;  %457 = vst [vmem:[%s1838_s10 + $0x118] sm:$0xff] %v456_v39  ;;  %v458_v40 = vld [vmem:[%s1833_s27 + $0x240] sm:$0xff]  ;;  %v460_v41 = vld [vmem:[%s1833_s27 + $0x250] sm:$0xff] }
  0x4a   : > { %v462_v42 = vld [vmem:[%s1833_s27 + $0x260] sm:$0xff]  ;;  %459 = vst [vmem:[%s1838_s10 + $0x120] sm:$0xff] %v458_v40  ;;  %461 = vst [vmem:[%s1838_s10 + $0x128] sm:$0xff] %v460_v41  ;;  %v464_v43 = vld [vmem:[%s1833_s27 + $0x270] sm:$0xff] }
  0x4b   : > { %463 = vst [vmem:[%s1838_s10 + $0x130] sm:$0xff] %v462_v42  ;;  %v466_v44 = vld [vmem:[%s1833_s27 + $0x280] sm:$0xff]  ;;  %v468_v45 = vld [vmem:[%s1833_s27 + $0x290] sm:$0xff]  ;;  %465 = vst [vmem:[%s1838_s10 + $0x138] sm:$0xff] %v464_v43 }
  0x4c   : > { %467 = vst [vmem:[%s1838_s10 + $0x140] sm:$0xff] %v466_v44  ;;  %469 = vst [vmem:[%s1838_s10 + $0x148] sm:$0xff] %v468_v45  ;;  %v470_v46 = vld [vmem:[%s1833_s27 + $0x2a0] sm:$0xff]  ;;  %v472_v47 = vld [vmem:[%s1833_s27 + $0x2b0] sm:$0xff] }
  0x4d   : > { %v474_v48 = vld [vmem:[%s1833_s27 + $0x2c0] sm:$0xff]  ;;  %471 = vst [vmem:[%s1838_s10 + $0x150] sm:$0xff] %v470_v46  ;;  %473 = vst [vmem:[%s1838_s10 + $0x158] sm:$0xff] %v472_v47  ;;  %v476_v49 = vld [vmem:[%s1833_s27 + $0x2d0] sm:$0xff] }
  0x4e   : > { %475 = vst [vmem:[%s1838_s10 + $0x160] sm:$0xff] %v474_v48  ;;  %v478_v50 = vld [vmem:[%s1833_s27 + $0x2e0] sm:$0xff]  ;;  %v480_v51 = vld [vmem:[%s1833_s27 + $0x2f0] sm:$0xff]  ;;  %477 = vst [vmem:[%s1838_s10 + $0x168] sm:$0xff] %v476_v49 }
  0x4f   : > { %479 = vst [vmem:[%s1838_s10 + $0x170] sm:$0xff] %v478_v50  ;;  %481 = vst [vmem:[%s1838_s10 + $0x178] sm:$0xff] %v480_v51  ;;  %v482_v52 = vld [vmem:[%s1833_s27 + $0x300] sm:$0xff]  ;;  %v484_v53 = vld [vmem:[%s1833_s27 + $0x310] sm:$0xff] }
  0x50   : > { %v486_v54 = vld [vmem:[%s1833_s27 + $0x320] sm:$0xff]  ;;  %483 = vst [vmem:[%s1838_s10 + $0x180] sm:$0xff] %v482_v52  ;;  %485 = vst [vmem:[%s1838_s10 + $0x188] sm:$0xff] %v484_v53  ;;  %v488_v55 = vld [vmem:[%s1833_s27 + $0x330] sm:$0xff] }
  0x51   : > { %487 = vst [vmem:[%s1838_s10 + $0x190] sm:$0xff] %v486_v54  ;;  %v490_v56 = vld [vmem:[%s1833_s27 + $0x340] sm:$0xff]  ;;  %v492_v57 = vld [vmem:[%s1833_s27 + $0x350] sm:$0xff]  ;;  %489 = vst [vmem:[%s1838_s10 + $0x198] sm:$0xff] %v488_v55 }
  0x52   : > { %491 = vst [vmem:[%s1838_s10 + $0x1a0] sm:$0xff] %v490_v56  ;;  %493 = vst [vmem:[%s1838_s10 + $0x1a8] sm:$0xff] %v492_v57  ;;  %v494_v58 = vld [vmem:[%s1833_s27 + $0x360] sm:$0xff]  ;;  %v496_v59 = vld [vmem:[%s1833_s27 + $0x370] sm:$0xff] }
  0x53   : > { %v498_v60 = vld [vmem:[%s1833_s27 + $0x380] sm:$0xff]  ;;  %495 = vst [vmem:[%s1838_s10 + $0x1b0] sm:$0xff] %v494_v58  ;;  %497 = vst [vmem:[%s1838_s10 + $0x1b8] sm:$0xff] %v496_v59  ;;  %v500_v61 = vld [vmem:[%s1833_s27 + $0x390] sm:$0xff] }
  0x54   : > { %499 = vst [vmem:[%s1838_s10 + $0x1c0] sm:$0xff] %v498_v60  ;;  %v502_v62 = vld [vmem:[%s1833_s27 + $0x3a0] sm:$0xff]  ;;  %v504_v63 = vld [vmem:[%s1833_s27 + $0x3b0] sm:$0xff]  ;;  %501 = vst [vmem:[%s1838_s10 + $0x1c8] sm:$0xff] %v500_v61 }
  0x55   : > { %503 = vst [vmem:[%s1838_s10 + $0x1d0] sm:$0xff] %v502_v62  ;;  %505 = vst [vmem:[%s1838_s10 + $0x1d8] sm:$0xff] %v504_v63  ;;  %v506_v0 = vld [vmem:[%s1833_s27 + $0x3c0] sm:$0xff]  ;;  %v508_v1 = vld [vmem:[%s1833_s27 + $0x3d0] sm:$0xff] }
  0x56   : > { %v510_v2 = vld [vmem:[%s1833_s27 + $0x3e0] sm:$0xff]  ;;  %507 = vst [vmem:[%s1838_s10 + $0x1e0] sm:$0xff] %v506_v0  ;;  %509 = vst [vmem:[%s1838_s10 + $0x1e8] sm:$0xff] %v508_v1  ;;  %v512_v3 = vld [vmem:[%s1833_s27 + $0x3f0] sm:$0xff] }
  0x57   : > { %511 = vst [vmem:[%s1838_s10 + $0x1f0] sm:$0xff] %v510_v2  ;;  %513 = vst [vmem:[%s1838_s10 + $0x1f8] sm:$0xff] %v512_v3 }
  0x58 PF: > { %p1326_p0 = scmp.ge.s32.totalorder %s1691_s25, 1  ;;  %p534_p1 = scmp.lt.s32.totalorder %s1691_s25, 19 }
  0x5a   : > { %p535_p2 = pnand %p1326_p0, %p534_p1 }
  0x5b   : > { %s541_s0 = sand.u32 (!%p535_p2), 1, %s1667_s19   ;;  %s548_s28 = sand.u32 (!%p535_p2), 1, %s1659_s17  }
  0x5c   : > { %538 = sbr.rel (%p535_p2) target bundleno = 414 (0x19e), region = 89  ;;  %s1327_s11 = sshll.u32 (!%p535_p2), %s541_s0, 5 }
  0x5d   : > { %s1328_s26 = sshll.u32 (!%p535_p2), %s548_s28, 9  ;;  %s581_s5 = sand.u32 (!%p535_p2), 1, %s1651_s15  }
  0x5e   : > { %s1330_s29 = sshll.u32 (!%p535_p2), %s1679_s22, 1  ;;  %s1329_s27 = sshll.u32 (!%p535_p2), %s581_s5, 5 }
  0x5f   : > { %p589_p3 = scmp.lt.s32.totalorder (!%p535_p2), %s1330_s29, 3  ;;  %s1981_s19 = scalar_lea.vmem (!%p535_p2), [#allocation3], %s1327_s11 }
  0x60   : > { %s1983_s17 = scalar_lea.vmem (!%p535_p2), [#allocation4], %s1328_s26  ;;  %s1985_s15 = scalar_lea.vmem (!%p535_p2), [#allocation5], %s1329_s27 }
  0x61   : > { %p1332_p4 = scmp.ne.s32.totalorder (!%p535_p2), %s1675_s21, 0 }
  0x63   : > { %s2149_s29 = smov (!%p589_p3, %s1330_s29), 3  ;;  %603 = sbr.rel (%p1332_p4) target bundleno = 106 (0x6a), region = 101 }
  0x64   : > { %s591_s9 = scalar_lea.vmem %s2116_s2, %s2149_s29  ;;  %s596_s1 = scalar_lea.vmem %s2117_s3, %s2149_s29  ;;  %v1693_v4 = vmov (!%p1332_p4), 0.0  }
  0x65   : > { %604 = vst [vmem:[#allocation2] sm:$0xff] (!%p1332_p4), %v1693_v4  ;;  %605 = vst [vmem:[#allocation2 + $0x8] sm:$0xff] (!%p1332_p4), %v1693_v4 }
  0x66   : > { %606 = vst [vmem:[#allocation2 + $0x10] sm:$0xff] (!%p1332_p4), %v1693_v4  ;;  %607 = vst [vmem:[#allocation2 + $0x18] sm:$0xff] (!%p1332_p4), %v1693_v4 }
  0x6a PF: > { %v1503_v5 = vld [vmem:[%s1983_s17 + $0x4] ss:$8 sps:$4 sm:$0xff]   ;;  %v1507_v7 = vld [vmem:[%s1983_s17] ss:$8 sps:$4 sm:$0xff]   ;;  %v1509_v9 = vld [vmem:[%s1983_s17 + $0x14] ss:$8 sps:$4 sm:$0xff]  }
  0x6b   : > { %v1505_v6 = vld [vmem:[%s1983_s17 + $0x104] ss:$8 sps:$4 sm:$0xff]   ;;  %1020 = vmatprep.subr.bf16.mxu1 %v1503_v5  ;;  %v1508_v8 = vld [vmem:[%s1983_s17 + $0x100] ss:$8 sps:$4 sm:$0xff]   ;;  %v1511_v10 = vld [vmem:[%s1983_s17 + $0x114] ss:$8 sps:$4 sm:$0xff]  }
  0x6c   : > { %1063 = vmatprep.subr.bf16.mxu0 %v1505_v6  ;;  %1021 = vmatpush1.bf16.msra.mxu1 %v1507_v7  ;;  %v1513_v11 = vld [vmem:[%s1983_s17 + $0x10] ss:$8 sps:$4 sm:$0xff]   ;;  %v1515_v13 = vld [vmem:[%s1983_s17 + $0x24] ss:$8 sps:$4 sm:$0xff]   ;;  %v1519_v15 = vld [vmem:[%s1983_s17 + $0x20] ss:$8 sps:$4 sm:$0xff]  }
  0x6d   : > { %1064 = vmatpush1.bf16.msra.mxu0 %v1508_v8  ;;  %1022 = vmatprep.subr.bf16.mxu1 %v1509_v9  ;;  %v1514_v12 = vld [vmem:[%s1983_s17 + $0x110] ss:$8 sps:$4 sm:$0xff]   ;;  %v1517_v14 = vld [vmem:[%s1983_s17 + $0x124] ss:$8 sps:$4 sm:$0xff]   ;;  %v1520_v16 = vld [vmem:[%s1983_s17 + $0x120] ss:$8 sps:$4 sm:$0xff]  }
  0x6e   : > { %1065 = vmatprep.subr.bf16.mxu0 %v1511_v10  ;;  %v1521_v17 = vld [vmem:[%s1983_s17 + $0x34] ss:$8 sps:$4 sm:$0xff]   ;;  %v1525_v19 = vld [vmem:[%s1983_s17 + $0x30] ss:$8 sps:$4 sm:$0xff]   ;;  %v1527_v21 = vld [vmem:[%s1983_s17 + $0x44] ss:$8 sps:$4 sm:$0xff]  }
  0x6f   : > { %v1523_v18 = vld [vmem:[%s1983_s17 + $0x134] ss:$8 sps:$4 sm:$0xff]   ;;  %v1526_v20 = vld [vmem:[%s1983_s17 + $0x130] ss:$8 sps:$4 sm:$0xff]   ;;  %v1529_v22 = vld [vmem:[%s1983_s17 + $0x144] ss:$8 sps:$4 sm:$0xff]  }
  0x70   : > { %1023 = vmatpush1.bf16.msra.mxu1 %v1513_v11  ;;  %v1531_v23 = vld [vmem:[%s1983_s17 + $0x40] ss:$8 sps:$4 sm:$0xff]   ;;  %v1533_v25 = vld [vmem:[%s1983_s17 + $0x54] ss:$8 sps:$4 sm:$0xff]   ;;  %v1537_v27 = vld [vmem:[%s1983_s17 + $0x50] ss:$8 sps:$4 sm:$0xff]  }
  0x71   : > { %1066 = vmatpush1.bf16.msra.mxu0 %v1514_v12  ;;  %1024 = vmatprep.subr.bf16.mxu1 %v1515_v13  ;;  %v1532_v24 = vld [vmem:[%s1983_s17 + $0x140] ss:$8 sps:$4 sm:$0xff]   ;;  %v1535_v26 = vld [vmem:[%s1983_s17 + $0x154] ss:$8 sps:$4 sm:$0xff]   ;;  %v1538_v28 = vld [vmem:[%s1983_s17 + $0x150] ss:$8 sps:$4 sm:$0xff]  }
  0x72   : > { %1067 = vmatprep.subr.bf16.mxu0 %v1517_v14  ;;  %v1539_v29 = vld [vmem:[%s1983_s17 + $0x64] ss:$8 sps:$4 sm:$0xff]   ;;  %v1543_v31 = vld [vmem:[%s1983_s17 + $0x60] ss:$8 sps:$4 sm:$0xff]   ;;  %v1545_v33 = vld [vmem:[%s1983_s17 + $0x74] ss:$8 sps:$4 sm:$0xff]  }
  0x73   : > { %v1541_v30 = vld [vmem:[%s1983_s17 + $0x164] ss:$8 sps:$4 sm:$0xff]   ;;  %v1544_v32 = vld [vmem:[%s1983_s17 + $0x160] ss:$8 sps:$4 sm:$0xff]   ;;  %v1547_v34 = vld [vmem:[%s1983_s17 + $0x174] ss:$8 sps:$4 sm:$0xff]  }
  0x74   : > { %1025 = vmatpush1.bf16.msra.mxu1 %v1519_v15  ;;  %v1549_v35 = vld [vmem:[%s1983_s17 + $0x70] ss:$8 sps:$4 sm:$0xff]   ;;  %v1551_v37 = vld [vmem:[%s1983_s17 + $0x84] ss:$8 sps:$4 sm:$0xff]   ;;  %v1555_v39 = vld [vmem:[%s1983_s17 + $0x80] ss:$8 sps:$4 sm:$0xff]  }
  0x75   : > { %1068 = vmatpush1.bf16.msra.mxu0 %v1520_v16  ;;  %1026 = vmatprep.subr.bf16.mxu1 %v1521_v17  ;;  %v1550_v36 = vld [vmem:[%s1983_s17 + $0x170] ss:$8 sps:$4 sm:$0xff]   ;;  %v1553_v38 = vld [vmem:[%s1983_s17 + $0x184] ss:$8 sps:$4 sm:$0xff]   ;;  %v1556_v40 = vld [vmem:[%s1983_s17 + $0x180] ss:$8 sps:$4 sm:$0xff]  }
  0x76   : > { %1069 = vmatprep.subr.bf16.mxu0 %v1523_v18  ;;  %v1557_v41 = vld [vmem:[%s1983_s17 + $0x94] ss:$8 sps:$4 sm:$0xff]   ;;  %v1561_v43 = vld [vmem:[%s1983_s17 + $0x90] ss:$8 sps:$4 sm:$0xff]   ;;  %v1563_v45 = vld [vmem:[%s1983_s17 + $0xa4] ss:$8 sps:$4 sm:$0xff]  }
  0x77   : > { %v1559_v42 = vld [vmem:[%s1983_s17 + $0x194] ss:$8 sps:$4 sm:$0xff]   ;;  %v1562_v44 = vld [vmem:[%s1983_s17 + $0x190] ss:$8 sps:$4 sm:$0xff]   ;;  %v1565_v46 = vld [vmem:[%s1983_s17 + $0x1a4] ss:$8 sps:$4 sm:$0xff]  }
  0x78   : > { %1027 = vmatpush1.bf16.msra.mxu1 %v1525_v19  ;;  %v1567_v47 = vld [vmem:[%s1983_s17 + $0xa0] ss:$8 sps:$4 sm:$0xff]   ;;  %v1569_v49 = vld [vmem:[%s1983_s17 + $0xb4] ss:$8 sps:$4 sm:$0xff]   ;;  %v1573_v51 = vld [vmem:[%s1983_s17 + $0xb0] ss:$8 sps:$4 sm:$0xff]  }
  0x79   : > { %1070 = vmatpush1.bf16.msra.mxu0 %v1526_v20  ;;  %1028 = vmatprep.subr.bf16.mxu1 %v1527_v21  ;;  %v1568_v48 = vld [vmem:[%s1983_s17 + $0x1a0] ss:$8 sps:$4 sm:$0xff]   ;;  %v1571_v50 = vld [vmem:[%s1983_s17 + $0x1b4] ss:$8 sps:$4 sm:$0xff]   ;;  %v1574_v53 = vld [vmem:[%s1983_s17 + $0x1b0] ss:$8 sps:$4 sm:$0xff]  }
  0x7a   : > { %1071 = vmatprep.subr.bf16.mxu0 %v1529_v22  ;;  %v1601_v52 = vld [vmem:[%s1981_s19 + $0x4] ss:$16 sps:$4 sm:$0xff]   ;;  %v1604_v56 = vld [vmem:[%s1981_s19 + $0xc] ss:$16 sps:$4 sm:$0xff]   ;;  %v1579_v57 = vld [vmem:[%s1983_s17 + $0xc0] ss:$8 sps:$4 sm:$0xff]  }
  0x7b   : > { %v1575_v54 = vld [vmem:[%s1983_s17 + $0xc4] ss:$8 sps:$4 sm:$0xff]   ;;  %1052 = vmatprep.mubr.bf16.mxu1 %v1601_v52  ;;  %1095 = vmatprep.mubr.bf16.mxu0 %v1604_v56  ;;  %v1580_v58 = vld [vmem:[%s1983_s17 + $0x1c0] ss:$8 sps:$4 sm:$0xff]   ;;  %v1581_v59 = vld [vmem:[%s1983_s17 + $0xd4] ss:$8 sps:$4 sm:$0xff]  }
  0x7c   : > { %1029 = vmatpush1.bf16.msra.mxu1 %v1531_v23  ;;  %v1577_v55 = vld [vmem:[%s1983_s17 + $0x1c4] ss:$8 sps:$4 sm:$0xff]   ;;  %v1583_v60 = vld [vmem:[%s1983_s17 + $0x1d4] ss:$8 sps:$4 sm:$0xff]   ;;  %v1585_v61 = vld [vmem:[%s1983_s17 + $0xd0] ss:$8 sps:$4 sm:$0xff]  }
  0x7d   : > { %1072 = vmatpush1.bf16.msra.mxu0 %v1532_v24  ;;  %1030 = vmatprep.subr.bf16.mxu1 %v1533_v25  ;;  %v1586_v62 = vld [vmem:[%s1983_s17 + $0x1d0] ss:$8 sps:$4 sm:$0xff]   ;;  %v1587_v63 = vld [vmem:[%s1983_s17 + $0xe4] ss:$8 sps:$4 sm:$0xff]   ;;  %v1591_v1 = vld [vmem:[%s1983_s17 + $0xe0] ss:$8 sps:$4 sm:$0xff]  }
  0x7e   : > { %1073 = vmatprep.subr.bf16.mxu0 %v1535_v26  ;;  %v1589_v0 = vld [vmem:[%s1983_s17 + $0x1e4] ss:$8 sps:$4 sm:$0xff]   ;;  %v1592_v2 = vld [vmem:[%s1983_s17 + $0x1e0] ss:$8 sps:$4 sm:$0xff]   ;;  %v1593_v3 = vld [vmem:[%s1983_s17 + $0xf4] ss:$8 sps:$4 sm:$0xff]  }
  0x7f   : > { %v1595_v4 = vld [vmem:[%s1983_s17 + $0x1f4] ss:$8 sps:$4 sm:$0xff]   ;;  %v1597_v5 = vld [vmem:[%s1983_s17 + $0xf0] ss:$8 sps:$4 sm:$0xff]   ;;  %v608_v10 = vld [vmem:[#allocation2] sm:$0xff]  ;;  %p1401_p5 = scmp.ne.s32.totalorder %s1675_s21, 8 }
  0x80   : > { %1031 = vmatpush1.bf16.msra.mxu1 %v1537_v27  ;;  %v1598_v6 = vld [vmem:[%s1983_s17 + $0x1f0] ss:$8 sps:$4 sm:$0xff]   ;;  %v609_v14 = vld [vmem:[#allocation2 + $0x8] sm:$0xff] }
  0x81   : > { %1074 = vmatpush1.bf16.msra.mxu0 %v1538_v28  ;;  %1032 = vmatprep.subr.bf16.mxu1 %v1539_v29  ;;  %v1599_v7 = vld [vmem:[%s1981_s19] ss:$16 sps:$4 sm:$0xff]   ;;  %v1602_v8 = vld [vmem:[%s1981_s19 + $0x8] ss:$16 sps:$4 sm:$0xff]   ;;  %v1124_v29 = vlaneseq (!%p1401_p5) }
  0x82   : > { %1075 = vmatprep.subr.bf16.mxu0 %v1541_v30  ;;  %v610_v18 = vld [vmem:[#allocation2 + $0x10] sm:$0xff]  ;;  %v611_v23 = vld [vmem:[#allocation2 + $0x18] sm:$0xff] }
  0x83   : > { %v1125_v30 = vshrl.u32 (!%p1401_p5), %v1124_v29, 7 }
  0x84   : > { %1033 = vmatpush1.bf16.msra.mxu1 %v1543_v31  ;;  %v1122_v31 = vld [vmem:[%s591_s9] sm:$0x3] (!%p1401_p5) }
  0x85   : > { %1076 = vmatpush1.bf16.msra.mxu0 %v1544_v32  ;;  %1034 = vmatprep.subr.bf16.mxu1 %v1545_v33  ;;  %v1138_v32 = vld [vmem:[%s596_s1] sm:$0x3] (!%p1401_p5) }
  0x86   : > { %1077 = vmatprep.subr.bf16.mxu0 %v1547_v34  ;;  %v1126_v34 = vsub.s32 (!%p1401_p5), 0, %v1125_v30 }
  0x88   : > { %1035 = vmatpush1.bf16.msra.mxu1 %v1549_v35  ;;  %v1130_v35 = vsub.s32 (!%p1401_p5), 1, %v1125_v30 }
  0x89   : > { %1078 = vmatpush1.bf16.msra.mxu0 %v1550_v36  ;;  %1036 = vmatprep.subr.bf16.mxu1 %v1551_v37 }
  0x8a   : > { %1079 = vmatprep.subr.bf16.mxu0 %v1553_v38 }
  0x8c   : > { %1037 = vmatpush1.bf16.msra.mxu1 %v1555_v39  ;;  %v1127_v39 = vrot.slane (!%p1401_p5), %v1122_v31, %v1126_v34 }
  0x8d   : > { %1080 = vmatpush1.bf16.msra.mxu0 %v1556_v40  ;;  %1038 = vmatprep.subr.bf16.mxu1 %v1557_v41  ;;  %v1143_v40 = vrot.slane (!%p1401_p5), %v1138_v32, %v1126_v34  ;;  %v1131_v41 = vrot.slane (!%p1401_p5), %v1122_v31, %v1130_v35 }
  0x8e   : > { %1081 = vmatprep.subr.bf16.mxu0 %v1559_v42  ;;  %v1147_v42 = vrot.slane (!%p1401_p5), %v1138_v32, %v1130_v35 }
  0x90   : > { %1039 = vmatpush1.bf16.msra.mxu1 %v1561_v43 }
  0x91   : > { %1082 = vmatpush1.bf16.msra.mxu0 %v1562_v44  ;;  %1040 = vmatprep.subr.bf16.mxu1 %v1563_v45 }
  0x92   : > { %1083 = vmatprep.subr.bf16.mxu0 %v1565_v46 }
  0x94   : > { %1041 = vmatpush1.bf16.msra.mxu1 %v1567_v47 }
  0x95   : > { %1084 = vmatpush1.bf16.msra.mxu0 %v1568_v48  ;;  %1042 = vmatprep.subr.bf16.mxu1 %v1569_v49 }
  0x96   : > { %1085 = vmatprep.subr.bf16.mxu0 %v1571_v50 }
  0x98   : > { %1043 = vmatpush1.bf16.msra.mxu1 %v1573_v51 }
  0x99   : > { %1086 = vmatpush1.bf16.msra.mxu0 %v1574_v53  ;;  %1044 = vmatprep.subr.bf16.mxu1 %v1575_v54 }
  0x9a   : > { %1087 = vmatprep.subr.bf16.mxu0 %v1577_v55 }
  0x9c   : > { %1045 = vmatpush1.bf16.msra.mxu1 %v1579_v57 }
  0x9d   : > { %1088 = vmatpush1.bf16.msra.mxu0 %v1580_v58  ;;  %1046 = vmatprep.subr.bf16.mxu1 %v1581_v59 }
  0x9e   : > { %1089 = vmatprep.subr.bf16.mxu0 %v1583_v60 }
  0xa0   : > { %1047 = vmatpush1.bf16.msra.mxu1 %v1585_v61 }
  0xa1   : > { %1090 = vmatpush1.bf16.msra.mxu0 %v1586_v62  ;;  %1048 = vmatprep.subr.bf16.mxu1 %v1587_v63 }
  0xa2   : > { %1091 = vmatprep.subr.bf16.mxu0 %v1589_v0 }
  0xa4   : > { %1049 = vmatpush1.bf16.msra.mxu1 %v1591_v1 }
  0xa5   : > { %1092 = vmatpush1.bf16.msra.mxu0 %v1592_v2  ;;  %1050 = vmatprep.subr.bf16.mxu1 %v1593_v3 }
  0xa6   : > { %1093 = vmatprep.subr.bf16.mxu0 %v1595_v4 }
  0xa8   : > { %1051 = vmatpush1.bf16.msra.mxu1 %v1597_v5 }
  0xa9   : > { %1094 = vmatpush1.bf16.msra.mxu0 %v1598_v6 }
  0xab   : > { %1053 = vmatmul.mubr.bf16.vlgmr.msra.gmra.mrb[0].mxu1 %v1599_v7 }
  0xac   : > { %1096 = vmatmul.mubr.bf16.vlgmr.msra.gmra.mrb[0].mxu0 %v1602_v8 }
 0x17e   : > { %v1054_v9 = vpop.f32.mrb[0].mxu1 }
 0x17f   : > { %v1097_v11 = vpop.f32.mrb[0].mxu0  ;;  %v1056_v13 = vpop.f32.mrb[1].mxu1 }
 0x180   : > { %v1098_v12 = vadd.f32 %v1097_v11, %v1054_v9  ;;  %v1099_v15 = vpop.f32.mrb[1].mxu0  ;;  %v1058_v17 = vpop.f32.mrb[2].mxu1 }
 0x181   : > { %v1100_v16 = vadd.f32 %v1099_v15, %v1056_v13  ;;  %v1101_v19 = vpop.f32.mrb[2].mxu0  ;;  %v1060_v22 = vpop.f32.mrb[3].mxu1  ;;  %1117 = sbr.rel (%p1401_p5) target bundleno = 406 (0x196), region = 105 }
 0x182   : > { %v1106_v20 = vadd.f32 %v1098_v12, %v608_v10  ;;  %v1102_v21 = vadd.f32 %v1101_v19, %v1058_v17  ;;  %v1103_v24 = vpop.f32.mrb[3].mxu0 }
 0x183   : > { %v1107_v25 = vadd.f32 %v1100_v16, %v609_v14  ;;  %v1104_v26 = vadd.f32 %v1103_v24, %v1060_v22 }
 0x184   : > { %1110 = vst [vmem:[#allocation2] sm:$0xff] %v1106_v20  ;;  %v1108_v27 = vadd.f32 %v1102_v21, %v610_v18 }
 0x185   : > { %1111 = vst [vmem:[#allocation2 + $0x8] sm:$0xff] %v1107_v25  ;;  %v1109_v28 = vadd.f32 %v1104_v26, %v611_v23 }
 0x186   : > { %1112 = vst [vmem:[#allocation2 + $0x10] sm:$0xff] %v1108_v27 }
 0x187   : > { %1113 = vst [vmem:[#allocation2 + $0x18] sm:$0xff] %v1109_v28 }
 0x18b   : > { %v1118_v33 = vld [vmem:[#allocation2] sm:$0xff] }
 0x18c   : > { %v1119_v36 = vld [vmem:[#allocation2 + $0x8] sm:$0xff]  ;;  %v1134_v43 = vmul.f32 %v1127_v39, %v1118_v33 }
 0x18d   : > { %v1120_v37 = vld [vmem:[#allocation2 + $0x10] sm:$0xff]  ;;  %v1135_v44 = vmul.f32 %v1131_v41, %v1119_v36 }
 0x18e   : > { %v1121_v38 = vld [vmem:[#allocation2 + $0x18] sm:$0xff]  ;;  %v1136_v45 = vmul.f32 %v1127_v39, %v1120_v37  ;;  %v1150_v47 = vadd.f32 %v1143_v40, %v1134_v43 }
 0x18f   : > { %v1137_v46 = vmul.f32 %v1131_v41, %v1121_v38  ;;  %v1151_v48 = vadd.f32 %v1147_v42, %v1135_v44 }
 0x190   : > { %v1152_v49 = vadd.f32 %v1143_v40, %v1136_v45  ;;  %v1154_v51 = vmax.f32 %v1150_v47, 0.0 }
 0x191   : > { %v1153_v50 = vadd.f32 %v1147_v42, %v1137_v46  ;;  %v1155_v52 = vmax.f32 %v1151_v48, 0.0 }
 0x192   : > { %v1156_v53 = vmax.f32 %v1152_v49, 0.0  ;;  %1158 = vst [vmem:[%s1985_s15] sm:$0xff] %v1154_v51 }
 0x193   : > { %v1157_v54 = vmax.f32 %v1153_v50, 0.0  ;;  %1159 = vst [vmem:[%s1985_s15 + $0x8] sm:$0xff] %v1155_v52 }
 0x194   : > { %1160 = vst [vmem:[%s1985_s15 + $0x10] sm:$0xff] %v1156_v53 }
 0x195   : > { %1161 = vst [vmem:[%s1985_s15 + $0x18] sm:$0xff] %v1157_v54 }
 0x196 PF: > { %1168 = sbr.rel (!%p1813_p12) target bundleno = 414 (0x19e), region = 109  ;;  %s1409_s1 = sshll.u32 (%p1813_p12), %s1679_s22, 4 }
 0x197   : > { %s1174_s29 = scalar_lea.vmem (%p1813_p12), %s2118_s4, %s1409_s1 }
 0x199   : > { %v1187_v55 = vld [vmem:[%s1985_s15] sm:$0xff] (%p1813_p12) }
 0x19a   : > { %v1189_v56 = vld [vmem:[%s1985_s15 + $0x8] sm:$0xff] (%p1813_p12)  ;;  %1188 = vst [vmem:[%s1174_s29] sm:$0xff] (%p1813_p12), %v1187_v55 }
 0x19b   : > { %v1191_v57 = vld [vmem:[%s1985_s15 + $0x10] sm:$0xff] (%p1813_p12)  ;;  %1190 = vst [vmem:[%s1174_s29 + $0x8] sm:$0xff] (%p1813_p12), %v1189_v56 }
 0x19c   : > { %v1193_v58 = vld [vmem:[%s1985_s15 + $0x18] sm:$0xff] (%p1813_p12)  ;;  %1192 = vst [vmem:[%s1174_s29 + $0x20] sm:$0xff] (%p1813_p12), %v1191_v57 }
 0x19d   : > { %1194 = vst [vmem:[%s1174_s29 + $0x28] sm:$0xff] %v1193_v58 }
 0x19e PF: > { %s14_s25 = sadd.s32 1, %s1691_s25   ;;  %s2130_s14 = sld [smem:[#allocation6_spill]] }
 0x19f   : > { %p11_p6 = scmp.ge.s32.totalorder %s14_s25, 20   ;;  %s2131_s27 = sld [smem:[#allocation7_spill]] }
 0x1a0   : > { %s2132_s15 = smov %s1655_s16  ;;  %s2133_s16 = smov %s1811_s13 }
 0x1a1   : > { %s2134_s17 = smov %s1663_s18  ;;  %s2135_s18 = smov %s1808_s12 }
 0x1a2   : > { %s2136_s19 = smov %s1671_s20  ;;  %s2137_s20 = smov %s1794_s7 }
 0x1a3   : > { %s2138_s21 = smov %s1683_s23  ;;  %s2139_s22 = smov %s1687_s24 }
 0x1a4   : > { %s2140_s23 = smov %s2130_s14  ;;  %13 = sbr.rel (!%p11_p6) target bundleno = 9 (0x9), region = 177 }
 0x1a5   : > { %s2141_s24 = smov %s2131_s27 }

// kernel: resnet_up_forward.47
= control target key start
LH: loop header
LB: loop body
LE: loop exit
PB: predicated region body
PF: predicated region fallthrough
CT: control target
= control target key end

     0   :  { %s1178_s9 = smov 0   ;;  %s1180_s10 = smov 0   ;;  %s1329_s0 = inlined_call_operand.vmem [shape: bf16[16,8192], index: 0, kind: input, shape index: {}]   ;;  %s1330_s1 = inlined_call_operand.vmem [shape: bf16[8192,256], index: 1, kind: input, shape index: {}]   ;;  %s1331_s2 = inlined_call_operand.vmem [shape: f32[16,256], index: 2, kind: output, shape index: {}]  }
   0x1   :  { %s1182_s11 = smov 0   ;;  %s1184_s12 = smov 0  }
   0x2   :  { %s1186_s13 = smov 0  }
   0x3 LB: > { %s24_s14 = sadd.s32 1, %s1156_s12  ;;  %p47_p1 = scmp.ne.s32.totalorder %s1148_s10, %s1144_s9  ;;  %s1160_s13 = sphi %s1186_s13, %s12_s13   ;;  %s1156_s12 = sphi %s1184_s12, %s1335_s12   ;;  %s1152_s11 = sphi %s1182_s11, %s1334_s11   ;;  %s1148_s10 = sphi %s1180_s10, %s1333_s10   ;;  %s1144_s9 = sphi %s1178_s9, %s1332_s9  }
   0x4   : > { %p25_p0 = scmp.ge.s32.totalorder %s24_s14, 16  ;;  %p48_p2 = scmp.eq.s32.totalorder %s1160_s13, 0 }
   0x5   : > { %s40_s16 = sadd.s32 1, %s1148_s10  ;;  %p890_p5 = scmp.ge.s32.totalorder %s1160_s13, 16 }
   0x6   : > { %s1337_s14 = smov (%p25_p0, %s24_s14), 0  ;;  %p49_p3 = por %p48_p2, %p47_p1 }
   0x7   : > { %s36_s15 = ssub.s32 %s1156_s12, %s1337_s14  ;;  %129 = sbr.rel (%p890_p5) target bundleno = 21 (0x15), region = 16 }
   0x8   : > { %p38_p4 = scmp.eq.s32.totalorder %s36_s15, 0 }
   0xa   : > { %s1213_s17 = scalar_select %p38_p4, %s1148_s10, %s40_s16  }
   0xe   : > { %132 = sbr.rel (!%p49_p3) target bundleno = 21 (0x15), region = 20  ;;  %s134_s18 = sand.u32 (%p49_p3), 1, %s1148_s10  }
   0xf   : > { %s973_s19 = sshll.u32 (%p49_p3), %s1156_s12, 4  ;;  %s891_s20 = sshll.u32 (%p49_p3), %s134_s18, 5 }
  0x10   : > { %s142_s23 = scalar_lea.vmem (%p49_p3), %s1329_s0, %s973_s19  ;;  %s136_s24 = scalar_lea.vmem (%p49_p3), [#allocation3], %s891_s20 }
  0x11   : > { %v155_v0 = vld [vmem:[%s142_s23] sm:$0xff] (%p49_p3)  ;;  %v157_v1 = vld [vmem:[%s142_s23 + $0x8] sm:$0xff] (%p49_p3) }
  0x12   : > { %v159_v2 = vld [vmem:[%s142_s23 + $0x100] sm:$0xff] (%p49_p3)  ;;  %156 = vst [vmem:[%s136_s24] sm:$0xff] (%p49_p3), %v155_v0  ;;  %158 = vst [vmem:[%s136_s24 + $0x8] sm:$0xff] (%p49_p3), %v157_v1  ;;  %v161_v3 = vld [vmem:[%s142_s23 + $0x108] sm:$0xff] (%p49_p3) }
  0x13   : > { %160 = vst [vmem:[%s136_s24 + $0x10] sm:$0xff] (%p49_p3), %v159_v2  ;;  %162 = vst [vmem:[%s136_s24 + $0x18] sm:$0xff] (%p49_p3), %v161_v3 }
  0x15 PF: > { %p894_p6 = scmp.ge.s32.totalorder %s1160_s13, 1  ;;  %p182_p7 = scmp.lt.s32.totalorder %s1160_s13, 17 }
  0x17   : > { %p183_p8 = pnand %p894_p6, %p182_p7 }
  0x18   : > { %s189_s25 = sand.u32 (!%p183_p8), 1, %s1144_s9   ;;  %s896_s26 = sshll.u32 (!%p183_p8), %s1152_s11, 6 }
  0x19   : > { %186 = sbr.rel (%p183_p8) target bundleno = 333 (0x14d), region = 47  ;;  %s895_s27 = sshll.u32 (!%p183_p8), %s189_s25, 5 }
  0x1a   : > { %p229_p9 = scmp.lt.s32.totalorder (!%p183_p8), %s896_s26, 1023  ;;  %s1230_s4 = scalar_lea.vmem (!%p183_p8), [#allocation3], %s895_s27 }
  0x1b   : > { %p899_p10 = scmp.ne.s32.totalorder (!%p183_p8), %s1152_s11, 0 }
  0x20   : > { %s1339_s26 = smov (!%p229_p9, %s896_s26), 1023  ;;  %254 = sbr.rel (%p899_p10) target bundleno = 39 (0x27), region = 55 }
  0x21   : > { %s974_s28 = sshll.u32 %s1339_s26, 3  ;;  %v1162_v4 = vmov (!%p899_p10), 0.0  }
  0x22   : > { %s1228_s3 = scalar_lea.vmem %s1330_s1, %s974_s28  ;;  %255 = vst [vmem:[#allocation2] sm:$0xff] (!%p899_p10), %v1162_v4  ;;  %256 = vst [vmem:[#allocation2 + $0x8] sm:$0xff] (!%p899_p10), %v1162_v4 }
  0x23   : > { %257 = vst [vmem:[#allocation2 + $0x10] sm:$0xff] (!%p899_p10), %v1162_v4  ;;  %258 = vst [vmem:[#allocation2 + $0x18] sm:$0xff] (!%p899_p10), %v1162_v4 }
  0x27 PF: > { %v1020_v5 = vld [vmem:[%s1228_s3 + $0x4] ss:$8 sps:$4 sm:$0xff]   ;;  %v1024_v7 = vld [vmem:[%s1228_s3] ss:$8 sps:$4 sm:$0xff]   ;;  %v1026_v9 = vld [vmem:[%s1228_s3 + $0x14] ss:$8 sps:$4 sm:$0xff]  }
  0x28   : > { %v1022_v6 = vld [vmem:[%s1228_s3 + $0x104] ss:$8 sps:$4 sm:$0xff]   ;;  %671 = vmatprep.subr.bf16.mxu1 %v1020_v5  ;;  %v1025_v8 = vld [vmem:[%s1228_s3 + $0x100] ss:$8 sps:$4 sm:$0xff]   ;;  %v1028_v10 = vld [vmem:[%s1228_s3 + $0x114] ss:$8 sps:$4 sm:$0xff]  }
  0x29   : > { %714 = vmatprep.subr.bf16.mxu0 %v1022_v6  ;;  %672 = vmatpush1.bf16.msra.mxu1 %v1024_v7  ;;  %v1030_v11 = vld [vmem:[%s1228_s3 + $0x10] ss:$8 sps:$4 sm:$0xff]   ;;  %v1032_v13 = vld [vmem:[%s1228_s3 + $0x24] ss:$8 sps:$4 sm:$0xff]   ;;  %v1036_v15 = vld [vmem:[%s1228_s3 + $0x20] ss:$8 sps:$4 sm:$0xff]  }
  0x2a   : > { %715 = vmatpush1.bf16.msra.mxu0 %v1025_v8  ;;  %673 = vmatprep.subr.bf16.mxu1 %v1026_v9  ;;  %v1031_v12 = vld [vmem:[%s1228_s3 + $0x110] ss:$8 sps:$4 sm:$0xff]   ;;  %v1034_v14 = vld [vmem:[%s1228_s3 + $0x124] ss:$8 sps:$4 sm:$0xff]   ;;  %v1037_v16 = vld [vmem:[%s1228_s3 + $0x120] ss:$8 sps:$4 sm:$0xff]  }
  0x2b   : > { %716 = vmatprep.subr.bf16.mxu0 %v1028_v10  ;;  %v1038_v17 = vld [vmem:[%s1228_s3 + $0x34] ss:$8 sps:$4 sm:$0xff]   ;;  %v1042_v19 = vld [vmem:[%s1228_s3 + $0x30] ss:$8 sps:$4 sm:$0xff]   ;;  %v1044_v21 = vld [vmem:[%s1228_s3 + $0x44] ss:$8 sps:$4 sm:$0xff]  }
  0x2c   : > { %v1040_v18 = vld [vmem:[%s1228_s3 + $0x134] ss:$8 sps:$4 sm:$0xff]   ;;  %v1043_v20 = vld [vmem:[%s1228_s3 + $0x130] ss:$8 sps:$4 sm:$0xff]   ;;  %v1046_v22 = vld [vmem:[%s1228_s3 + $0x144] ss:$8 sps:$4 sm:$0xff]  }
  0x2d   : > { %674 = vmatpush1.bf16.msra.mxu1 %v1030_v11  ;;  %v1048_v23 = vld [vmem:[%s1228_s3 + $0x40] ss:$8 sps:$4 sm:$0xff]   ;;  %v1050_v25 = vld [vmem:[%s1228_s3 + $0x54] ss:$8 sps:$4 sm:$0xff]   ;;  %v1054_v27 = vld [vmem:[%s1228_s3 + $0x50] ss:$8 sps:$4 sm:$0xff]  }
  0x2e   : > { %717 = vmatpush1.bf16.msra.mxu0 %v1031_v12  ;;  %675 = vmatprep.subr.bf16.mxu1 %v1032_v13  ;;  %v1049_v24 = vld [vmem:[%s1228_s3 + $0x140] ss:$8 sps:$4 sm:$0xff]   ;;  %v1052_v26 = vld [vmem:[%s1228_s3 + $0x154] ss:$8 sps:$4 sm:$0xff]   ;;  %v1055_v28 = vld [vmem:[%s1228_s3 + $0x150] ss:$8 sps:$4 sm:$0xff]  }
  0x2f   : > { %718 = vmatprep.subr.bf16.mxu0 %v1034_v14  ;;  %v1056_v29 = vld [vmem:[%s1228_s3 + $0x64] ss:$8 sps:$4 sm:$0xff]   ;;  %v1060_v31 = vld [vmem:[%s1228_s3 + $0x60] ss:$8 sps:$4 sm:$0xff]   ;;  %v1062_v33 = vld [vmem:[%s1228_s3 + $0x74] ss:$8 sps:$4 sm:$0xff]  }
  0x30   : > { %v1058_v30 = vld [vmem:[%s1228_s3 + $0x164] ss:$8 sps:$4 sm:$0xff]   ;;  %v1061_v32 = vld [vmem:[%s1228_s3 + $0x160] ss:$8 sps:$4 sm:$0xff]   ;;  %v1064_v34 = vld [vmem:[%s1228_s3 + $0x174] ss:$8 sps:$4 sm:$0xff]  }
  0x31   : > { %676 = vmatpush1.bf16.msra.mxu1 %v1036_v15  ;;  %v1066_v35 = vld [vmem:[%s1228_s3 + $0x70] ss:$8 sps:$4 sm:$0xff]   ;;  %v1068_v37 = vld [vmem:[%s1228_s3 + $0x84] ss:$8 sps:$4 sm:$0xff]   ;;  %v1072_v39 = vld [vmem:[%s1228_s3 + $0x80] ss:$8 sps:$4 sm:$0xff]  }
  0x32   : > { %719 = vmatpush1.bf16.msra.mxu0 %v1037_v16  ;;  %677 = vmatprep.subr.bf16.mxu1 %v1038_v17  ;;  %v1067_v36 = vld [vmem:[%s1228_s3 + $0x170] ss:$8 sps:$4 sm:$0xff]   ;;  %v1070_v38 = vld [vmem:[%s1228_s3 + $0x184] ss:$8 sps:$4 sm:$0xff]   ;;  %v1073_v40 = vld [vmem:[%s1228_s3 + $0x180] ss:$8 sps:$4 sm:$0xff]  }
  0x33   : > { %720 = vmatprep.subr.bf16.mxu0 %v1040_v18  ;;  %v1074_v41 = vld [vmem:[%s1228_s3 + $0x94] ss:$8 sps:$4 sm:$0xff]   ;;  %v1078_v43 = vld [vmem:[%s1228_s3 + $0x90] ss:$8 sps:$4 sm:$0xff]   ;;  %v1080_v45 = vld [vmem:[%s1228_s3 + $0xa4] ss:$8 sps:$4 sm:$0xff]  }
  0x34   : > { %v1076_v42 = vld [vmem:[%s1228_s3 + $0x194] ss:$8 sps:$4 sm:$0xff]   ;;  %v1079_v44 = vld [vmem:[%s1228_s3 + $0x190] ss:$8 sps:$4 sm:$0xff]   ;;  %v1082_v46 = vld [vmem:[%s1228_s3 + $0x1a4] ss:$8 sps:$4 sm:$0xff]  }
  0x35   : > { %678 = vmatpush1.bf16.msra.mxu1 %v1042_v19  ;;  %v1084_v47 = vld [vmem:[%s1228_s3 + $0xa0] ss:$8 sps:$4 sm:$0xff]   ;;  %v1086_v49 = vld [vmem:[%s1228_s3 + $0xb4] ss:$8 sps:$4 sm:$0xff]   ;;  %v1090_v51 = vld [vmem:[%s1228_s3 + $0xb0] ss:$8 sps:$4 sm:$0xff]  }
  0x36   : > { %721 = vmatpush1.bf16.msra.mxu0 %v1043_v20  ;;  %679 = vmatprep.subr.bf16.mxu1 %v1044_v21  ;;  %v1085_v48 = vld [vmem:[%s1228_s3 + $0x1a0] ss:$8 sps:$4 sm:$0xff]   ;;  %v1088_v50 = vld [vmem:[%s1228_s3 + $0x1b4] ss:$8 sps:$4 sm:$0xff]   ;;  %v1091_v53 = vld [vmem:[%s1228_s3 + $0x1b0] ss:$8 sps:$4 sm:$0xff]  }
  0x37   : > { %722 = vmatprep.subr.bf16.mxu0 %v1046_v22  ;;  %v1118_v52 = vld [vmem:[%s1230_s4 + $0x4] ss:$16 sps:$4 sm:$0xff]   ;;  %v1121_v56 = vld [vmem:[%s1230_s4 + $0xc] ss:$16 sps:$4 sm:$0xff]   ;;  %v1096_v57 = vld [vmem:[%s1228_s3 + $0xc0] ss:$8 sps:$4 sm:$0xff]  }
  0x38   : > { %v1092_v54 = vld [vmem:[%s1228_s3 + $0xc4] ss:$8 sps:$4 sm:$0xff]   ;;  %703 = vmatprep.mubr.bf16.mxu1 %v1118_v52  ;;  %746 = vmatprep.mubr.bf16.mxu0 %v1121_v56  ;;  %v1097_v58 = vld [vmem:[%s1228_s3 + $0x1c0] ss:$8 sps:$4 sm:$0xff]   ;;  %v1098_v59 = vld [vmem:[%s1228_s3 + $0xd4] ss:$8 sps:$4 sm:$0xff]  }
  0x39   : > { %680 = vmatpush1.bf16.msra.mxu1 %v1048_v23  ;;  %v1094_v55 = vld [vmem:[%s1228_s3 + $0x1c4] ss:$8 sps:$4 sm:$0xff]   ;;  %v1100_v60 = vld [vmem:[%s1228_s3 + $0x1d4] ss:$8 sps:$4 sm:$0xff]   ;;  %v1102_v61 = vld [vmem:[%s1228_s3 + $0xd0] ss:$8 sps:$4 sm:$0xff]  }
  0x3a   : > { %723 = vmatpush1.bf16.msra.mxu0 %v1049_v24  ;;  %681 = vmatprep.subr.bf16.mxu1 %v1050_v25  ;;  %v1103_v62 = vld [vmem:[%s1228_s3 + $0x1d0] ss:$8 sps:$4 sm:$0xff]   ;;  %v1104_v63 = vld [vmem:[%s1228_s3 + $0xe4] ss:$8 sps:$4 sm:$0xff]   ;;  %v1108_v1 = vld [vmem:[%s1228_s3 + $0xe0] ss:$8 sps:$4 sm:$0xff]  }
  0x3b   : > { %724 = vmatprep.subr.bf16.mxu0 %v1052_v26  ;;  %v1106_v0 = vld [vmem:[%s1228_s3 + $0x1e4] ss:$8 sps:$4 sm:$0xff]   ;;  %v1109_v2 = vld [vmem:[%s1228_s3 + $0x1e0] ss:$8 sps:$4 sm:$0xff]   ;;  %v1110_v3 = vld [vmem:[%s1228_s3 + $0xf4] ss:$8 sps:$4 sm:$0xff]  }
  0x3c   : > { %v1112_v4 = vld [vmem:[%s1228_s3 + $0x1f4] ss:$8 sps:$4 sm:$0xff]   ;;  %v1114_v5 = vld [vmem:[%s1228_s3 + $0xf0] ss:$8 sps:$4 sm:$0xff]   ;;  %v259_v10 = vld [vmem:[#allocation2] sm:$0xff]  ;;  %p968_p11 = scmp.ne.s32.totalorder %s1152_s11, 15 }
  0x3d   : > { %682 = vmatpush1.bf16.msra.mxu1 %v1054_v27  ;;  %v1115_v6 = vld [vmem:[%s1228_s3 + $0x1f0] ss:$8 sps:$4 sm:$0xff]   ;;  %v260_v14 = vld [vmem:[#allocation2 + $0x8] sm:$0xff] }
  0x3e   : > { %725 = vmatpush1.bf16.msra.mxu0 %v1055_v28  ;;  %683 = vmatprep.subr.bf16.mxu1 %v1056_v29  ;;  %v1116_v7 = vld [vmem:[%s1230_s4] ss:$16 sps:$4 sm:$0xff]   ;;  %v1119_v8 = vld [vmem:[%s1230_s4 + $0x8] ss:$16 sps:$4 sm:$0xff]  }
  0x3f   : > { %726 = vmatprep.subr.bf16.mxu0 %v1058_v30  ;;  %v261_v18 = vld [vmem:[#allocation2 + $0x10] sm:$0xff]  ;;  %v262_v23 = vld [vmem:[#allocation2 + $0x18] sm:$0xff] }
  0x41   : > { %684 = vmatpush1.bf16.msra.mxu1 %v1060_v31 }
  0x42   : > { %727 = vmatpush1.bf16.msra.mxu0 %v1061_v32  ;;  %685 = vmatprep.subr.bf16.mxu1 %v1062_v33 }
  0x43   : > { %728 = vmatprep.subr.bf16.mxu0 %v1064_v34 }
  0x45   : > { %686 = vmatpush1.bf16.msra.mxu1 %v1066_v35 }
  0x46   : > { %729 = vmatpush1.bf16.msra.mxu0 %v1067_v36  ;;  %687 = vmatprep.subr.bf16.mxu1 %v1068_v37 }
  0x47   : > { %730 = vmatprep.subr.bf16.mxu0 %v1070_v38 }
  0x49   : > { %688 = vmatpush1.bf16.msra.mxu1 %v1072_v39 }
  0x4a   : > { %731 = vmatpush1.bf16.msra.mxu0 %v1073_v40  ;;  %689 = vmatprep.subr.bf16.mxu1 %v1074_v41 }
  0x4b   : > { %732 = vmatprep.subr.bf16.mxu0 %v1076_v42 }
  0x4d   : > { %690 = vmatpush1.bf16.msra.mxu1 %v1078_v43 }
  0x4e   : > { %733 = vmatpush1.bf16.msra.mxu0 %v1079_v44  ;;  %691 = vmatprep.subr.bf16.mxu1 %v1080_v45 }
  0x4f   : > { %734 = vmatprep.subr.bf16.mxu0 %v1082_v46 }
  0x51   : > { %692 = vmatpush1.bf16.msra.mxu1 %v1084_v47 }
  0x52   : > { %735 = vmatpush1.bf16.msra.mxu0 %v1085_v48  ;;  %693 = vmatprep.subr.bf16.mxu1 %v1086_v49 }
  0x53   : > { %736 = vmatprep.subr.bf16.mxu0 %v1088_v50 }
  0x55   : > { %694 = vmatpush1.bf16.msra.mxu1 %v1090_v51 }
  0x56   : > { %737 = vmatpush1.bf16.msra.mxu0 %v1091_v53  ;;  %695 = vmatprep.subr.bf16.mxu1 %v1092_v54 }
  0x57   : > { %738 = vmatprep.subr.bf16.mxu0 %v1094_v55 }
  0x59   : > { %696 = vmatpush1.bf16.msra.mxu1 %v1096_v57 }
  0x5a   : > { %739 = vmatpush1.bf16.msra.mxu0 %v1097_v58  ;;  %697 = vmatprep.subr.bf16.mxu1 %v1098_v59 }
  0x5b   : > { %740 = vmatprep.subr.bf16.mxu0 %v1100_v60 }
  0x5d   : > { %698 = vmatpush1.bf16.msra.mxu1 %v1102_v61 }
  0x5e   : > { %741 = vmatpush1.bf16.msra.mxu0 %v1103_v62  ;;  %699 = vmatprep.subr.bf16.mxu1 %v1104_v63 }
  0x5f   : > { %742 = vmatprep.subr.bf16.mxu0 %v1106_v0 }
  0x61   : > { %700 = vmatpush1.bf16.msra.mxu1 %v1108_v1 }
  0x62   : > { %743 = vmatpush1.bf16.msra.mxu0 %v1109_v2  ;;  %701 = vmatprep.subr.bf16.mxu1 %v1110_v3 }
  0x63   : > { %744 = vmatprep.subr.bf16.mxu0 %v1112_v4 }
  0x65   : > { %702 = vmatpush1.bf16.msra.mxu1 %v1114_v5 }
  0x66   : > { %745 = vmatpush1.bf16.msra.mxu0 %v1115_v6 }
  0x68   : > { %704 = vmatmul.mubr.bf16.vlgmr.msra.gmra.mrb[0].mxu1 %v1116_v7 }
  0x69   : > { %747 = vmatmul.mubr.bf16.vlgmr.msra.gmra.mrb[0].mxu0 %v1119_v8 }
 0x13b   : > { %v705_v9 = vpop.f32.mrb[0].mxu1 }
 0x13c   : > { %v748_v11 = vpop.f32.mrb[0].mxu0  ;;  %v707_v13 = vpop.f32.mrb[1].mxu1 }
 0x13d   : > { %v749_v12 = vadd.f32 %v748_v11, %v705_v9  ;;  %v750_v15 = vpop.f32.mrb[1].mxu0  ;;  %v709_v17 = vpop.f32.mrb[2].mxu1 }
 0x13e   : > { %v751_v16 = vadd.f32 %v750_v15, %v707_v13  ;;  %v752_v19 = vpop.f32.mrb[2].mxu0  ;;  %v711_v22 = vpop.f32.mrb[3].mxu1  ;;  %768 = sbr.rel (%p968_p11) target bundleno = 333 (0x14d), region = 59 }
 0x13f   : > { %v757_v20 = vadd.f32 %v749_v12, %v259_v10  ;;  %v753_v21 = vadd.f32 %v752_v19, %v709_v17  ;;  %v754_v24 = vpop.f32.mrb[3].mxu0 }
 0x140   : > { %v758_v25 = vadd.f32 %v751_v16, %v260_v14  ;;  %v755_v26 = vadd.f32 %v754_v24, %v711_v22 }
 0x141   : > { %761 = vst [vmem:[#allocation2] sm:$0xff] %v757_v20  ;;  %v759_v27 = vadd.f32 %v753_v21, %v261_v18 }
 0x142   : > { %762 = vst [vmem:[#allocation2 + $0x8] sm:$0xff] %v758_v25  ;;  %v760_v28 = vadd.f32 %v755_v26, %v262_v23 }
 0x143   : > { %763 = vst [vmem:[#allocation2 + $0x10] sm:$0xff] %v759_v27 }
 0x144   : > { %764 = vst [vmem:[#allocation2 + $0x18] sm:$0xff] %v760_v28 }
 0x148   : > { %v769_v29 = vld [vmem:[#allocation2] sm:$0xff] }
 0x149   : > { %v770_v30 = vld [vmem:[#allocation2 + $0x8] sm:$0xff]  ;;  %773 = vst [vmem:[%s1331_s2] sm:$0xff] %v769_v29 }
 0x14a   : > { %v771_v31 = vld [vmem:[#allocation2 + $0x10] sm:$0xff]  ;;  %774 = vst [vmem:[%s1331_s2 + $0x8] sm:$0xff] %v770_v30 }
 0x14b   : > { %775 = vst [vmem:[%s1331_s2 + $0x10] sm:$0xff] %v771_v31  ;;  %v772_v32 = vld [vmem:[#allocation2 + $0x18] sm:$0xff] }
 0x14c   : > { %776 = vst [vmem:[%s1331_s2 + $0x18] sm:$0xff] %v772_v32 }
 0x14d PF: > { %s12_s13 = sadd.s32 1, %s1160_s13   ;;  %s1332_s9 = smov %s1148_s10 }
 0x14e   : > { %p9_p12 = scmp.ge.s32.totalorder %s12_s13, 18   ;;  %s1333_s10 = smov %s1213_s17 }
 0x14f   : > { %s1334_s11 = smov %s1156_s12  ;;  %s1335_s12 = smov %s1337_s14 }
 0x150   :  { %11 = sbr.rel (!%p9_p12) target bundleno = 3 (0x3), region = 97 }

// kernel: resnet_up_forward.48
= control target key start
LH: loop header
LB: loop body
LE: loop exit
PB: predicated region body
PF: predicated region fallthrough
CT: control target
= control target key end

     0   :  { %s817_s9 = smov 0   ;;  %s819_s10 = smov 0   ;;  %s906_s0 = inlined_call_operand.vmem [shape: bf16[256,128], index: 0, kind: input, shape index: {}]   ;;  %s907_s1 = inlined_call_operand.vmem [shape: bf16[128,128], index: 1, kind: input, shape index: {}]   ;;  %s908_s2 = inlined_call_operand.vmem [shape: f32[256,128], index: 2, kind: output, shape index: {}]  }
   0x1   :  { %s821_s11 = smov 0  }
   0x2 LB: > { %s31_s12 = sadd.s32 1, %s796_s10  ;;  %p651_p0 = scmp.ge.s32.totalorder %s800_s11, 1  ;;  %s800_s11 = sphi %s821_s11, %s12_s11   ;;  %s796_s10 = sphi %s819_s10, %s910_s10   ;;  %s792_s9 = sphi %s817_s9, %s909_s9  }
   0x3   : > { %p33_p1 = scmp.ge.s32.totalorder %s31_s12, 2  ;;  %p155_p2 = scmp.lt.s32.totalorder %s800_s11, 3 }
   0x5   : > { %s912_s12 = smov (%p33_p1, %s31_s12), 0  ;;  %p156_p3 = pnand %p651_p0, %p155_p2 }
   0x6   : > { %v762_v0 = vld [vmem:[%s907_s1] sm:$0xff] (!%p156_p3)   ;;  %s652_s15 = sshll.u32 (!%p156_p3), %s792_s9, 4  ;;  %v763_v1 = vld [vmem:[%s907_s1 + $0x8] sm:$0xff] (!%p156_p3)   ;;  %v764_v2 = vld [vmem:[%s907_s1 + $0x10] sm:$0xff] (!%p156_p3)  }
   0x7   : > { %159 = sbr.rel (%p156_p3) target bundleno = 263 (0x107), region = 28  ;;  %p192_p4 = scmp.lt.s32.totalorder (!%p156_p3), %s652_s15, 31  ;;  %690 = vmatprep.subr.bf16.mxu0 (!%p156_p3), %v762_v0  ;;  %722 = vmatprep.subr.bf16.mxu1 (!%p156_p3), %v762_v0  ;;  %v765_v3 = vld [vmem:[%s907_s1 + $0x18] sm:$0xff] (!%p156_p3)   ;;  %v766_v6 = vld [vmem:[%s907_s1 + $0x20] sm:$0xff] (!%p156_p3)   ;;  %v767_v7 = vld [vmem:[%s907_s1 + $0x28] sm:$0xff] (!%p156_p3)  }
   0x8   : > { %691 = vmatpush3.bf16.msra.mxu0 (!%p156_p3), %v762_v0  ;;  %730 = vmatpush3.bf16.msra.mxu1 (!%p156_p3), %v762_v0  ;;  %v768_v8 = vld [vmem:[%s907_s1 + $0x30] sm:$0xff] (!%p156_p3)   ;;  %v769_v9 = vld [vmem:[%s907_s1 + $0x38] sm:$0xff] (!%p156_p3)  }
   0x9   : > { %692 = vmatprep.subr.bf16.mxu0 (!%p156_p3), %v763_v1  ;;  %723 = vmatprep.subr.bf16.mxu1 (!%p156_p3), %v763_v1 }
   0xc   : > { %693 = vmatpush3.bf16.msra.mxu0 (!%p156_p3), %v763_v1  ;;  %731 = vmatpush3.bf16.msra.mxu1 (!%p156_p3), %v763_v1 }
   0xd   : > { %694 = vmatprep.subr.bf16.mxu0 (!%p156_p3), %v764_v2  ;;  %724 = vmatprep.subr.bf16.mxu1 (!%p156_p3), %v764_v2 }
   0xe   : > { %s914_s15 = smov (!%p192_p4, %s652_s15), 31 }
   0xf   : > { %s653_s20 = sshll.u32 %s914_s15, 2  ;;  %s655_s6 = sshll.u32 %s914_s15, 3 }
  0x10   : > { %s850_s23 = scalar_lea.vmem %s906_s0, %s653_s20  ;;  %695 = vmatpush3.bf16.msra.mxu0 %v764_v2  ;;  %732 = vmatpush3.bf16.msra.mxu1 %v764_v2  ;;  %s879_s9 = scalar_lea.vmem %s908_s2, %s655_s6 }
  0x11   : > { %v770_v4 = vld [vmem:[%s850_s23] sm:$0xff]   ;;  %696 = vmatprep.subr.bf16.mxu0 %v765_v3  ;;  %725 = vmatprep.subr.bf16.mxu1 %v765_v3  ;;  %v772_v10 = vld [vmem:[%s850_s23 + $0x8] sm:$0xff]   ;;  %v774_v12 = vld [vmem:[%s850_s23 + $0x10] sm:$0xff]  }
  0x12   : > { %v771_v5 = vld [vmem:[%s850_s23 + $0x20] sm:$0xff]   ;;  %706 = vmatprep.mubr.bf16.mxu0 %v770_v4  ;;  %v773_v11 = vld [vmem:[%s850_s23 + $0x28] sm:$0xff]   ;;  %v775_v13 = vld [vmem:[%s850_s23 + $0x30] sm:$0xff]  }
  0x13   : > { %714 = vmatprep.mubr.bf16.mxu1 %v771_v5  ;;  %v776_v14 = vld [vmem:[%s850_s23 + $0x18] sm:$0xff]  }
  0x14   : > { %697 = vmatpush3.bf16.msra.mxu0 %v765_v3  ;;  %733 = vmatpush3.bf16.msra.mxu1 %v765_v3  ;;  %v777_v15 = vld [vmem:[%s850_s23 + $0x38] sm:$0xff]  }
  0x15   : > { %698 = vmatprep.subr.bf16.mxu0 %v766_v6  ;;  %726 = vmatprep.subr.bf16.mxu1 %v766_v6 }
  0x18   : > { %699 = vmatpush3.bf16.msra.mxu0 %v766_v6  ;;  %734 = vmatpush3.bf16.msra.mxu1 %v766_v6 }
  0x19   : > { %700 = vmatprep.subr.bf16.mxu0 %v767_v7  ;;  %727 = vmatprep.subr.bf16.mxu1 %v767_v7 }
  0x1c   : > { %701 = vmatpush3.bf16.msra.mxu0 %v767_v7  ;;  %735 = vmatpush3.bf16.msra.mxu1 %v767_v7 }
  0x1d   : > { %702 = vmatprep.subr.bf16.mxu0 %v768_v8  ;;  %728 = vmatprep.subr.bf16.mxu1 %v768_v8 }
  0x20   : > { %703 = vmatpush3.bf16.msra.mxu0 %v768_v8  ;;  %736 = vmatpush3.bf16.msra.mxu1 %v768_v8 }
  0x21   : > { %704 = vmatprep.subr.bf16.mxu0 %v769_v9  ;;  %729 = vmatprep.subr.bf16.mxu1 %v769_v9 }
  0x24   : > { %705 = vmatpush3.bf16.msra.mxu0 %v769_v9  ;;  %737 = vmatpush3.bf16.msra.mxu1 %v769_v9 }
  0x27   : > { %707 = vmatmul.mubr.bf16.vlgmr.msra.gmra.mrb[0].mxu0 %v772_v10  ;;  %715 = vmatmul.mubr.bf16.vlgmr.msra.gmra.mrb[0].mxu1 %v773_v11 }
  0x28   : > { %710 = vmatprep.mubr.bf16.mxu0 %v774_v12  ;;  %718 = vmatprep.mubr.bf16.mxu1 %v775_v13 }
  0x2f   : > { %711 = vmatmul.mubr.bf16.gmra.mrb[4].mxu0 %v776_v14  ;;  %719 = vmatmul.mubr.bf16.gmra.mrb[4].mxu1 %v777_v15 }
  0xfa   : > { %v708_v16 = vpop.f32.mrb[0].mxu0  ;;  %v716_v17 = vpop.f32.mrb[0].mxu1 }
  0xfb   : > { %533 = vst [vmem:[%s879_s9 + $0x10] sm:$0xff] %v708_v16  ;;  %541 = vst [vmem:[%s879_s9 + $0x50] sm:$0xff] %v716_v17  ;;  %v417_v18 = vpop.f32.mrb[1].mxu0  ;;  %v449_v19 = vpop.f32.mrb[1].mxu1 }
  0xfc   : > { %531 = vst [vmem:[%s879_s9] sm:$0xff] %v417_v18  ;;  %539 = vst [vmem:[%s879_s9 + $0x40] sm:$0xff] %v449_v19  ;;  %v709_v20 = vpop.f32.mrb[2].mxu0  ;;  %v717_v21 = vpop.f32.mrb[2].mxu1 }
  0xfd   : > { %534 = vst [vmem:[%s879_s9 + $0x18] sm:$0xff] %v709_v20  ;;  %542 = vst [vmem:[%s879_s9 + $0x58] sm:$0xff] %v717_v21  ;;  %v420_v22 = vpop.f32.mrb[3].mxu0  ;;  %v452_v23 = vpop.f32.mrb[3].mxu1 }
  0xfe   : > { %532 = vst [vmem:[%s879_s9 + $0x8] sm:$0xff] %v420_v22  ;;  %540 = vst [vmem:[%s879_s9 + $0x48] sm:$0xff] %v452_v23 }
 0x102   : > { %v712_v24 = vpop.f32.mrb[4].mxu0  ;;  %v720_v25 = vpop.f32.mrb[4].mxu1 }
 0x103   : > { %537 = vst [vmem:[%s879_s9 + $0x30] sm:$0xff] %v712_v24  ;;  %545 = vst [vmem:[%s879_s9 + $0x70] sm:$0xff] %v720_v25  ;;  %v433_v26 = vpop.f32.mrb[5].mxu0  ;;  %v465_v27 = vpop.f32.mrb[5].mxu1 }
 0x104   : > { %535 = vst [vmem:[%s879_s9 + $0x20] sm:$0xff] %v433_v26  ;;  %543 = vst [vmem:[%s879_s9 + $0x60] sm:$0xff] %v465_v27  ;;  %v713_v28 = vpop.f32.mrb[6].mxu0  ;;  %v721_v29 = vpop.f32.mrb[6].mxu1 }
 0x105   : > { %538 = vst [vmem:[%s879_s9 + $0x38] sm:$0xff] %v713_v28  ;;  %546 = vst [vmem:[%s879_s9 + $0x78] sm:$0xff] %v721_v29  ;;  %v436_v30 = vpop.f32.mrb[7].mxu0  ;;  %v468_v31 = vpop.f32.mrb[7].mxu1 }
 0x106   : > { %536 = vst [vmem:[%s879_s9 + $0x28] sm:$0xff] %v436_v30  ;;  %544 = vst [vmem:[%s879_s9 + $0x68] sm:$0xff] %v468_v31 }
 0x107 PF: > { %s12_s11 = sadd.s32 1, %s800_s11   ;;  %s909_s9 = smov %s796_s10 }
 0x108   : > { %p9_p5 = scmp.ge.s32.totalorder %s12_s11, 4   ;;  %s910_s10 = smov %s912_s12 }
 0x10a   :  { %11 = sbr.rel (!%p9_p5) target bundleno = 2 (0x2), region = 69 }

// kernel: resnet_up_forward.49
= control target key start
LH: loop header
LB: loop body
LE: loop exit
PB: predicated region body
PF: predicated region fallthrough
CT: control target
= control target key end

     0   :  { %v197_v0 = vmov 0.0   ;;  %vm198_vm0 = vmmov 0   ;;  %s247_s1 = inlined_call_operand.vmem [shape: bf16[128,128], index: 1, kind: input, shape index: {}]   ;;  %s248_s0 = inlined_call_operand.vmem [shape: bf16[16,128], index: 0, kind: input, shape index: {}]   ;;  %s249_s2 = inlined_call_operand.vmem [shape: f32[16,128], index: 2, kind: output, shape index: {}]  }
   0x1   :  { %166 = vmatprep.subr.bf16.mxu0 %v197_v0  ;;  %v188_v1 = vld [vmem:[%s247_s1] sm:$0xff]   ;;  %182 = vmatprep.mubr.msk.bf16.mxu0 %vm198_vm0, %v197_v0  ;;  %v189_v2 = vld [vmem:[%s247_s1 + $0x8] sm:$0xff]   ;;  %v190_v3 = vld [vmem:[%s247_s1 + $0x10] sm:$0xff]  }
   0x2   :  { %167 = vmatpush3.bf16.msra.mxu0 %v188_v1  ;;  %v191_v4 = vld [vmem:[%s247_s1 + $0x18] sm:$0xff]   ;;  %v192_v5 = vld [vmem:[%s247_s1 + $0x20] sm:$0xff]   ;;  %v193_v6 = vld [vmem:[%s247_s1 + $0x28] sm:$0xff]  }
   0x3   :  { %168 = vmatprep.subr.bf16.mxu0 %v197_v0  ;;  %v194_v7 = vld [vmem:[%s247_s1 + $0x30] sm:$0xff]   ;;  %v195_v8 = vld [vmem:[%s247_s1 + $0x38] sm:$0xff]   ;;  %v196_v9 = vld [vmem:[%s248_s0] sm:$0xff]  }
   0x6   :  { %169 = vmatpush3.bf16.msra.mxu0 %v189_v2 }
   0x7   :  { %170 = vmatprep.subr.bf16.mxu0 %v197_v0 }
   0xa   :  { %171 = vmatpush3.bf16.msra.mxu0 %v190_v3 }
   0xb   :  { %172 = vmatprep.subr.bf16.mxu0 %v197_v0 }
   0xe   :  { %173 = vmatpush3.bf16.msra.mxu0 %v191_v4 }
   0xf   :  { %174 = vmatprep.subr.bf16.mxu0 %v197_v0 }
  0x12   :  { %175 = vmatpush3.bf16.msra.mxu0 %v192_v5 }
  0x13   :  { %176 = vmatprep.subr.bf16.mxu0 %v197_v0 }
  0x16   :  { %177 = vmatpush3.bf16.msra.mxu0 %v193_v6 }
  0x17   :  { %178 = vmatprep.subr.bf16.mxu0 %v197_v0 }
  0x1a   :  { %179 = vmatpush3.bf16.msra.mxu0 %v194_v7 }
  0x1b   :  { %180 = vmatprep.subr.bf16.mxu0 %v197_v0 }
  0x1e   :  { %181 = vmatpush3.bf16.msra.mxu0 %v195_v8 }
  0x21   :  { %183 = vmatmul.mubr.bf16.vlgmr.msra.gmra.mrb[0].mxu0 %v196_v9 }
  0xf4   :  { %v126_v10 = vpop.f32.mrb[0].mxu0 }
  0xf5   :  { %142 = vst [vmem:[%s249_s2] sm:$0xff] %v126_v10  ;;  %v184_v11 = vpop.f32.mrb[1].mxu0 }
  0xf6   :  { %v129_v12 = vpop.f32.mrb[2].mxu0 }
  0xf7   :  { %143 = vst [vmem:[%s249_s2 + $0x8] sm:$0xff] %v129_v12  ;;  %v185_v13 = vpop.f32.mrb[3].mxu0 }

// kernel: resnet_up_forward.50
= control target key start
LH: loop header
LB: loop body
LE: loop exit
PB: predicated region body
PF: predicated region fallthrough
CT: control target
= control target key end

     0   :  { %s350_s1 = inlined_call_operand.vmem [shape: bf16[256,128], index: 1, kind: input, shape index: {}]   ;;  %s351_s0 = inlined_call_operand.vmem [shape: bf16[16,256], index: 0, kind: input, shape index: {}]   ;;  %s352_s2 = inlined_call_operand.vmem [shape: f32[16,128], index: 2, kind: output, shape index: {}]  }
   0x1   :  { %v256_v0 = vld [vmem:[%s350_s1 + $0x40] sm:$0xff]   ;;  %v258_v2 = vld [vmem:[%s350_s1 + $0x48] sm:$0xff]   ;;  %v260_v4 = vld [vmem:[%s350_s1 + $0x50] sm:$0xff]  }
   0x2   :  { %v257_v1 = vld [vmem:[%s350_s1] sm:$0xff]   ;;  %234 = vmatprep.subr.bf16.mxu0 %v256_v0  ;;  %v259_v3 = vld [vmem:[%s350_s1 + $0x8] sm:$0xff]   ;;  %v261_v5 = vld [vmem:[%s350_s1 + $0x10] sm:$0xff]  }
   0x3   :  { %235 = vmatpush3.bf16.msra.mxu0 %v257_v1  ;;  %v262_v6 = vld [vmem:[%s350_s1 + $0x58] sm:$0xff]   ;;  %v264_v8 = vld [vmem:[%s350_s1 + $0x60] sm:$0xff]   ;;  %v266_v10 = vld [vmem:[%s350_s1 + $0x68] sm:$0xff]  }
   0x4   :  { %236 = vmatprep.subr.bf16.mxu0 %v258_v2  ;;  %v263_v7 = vld [vmem:[%s350_s1 + $0x18] sm:$0xff]   ;;  %v265_v9 = vld [vmem:[%s350_s1 + $0x20] sm:$0xff]   ;;  %v267_v12 = vld [vmem:[%s350_s1 + $0x28] sm:$0xff]  }
   0x5   :  { %v274_v11 = vld [vmem:[%s351_s0 + $0x4] ss:$8 sps:$4 sm:$0xff]   ;;  %v268_v13 = vld [vmem:[%s350_s1 + $0x70] sm:$0xff]   ;;  %v270_v15 = vld [vmem:[%s350_s1 + $0x78] sm:$0xff]  }
   0x6   :  { %192 = vmatprep.mubr.bf16.mxu0 %v274_v11  ;;  %v269_v14 = vld [vmem:[%s350_s1 + $0x30] sm:$0xff]   ;;  %v271_v16 = vld [vmem:[%s350_s1 + $0x38] sm:$0xff]   ;;  %v272_v17 = vld [vmem:[%s351_s0] ss:$8 sps:$4 sm:$0xff]  }
   0x7   :  { %237 = vmatpush3.bf16.msra.mxu0 %v259_v3 }
   0x8   :  { %238 = vmatprep.subr.bf16.mxu0 %v260_v4 }
   0xb   :  { %239 = vmatpush3.bf16.msra.mxu0 %v261_v5 }
   0xc   :  { %240 = vmatprep.subr.bf16.mxu0 %v262_v6 }
   0xf   :  { %241 = vmatpush3.bf16.msra.mxu0 %v263_v7 }
  0x10   :  { %242 = vmatprep.subr.bf16.mxu0 %v264_v8 }
  0x13   :  { %243 = vmatpush3.bf16.msra.mxu0 %v265_v9 }
  0x14   :  { %244 = vmatprep.subr.bf16.mxu0 %v266_v10 }
  0x17   :  { %245 = vmatpush3.bf16.msra.mxu0 %v267_v12 }
  0x18   :  { %246 = vmatprep.subr.bf16.mxu0 %v268_v13 }
  0x1b   :  { %247 = vmatpush3.bf16.msra.mxu0 %v269_v14 }
  0x1c   :  { %248 = vmatprep.subr.bf16.mxu0 %v270_v15 }
  0x1f   :  { %249 = vmatpush3.bf16.msra.mxu0 %v271_v16 }
  0x22   :  { %193 = vmatmul.mubr.bf16.vlgmr.msra.gmra.mrb[0].mxu0 %v272_v17 }
  0xf5   :  { %v250_v18 = vpop.f32.mrb[0].mxu0 }
  0xf6   :  { %v251_v19 = vpop.f32.mrb[1].mxu0 }
  0xf7   :  { %v252_v20 = vadd.f32 %v251_v19, %v250_v18  ;;  %v253_v21 = vpop.f32.mrb[2].mxu0 }
  0xf8   :  { %v254_v22 = vpop.f32.mrb[3].mxu0 }
  0xf9   :  { %210 = vst [vmem:[%s352_s2] sm:$0xff] %v252_v20  ;;  %v255_v23 = vadd.f32 %v254_v22, %v253_v21 }
  0xfb   :  { %211 = vst [vmem:[%s352_s2 + $0x8] sm:$0xff] %v255_v23 }

// kernel: resnet_up_forward.51
= control target key start
LH: loop header
LB: loop body
LE: loop exit
PB: predicated region body
PF: predicated region fallthrough
CT: control target
= control target key end

     0   :  { %vm11_vm0 = vcmask 1043456   ;;  %s102_s0 = inlined_call_operand.vmem [shape: f32[2,4,128], index: 0, kind: input, shape index: {}]   ;;  %s103_s1 = inlined_call_operand.hbm [shape: f32[2,128], index: 1, kind: output, shape index: {}]  }
   0x1   :  { %v9_v0 = vld [vmem:[%s102_s0] sm:$0xf]  ;;  %v10_v1 = vld [vmem:[%s102_s0 + $0x4] sm:$0xf] }
   0x2   :  { %v12_v2 = vsel %vm11_vm0, %v9_v0, 0.0  ;;  %v19_v3 = vsel %vm11_vm0, %v10_v1, 0.0 }
   0x3   :  { %6 = vsyncpa [#allocation3], 0  ;;  %v13_v4 = vrot.slane %v12_v2, 4  ;;  %v20_v5 = vrot.slane %v19_v3, 4  ;;  %s73_s10 = smov [#allocation2]   ;;  %vm30_vm1 = vcmask 1041409  }
   0x4   :  { %s40_s11 = sshll.u32 %s73_s10, 4  ;;  %s41_s11 = int_to_ptr.vmem [resolvable:$true] %s40_s11 }
   0x5   :  { %v14_v6 = vadd.f32 %v13_v4, %v12_v2  ;;  %v21_v7 = vadd.f32 %v20_v5, %v19_v3  ;;  %s49_s0 = scalar_lea.vmem %s41_s11, 32  ;;  %p54_p1 = scmp.lt.s32.totalorder %s41_s11, %s41_s11 }
   0x6   :  { %p50_p0 = scmp.ne.s32.totalorder %s41_s11, %s49_s0  ;;  %p55_p2 = scmp.lt.s32.totalorder %s49_s0, %s49_s0 }
   0x7   :  { %v15_v8 = vrot.slane %v14_v6, 2  ;;  %v22_v9 = vrot.slane %v21_v7, 2 }
   0x8   :  { %p56_p3 = por %p55_p2, %p54_p1 }
   0x9   :  { %v16_v10 = vadd.f32 %v15_v8, %v14_v6  ;;  %v23_v11 = vadd.f32 %v22_v9, %v21_v7 }
   0xa   :  { %p57_p4 = pnand %p56_p3, %p50_p0 }
   0xb   :  { %v17_v12 = vrot.slane %v16_v10, 1  ;;  %v24_v13 = vrot.slane %v23_v11, 1 }
   0xd   :  { %v18_v14 = vadd.f32 %v17_v12, %v16_v10  ;;  %v25_v15 = vadd.f32 %v24_v13, %v23_v11 }
   0xf   :  { %v26_v16 = vmul.f32 0.25, %v18_v14  ;;  %v27_v17 = vmul.f32 0.25, %v25_v15 }
  0x11   :  { %v31_v18 = vsel %vm30_vm1, %v27_v17, %v26_v16 }
  0x12   :  { %33 = vst [vmem:[#allocation2] sm:$0x3] %v31_v18 }
  0x13   :  { %60 = shalt.err (!%p57_p4)
}
  0x14   :  { %s61_s14 = scalar_lea.hbm %s103_s1, 32 }
  0x15   :  { %p62_p5 = scmp.ne.s32.totalorder %s103_s1, %s61_s14  ;;  %p65_p6 = scmp.lt.u32.totalorder %s61_s14, %s103_s1 }
  0x17   :  { %p67_p7 = pnand %p65_p6, %p62_p5 }
  0x19   :  { %70 = shalt.err (!%p67_p7)
}
  0x1a   :  { %43 = dma.vmem_to_hbm [thread:$0]  %s41_s11, 32, %s103_s1, [#allocation3]  }
  0x1b   :  { %71 = dma.done.wait [#allocation3], 32  }
  0x1c   :  { %72 = vsyncadd [#allocation3], 4294967264 }
  0x1d   :  { %47 = vsyncpa [#allocation3], 1 }

</bundles_post_ra>
